<compile_context>
chip_gen: v7x
topology: tpu7x:2x2x1
jax: 0.10.0
libtpu: 0.0.40
codegen_flags: <defaults>
</compile_context>

<pallas_src>
import jax
import jax.numpy as jnp
import numpy as np
from jax import lax
from jax.experimental import pallas as pl
from jax.experimental.pallas import tpu as pltpu

# ---- model dimensions (consistent with the module's hard-coded sizes) ----
N = 8            # batch == unbatched ESM sequence length
E_ESM = 64       # input_shape_esm
D_1D = 144       # x_1d feature dim
D_2D = 1108      # x_2d feature dim
D_1D_PAD = 256   # zero-padded K dims -> unmasked 128-lane operands
D_2D_PAD = 1152
H_LSTM = 128     # lstm_hidden  (bridge-tower num_hiddens = 2*lstm_hidden = 256)
D_MODEL = 2 * H_LSTM          # 256
FFN_HID = 1024
EPS = 1e-5

# rows of the packed (17, 256) small-parameter block
(LN2_G, LN2_B, LN3_G, LN3_B, LN4_G, LN4_B, LN5_G, LN5_B, LN6_G, LN6_B,
 B_ALL, C1_BV, C2_BV, S1_BV, S2_BV, F1_B2, F2_B2) = range(17)


def _sig_fast(x):
    # single-transcendental sigmoid (one EUP tanh, no divide)
    return 0.5 * jnp.tanh(0.5 * x) + 0.5


def _ln(x, g, b):
    mu = jnp.mean(x, axis=-1, keepdims=True)
    var = jnp.mean((x - mu) ** 2, axis=-1, keepdims=True)
    return (x - mu) * lax.rsqrt(var + EPS) * g + b


# ----------------------------------------------------------------------------
# Single fused kernel: BiLSTM + LayerNorm2 + contraLinear_all + BridgeTower
# ----------------------------------------------------------------------------
def _fused_kernel(x_aug_ref, x_1d_ref, x_2d_ref,
                  wih_ref, whh_ref, sp_ref, bp_ref,
                  w2d_hbm, w1d_hbm, wv_hbm, fw1_hbm, fw2_hbm,
                  out_ref,
                  lstm_sc, w2d_buf, w1d_buf, wv_buf, fw1_buf, fw2_buf, sems):
    H = H_LSTM
    f32 = jnp.float32
    bf16 = jnp.bfloat16

    # ---- start DMAs of every post-LSTM weight so they overlap the serial
    # ---- LSTM recurrence (the dominant latency chain at N=8)
    cp_w2d = pltpu.make_async_copy(w2d_hbm, w2d_buf, sems.at[0]); cp_w2d.start()
    cp_w1d = pltpu.make_async_copy(w1d_hbm, w1d_buf, sems.at[1]); cp_w1d.start()
    cp_wv = pltpu.make_async_copy(wv_hbm, wv_buf, sems.at[2]);   cp_wv.start()
    cp_f1 = pltpu.make_async_copy(fw1_hbm, fw1_buf, sems.at[3]); cp_f1.start()
    cp_f2 = pltpu.make_async_copy(fw2_hbm, fw2_buf, sems.at[4]); cp_f2.start()

    # ---------------- BiLSTM (fwd/bwd fused, PyTorch gate order) ------------
    # x_aug = [x | reverse(x)]; wih/whh/bias use the interleaved gate layout
    #   [i_f i_b | f_f f_b | g_f g_b | o_f o_b]   (each block 128 lanes wide)
    # so step s computes forward gates for time s and backward gates for
    # time N-1-s from the SAME row of xg, and one (1,256)@(256,1024) matmul
    # drives both directions' recurrences.
    xg = (jnp.dot(x_aug_ref[...].astype(bf16), wih_ref[...],
                  preferred_element_type=f32) + bp_ref[0:1, :])
    whh = whh_ref[...]                         # bf16 block-diag (256, 1024)

    h = jnp.zeros((1, 2 * H), f32)             # [h_f | h_b]
    c = jnp.zeros((1, 2 * H), f32)             # [c_f | c_b]
    for s in range(N):                         # fully unrolled
        gates = xg[s:s + 1, :] + jnp.dot(h.astype(bf16), whh,
                                         preferred_element_type=f32)
        i = _sig_fast(gates[:, 0:2 * H])
        f = _sig_fast(gates[:, 2 * H:4 * H])
        g = jnp.tanh(gates[:, 4 * H:6 * H])
        o = _sig_fast(gates[:, 6 * H:8 * H])
        c = f * c + i * g
        h = o * jnp.tanh(c)
        lstm_sc[s:s + 1, 0:H] = h[:, 0:H]                   # fwd out @ time s
        lstm_sc[N - 1 - s:N - s, H:2 * H] = h[:, H:2 * H]   # bwd out @ time N-1-s
    lstm_out = lstm_sc[...]

    # ---------------- LayerNorm2 + contraLinear_all --------------------------
    sp = sp_ref[...]                           # packed (17, 256) small params

    def row(i):
        return sp[i:i + 1, :]

    x_esm = _ln(lstm_out, row(LN2_G), row(LN2_B))

    # contraLinear_all on cat(x_2d, x_1d) == x_2d @ w_2d + x_1d @ w_1d + b
    cp_w2d.wait(); cp_w1d.wait()
    x_all = (jnp.dot(x_2d_ref[...].astype(bf16), w2d_buf[...],
                     preferred_element_type=f32)
             + jnp.dot(x_1d_ref[...].astype(bf16), w1d_buf[...],
                       preferred_element_type=f32)
             + row(B_ALL))

    # ---------------- BridgeTowerBlock ---------------------------------------
    # MHA on 2-D inputs reduces exactly to relu(Wv @ values + bv) + queries
    # (softmax over a single key == 1). Dropout layers are eval-mode no-ops.
    cp_wv.wait()
    oa1 = jnp.maximum(jnp.dot(x_esm.astype(bf16), wv_buf[0],
                              preferred_element_type=f32)
                      + row(C1_BV), 0.0) + x_all               # cross_attn_1
    oa2 = jnp.maximum(jnp.dot(x_all.astype(bf16), wv_buf[1],
                              preferred_element_type=f32)
                      + row(C2_BV), 0.0) + x_esm               # cross_attn_2
    m1 = _ln(oa1 + x_all, row(LN3_G), row(LN3_B))              # AddNorm3
    m2 = _ln(oa2 + x_esm, row(LN4_G), row(LN4_B))              # AddNorm4
    oa1 = jnp.maximum(jnp.dot(m1.astype(bf16), wv_buf[2],
                              preferred_element_type=f32)
                      + row(S1_BV), 0.0) + m1                  # self_attn_1
    oa2 = jnp.maximum(jnp.dot(m2.astype(bf16), wv_buf[3],
                              preferred_element_type=f32)
                      + row(S2_BV), 0.0) + m2                  # self_attn_2

    cp_f1.wait(); cp_f2.wait()
    h1 = jnp.maximum(jnp.dot(oa1.astype(bf16), fw1_buf[0],
                             preferred_element_type=f32)
                     + bp_ref[1:2, :], 0.0)                    # FFN_1 dense1
    h2 = jnp.maximum(jnp.dot(oa2.astype(bf16), fw1_buf[1],
                             preferred_element_type=f32)
                     + bp_ref[2:3, :], 0.0)                    # FFN_2 dense1
    o1 = jnp.dot(h1.astype(bf16), fw2_buf[0],
                 preferred_element_type=f32) + row(F1_B2)
    o2 = jnp.dot(h2.astype(bf16), fw2_buf[1],
                 preferred_element_type=f32) + row(F2_B2)
    o1 = _ln(o1 + oa1, row(LN5_G), row(LN5_B))                 # AddNorm5
    o2 = _ln(o2 + oa2, row(LN6_G), row(LN6_B))                 # AddNorm6

    out_ref[:, 0:D_MODEL] = o1
    out_ref[:, D_MODEL:2 * D_MODEL] = o2


def model_a_forward(x_1d, x_2d, x_esm, kp):
    # zero-pad activation K dims so matmul operands are unmasked 128-lane tiles
    x_1d_p = jnp.pad(x_1d, ((0, 0), (0, D_1D_PAD - D_1D)))
    x_2d_p = jnp.pad(x_2d, ((0, 0), (0, D_2D_PAD - D_2D)))
    # forward input next to time-reversed input -> one projection matmul
    x_aug = jnp.concatenate([x_esm, x_esm[::-1]], axis=1)      # (N, 128)

    args = (x_aug, x_1d_p, x_2d_p,
            kp["wih_aug"], kp["whh_bd"],
            kp["small256"], kp["bias1024"],
            kp["w_2d"], kp["w_1d"],
            kp["wv_stack"], kp["ffn_w1"], kp["ffn_w2"])
    vmem = pl.BlockSpec(memory_space=pltpu.MemorySpace.VMEM)
    hbm = pl.BlockSpec(memory_space=pl.ANY)   # manually DMA'd inside the kernel
    return pl.pallas_call(
        _fused_kernel,
        out_shape=jax.ShapeDtypeStruct((N, 2 * D_MODEL), jnp.float32),
        in_specs=[vmem] * 7 + [hbm] * 5,
        out_specs=vmem,
        scratch_shapes=[
            pltpu.VMEM((N, 2 * H_LSTM), jnp.float32),             # lstm_out
            pltpu.VMEM((D_2D_PAD, D_MODEL), jnp.bfloat16),        # w_2d buf
            pltpu.VMEM((D_1D_PAD, D_MODEL), jnp.bfloat16),        # w_1d buf
            pltpu.VMEM((4, D_MODEL, D_MODEL), jnp.bfloat16),      # wv buf
            pltpu.VMEM((2, D_MODEL, FFN_HID), jnp.bfloat16),      # ffn_w1 buf
            pltpu.VMEM((2, FFN_HID, D_MODEL), jnp.bfloat16),      # ffn_w2 buf
            pltpu.SemaphoreType.DMA((5,)),
        ],
    )(*args)


# ----------------------------------------------------------------------------
# Host-side parameter packing (done once)
# ----------------------------------------------------------------------------
def _interleave_gates(a_f, a_b):
    """PyTorch gate layout [i,f,g,o] per direction -> [i_f i_b f_f f_b ...]."""
    H = H_LSTM
    parts = []
    for gi in range(4):
        parts.append(a_f[..., gi * H:(gi + 1) * H])
        parts.append(a_b[..., gi * H:(gi + 1) * H])
    return jnp.concatenate(parts, axis=-1)


def pack_params(p):
    bf16 = jnp.bfloat16
    kp = {}
    # ---- fused BiLSTM weights ------------------------------------------------
    zin = jnp.zeros_like(p["wih_f"])
    zh = jnp.zeros_like(p["whh_f"])
    # (128, 1024): rows 0:64 forward weights in forward-gate cols,
    #              rows 64:128 backward weights in backward-gate cols
    kp["wih_aug"] = jnp.concatenate(
        [_interleave_gates(p["wih_f"], zin),
         _interleave_gates(zin, p["wih_b"])], axis=0).astype(bf16)
    # block-diagonal (256, 1024) recurrence weight in the interleaved layout
    kp["whh_bd"] = jnp.concatenate(
        [_interleave_gates(p["whh_f"], zh),
         _interleave_gates(zh, p["whh_b"])], axis=0).astype(bf16)
    # ---- contraLinear_all split for cat(x_2d, x_1d), zero-padded on K -------
    w2d = p["w_all"][:D_2D]
    w1d = p["w_all"][D_2D:]
    kp["w_2d"] = jnp.pad(w2d, ((0, D_2D_PAD - D_2D), (0, 0))).astype(bf16)
    kp["w_1d"] = jnp.pad(w1d, ((0, D_1D_PAD - D_1D), (0, 0))).astype(bf16)
    # ---- attention Wv's / FFN weights (bf16 MXU operands) --------------------
    kp["wv_stack"] = jnp.stack(
        [p["c1_wv"], p["c2_wv"], p["s1_wv"], p["s2_wv"]]).astype(bf16)
    kp["ffn_w1"] = jnp.stack([p["f1_w1"], p["f2_w1"]]).astype(bf16)   # (2,256,1024)
    kp["ffn_w2"] = jnp.stack([p["f1_w2"], p["f2_w2"]]).astype(bf16)   # (2,1024,256)
    # ---- small f32 params (biases / LayerNorms) ------------------------------
    kp["small256"] = jnp.concatenate([
        p["ln2_g"], p["ln2_b"], p["ln3_g"], p["ln3_b"], p["ln4_g"], p["ln4_b"],
        p["ln5_g"], p["ln5_b"], p["ln6_g"], p["ln6_b"],
        p["b_all"], p["c1_bv"], p["c2_bv"], p["s1_bv"], p["s2_bv"],
        p["f1_b2"], p["f2_b2"]], axis=0)                              # (17,256)
    b_lstm = _interleave_gates(p["b_f"], p["b_b"])                    # (1,1024)
    kp["bias1024"] = jnp.concatenate([b_lstm, p["f1_b1"], p["f2_b1"]],
                                     axis=0)                          # (3,1024)
    return kp


# ----------------------------------------------------------------------------
# Pure-JAX reference (same math, no Pallas) for the correctness check
# ----------------------------------------------------------------------------
def ref_forward(x_1d, x_2d, x_esm, p):
    H = H_LSTM

    def _sig(x):
        return 1.0 / (1.0 + jnp.exp(-x))

    def lstm_dir(x, wih, whh, b, reverse):
        xs = x[::-1] if reverse else x
        pre = xs @ wih + b[0]                       # (N, 4H)

        def step(carry, g_pre):
            h, c = carry
            gates = g_pre + h @ whh
            i = _sig(gates[0:H]); f = _sig(gates[H:2 * H])
            g = jnp.tanh(gates[2 * H:3 * H]); o = _sig(gates[3 * H:4 * H])
            c = f * c + i * g
            h = o * jnp.tanh(c)
            return (h, c), h

        _, hs = lax.scan(step, (jnp.zeros(H), jnp.zeros(H)), pre)
        return hs[::-1] if reverse else hs

    hf = lstm_dir(x_esm, p["wih_f"], p["whh_f"], p["b_f"], False)
    hb = lstm_dir(x_esm, p["wih_b"], p["whh_b"], p["b_b"], True)
    lstm_out = jnp.concatenate([hf, hb], axis=-1)

    def ln(x, g, b):
        mu = jnp.mean(x, -1, keepdims=True)
        var = jnp.mean((x - mu) ** 2, -1, keepdims=True)
        return (x - mu) * lax.rsqrt(var + EPS) * g + b

    def lin(x, w, b):
        return x @ w + b

    x_esm_n = ln(lstm_out, p["ln2_g"], p["ln2_b"])
    x_all = lin(jnp.concatenate([x_2d, x_1d], axis=1), p["w_all"], p["b_all"])

    oa1 = jnp.maximum(lin(x_esm_n, p["c1_wv"], p["c1_bv"]), 0.0) + x_all
    oa2 = jnp.maximum(lin(x_all, p["c2_wv"], p["c2_bv"]), 0.0) + x_esm_n
    m1 = ln(oa1 + x_all, p["ln3_g"], p["ln3_b"])
    m2 = ln(oa2 + x_esm_n, p["ln4_g"], p["ln4_b"])
    oa1 = jnp.maximum(lin(m1, p["s1_wv"], p["s1_bv"]), 0.0) + m1
    oa2 = jnp.maximum(lin(m2, p["s2_wv"], p["s2_bv"]), 0.0) + m2
    o1 = lin(jnp.maximum(lin(oa1, p["f1_w1"], p["f1_b1"]), 0.0),
             p["f1_w2"], p["f1_b2"])
    o2 = lin(jnp.maximum(lin(oa2, p["f2_w1"], p["f2_b1"]), 0.0),
             p["f2_w2"], p["f2_b2"])
    o1 = ln(o1 + oa1, p["ln5_g"], p["ln5_b"])
    o2 = ln(o2 + oa2, p["ln6_g"], p["ln6_b"])
    return jnp.concatenate([o1, o2], axis=-1)


# ----------------------------------------------------------------------------
def make_params(key):
    def rnd(k, shape, scale=0.05):
        return scale * jax.random.normal(k, shape, dtype=jnp.float32)

    ks = iter(jax.random.split(key, 64))
    p = {}
    # bidirectional LSTM (weights stored transposed; b = b_ih + b_hh combined)
    p["wih_f"] = rnd(next(ks), (E_ESM, 4 * H_LSTM))
    p["whh_f"] = rnd(next(ks), (H_LSTM, 4 * H_LSTM))
    p["b_f"] = rnd(next(ks), (1, 4 * H_LSTM))
    p["wih_b"] = rnd(next(ks), (E_ESM, 4 * H_LSTM))
    p["whh_b"] = rnd(next(ks), (H_LSTM, 4 * H_LSTM))
    p["b_b"] = rnd(next(ks), (1, 4 * H_LSTM))
    # LayerNorms (gamma=1, beta=0 like fresh nn.LayerNorm)
    for name in ["ln2", "ln3", "ln4", "ln5", "ln6"]:
        p[name + "_g"] = jnp.ones((1, D_MODEL), jnp.float32)
        p[name + "_b"] = jnp.zeros((1, D_MODEL), jnp.float32)
    # contraLinear_all : (1108+144) -> 256
    p["w_all"] = rnd(next(ks), (D_2D + D_1D, D_MODEL))
    p["b_all"] = rnd(next(ks), (1, D_MODEL))
    # attention value projections (only Wv affects the output; see kernel comment)
    for name in ["c1", "c2", "s1", "s2"]:
        p[name + "_wv"] = rnd(next(ks), (D_MODEL, D_MODEL))
        p[name + "_bv"] = rnd(next(ks), (1, D_MODEL))
    # FFNs 256 -> 1024 -> 256
    for name in ["f1", "f2"]:
        p[name + "_w1"] = rnd(next(ks), (D_MODEL, FFN_HID))
        p[name + "_b1"] = rnd(next(ks), (1, FFN_HID))
        p[name + "_w2"] = rnd(next(ks), (FFN_HID, D_MODEL))
        p[name + "_b2"] = rnd(next(ks), (1, D_MODEL))
    return p


if __name__ == "__main__":
    root = jax.random.PRNGKey(0)
    k_in, k_par = jax.random.split(root)
    k1, k2, k3 = jax.random.split(k_in, 3)

    x_1d = jax.random.normal(k1, (N, D_1D), dtype=jnp.float32)
    x_2d = jax.random.normal(k2, (N, D_2D), dtype=jnp.float32)
    x_esm = jax.random.normal(k3, (N, E_ESM), dtype=jnp.float32)

    params = make_params(k_par)
    kparams = pack_params(params)

    out = jax.jit(model_a_forward)(x_1d, x_2d, x_esm, kparams)
    out = jax.block_until_ready(out)
    assert out.shape == (N, 2 * D_MODEL) and out.dtype == jnp.float32

    ref = jax.block_until_ready(ref_forward(x_1d, x_2d, x_esm, params))
    # The kernel stores MXU operands in bf16 (identical rounding to default
    # MXU precision, which rounds f32 operands to bf16 per multiply pass);
    # the tolerance covers accumulation-order differences amplified through
    # the five LayerNorms.
    np.testing.assert_allclose(np.asarray(out), np.asarray(ref),
                               rtol=2e-2, atol=2e-2)

    # TODO(synk): Dropout / training-mode BatchNorm semantics are not modeled
    # (forward is implemented in eval mode, where they are identity / unused).
    print("KERNEL_OK")
</pallas_src>

<mosaic_0001>
module attributes {stable_mosaic.version = 11 : i64} {
  func.func @_fused_kernel(%arg0: memref<8x128xf32, #tpu.memory_space<vmem>>, %arg1: memref<8x256xf32, #tpu.memory_space<vmem>>, %arg2: memref<8x1152xf32, #tpu.memory_space<vmem>>, %arg3: memref<128x1024xbf16, #tpu.memory_space<vmem>>, %arg4: memref<256x1024xbf16, #tpu.memory_space<vmem>>, %arg5: memref<17x256xf32, #tpu.memory_space<vmem>>, %arg6: memref<3x1024xf32, #tpu.memory_space<vmem>>, %arg7: memref<1152x256xbf16, #tpu.memory_space<any>>, %arg8: memref<256x256xbf16, #tpu.memory_space<any>>, %arg9: memref<4x256x256xbf16, #tpu.memory_space<any>>, %arg10: memref<2x256x1024xbf16, #tpu.memory_space<any>>, %arg11: memref<2x1024x256xbf16, #tpu.memory_space<any>>, %arg12: memref<8x512xf32, #tpu.memory_space<vmem>>, %arg13: memref<8x256xf32, #tpu.memory_space<vmem>>, %arg14: memref<1152x256xbf16, #tpu.memory_space<vmem>>, %arg15: memref<256x256xbf16, #tpu.memory_space<vmem>>, %arg16: memref<4x256x256xbf16, #tpu.memory_space<vmem>>, %arg17: memref<2x256x1024xbf16, #tpu.memory_space<vmem>>, %arg18: memref<2x1024x256xbf16, #tpu.memory_space<vmem>>, %arg19: memref<5x!tpu.dma_semaphore, #tpu.memory_space<semaphore_mem>>) attributes {dimension_semantics = [], scalar_prefetch = 0 : i64, scratch_operands = 7 : i64, tpu.core_type = #tpu.core_type<tc>} {
    %c0_i32 = arith.constant 0 : i32
    %0 = tpu.memref_slice %arg19[%c0_i32] : memref<5x!tpu.dma_semaphore, #tpu.memory_space<semaphore_mem>> -> memref<1x!tpu.dma_semaphore, #tpu.memory_space<semaphore_mem>>
    %1 = tpu.memref_squeeze %0 : memref<1x!tpu.dma_semaphore, #tpu.memory_space<semaphore_mem>> -> memref<!tpu.dma_semaphore, #tpu.memory_space<semaphore_mem>>
    tpu.enqueue_dma source(%arg7 : memref<1152x256xbf16, #tpu.memory_space<any>>) target(%arg14 : memref<1152x256xbf16, #tpu.memory_space<vmem>>) target_semaphore(%1 : memref<!tpu.dma_semaphore, #tpu.memory_space<semaphore_mem>>)
    %c1_i32 = arith.constant 1 : i32
    %2 = tpu.memref_slice %arg19[%c1_i32] : memref<5x!tpu.dma_semaphore, #tpu.memory_space<semaphore_mem>> -> memref<1x!tpu.dma_semaphore, #tpu.memory_space<semaphore_mem>>
    %3 = tpu.memref_squeeze %2 : memref<1x!tpu.dma_semaphore, #tpu.memory_space<semaphore_mem>> -> memref<!tpu.dma_semaphore, #tpu.memory_space<semaphore_mem>>
    tpu.enqueue_dma source(%arg8 : memref<256x256xbf16, #tpu.memory_space<any>>) target(%arg15 : memref<256x256xbf16, #tpu.memory_space<vmem>>) target_semaphore(%3 : memref<!tpu.dma_semaphore, #tpu.memory_space<semaphore_mem>>)
    %c2_i32 = arith.constant 2 : i32
    %4 = tpu.memref_slice %arg19[%c2_i32] : memref<5x!tpu.dma_semaphore, #tpu.memory_space<semaphore_mem>> -> memref<1x!tpu.dma_semaphore, #tpu.memory_space<semaphore_mem>>
    %5 = tpu.memref_squeeze %4 : memref<1x!tpu.dma_semaphore, #tpu.memory_space<semaphore_mem>> -> memref<!tpu.dma_semaphore, #tpu.memory_space<semaphore_mem>>
    tpu.enqueue_dma source(%arg9 : memref<4x256x256xbf16, #tpu.memory_space<any>>) target(%arg16 : memref<4x256x256xbf16, #tpu.memory_space<vmem>>) target_semaphore(%5 : memref<!tpu.dma_semaphore, #tpu.memory_space<semaphore_mem>>)
    %c3_i32 = arith.constant 3 : i32
    %6 = tpu.memref_slice %arg19[%c3_i32] : memref<5x!tpu.dma_semaphore, #tpu.memory_space<semaphore_mem>> -> memref<1x!tpu.dma_semaphore, #tpu.memory_space<semaphore_mem>>
    %7 = tpu.memref_squeeze %6 : memref<1x!tpu.dma_semaphore, #tpu.memory_space<semaphore_mem>> -> memref<!tpu.dma_semaphore, #tpu.memory_space<semaphore_mem>>
    tpu.enqueue_dma source(%arg10 : memref<2x256x1024xbf16, #tpu.memory_space<any>>) target(%arg17 : memref<2x256x1024xbf16, #tpu.memory_space<vmem>>) target_semaphore(%7 : memref<!tpu.dma_semaphore, #tpu.memory_space<semaphore_mem>>)
    %c4_i32 = arith.constant 4 : i32
    %8 = tpu.memref_slice %arg19[%c4_i32] : memref<5x!tpu.dma_semaphore, #tpu.memory_space<semaphore_mem>> -> memref<1x!tpu.dma_semaphore, #tpu.memory_space<semaphore_mem>>
    %9 = tpu.memref_squeeze %8 : memref<1x!tpu.dma_semaphore, #tpu.memory_space<semaphore_mem>> -> memref<!tpu.dma_semaphore, #tpu.memory_space<semaphore_mem>>
    tpu.enqueue_dma source(%arg11 : memref<2x1024x256xbf16, #tpu.memory_space<any>>) target(%arg18 : memref<2x1024x256xbf16, #tpu.memory_space<vmem>>) target_semaphore(%9 : memref<!tpu.dma_semaphore, #tpu.memory_space<semaphore_mem>>)
    %c0 = arith.constant 0 : index
    %c0_0 = arith.constant 0 : index
    %10 = vector.load %arg0[%c0, %c0_0] : memref<8x128xf32, #tpu.memory_space<vmem>>, vector<8x128xf32>
    %11 = arith.truncf %10 : vector<8x128xf32> to vector<8x128xbf16>
    %c0_1 = arith.constant 0 : index
    %c0_2 = arith.constant 0 : index
    %12 = vector.load %arg3[%c0_1, %c0_2] : memref<128x1024xbf16, #tpu.memory_space<vmem>>, vector<128x1024xbf16>
    %cst = arith.constant dense<0.000000e+00> : vector<8x1024xf32>
    %13 = tpu.matmul %11, %12, %cst {dimension_numbers = #tpu.dot_dimension_numbers<[1], [0], [0], [1], [0, 0, 1, 1], [], []>} : vector<8x128xbf16>, vector<128x1024xbf16>, vector<8x1024xf32> -> vector<8x1024xf32>
    %c0_3 = arith.constant 0 : index
    %c0_4 = arith.constant 0 : index
    %14 = vector.load %arg6[%c0_3, %c0_4] : memref<3x1024xf32, #tpu.memory_space<vmem>>, vector<1x1024xf32>
    %15 = vector.broadcast %14 : vector<1x1024xf32> to vector<8x1024xf32>
    %16 = arith.addf %13, %15 : vector<8x1024xf32>
    %c0_5 = arith.constant 0 : index
    %c0_6 = arith.constant 0 : index
    %17 = vector.load %arg4[%c0_5, %c0_6] : memref<256x1024xbf16, #tpu.memory_space<vmem>>, vector<256x1024xbf16>
    %cst_7 = arith.constant 0.000000e+00 : f32
    %18 = vector.broadcast %cst_7 : f32 to vector<1x256xf32>
    %cst_8 = arith.constant 0.000000e+00 : f32
    %19 = vector.broadcast %cst_8 : f32 to vector<1x256xf32>
    %20 = vector.extract_strided_slice %16 {offsets = [0, 0], sizes = [1, 1024], strides = [1, 1]} : vector<8x1024xf32> to vector<1x1024xf32>
    %21 = arith.truncf %18 : vector<1x256xf32> to vector<1x256xbf16>
    %cst_9 = arith.constant dense<0.000000e+00> : vector<1x1024xf32>
    %22 = tpu.matmul %21, %17, %cst_9 {dimension_numbers = #tpu.dot_dimension_numbers<[1], [0], [0], [1], [0, 0, 1, 1], [], []>} : vector<1x256xbf16>, vector<256x1024xbf16>, vector<1x1024xf32> -> vector<1x1024xf32>
    %23 = arith.addf %20, %22 : vector<1x1024xf32>
    %24 = vector.extract_strided_slice %23 {offsets = [0, 0], sizes = [1, 256], strides = [1, 1]} : vector<1x1024xf32> to vector<1x256xf32>
    %cst_10 = arith.constant 5.000000e-01 : f32
    %25 = vector.broadcast %cst_10 : f32 to vector<1x256xf32>
    %26 = arith.mulf %25, %24 : vector<1x256xf32>
    %27 = math.tanh %26 : vector<1x256xf32>
    %cst_11 = arith.constant 5.000000e-01 : f32
    %28 = vector.broadcast %cst_11 : f32 to vector<1x256xf32>
    %29 = arith.mulf %28, %27 : vector<1x256xf32>
    %cst_12 = arith.constant 5.000000e-01 : f32
    %30 = vector.broadcast %cst_12 : f32 to vector<1x256xf32>
    %31 = arith.addf %29, %30 : vector<1x256xf32>
    %32 = vector.extract_strided_slice %23 {offsets = [0, 256], sizes = [1, 256], strides = [1, 1]} : vector<1x1024xf32> to vector<1x256xf32>
    %cst_13 = arith.constant 5.000000e-01 : f32
    %33 = vector.broadcast %cst_13 : f32 to vector<1x256xf32>
    %34 = arith.mulf %33, %32 : vector<1x256xf32>
    %35 = math.tanh %34 : vector<1x256xf32>
    %cst_14 = arith.constant 5.000000e-01 : f32
    %36 = vector.broadcast %cst_14 : f32 to vector<1x256xf32>
    %37 = arith.mulf %36, %35 : vector<1x256xf32>
    %cst_15 = arith.constant 5.000000e-01 : f32
    %38 = vector.broadcast %cst_15 : f32 to vector<1x256xf32>
    %39 = arith.addf %37, %38 : vector<1x256xf32>
    %40 = vector.extract_strided_slice %23 {offsets = [0, 512], sizes = [1, 256], strides = [1, 1]} : vector<1x1024xf32> to vector<1x256xf32>
    %41 = math.tanh %40 : vector<1x256xf32>
    %42 = vector.extract_strided_slice %23 {offsets = [0, 768], sizes = [1, 256], strides = [1, 1]} : vector<1x1024xf32> to vector<1x256xf32>
    %cst_16 = arith.constant 5.000000e-01 : f32
    %43 = vector.broadcast %cst_16 : f32 to vector<1x256xf32>
    %44 = arith.mulf %43, %42 : vector<1x256xf32>
    %45 = math.tanh %44 : vector<1x256xf32>
    %cst_17 = arith.constant 5.000000e-01 : f32
    %46 = vector.broadcast %cst_17 : f32 to vector<1x256xf32>
    %47 = arith.mulf %46, %45 : vector<1x256xf32>
    %cst_18 = arith.constant 5.000000e-01 : f32
    %48 = vector.broadcast %cst_18 : f32 to vector<1x256xf32>
    %49 = arith.addf %47, %48 : vector<1x256xf32>
    %50 = arith.mulf %39, %19 : vector<1x256xf32>
    %51 = arith.mulf %31, %41 : vector<1x256xf32>
    %52 = arith.addf %50, %51 : vector<1x256xf32>
    %53 = math.tanh %52 : vector<1x256xf32>
    %54 = arith.mulf %49, %53 : vector<1x256xf32>
    %55 = vector.extract_strided_slice %54 {offsets = [0, 0], sizes = [1, 128], strides = [1, 1]} : vector<1x256xf32> to vector<1x128xf32>
    %c0_19 = arith.constant 0 : index
    %c0_20 = arith.constant 0 : index
    %56 = vector.load %arg13[%c0_19, %c0_20] : memref<8x256xf32, #tpu.memory_space<vmem>>, vector<1x128xf32>
    tpu.vector_store %arg13[%c0_19, %c0_20], %55 {strides = array<i32>} : memref<8x256xf32, #tpu.memory_space<vmem>>, vector<1x128xf32>,
    %57 = vector.extract_strided_slice %54 {offsets = [0, 128], sizes = [1, 128], strides = [1, 1]} : vector<1x256xf32> to vector<1x128xf32>
    %c7 = arith.constant 7 : index
    %c128 = arith.constant 128 : index
    %58 = vector.load %arg13[%c7, %c128] : memref<8x256xf32, #tpu.memory_space<vmem>>, vector<1x128xf32>
    tpu.vector_store %arg13[%c7, %c128], %57 {strides = array<i32>} : memref<8x256xf32, #tpu.memory_space<vmem>>, vector<1x128xf32>,
    %59 = vector.extract_strided_slice %16 {offsets = [1, 0], sizes = [1, 1024], strides = [1, 1]} : vector<8x1024xf32> to vector<1x1024xf32>
    %60 = arith.truncf %54 : vector<1x256xf32> to vector<1x256xbf16>
    %cst_21 = arith.constant dense<0.000000e+00> : vector<1x1024xf32>
    %61 = tpu.matmul %60, %17, %cst_21 {dimension_numbers = #tpu.dot_dimension_numbers<[1], [0], [0], [1], [0, 0, 1, 1], [], []>} : vector<1x256xbf16>, vector<256x1024xbf16>, vector<1x1024xf32> -> vector<1x1024xf32>
    %62 = arith.addf %59, %61 : vector<1x1024xf32>
    %63 = vector.extract_strided_slice %62 {offsets = [0, 0], sizes = [1, 256], strides = [1, 1]} : vector<1x1024xf32> to vector<1x256xf32>
    %cst_22 = arith.constant 5.000000e-01 : f32
    %64 = vector.broadcast %cst_22 : f32 to vector<1x256xf32>
    %65 = arith.mulf %64, %63 : vector<1x256xf32>
    %66 = math.tanh %65 : vector<1x256xf32>
    %cst_23 = arith.constant 5.000000e-01 : f32
    %67 = vector.broadcast %cst_23 : f32 to vector<1x256xf32>
    %68 = arith.mulf %67, %66 : vector<1x256xf32>
    %cst_24 = arith.constant 5.000000e-01 : f32
    %69 = vector.broadcast %cst_24 : f32 to vector<1x256xf32>
    %70 = arith.addf %68, %69 : vector<1x256xf32>
    %71 = vector.extract_strided_slice %62 {offsets = [0, 256], sizes = [1, 256], strides = [1, 1]} : vector<1x1024xf32> to vector<1x256xf32>
    %cst_25 = arith.constant 5.000000e-01 : f32
    %72 = vector.broadcast %cst_25 : f32 to vector<1x256xf32>
    %73 = arith.mulf %72, %71 : vector<1x256xf32>
    %74 = math.tanh %73 : vector<1x256xf32>
    %cst_26 = arith.constant 5.000000e-01 : f32
    %75 = vector.broadcast %cst_26 : f32 to vector<1x256xf32>
    %76 = arith.mulf %75, %74 : vector<1x256xf32>
    %cst_27 = arith.constant 5.000000e-01 : f32
    %77 = vector.broadcast %cst_27 : f32 to vector<1x256xf32>
    %78 = arith.addf %76, %77 : vector<1x256xf32>
    %79 = vector.extract_strided_slice %62 {offsets = [0, 512], sizes = [1, 256], strides = [1, 1]} : vector<1x1024xf32> to vector<1x256xf32>
    %80 = math.tanh %79 : vector<1x256xf32>
    %81 = vector.extract_strided_slice %62 {offsets = [0, 768], sizes = [1, 256], strides = [1, 1]} : vector<1x1024xf32> to vector<1x256xf32>
    %cst_28 = arith.constant 5.000000e-01 : f32
    %82 = vector.broadcast %cst_28 : f32 to vector<1x256xf32>
    %83 = arith.mulf %82, %81 : vector<1x256xf32>
    %84 = math.tanh %83 : vector<1x256xf32>
    %cst_29 = arith.constant 5.000000e-01 : f32
    %85 = vector.broadcast %cst_29 : f32 to vector<1x256xf32>
    %86 = arith.mulf %85, %84 : vector<1x256xf32>
    %cst_30 = arith.constant 5.000000e-01 : f32
    %87 = vector.broadcast %cst_30 : f32 to vector<1x256xf32>
    %88 = arith.addf %86, %87 : vector<1x256xf32>
    %89 = arith.mulf %78, %52 : vector<1x256xf32>
    %90 = arith.mulf %70, %80 : vector<1x256xf32>
    %91 = arith.addf %89, %90 : vector<1x256xf32>
    %92 = math.tanh %91 : vector<1x256xf32>
    %93 = arith.mulf %88, %92 : vector<1x256xf32>
    %94 = vector.extract_strided_slice %93 {offsets = [0, 0], sizes = [1, 128], strides = [1, 1]} : vector<1x256xf32> to vector<1x128xf32>
    %c1 = arith.constant 1 : index
    %c0_31 = arith.constant 0 : index
    %95 = vector.load %arg13[%c1, %c0_31] : memref<8x256xf32, #tpu.memory_space<vmem>>, vector<1x128xf32>
    tpu.vector_store %arg13[%c1, %c0_31], %94 {strides = array<i32>} : memref<8x256xf32, #tpu.memory_space<vmem>>, vector<1x128xf32>,
    %96 = vector.extract_strided_slice %93 {offsets = [0, 128], sizes = [1, 128], strides = [1, 1]} : vector<1x256xf32> to vector<1x128xf32>
    %c6 = arith.constant 6 : index
    %c128_32 = arith.constant 128 : index
    %97 = vector.load %arg13[%c6, %c128_32] : memref<8x256xf32, #tpu.memory_space<vmem>>, vector<1x128xf32>
    tpu.vector_store %arg13[%c6, %c128_32], %96 {strides = array<i32>} : memref<8x256xf32, #tpu.memory_space<vmem>>, vector<1x128xf32>,
    %98 = vector.extract_strided_slice %16 {offsets = [2, 0], sizes = [1, 1024], strides = [1, 1]} : vector<8x1024xf32> to vector<1x1024xf32>
    %99 = arith.truncf %93 : vector<1x256xf32> to vector<1x256xbf16>
    %cst_33 = arith.constant dense<0.000000e+00> : vector<1x1024xf32>
    %100 = tpu.matmul %99, %17, %cst_33 {dimension_numbers = #tpu.dot_dimension_numbers<[1], [0], [0], [1], [0, 0, 1, 1], [], []>} : vector<1x256xbf16>, vector<256x1024xbf16>, vector<1x1024xf32> -> vector<1x1024xf32>
    %101 = arith.addf %98, %100 : vector<1x1024xf32>
    %102 = vector.extract_strided_slice %101 {offsets = [0, 0], sizes = [1, 256], strides = [1, 1]} : vector<1x1024xf32> to vector<1x256xf32>
    %cst_34 = arith.constant 5.000000e-01 : f32
    %103 = vector.broadcast %cst_34 : f32 to vector<1x256xf32>
    %104 = arith.mulf %103, %102 : vector<1x256xf32>
    %105 = math.tanh %104 : vector<1x256xf32>
    %cst_35 = arith.constant 5.000000e-01 : f32
    %106 = vector.broadcast %cst_35 : f32 to vector<1x256xf32>
    %107 = arith.mulf %106, %105 : vector<1x256xf32>
    %cst_36 = arith.constant 5.000000e-01 : f32
    %108 = vector.broadcast %cst_36 : f32 to vector<1x256xf32>
    %109 = arith.addf %107, %108 : vector<1x256xf32>
    %110 = vector.extract_strided_slice %101 {offsets = [0, 256], sizes = [1, 256], strides = [1, 1]} : vector<1x1024xf32> to vector<1x256xf32>
    %cst_37 = arith.constant 5.000000e-01 : f32
    %111 = vector.broadcast %cst_37 : f32 to vector<1x256xf32>
    %112 = arith.mulf %111, %110 : vector<1x256xf32>
    %113 = math.tanh %112 : vector<1x256xf32>
    %cst_38 = arith.constant 5.000000e-01 : f32
    %114 = vector.broadcast %cst_38 : f32 to vector<1x256xf32>
    %115 = arith.mulf %114, %113 : vector<1x256xf32>
    %cst_39 = arith.constant 5.000000e-01 : f32
    %116 = vector.broadcast %cst_39 : f32 to vector<1x256xf32>
    %117 = arith.addf %115, %116 : vector<1x256xf32>
    %118 = vector.extract_strided_slice %101 {offsets = [0, 512], sizes = [1, 256], strides = [1, 1]} : vector<1x1024xf32> to vector<1x256xf32>
    %119 = math.tanh %118 : vector<1x256xf32>
    %120 = vector.extract_strided_slice %101 {offsets = [0, 768], sizes = [1, 256], strides = [1, 1]} : vector<1x1024xf32> to vector<1x256xf32>
    %cst_40 = arith.constant 5.000000e-01 : f32
    %121 = vector.broadcast %cst_40 : f32 to vector<1x256xf32>
    %122 = arith.mulf %121, %120 : vector<1x256xf32>
    %123 = math.tanh %122 : vector<1x256xf32>
    %cst_41 = arith.constant 5.000000e-01 : f32
    %124 = vector.broadcast %cst_41 : f32 to vector<1x256xf32>
    %125 = arith.mulf %124, %123 : vector<1x256xf32>
    %cst_42 = arith.constant 5.000000e-01 : f32
    %126 = vector.broadcast %cst_42 : f32 to vector<1x256xf32>
    %127 = arith.addf %125, %126 : vector<1x256xf32>
    %128 = arith.mulf %117, %91 : vector<1x256xf32>
    %129 = arith.mulf %109, %119 : vector<1x256xf32>
    %130 = arith.addf %128, %129 : vector<1x256xf32>
    %131 = math.tanh %130 : vector<1x256xf32>
    %132 = arith.mulf %127, %131 : vector<1x256xf32>
    %133 = vector.extract_strided_slice %132 {offsets = [0, 0], sizes = [1, 128], strides = [1, 1]} : vector<1x256xf32> to vector<1x128xf32>
    %c2 = arith.constant 2 : index
    %c0_43 = arith.constant 0 : index
    %134 = vector.load %arg13[%c2, %c0_43] : memref<8x256xf32, #tpu.memory_space<vmem>>, vector<1x128xf32>
    tpu.vector_store %arg13[%c2, %c0_43], %133 {strides = array<i32>} : memref<8x256xf32, #tpu.memory_space<vmem>>, vector<1x128xf32>,
    %135 = vector.extract_strided_slice %132 {offsets = [0, 128], sizes = [1, 128], strides = [1, 1]} : vector<1x256xf32> to vector<1x128xf32>
    %c5 = arith.constant 5 : index
    %c128_44 = arith.constant 128 : index
    %136 = vector.load %arg13[%c5, %c128_44] : memref<8x256xf32, #tpu.memory_space<vmem>>, vector<1x128xf32>
    tpu.vector_store %arg13[%c5, %c128_44], %135 {strides = array<i32>} : memref<8x256xf32, #tpu.memory_space<vmem>>, vector<1x128xf32>,
    %137 = vector.extract_strided_slice %16 {offsets = [3, 0], sizes = [1, 1024], strides = [1, 1]} : vector<8x1024xf32> to vector<1x1024xf32>
    %138 = arith.truncf %132 : vector<1x256xf32> to vector<1x256xbf16>
    %cst_45 = arith.constant dense<0.000000e+00> : vector<1x1024xf32>
    %139 = tpu.matmul %138, %17, %cst_45 {dimension_numbers = #tpu.dot_dimension_numbers<[1], [0], [0], [1], [0, 0, 1, 1], [], []>} : vector<1x256xbf16>, vector<256x1024xbf16>, vector<1x1024xf32> -> vector<1x1024xf32>
    %140 = arith.addf %137, %139 : vector<1x1024xf32>
    %141 = vector.extract_strided_slice %140 {offsets = [0, 0], sizes = [1, 256], strides = [1, 1]} : vector<1x1024xf32> to vector<1x256xf32>
    %cst_46 = arith.constant 5.000000e-01 : f32
    %142 = vector.broadcast %cst_46 : f32 to vector<1x256xf32>
    %143 = arith.mulf %142, %141 : vector<1x256xf32>
    %144 = math.tanh %143 : vector<1x256xf32>
    %cst_47 = arith.constant 5.000000e-01 : f32
    %145 = vector.broadcast %cst_47 : f32 to vector<1x256xf32>
    %146 = arith.mulf %145, %144 : vector<1x256xf32>
    %cst_48 = arith.constant 5.000000e-01 : f32
    %147 = vector.broadcast %cst_48 : f32 to vector<1x256xf32>
    %148 = arith.addf %146, %147 : vector<1x256xf32>
    %149 = vector.extract_strided_slice %140 {offsets = [0, 256], sizes = [1, 256], strides = [1, 1]} : vector<1x1024xf32> to vector<1x256xf32>
    %cst_49 = arith.constant 5.000000e-01 : f32
    %150 = vector.broadcast %cst_49 : f32 to vector<1x256xf32>
    %151 = arith.mulf %150, %149 : vector<1x256xf32>
    %152 = math.tanh %151 : vector<1x256xf32>
    %cst_50 = arith.constant 5.000000e-01 : f32
    %153 = vector.broadcast %cst_50 : f32 to vector<1x256xf32>
    %154 = arith.mulf %153, %152 : vector<1x256xf32>
    %cst_51 = arith.constant 5.000000e-01 : f32
    %155 = vector.broadcast %cst_51 : f32 to vector<1x256xf32>
    %156 = arith.addf %154, %155 : vector<1x256xf32>
    %157 = vector.extract_strided_slice %140 {offsets = [0, 512], sizes = [1, 256], strides = [1, 1]} : vector<1x1024xf32> to vector<1x256xf32>
    %158 = math.tanh %157 : vector<1x256xf32>
    %159 = vector.extract_strided_slice %140 {offsets = [0, 768], sizes = [1, 256], strides = [1, 1]} : vector<1x1024xf32> to vector<1x256xf32>
    %cst_52 = arith.constant 5.000000e-01 : f32
    %160 = vector.broadcast %cst_52 : f32 to vector<1x256xf32>
    %161 = arith.mulf %160, %159 : vector<1x256xf32>
    %162 = math.tanh %161 : vector<1x256xf32>
    %cst_53 = arith.constant 5.000000e-01 : f32
    %163 = vector.broadcast %cst_53 : f32 to vector<1x256xf32>
    %164 = arith.mulf %163, %162 : vector<1x256xf32>
    %cst_54 = arith.constant 5.000000e-01 : f32
    %165 = vector.broadcast %cst_54 : f32 to vector<1x256xf32>
    %166 = arith.addf %164, %165 : vector<1x256xf32>
    %167 = arith.mulf %156, %130 : vector<1x256xf32>
    %168 = arith.mulf %148, %158 : vector<1x256xf32>
    %169 = arith.addf %167, %168 : vector<1x256xf32>
    %170 = math.tanh %169 : vector<1x256xf32>
    %171 = arith.mulf %166, %170 : vector<1x256xf32>
    %172 = vector.extract_strided_slice %171 {offsets = [0, 0], sizes = [1, 128], strides = [1, 1]} : vector<1x256xf32> to vector<1x128xf32>
    %c3 = arith.constant 3 : index
    %c0_55 = arith.constant 0 : index
    %173 = vector.load %arg13[%c3, %c0_55] : memref<8x256xf32, #tpu.memory_space<vmem>>, vector<1x128xf32>
    tpu.vector_store %arg13[%c3, %c0_55], %172 {strides = array<i32>} : memref<8x256xf32, #tpu.memory_space<vmem>>, vector<1x128xf32>,
    %174 = vector.extract_strided_slice %171 {offsets = [0, 128], sizes = [1, 128], strides = [1, 1]} : vector<1x256xf32> to vector<1x128xf32>
    %c4 = arith.constant 4 : index
    %c128_56 = arith.constant 128 : index
    %175 = vector.load %arg13[%c4, %c128_56] : memref<8x256xf32, #tpu.memory_space<vmem>>, vector<1x128xf32>
    tpu.vector_store %arg13[%c4, %c128_56], %174 {strides = array<i32>} : memref<8x256xf32, #tpu.memory_space<vmem>>, vector<1x128xf32>,
    %176 = vector.extract_strided_slice %16 {offsets = [4, 0], sizes = [1, 1024], strides = [1, 1]} : vector<8x1024xf32> to vector<1x1024xf32>
    %177 = arith.truncf %171 : vector<1x256xf32> to vector<1x256xbf16>
    %cst_57 = arith.constant dense<0.000000e+00> : vector<1x1024xf32>
    %178 = tpu.matmul %177, %17, %cst_57 {dimension_numbers = #tpu.dot_dimension_numbers<[1], [0], [0], [1], [0, 0, 1, 1], [], []>} : vector<1x256xbf16>, vector<256x1024xbf16>, vector<1x1024xf32> -> vector<1x1024xf32>
    %179 = arith.addf %176, %178 : vector<1x1024xf32>
    %180 = vector.extract_strided_slice %179 {offsets = [0, 0], sizes = [1, 256], strides = [1, 1]} : vector<1x1024xf32> to vector<1x256xf32>
    %cst_58 = arith.constant 5.000000e-01 : f32
    %181 = vector.broadcast %cst_58 : f32 to vector<1x256xf32>
    %182 = arith.mulf %181, %180 : vector<1x256xf32>
    %183 = math.tanh %182 : vector<1x256xf32>
    %cst_59 = arith.constant 5.000000e-01 : f32
    %184 = vector.broadcast %cst_59 : f32 to vector<1x256xf32>
    %185 = arith.mulf %184, %183 : vector<1x256xf32>
    %cst_60 = arith.constant 5.000000e-01 : f32
    %186 = vector.broadcast %cst_60 : f32 to vector<1x256xf32>
    %187 = arith.addf %185, %186 : vector<1x256xf32>
    %188 = vector.extract_strided_slice %179 {offsets = [0, 256], sizes = [1, 256], strides = [1, 1]} : vector<1x1024xf32> to vector<1x256xf32>
    %cst_61 = arith.constant 5.000000e-01 : f32
    %189 = vector.broadcast %cst_61 : f32 to vector<1x256xf32>
    %190 = arith.mulf %189, %188 : vector<1x256xf32>
    %191 = math.tanh %190 : vector<1x256xf32>
    %cst_62 = arith.constant 5.000000e-01 : f32
    %192 = vector.broadcast %cst_62 : f32 to vector<1x256xf32>
    %193 = arith.mulf %192, %191 : vector<1x256xf32>
    %cst_63 = arith.constant 5.000000e-01 : f32
    %194 = vector.broadcast %cst_63 : f32 to vector<1x256xf32>
    %195 = arith.addf %193, %194 : vector<1x256xf32>
    %196 = vector.extract_strided_slice %179 {offsets = [0, 512], sizes = [1, 256], strides = [1, 1]} : vector<1x1024xf32> to vector<1x256xf32>
    %197 = math.tanh %196 : vector<1x256xf32>
    %198 = vector.extract_strided_slice %179 {offsets = [0, 768], sizes = [1, 256], strides = [1, 1]} : vector<1x1024xf32> to vector<1x256xf32>
    %cst_64 = arith.constant 5.000000e-01 : f32
    %199 = vector.broadcast %cst_64 : f32 to vector<1x256xf32>
    %200 = arith.mulf %199, %198 : vector<1x256xf32>
    %201 = math.tanh %200 : vector<1x256xf32>
    %cst_65 = arith.constant 5.000000e-01 : f32
    %202 = vector.broadcast %cst_65 : f32 to vector<1x256xf32>
    %203 = arith.mulf %202, %201 : vector<1x256xf32>
    %cst_66 = arith.constant 5.000000e-01 : f32
    %204 = vector.broadcast %cst_66 : f32 to vector<1x256xf32>
    %205 = arith.addf %203, %204 : vector<1x256xf32>
    %206 = arith.mulf %195, %169 : vector<1x256xf32>
    %207 = arith.mulf %187, %197 : vector<1x256xf32>
    %208 = arith.addf %206, %207 : vector<1x256xf32>
    %209 = math.tanh %208 : vector<1x256xf32>
    %210 = arith.mulf %205, %209 : vector<1x256xf32>
    %211 = vector.extract_strided_slice %210 {offsets = [0, 0], sizes = [1, 128], strides = [1, 1]} : vector<1x256xf32> to vector<1x128xf32>
    %c4_67 = arith.constant 4 : index
    %c0_68 = arith.constant 0 : index
    %212 = vector.load %arg13[%c4_67, %c0_68] : memref<8x256xf32, #tpu.memory_space<vmem>>, vector<1x128xf32>
    tpu.vector_store %arg13[%c4_67, %c0_68], %211 {strides = array<i32>} : memref<8x256xf32, #tpu.memory_space<vmem>>, vector<1x128xf32>,
    %213 = vector.extract_strided_slice %210 {offsets = [0, 128], sizes = [1, 128], strides = [1, 1]} : vector<1x256xf32> to vector<1x128xf32>
    %c3_69 = arith.constant 3 : index
    %c128_70 = arith.constant 128 : index
    %214 = vector.load %arg13[%c3_69, %c128_70] : memref<8x256xf32, #tpu.memory_space<vmem>>, vector<1x128xf32>
    tpu.vector_store %arg13[%c3_69, %c128_70], %213 {strides = array<i32>} : memref<8x256xf32, #tpu.memory_space<vmem>>, vector<1x128xf32>,
    %215 = vector.extract_strided_slice %16 {offsets = [5, 0], sizes = [1, 1024], strides = [1, 1]} : vector<8x1024xf32> to vector<1x1024xf32>
    %216 = arith.truncf %210 : vector<1x256xf32> to vector<1x256xbf16>
    %cst_71 = arith.constant dense<0.000000e+00> : vector<1x1024xf32>
    %217 = tpu.matmul %216, %17, %cst_71 {dimension_numbers = #tpu.dot_dimension_numbers<[1], [0], [0], [1], [0, 0, 1, 1], [], []>} : vector<1x256xbf16>, vector<256x1024xbf16>, vector<1x1024xf32> -> vector<1x1024xf32>
    %218 = arith.addf %215, %217 : vector<1x1024xf32>
    %219 = vector.extract_strided_slice %218 {offsets = [0, 0], sizes = [1, 256], strides = [1, 1]} : vector<1x1024xf32> to vector<1x256xf32>
    %cst_72 = arith.constant 5.000000e-01 : f32
    %220 = vector.broadcast %cst_72 : f32 to vector<1x256xf32>
    %221 = arith.mulf %220, %219 : vector<1x256xf32>
    %222 = math.tanh %221 : vector<1x256xf32>
    %cst_73 = arith.constant 5.000000e-01 : f32
    %223 = vector.broadcast %cst_73 : f32 to vector<1x256xf32>
    %224 = arith.mulf %223, %222 : vector<1x256xf32>
    %cst_74 = arith.constant 5.000000e-01 : f32
    %225 = vector.broadcast %cst_74 : f32 to vector<1x256xf32>
    %226 = arith.addf %224, %225 : vector<1x256xf32>
    %227 = vector.extract_strided_slice %218 {offsets = [0, 256], sizes = [1, 256], strides = [1, 1]} : vector<1x1024xf32> to vector<1x256xf32>
    %cst_75 = arith.constant 5.000000e-01 : f32
    %228 = vector.broadcast %cst_75 : f32 to vector<1x256xf32>
    %229 = arith.mulf %228, %227 : vector<1x256xf32>
    %230 = math.tanh %229 : vector<1x256xf32>
    %cst_76 = arith.constant 5.000000e-01 : f32
    %231 = vector.broadcast %cst_76 : f32 to vector<1x256xf32>
    %232 = arith.mulf %231, %230 : vector<1x256xf32>
    %cst_77 = arith.constant 5.000000e-01 : f32
    %233 = vector.broadcast %cst_77 : f32 to vector<1x256xf32>
    %234 = arith.addf %232, %233 : vector<1x256xf32>
    %235 = vector.extract_strided_slice %218 {offsets = [0, 512], sizes = [1, 256], strides = [1, 1]} : vector<1x1024xf32> to vector<1x256xf32>
    %236 = math.tanh %235 : vector<1x256xf32>
    %237 = vector.extract_strided_slice %218 {offsets = [0, 768], sizes = [1, 256], strides = [1, 1]} : vector<1x1024xf32> to vector<1x256xf32>
    %cst_78 = arith.constant 5.000000e-01 : f32
    %238 = vector.broadcast %cst_78 : f32 to vector<1x256xf32>
    %239 = arith.mulf %238, %237 : vector<1x256xf32>
    %240 = math.tanh %239 : vector<1x256xf32>
    %cst_79 = arith.constant 5.000000e-01 : f32
    %241 = vector.broadcast %cst_79 : f32 to vector<1x256xf32>
    %242 = arith.mulf %241, %240 : vector<1x256xf32>
    %cst_80 = arith.constant 5.000000e-01 : f32
    %243 = vector.broadcast %cst_80 : f32 to vector<1x256xf32>
    %244 = arith.addf %242, %243 : vector<1x256xf32>
    %245 = arith.mulf %234, %208 : vector<1x256xf32>
    %246 = arith.mulf %226, %236 : vector<1x256xf32>
    %247 = arith.addf %245, %246 : vector<1x256xf32>
    %248 = math.tanh %247 : vector<1x256xf32>
    %249 = arith.mulf %244, %248 : vector<1x256xf32>
    %250 = vector.extract_strided_slice %249 {offsets = [0, 0], sizes = [1, 128], strides = [1, 1]} : vector<1x256xf32> to vector<1x128xf32>
    %c5_81 = arith.constant 5 : index
    %c0_82 = arith.constant 0 : index
    %251 = vector.load %arg13[%c5_81, %c0_82] : memref<8x256xf32, #tpu.memory_space<vmem>>, vector<1x128xf32>
    tpu.vector_store %arg13[%c5_81, %c0_82], %250 {strides = array<i32>} : memref<8x256xf32, #tpu.memory_space<vmem>>, vector<1x128xf32>,
    %252 = vector.extract_strided_slice %249 {offsets = [0, 128], sizes = [1, 128], strides = [1, 1]} : vector<1x256xf32> to vector<1x128xf32>
    %c2_83 = arith.constant 2 : index
    %c128_84 = arith.constant 128 : index
    %253 = vector.load %arg13[%c2_83, %c128_84] : memref<8x256xf32, #tpu.memory_space<vmem>>, vector<1x128xf32>
    tpu.vector_store %arg13[%c2_83, %c128_84], %252 {strides = array<i32>} : memref<8x256xf32, #tpu.memory_space<vmem>>, vector<1x128xf32>,
    %254 = vector.extract_strided_slice %16 {offsets = [6, 0], sizes = [1, 1024], strides = [1, 1]} : vector<8x1024xf32> to vector<1x1024xf32>
    %255 = arith.truncf %249 : vector<1x256xf32> to vector<1x256xbf16>
    %cst_85 = arith.constant dense<0.000000e+00> : vector<1x1024xf32>
    %256 = tpu.matmul %255, %17, %cst_85 {dimension_numbers = #tpu.dot_dimension_numbers<[1], [0], [0], [1], [0, 0, 1, 1], [], []>} : vector<1x256xbf16>, vector<256x1024xbf16>, vector<1x1024xf32> -> vector<1x1024xf32>
    %257 = arith.addf %254, %256 : vector<1x1024xf32>
    %258 = vector.extract_strided_slice %257 {offsets = [0, 0], sizes = [1, 256], strides = [1, 1]} : vector<1x1024xf32> to vector<1x256xf32>
    %cst_86 = arith.constant 5.000000e-01 : f32
    %259 = vector.broadcast %cst_86 : f32 to vector<1x256xf32>
    %260 = arith.mulf %259, %258 : vector<1x256xf32>
    %261 = math.tanh %260 : vector<1x256xf32>
    %cst_87 = arith.constant 5.000000e-01 : f32
    %262 = vector.broadcast %cst_87 : f32 to vector<1x256xf32>
    %263 = arith.mulf %262, %261 : vector<1x256xf32>
    %cst_88 = arith.constant 5.000000e-01 : f32
    %264 = vector.broadcast %cst_88 : f32 to vector<1x256xf32>
    %265 = arith.addf %263, %264 : vector<1x256xf32>
    %266 = vector.extract_strided_slice %257 {offsets = [0, 256], sizes = [1, 256], strides = [1, 1]} : vector<1x1024xf32> to vector<1x256xf32>
    %cst_89 = arith.constant 5.000000e-01 : f32
    %267 = vector.broadcast %cst_89 : f32 to vector<1x256xf32>
    %268 = arith.mulf %267, %266 : vector<1x256xf32>
    %269 = math.tanh %268 : vector<1x256xf32>
    %cst_90 = arith.constant 5.000000e-01 : f32
    %270 = vector.broadcast %cst_90 : f32 to vector<1x256xf32>
    %271 = arith.mulf %270, %269 : vector<1x256xf32>
    %cst_91 = arith.constant 5.000000e-01 : f32
    %272 = vector.broadcast %cst_91 : f32 to vector<1x256xf32>
    %273 = arith.addf %271, %272 : vector<1x256xf32>
    %274 = vector.extract_strided_slice %257 {offsets = [0, 512], sizes = [1, 256], strides = [1, 1]} : vector<1x1024xf32> to vector<1x256xf32>
    %275 = math.tanh %274 : vector<1x256xf32>
    %276 = vector.extract_strided_slice %257 {offsets = [0, 768], sizes = [1, 256], strides = [1, 1]} : vector<1x1024xf32> to vector<1x256xf32>
    %cst_92 = arith.constant 5.000000e-01 : f32
    %277 = vector.broadcast %cst_92 : f32 to vector<1x256xf32>
    %278 = arith.mulf %277, %276 : vector<1x256xf32>
    %279 = math.tanh %278 : vector<1x256xf32>
    %cst_93 = arith.constant 5.000000e-01 : f32
    %280 = vector.broadcast %cst_93 : f32 to vector<1x256xf32>
    %281 = arith.mulf %280, %279 : vector<1x256xf32>
    %cst_94 = arith.constant 5.000000e-01 : f32
    %282 = vector.broadcast %cst_94 : f32 to vector<1x256xf32>
    %283 = arith.addf %281, %282 : vector<1x256xf32>
    %284 = arith.mulf %273, %247 : vector<1x256xf32>
    %285 = arith.mulf %265, %275 : vector<1x256xf32>
    %286 = arith.addf %284, %285 : vector<1x256xf32>
    %287 = math.tanh %286 : vector<1x256xf32>
    %288 = arith.mulf %283, %287 : vector<1x256xf32>
    %289 = vector.extract_strided_slice %288 {offsets = [0, 0], sizes = [1, 128], strides = [1, 1]} : vector<1x256xf32> to vector<1x128xf32>
    %c6_95 = arith.constant 6 : index
    %c0_96 = arith.constant 0 : index
    %290 = vector.load %arg13[%c6_95, %c0_96] : memref<8x256xf32, #tpu.memory_space<vmem>>, vector<1x128xf32>
    tpu.vector_store %arg13[%c6_95, %c0_96], %289 {strides = array<i32>} : memref<8x256xf32, #tpu.memory_space<vmem>>, vector<1x128xf32>,
    %291 = vector.extract_strided_slice %288 {offsets = [0, 128], sizes = [1, 128], strides = [1, 1]} : vector<1x256xf32> to vector<1x128xf32>
    %c1_97 = arith.constant 1 : index
    %c128_98 = arith.constant 128 : index
    %292 = vector.load %arg13[%c1_97, %c128_98] : memref<8x256xf32, #tpu.memory_space<vmem>>, vector<1x128xf32>
    tpu.vector_store %arg13[%c1_97, %c128_98], %291 {strides = array<i32>} : memref<8x256xf32, #tpu.memory_space<vmem>>, vector<1x128xf32>,
    %293 = vector.extract_strided_slice %16 {offsets = [7, 0], sizes = [1, 1024], strides = [1, 1]} : vector<8x1024xf32> to vector<1x1024xf32>
    %294 = arith.truncf %288 : vector<1x256xf32> to vector<1x256xbf16>
    %cst_99 = arith.constant dense<0.000000e+00> : vector<1x1024xf32>
    %295 = tpu.matmul %294, %17, %cst_99 {dimension_numbers = #tpu.dot_dimension_numbers<[1], [0], [0], [1], [0, 0, 1, 1], [], []>} : vector<1x256xbf16>, vector<256x1024xbf16>, vector<1x1024xf32> -> vector<1x1024xf32>
    %296 = arith.addf %293, %295 : vector<1x1024xf32>
    %297 = vector.extract_strided_slice %296 {offsets = [0, 0], sizes = [1, 256], strides = [1, 1]} : vector<1x1024xf32> to vector<1x256xf32>
    %cst_100 = arith.constant 5.000000e-01 : f32
    %298 = vector.broadcast %cst_100 : f32 to vector<1x256xf32>
    %299 = arith.mulf %298, %297 : vector<1x256xf32>
    %300 = math.tanh %299 : vector<1x256xf32>
    %cst_101 = arith.constant 5.000000e-01 : f32
    %301 = vector.broadcast %cst_101 : f32 to vector<1x256xf32>
    %302 = arith.mulf %301, %300 : vector<1x256xf32>
    %cst_102 = arith.constant 5.000000e-01 : f32
    %303 = vector.broadcast %cst_102 : f32 to vector<1x256xf32>
    %304 = arith.addf %302, %303 : vector<1x256xf32>
    %305 = vector.extract_strided_slice %296 {offsets = [0, 256], sizes = [1, 256], strides = [1, 1]} : vector<1x1024xf32> to vector<1x256xf32>
    %cst_103 = arith.constant 5.000000e-01 : f32
    %306 = vector.broadcast %cst_103 : f32 to vector<1x256xf32>
    %307 = arith.mulf %306, %305 : vector<1x256xf32>
    %308 = math.tanh %307 : vector<1x256xf32>
    %cst_104 = arith.constant 5.000000e-01 : f32
    %309 = vector.broadcast %cst_104 : f32 to vector<1x256xf32>
    %310 = arith.mulf %309, %308 : vector<1x256xf32>
    %cst_105 = arith.constant 5.000000e-01 : f32
    %311 = vector.broadcast %cst_105 : f32 to vector<1x256xf32>
    %312 = arith.addf %310, %311 : vector<1x256xf32>
    %313 = vector.extract_strided_slice %296 {offsets = [0, 512], sizes = [1, 256], strides = [1, 1]} : vector<1x1024xf32> to vector<1x256xf32>
    %314 = math.tanh %313 : vector<1x256xf32>
    %315 = vector.extract_strided_slice %296 {offsets = [0, 768], sizes = [1, 256], strides = [1, 1]} : vector<1x1024xf32> to vector<1x256xf32>
    %cst_106 = arith.constant 5.000000e-01 : f32
    %316 = vector.broadcast %cst_106 : f32 to vector<1x256xf32>
    %317 = arith.mulf %316, %315 : vector<1x256xf32>
    %318 = math.tanh %317 : vector<1x256xf32>
    %cst_107 = arith.constant 5.000000e-01 : f32
    %319 = vector.broadcast %cst_107 : f32 to vector<1x256xf32>
    %320 = arith.mulf %319, %318 : vector<1x256xf32>
    %cst_108 = arith.constant 5.000000e-01 : f32
    %321 = vector.broadcast %cst_108 : f32 to vector<1x256xf32>
    %322 = arith.addf %320, %321 : vector<1x256xf32>
    %323 = arith.mulf %312, %286 : vector<1x256xf32>
    %324 = arith.mulf %304, %314 : vector<1x256xf32>
    %325 = arith.addf %323, %324 : vector<1x256xf32>
    %326 = math.tanh %325 : vector<1x256xf32>
    %327 = arith.mulf %322, %326 : vector<1x256xf32>
    %328 = vector.extract_strided_slice %327 {offsets = [0, 0], sizes = [1, 128], strides = [1, 1]} : vector<1x256xf32> to vector<1x128xf32>
    %c7_109 = arith.constant 7 : index
    %c0_110 = arith.constant 0 : index
    %329 = vector.load %arg13[%c7_109, %c0_110] : memref<8x256xf32, #tpu.memory_space<vmem>>, vector<1x128xf32>
    tpu.vector_store %arg13[%c7_109, %c0_110], %328 {strides = array<i32>} : memref<8x256xf32, #tpu.memory_space<vmem>>, vector<1x128xf32>,
    %330 = vector.extract_strided_slice %327 {offsets = [0, 128], sizes = [1, 128], strides = [1, 1]} : vector<1x256xf32> to vector<1x128xf32>
    %c0_111 = arith.constant 0 : index
    %c128_112 = arith.constant 128 : index
    %331 = vector.load %arg13[%c0_111, %c128_112] : memref<8x256xf32, #tpu.memory_space<vmem>>, vector<1x128xf32>
    tpu.vector_store %arg13[%c0_111, %c128_112], %330 {strides = array<i32>} : memref<8x256xf32, #tpu.memory_space<vmem>>, vector<1x128xf32>,
    %c0_113 = arith.constant 0 : index
    %c0_114 = arith.constant 0 : index
    %332 = vector.load %arg13[%c0_113, %c0_114] : memref<8x256xf32, #tpu.memory_space<vmem>>, vector<8x256xf32>
    %c0_115 = arith.constant 0 : index
    %c0_116 = arith.constant 0 : index
    %333 = vector.load %arg5[%c0_115, %c0_116] : memref<17x256xf32, #tpu.memory_space<vmem>>, vector<17x256xf32>
    %334 = vector.extract_strided_slice %333 {offsets = [0, 0], sizes = [1, 256], strides = [1, 1]} : vector<17x256xf32> to vector<1x256xf32>
    %335 = vector.extract_strided_slice %333 {offsets = [1, 0], sizes = [1, 256], strides = [1, 1]} : vector<17x256xf32> to vector<1x256xf32>
    %cst_117 = arith.constant dense<0.000000e+00> : vector<8xf32>
    %336 = vector.multi_reduction <add>, %332, %cst_117 [1] : vector<8x256xf32> to vector<8xf32>
    %337 = vector.shape_cast %336 : vector<8xf32> to vector<8x1xf32>
    %cst_118 = arith.constant 2.560000e+02 : f32
    %338 = vector.broadcast %cst_118 : f32 to vector<8x1xf32>
    %339 = arith.divf %337, %338 : vector<8x1xf32>
    %340 = vector.broadcast %339 : vector<8x1xf32> to vector<8x256xf32>
    %341 = arith.subf %332, %340 : vector<8x256xf32>
    %342 = arith.mulf %341, %341 : vector<8x256xf32>
    %cst_119 = arith.constant dense<0.000000e+00> : vector<8xf32>
    %343 = vector.multi_reduction <add>, %342, %cst_119 [1] : vector<8x256xf32> to vector<8xf32>
    %344 = vector.shape_cast %343 : vector<8xf32> to vector<8x1xf32>
    %cst_120 = arith.constant 2.560000e+02 : f32
    %345 = vector.broadcast %cst_120 : f32 to vector<8x1xf32>
    %346 = arith.divf %344, %345 : vector<8x1xf32>
    %347 = vector.broadcast %339 : vector<8x1xf32> to vector<8x256xf32>
    %348 = arith.subf %332, %347 : vector<8x256xf32>
    %cst_121 = arith.constant 9.99999974E-6 : f32
    %349 = vector.broadcast %cst_121 : f32 to vector<8x1xf32>
    %350 = arith.addf %346, %349 : vector<8x1xf32>
    %351 = math.rsqrt %350 : vector<8x1xf32>
    %352 = vector.broadcast %351 : vector<8x1xf32> to vector<8x256xf32>
    %353 = arith.mulf %348, %352 : vector<8x256xf32>
    %354 = vector.broadcast %334 : vector<1x256xf32> to vector<8x256xf32>
    %355 = arith.mulf %353, %354 : vector<8x256xf32>
    %356 = vector.broadcast %335 : vector<1x256xf32> to vector<8x256xf32>
    %357 = arith.addf %355, %356 : vector<8x256xf32>
    %c0_i32_122 = arith.constant 0 : i32
    %358 = tpu.memref_slice %arg19[%c0_i32_122] : memref<5x!tpu.dma_semaphore, #tpu.memory_space<semaphore_mem>> -> memref<1x!tpu.dma_semaphore, #tpu.memory_space<semaphore_mem>>
    %359 = tpu.memref_squeeze %358 : memref<1x!tpu.dma_semaphore, #tpu.memory_space<semaphore_mem>> -> memref<!tpu.dma_semaphore, #tpu.memory_space<semaphore_mem>>
    tpu.wait_dma2 semaphore(%359 : memref<!tpu.dma_semaphore, #tpu.memory_space<semaphore_mem>>) src(%arg7 : memref<1152x256xbf16, #tpu.memory_space<any>>) dst(%arg14 : memref<1152x256xbf16, #tpu.memory_space<vmem>>)
    %c1_i32_123 = arith.constant 1 : i32
    %360 = tpu.memref_slice %arg19[%c1_i32_123] : memref<5x!tpu.dma_semaphore, #tpu.memory_space<semaphore_mem>> -> memref<1x!tpu.dma_semaphore, #tpu.memory_space<semaphore_mem>>
    %361 = tpu.memref_squeeze %360 : memref<1x!tpu.dma_semaphore, #tpu.memory_space<semaphore_mem>> -> memref<!tpu.dma_semaphore, #tpu.memory_space<semaphore_mem>>
    tpu.wait_dma2 semaphore(%361 : memref<!tpu.dma_semaphore, #tpu.memory_space<semaphore_mem>>) src(%arg8 : memref<256x256xbf16, #tpu.memory_space<any>>) dst(%arg15 : memref<256x256xbf16, #tpu.memory_space<vmem>>)
    %c0_124 = arith.constant 0 : index
    %c0_125 = arith.constant 0 : index
    %362 = vector.load %arg2[%c0_124, %c0_125] : memref<8x1152xf32, #tpu.memory_space<vmem>>, vector<8x1152xf32>
    %363 = arith.truncf %362 : vector<8x1152xf32> to vector<8x1152xbf16>
    %c0_126 = arith.constant 0 : index
    %c0_127 = arith.constant 0 : index
    %364 = vector.load %arg14[%c0_126, %c0_127] : memref<1152x256xbf16, #tpu.memory_space<vmem>>, vector<1152x256xbf16>
    %cst_128 = arith.constant dense<0.000000e+00> : vector<8x256xf32>
    %365 = tpu.matmul %363, %364, %cst_128 {dimension_numbers = #tpu.dot_dimension_numbers<[1], [0], [0], [1], [0, 0, 1, 1], [], []>} : vector<8x1152xbf16>, vector<1152x256xbf16>, vector<8x256xf32> -> vector<8x256xf32>
    %c0_129 = arith.constant 0 : index
    %c0_130 = arith.constant 0 : index
    %366 = vector.load %arg1[%c0_129, %c0_130] : memref<8x256xf32, #tpu.memory_space<vmem>>, vector<8x256xf32>
    %367 = arith.truncf %366 : vector<8x256xf32> to vector<8x256xbf16>
    %c0_131 = arith.constant 0 : index
    %c0_132 = arith.constant 0 : index
    %368 = vector.load %arg15[%c0_131, %c0_132] : memref<256x256xbf16, #tpu.memory_space<vmem>>, vector<256x256xbf16>
    %cst_133 = arith.constant dense<0.000000e+00> : vector<8x256xf32>
    %369 = tpu.matmul %367, %368, %cst_133 {dimension_numbers = #tpu.dot_dimension_numbers<[1], [0], [0], [1], [0, 0, 1, 1], [], []>} : vector<8x256xbf16>, vector<256x256xbf16>, vector<8x256xf32> -> vector<8x256xf32>
    %370 = arith.addf %365, %369 : vector<8x256xf32>
    %371 = vector.extract_strided_slice %333 {offsets = [10, 0], sizes = [1, 256], strides = [1, 1]} : vector<17x256xf32> to vector<1x256xf32>
    %372 = vector.broadcast %371 : vector<1x256xf32> to vector<8x256xf32>
    %373 = arith.addf %370, %372 : vector<8x256xf32>
    %c2_i32_134 = arith.constant 2 : i32
    %374 = tpu.memref_slice %arg19[%c2_i32_134] : memref<5x!tpu.dma_semaphore, #tpu.memory_space<semaphore_mem>> -> memref<1x!tpu.dma_semaphore, #tpu.memory_space<semaphore_mem>>
    %375 = tpu.memref_squeeze %374 : memref<1x!tpu.dma_semaphore, #tpu.memory_space<semaphore_mem>> -> memref<!tpu.dma_semaphore, #tpu.memory_space<semaphore_mem>>
    tpu.wait_dma2 semaphore(%375 : memref<!tpu.dma_semaphore, #tpu.memory_space<semaphore_mem>>) src(%arg9 : memref<4x256x256xbf16, #tpu.memory_space<any>>) dst(%arg16 : memref<4x256x256xbf16, #tpu.memory_space<vmem>>)
    %376 = arith.truncf %357 : vector<8x256xf32> to vector<8x256xbf16>
    %c0_135 = arith.constant 0 : index
    %c0_136 = arith.constant 0 : index
    %c0_137 = arith.constant 0 : index
    %377 = vector.load %arg16[%c0_135, %c0_136, %c0_137] : memref<4x256x256xbf16, #tpu.memory_space<vmem>>, vector<1x256x256xbf16>
    %378 = vector.shape_cast %377 : vector<1x256x256xbf16> to vector<256x256xbf16>
    %cst_138 = arith.constant dense<0.000000e+00> : vector<8x256xf32>
    %379 = tpu.matmul %376, %378, %cst_138 {dimension_numbers = #tpu.dot_dimension_numbers<[1], [0], [0], [1], [0, 0, 1, 1], [], []>} : vector<8x256xbf16>, vector<256x256xbf16>, vector<8x256xf32> -> vector<8x256xf32>
    %380 = vector.extract_strided_slice %333 {offsets = [11, 0], sizes = [1, 256], strides = [1, 1]} : vector<17x256xf32> to vector<1x256xf32>
    %381 = vector.broadcast %380 : vector<1x256xf32> to vector<8x256xf32>
    %382 = arith.addf %379, %381 : vector<8x256xf32>
    %cst_139 = arith.constant 0.000000e+00 : f32
    %383 = vector.broadcast %cst_139 : f32 to vector<8x256xf32>
    %384 = arith.maximumf %382, %383 : vector<8x256xf32>
    %385 = arith.addf %384, %373 : vector<8x256xf32>
    %386 = arith.truncf %373 : vector<8x256xf32> to vector<8x256xbf16>
    %c1_140 = arith.constant 1 : index
    %c0_141 = arith.constant 0 : index
    %c0_142 = arith.constant 0 : index
    %387 = vector.load %arg16[%c1_140, %c0_141, %c0_142] : memref<4x256x256xbf16, #tpu.memory_space<vmem>>, vector<1x256x256xbf16>
    %388 = vector.shape_cast %387 : vector<1x256x256xbf16> to vector<256x256xbf16>
    %cst_143 = arith.constant dense<0.000000e+00> : vector<8x256xf32>
    %389 = tpu.matmul %386, %388, %cst_143 {dimension_numbers = #tpu.dot_dimension_numbers<[1], [0], [0], [1], [0, 0, 1, 1], [], []>} : vector<8x256xbf16>, vector<256x256xbf16>, vector<8x256xf32> -> vector<8x256xf32>
    %390 = vector.extract_strided_slice %333 {offsets = [12, 0], sizes = [1, 256], strides = [1, 1]} : vector<17x256xf32> to vector<1x256xf32>
    %391 = vector.broadcast %390 : vector<1x256xf32> to vector<8x256xf32>
    %392 = arith.addf %389, %391 : vector<8x256xf32>
    %cst_144 = arith.constant 0.000000e+00 : f32
    %393 = vector.broadcast %cst_144 : f32 to vector<8x256xf32>
    %394 = arith.maximumf %392, %393 : vector<8x256xf32>
    %395 = arith.addf %394, %357 : vector<8x256xf32>
    %396 = arith.addf %385, %373 : vector<8x256xf32>
    %397 = vector.extract_strided_slice %333 {offsets = [2, 0], sizes = [1, 256], strides = [1, 1]} : vector<17x256xf32> to vector<1x256xf32>
    %398 = vector.extract_strided_slice %333 {offsets = [3, 0], sizes = [1, 256], strides = [1, 1]} : vector<17x256xf32> to vector<1x256xf32>
    %cst_145 = arith.constant dense<0.000000e+00> : vector<8xf32>
    %399 = vector.multi_reduction <add>, %396, %cst_145 [1] : vector<8x256xf32> to vector<8xf32>
    %400 = vector.shape_cast %399 : vector<8xf32> to vector<8x1xf32>
    %cst_146 = arith.constant 2.560000e+02 : f32
    %401 = vector.broadcast %cst_146 : f32 to vector<8x1xf32>
    %402 = arith.divf %400, %401 : vector<8x1xf32>
    %403 = vector.broadcast %402 : vector<8x1xf32> to vector<8x256xf32>
    %404 = arith.subf %396, %403 : vector<8x256xf32>
    %405 = arith.mulf %404, %404 : vector<8x256xf32>
    %cst_147 = arith.constant dense<0.000000e+00> : vector<8xf32>
    %406 = vector.multi_reduction <add>, %405, %cst_147 [1] : vector<8x256xf32> to vector<8xf32>
    %407 = vector.shape_cast %406 : vector<8xf32> to vector<8x1xf32>
    %cst_148 = arith.constant 2.560000e+02 : f32
    %408 = vector.broadcast %cst_148 : f32 to vector<8x1xf32>
    %409 = arith.divf %407, %408 : vector<8x1xf32>
    %410 = vector.broadcast %402 : vector<8x1xf32> to vector<8x256xf32>
    %411 = arith.subf %396, %410 : vector<8x256xf32>
    %cst_149 = arith.constant 9.99999974E-6 : f32
    %412 = vector.broadcast %cst_149 : f32 to vector<8x1xf32>
    %413 = arith.addf %409, %412 : vector<8x1xf32>
    %414 = math.rsqrt %413 : vector<8x1xf32>
    %415 = vector.broadcast %414 : vector<8x1xf32> to vector<8x256xf32>
    %416 = arith.mulf %411, %415 : vector<8x256xf32>
    %417 = vector.broadcast %397 : vector<1x256xf32> to vector<8x256xf32>
    %418 = arith.mulf %416, %417 : vector<8x256xf32>
    %419 = vector.broadcast %398 : vector<1x256xf32> to vector<8x256xf32>
    %420 = arith.addf %418, %419 : vector<8x256xf32>
    %421 = arith.addf %395, %357 : vector<8x256xf32>
    %422 = vector.extract_strided_slice %333 {offsets = [4, 0], sizes = [1, 256], strides = [1, 1]} : vector<17x256xf32> to vector<1x256xf32>
    %423 = vector.extract_strided_slice %333 {offsets = [5, 0], sizes = [1, 256], strides = [1, 1]} : vector<17x256xf32> to vector<1x256xf32>
    %cst_150 = arith.constant dense<0.000000e+00> : vector<8xf32>
    %424 = vector.multi_reduction <add>, %421, %cst_150 [1] : vector<8x256xf32> to vector<8xf32>
    %425 = vector.shape_cast %424 : vector<8xf32> to vector<8x1xf32>
    %cst_151 = arith.constant 2.560000e+02 : f32
    %426 = vector.broadcast %cst_151 : f32 to vector<8x1xf32>
    %427 = arith.divf %425, %426 : vector<8x1xf32>
    %428 = vector.broadcast %427 : vector<8x1xf32> to vector<8x256xf32>
    %429 = arith.subf %421, %428 : vector<8x256xf32>
    %430 = arith.mulf %429, %429 : vector<8x256xf32>
    %cst_152 = arith.constant dense<0.000000e+00> : vector<8xf32>
    %431 = vector.multi_reduction <add>, %430, %cst_152 [1] : vector<8x256xf32> to vector<8xf32>
    %432 = vector.shape_cast %431 : vector<8xf32> to vector<8x1xf32>
    %cst_153 = arith.constant 2.560000e+02 : f32
    %433 = vector.broadcast %cst_153 : f32 to vector<8x1xf32>
    %434 = arith.divf %432, %433 : vector<8x1xf32>
    %435 = vector.broadcast %427 : vector<8x1xf32> to vector<8x256xf32>
    %436 = arith.subf %421, %435 : vector<8x256xf32>
    %cst_154 = arith.constant 9.99999974E-6 : f32
    %437 = vector.broadcast %cst_154 : f32 to vector<8x1xf32>
    %438 = arith.addf %434, %437 : vector<8x1xf32>
    %439 = math.rsqrt %438 : vector<8x1xf32>
    %440 = vector.broadcast %439 : vector<8x1xf32> to vector<8x256xf32>
    %441 = arith.mulf %436, %440 : vector<8x256xf32>
    %442 = vector.broadcast %422 : vector<1x256xf32> to vector<8x256xf32>
    %443 = arith.mulf %441, %442 : vector<8x256xf32>
    %444 = vector.broadcast %423 : vector<1x256xf32> to vector<8x256xf32>
    %445 = arith.addf %443, %444 : vector<8x256xf32>
    %446 = arith.truncf %420 : vector<8x256xf32> to vector<8x256xbf16>
    %c2_155 = arith.constant 2 : index
    %c0_156 = arith.constant 0 : index
    %c0_157 = arith.constant 0 : index
    %447 = vector.load %arg16[%c2_155, %c0_156, %c0_157] : memref<4x256x256xbf16, #tpu.memory_space<vmem>>, vector<1x256x256xbf16>
    %448 = vector.shape_cast %447 : vector<1x256x256xbf16> to vector<256x256xbf16>
    %cst_158 = arith.constant dense<0.000000e+00> : vector<8x256xf32>
    %449 = tpu.matmul %446, %448, %cst_158 {dimension_numbers = #tpu.dot_dimension_numbers<[1], [0], [0], [1], [0, 0, 1, 1], [], []>} : vector<8x256xbf16>, vector<256x256xbf16>, vector<8x256xf32> -> vector<8x256xf32>
    %450 = vector.extract_strided_slice %333 {offsets = [13, 0], sizes = [1, 256], strides = [1, 1]} : vector<17x256xf32> to vector<1x256xf32>
    %451 = vector.broadcast %450 : vector<1x256xf32> to vector<8x256xf32>
    %452 = arith.addf %449, %451 : vector<8x256xf32>
    %cst_159 = arith.constant 0.000000e+00 : f32
    %453 = vector.broadcast %cst_159 : f32 to vector<8x256xf32>
    %454 = arith.maximumf %452, %453 : vector<8x256xf32>
    %455 = arith.addf %454, %420 : vector<8x256xf32>
    %456 = arith.truncf %445 : vector<8x256xf32> to vector<8x256xbf16>
    %c3_160 = arith.constant 3 : index
    %c0_161 = arith.constant 0 : index
    %c0_162 = arith.constant 0 : index
    %457 = vector.load %arg16[%c3_160, %c0_161, %c0_162] : memref<4x256x256xbf16, #tpu.memory_space<vmem>>, vector<1x256x256xbf16>
    %458 = vector.shape_cast %457 : vector<1x256x256xbf16> to vector<256x256xbf16>
    %cst_163 = arith.constant dense<0.000000e+00> : vector<8x256xf32>
    %459 = tpu.matmul %456, %458, %cst_163 {dimension_numbers = #tpu.dot_dimension_numbers<[1], [0], [0], [1], [0, 0, 1, 1], [], []>} : vector<8x256xbf16>, vector<256x256xbf16>, vector<8x256xf32> -> vector<8x256xf32>
    %460 = vector.extract_strided_slice %333 {offsets = [14, 0], sizes = [1, 256], strides = [1, 1]} : vector<17x256xf32> to vector<1x256xf32>
    %461 = vector.broadcast %460 : vector<1x256xf32> to vector<8x256xf32>
    %462 = arith.addf %459, %461 : vector<8x256xf32>
    %cst_164 = arith.constant 0.000000e+00 : f32
    %463 = vector.broadcast %cst_164 : f32 to vector<8x256xf32>
    %464 = arith.maximumf %462, %463 : vector<8x256xf32>
    %465 = arith.addf %464, %445 : vector<8x256xf32>
    %c3_i32_165 = arith.constant 3 : i32
    %466 = tpu.memref_slice %arg19[%c3_i32_165] : memref<5x!tpu.dma_semaphore, #tpu.memory_space<semaphore_mem>> -> memref<1x!tpu.dma_semaphore, #tpu.memory_space<semaphore_mem>>
    %467 = tpu.memref_squeeze %466 : memref<1x!tpu.dma_semaphore, #tpu.memory_space<semaphore_mem>> -> memref<!tpu.dma_semaphore, #tpu.memory_space<semaphore_mem>>
    tpu.wait_dma2 semaphore(%467 : memref<!tpu.dma_semaphore, #tpu.memory_space<semaphore_mem>>) src(%arg10 : memref<2x256x1024xbf16, #tpu.memory_space<any>>) dst(%arg17 : memref<2x256x1024xbf16, #tpu.memory_space<vmem>>)
    %c4_i32_166 = arith.constant 4 : i32
    %468 = tpu.memref_slice %arg19[%c4_i32_166] : memref<5x!tpu.dma_semaphore, #tpu.memory_space<semaphore_mem>> -> memref<1x!tpu.dma_semaphore, #tpu.memory_space<semaphore_mem>>
    %469 = tpu.memref_squeeze %468 : memref<1x!tpu.dma_semaphore, #tpu.memory_space<semaphore_mem>> -> memref<!tpu.dma_semaphore, #tpu.memory_space<semaphore_mem>>
    tpu.wait_dma2 semaphore(%469 : memref<!tpu.dma_semaphore, #tpu.memory_space<semaphore_mem>>) src(%arg11 : memref<2x1024x256xbf16, #tpu.memory_space<any>>) dst(%arg18 : memref<2x1024x256xbf16, #tpu.memory_space<vmem>>)
    %470 = arith.truncf %455 : vector<8x256xf32> to vector<8x256xbf16>
    %c0_167 = arith.constant 0 : index
    %c0_168 = arith.constant 0 : index
    %c0_169 = arith.constant 0 : index
    %471 = vector.load %arg17[%c0_167, %c0_168, %c0_169] : memref<2x256x1024xbf16, #tpu.memory_space<vmem>>, vector<1x256x1024xbf16>
    %472 = vector.shape_cast %471 : vector<1x256x1024xbf16> to vector<256x1024xbf16>
    %cst_170 = arith.constant dense<0.000000e+00> : vector<8x1024xf32>
    %473 = tpu.matmul %470, %472, %cst_170 {dimension_numbers = #tpu.dot_dimension_numbers<[1], [0], [0], [1], [0, 0, 1, 1], [], []>} : vector<8x256xbf16>, vector<256x1024xbf16>, vector<8x1024xf32> -> vector<8x1024xf32>
    %c1_171 = arith.constant 1 : index
    %c0_172 = arith.constant 0 : index
    %474 = vector.load %arg6[%c1_171, %c0_172] : memref<3x1024xf32, #tpu.memory_space<vmem>>, vector<1x1024xf32>
    %475 = vector.broadcast %474 : vector<1x1024xf32> to vector<8x1024xf32>
    %476 = arith.addf %473, %475 : vector<8x1024xf32>
    %cst_173 = arith.constant 0.000000e+00 : f32
    %477 = vector.broadcast %cst_173 : f32 to vector<8x1024xf32>
    %478 = arith.maximumf %476, %477 : vector<8x1024xf32>
    %479 = arith.truncf %465 : vector<8x256xf32> to vector<8x256xbf16>
    %c1_174 = arith.constant 1 : index
    %c0_175 = arith.constant 0 : index
    %c0_176 = arith.constant 0 : index
    %480 = vector.load %arg17[%c1_174, %c0_175, %c0_176] : memref<2x256x1024xbf16, #tpu.memory_space<vmem>>, vector<1x256x1024xbf16>
    %481 = vector.shape_cast %480 : vector<1x256x1024xbf16> to vector<256x1024xbf16>
    %cst_177 = arith.constant dense<0.000000e+00> : vector<8x1024xf32>
    %482 = tpu.matmul %479, %481, %cst_177 {dimension_numbers = #tpu.dot_dimension_numbers<[1], [0], [0], [1], [0, 0, 1, 1], [], []>} : vector<8x256xbf16>, vector<256x1024xbf16>, vector<8x1024xf32> -> vector<8x1024xf32>
    %c2_178 = arith.constant 2 : index
    %c0_179 = arith.constant 0 : index
    %483 = vector.load %arg6[%c2_178, %c0_179] : memref<3x1024xf32, #tpu.memory_space<vmem>>, vector<1x1024xf32>
    %484 = vector.broadcast %483 : vector<1x1024xf32> to vector<8x1024xf32>
    %485 = arith.addf %482, %484 : vector<8x1024xf32>
    %cst_180 = arith.constant 0.000000e+00 : f32
    %486 = vector.broadcast %cst_180 : f32 to vector<8x1024xf32>
    %487 = arith.maximumf %485, %486 : vector<8x1024xf32>
    %488 = arith.truncf %478 : vector<8x1024xf32> to vector<8x1024xbf16>
    %c0_181 = arith.constant 0 : index
    %c0_182 = arith.constant 0 : index
    %c0_183 = arith.constant 0 : index
    %489 = vector.load %arg18[%c0_181, %c0_182, %c0_183] : memref<2x1024x256xbf16, #tpu.memory_space<vmem>>, vector<1x1024x256xbf16>
    %490 = vector.shape_cast %489 : vector<1x1024x256xbf16> to vector<1024x256xbf16>
    %cst_184 = arith.constant dense<0.000000e+00> : vector<8x256xf32>
    %491 = tpu.matmul %488, %490, %cst_184 {dimension_numbers = #tpu.dot_dimension_numbers<[1], [0], [0], [1], [0, 0, 1, 1], [], []>} : vector<8x1024xbf16>, vector<1024x256xbf16>, vector<8x256xf32> -> vector<8x256xf32>
    %492 = vector.extract_strided_slice %333 {offsets = [15, 0], sizes = [1, 256], strides = [1, 1]} : vector<17x256xf32> to vector<1x256xf32>
    %493 = vector.broadcast %492 : vector<1x256xf32> to vector<8x256xf32>
    %494 = arith.addf %491, %493 : vector<8x256xf32>
    %495 = arith.truncf %487 : vector<8x1024xf32> to vector<8x1024xbf16>
    %c1_185 = arith.constant 1 : index
    %c0_186 = arith.constant 0 : index
    %c0_187 = arith.constant 0 : index
    %496 = vector.load %arg18[%c1_185, %c0_186, %c0_187] : memref<2x1024x256xbf16, #tpu.memory_space<vmem>>, vector<1x1024x256xbf16>
    %497 = vector.shape_cast %496 : vector<1x1024x256xbf16> to vector<1024x256xbf16>
    %cst_188 = arith.constant dense<0.000000e+00> : vector<8x256xf32>
    %498 = tpu.matmul %495, %497, %cst_188 {dimension_numbers = #tpu.dot_dimension_numbers<[1], [0], [0], [1], [0, 0, 1, 1], [], []>} : vector<8x1024xbf16>, vector<1024x256xbf16>, vector<8x256xf32> -> vector<8x256xf32>
    %499 = vector.extract_strided_slice %333 {offsets = [16, 0], sizes = [1, 256], strides = [1, 1]} : vector<17x256xf32> to vector<1x256xf32>
    %500 = vector.broadcast %499 : vector<1x256xf32> to vector<8x256xf32>
    %501 = arith.addf %498, %500 : vector<8x256xf32>
    %502 = arith.addf %494, %455 : vector<8x256xf32>
    %503 = vector.extract_strided_slice %333 {offsets = [6, 0], sizes = [1, 256], strides = [1, 1]} : vector<17x256xf32> to vector<1x256xf32>
    %504 = vector.extract_strided_slice %333 {offsets = [7, 0], sizes = [1, 256], strides = [1, 1]} : vector<17x256xf32> to vector<1x256xf32>
    %cst_189 = arith.constant dense<0.000000e+00> : vector<8xf32>
    %505 = vector.multi_reduction <add>, %502, %cst_189 [1] : vector<8x256xf32> to vector<8xf32>
    %506 = vector.shape_cast %505 : vector<8xf32> to vector<8x1xf32>
    %cst_190 = arith.constant 2.560000e+02 : f32
    %507 = vector.broadcast %cst_190 : f32 to vector<8x1xf32>
    %508 = arith.divf %506, %507 : vector<8x1xf32>
    %509 = vector.broadcast %508 : vector<8x1xf32> to vector<8x256xf32>
    %510 = arith.subf %502, %509 : vector<8x256xf32>
    %511 = arith.mulf %510, %510 : vector<8x256xf32>
    %cst_191 = arith.constant dense<0.000000e+00> : vector<8xf32>
    %512 = vector.multi_reduction <add>, %511, %cst_191 [1] : vector<8x256xf32> to vector<8xf32>
    %513 = vector.shape_cast %512 : vector<8xf32> to vector<8x1xf32>
    %cst_192 = arith.constant 2.560000e+02 : f32
    %514 = vector.broadcast %cst_192 : f32 to vector<8x1xf32>
    %515 = arith.divf %513, %514 : vector<8x1xf32>
    %516 = vector.broadcast %508 : vector<8x1xf32> to vector<8x256xf32>
    %517 = arith.subf %502, %516 : vector<8x256xf32>
    %cst_193 = arith.constant 9.99999974E-6 : f32
    %518 = vector.broadcast %cst_193 : f32 to vector<8x1xf32>
    %519 = arith.addf %515, %518 : vector<8x1xf32>
    %520 = math.rsqrt %519 : vector<8x1xf32>
    %521 = vector.broadcast %520 : vector<8x1xf32> to vector<8x256xf32>
    %522 = arith.mulf %517, %521 : vector<8x256xf32>
    %523 = vector.broadcast %503 : vector<1x256xf32> to vector<8x256xf32>
    %524 = arith.mulf %522, %523 : vector<8x256xf32>
    %525 = vector.broadcast %504 : vector<1x256xf32> to vector<8x256xf32>
    %526 = arith.addf %524, %525 : vector<8x256xf32>
    %527 = arith.addf %501, %465 : vector<8x256xf32>
    %528 = vector.extract_strided_slice %333 {offsets = [8, 0], sizes = [1, 256], strides = [1, 1]} : vector<17x256xf32> to vector<1x256xf32>
    %529 = vector.extract_strided_slice %333 {offsets = [9, 0], sizes = [1, 256], strides = [1, 1]} : vector<17x256xf32> to vector<1x256xf32>
    %cst_194 = arith.constant dense<0.000000e+00> : vector<8xf32>
    %530 = vector.multi_reduction <add>, %527, %cst_194 [1] : vector<8x256xf32> to vector<8xf32>
    %531 = vector.shape_cast %530 : vector<8xf32> to vector<8x1xf32>
    %cst_195 = arith.constant 2.560000e+02 : f32
    %532 = vector.broadcast %cst_195 : f32 to vector<8x1xf32>
    %533 = arith.divf %531, %532 : vector<8x1xf32>
    %534 = vector.broadcast %533 : vector<8x1xf32> to vector<8x256xf32>
    %535 = arith.subf %527, %534 : vector<8x256xf32>
    %536 = arith.mulf %535, %535 : vector<8x256xf32>
    %cst_196 = arith.constant dense<0.000000e+00> : vector<8xf32>
    %537 = vector.multi_reduction <add>, %536, %cst_196 [1] : vector<8x256xf32> to vector<8xf32>
    %538 = vector.shape_cast %537 : vector<8xf32> to vector<8x1xf32>
    %cst_197 = arith.constant 2.560000e+02 : f32
    %539 = vector.broadcast %cst_197 : f32 to vector<8x1xf32>
    %540 = arith.divf %538, %539 : vector<8x1xf32>
    %541 = vector.broadcast %533 : vector<8x1xf32> to vector<8x256xf32>
    %542 = arith.subf %527, %541 : vector<8x256xf32>
    %cst_198 = arith.constant 9.99999974E-6 : f32
    %543 = vector.broadcast %cst_198 : f32 to vector<8x1xf32>
    %544 = arith.addf %540, %543 : vector<8x1xf32>
    %545 = math.rsqrt %544 : vector<8x1xf32>
    %546 = vector.broadcast %545 : vector<8x1xf32> to vector<8x256xf32>
    %547 = arith.mulf %542, %546 : vector<8x256xf32>
    %548 = vector.broadcast %528 : vector<1x256xf32> to vector<8x256xf32>
    %549 = arith.mulf %547, %548 : vector<8x256xf32>
    %550 = vector.broadcast %529 : vector<1x256xf32> to vector<8x256xf32>
    %551 = arith.addf %549, %550 : vector<8x256xf32>
    %c0_199 = arith.constant 0 : index
    %c0_200 = arith.constant 0 : index
    %552 = vector.load %arg12[%c0_199, %c0_200] : memref<8x512xf32, #tpu.memory_space<vmem>>, vector<8x256xf32>
    tpu.vector_store %arg12[%c0_199, %c0_200], %526 {strides = array<i32>} : memref<8x512xf32, #tpu.memory_space<vmem>>, vector<8x256xf32>,
    %c0_201 = arith.constant 0 : index
    %c256 = arith.constant 256 : index
    %553 = vector.load %arg12[%c0_201, %c256] : memref<8x512xf32, #tpu.memory_space<vmem>>, vector<8x256xf32>
    tpu.vector_store %arg12[%c0_201, %c256], %551 {strides = array<i32>} : memref<8x512xf32, #tpu.memory_space<vmem>>, vector<8x256xf32>,
    return
  }
}

</mosaic_0001>

<bundles_post_ra>
// kernel: model_a_forward.1
= control target key start
LH: loop header
LB: loop body
LE: loop exit
PB: predicated region body
PF: predicated region fallthrough
CT: control target
= control target key end

     0   :  { %17 = vsyncpa [#allocation10], 0  ;;  %s8468_s0 = inlined_call_operand.vmem [shape: f32[8,128], index: 0, kind: input, shape index: {}]   ;;  %s8469_s1 = inlined_call_operand.vmem [shape: f32[8,256], index: 1, kind: input, shape index: {}]   ;;  %s8470_s2 = inlined_call_operand.vmem [shape: f32[8,1152], index: 2, kind: input, shape index: {}]   ;;  %s8471_s3 = inlined_call_operand.hbm [shape: bf16[128,1024], index: 3, kind: input, shape index: {}]   ;;  %s8472_s4 = inlined_call_operand.hbm [shape: bf16[256,1024], index: 4, kind: input, shape index: {}]   ;;  %s8473_s5 = inlined_call_operand.vmem [shape: f32[17,256], index: 5, kind: input, shape index: {}]   ;;  %s8474_s6 = inlined_call_operand.vmem [shape: f32[3,1024], index: 6, kind: input, shape index: {}]   ;;  %s8475_s7 = inlined_call_operand.hbm [shape: bf16[1152,256], index: 7, kind: input, shape index: {}]   ;;  %s8476_s8 = inlined_call_operand.hbm [shape: bf16[256,256], index: 8, kind: input, shape index: {}]   ;;  %s8477_s9 = inlined_call_operand.hbm [shape: bf16[4,256,256], index: 9, kind: input, shape index: {}]   ;;  %s8478_s10 = inlined_call_operand.hbm [shape: bf16[2,256,1024], index: 10, kind: input, shape index: {}]   ;;  %s8479_s11 = inlined_call_operand.hbm [shape: bf16[2,1024,256], index: 11, kind: input, shape index: {}]   ;;  %s8480_s12 = inlined_call_operand.hbm [shape: f32[8,512], index: 12, kind: output, shape index: {}]  }
   0x1   :  { %18 = vsyncpa [#allocation13], 0 }
   0x2   :  { %19 = vsyncpa [#allocation11], 0  ;;  %s6465_s21 = smov [#allocation9]   ;;  %s6383_s25 = scalar_lea.hbm %s8471_s3, 8192 }
   0x3   :  { %s31_s22 = sshll.u32 %s6465_s21, 4  ;;  %p6384_p0 = scmp.ne.s32.totalorder %s8471_s3, %s6383_s25  ;;  %s32_s22 = int_to_ptr.vmem [resolvable:$true] %s31_s22 }
   0x4   :  { %p6387_p1 = scmp.lt.u32.totalorder %s6383_s25, %s8471_s3 }
   0x6   :  { %p6389_p2 = pnand %p6387_p1, %p6384_p0 }
   0x8   :  { %6392 = shalt.err (!%p6389_p2)
}
   0x9   :  { %s6393_s30 = scalar_lea.vmem %s32_s22, 8192  ;;  %p6398_p4 = scmp.lt.s32.totalorder %s32_s22, %s32_s22 }
   0xa   :  { %p6394_p3 = scmp.ne.s32.totalorder %s32_s22, %s6393_s30  ;;  %p6399_p5 = scmp.lt.s32.totalorder %s6393_s30, %s6393_s30 }
   0xc   :  { %p6400_p6 = por %p6399_p5, %p6398_p4 }
   0xe   :  { %p6401_p7 = pnand %p6400_p6, %p6394_p3 }
  0x10   :  { %6404 = shalt.err (!%p6401_p7)
}
  0x11   :  { %s6466_s13 = smov 512   ;;  %s6467_s14 = smov 32  }
  0x12   :  { %37 = dma.hbm_to_vmem [thread:$0]  %s8471_s3, 8192, %s32_s22, [#allocation10], %s6466_s13, %s6466_s13, %s6467_s14  }
  0x13   :  { %s6468_s17 = smov [#allocation12]   ;;  %s6405_s21 = scalar_lea.hbm %s8472_s4, 16384 }
  0x14   :  { %s43_s18 = sshll.u32 %s6468_s17, 4  ;;  %p6406_p8 = scmp.ne.s32.totalorder %s8472_s4, %s6405_s21  ;;  %s44_s18 = int_to_ptr.vmem [resolvable:$true] %s43_s18 }
  0x15   :  { %p6409_p9 = scmp.lt.u32.totalorder %s6405_s21, %s8472_s4 }
  0x17   :  { %p6411_p10 = pnand %p6409_p9, %p6406_p8 }
  0x19   :  { %6414 = shalt.err (!%p6411_p10)
}
  0x1a   :  { %s6415_s27 = scalar_lea.vmem %s44_s18, 16384  ;;  %p6420_p12 = scmp.lt.s32.totalorder %s44_s18, %s44_s18 }
  0x1b   :  { %p6416_p11 = scmp.ne.s32.totalorder %s44_s18, %s6415_s27  ;;  %p6421_p13 = scmp.lt.s32.totalorder %s6415_s27, %s6415_s27 }
  0x1d   :  { %p6422_p0 = por %p6421_p13, %p6420_p12 }
  0x1f   :  { %p6423_p1 = pnand %p6422_p0, %p6416_p11 }
  0x21   :  { %6426 = shalt.err (!%p6423_p1)
}
  0x22   :  { %49 = dma.hbm_to_vmem [thread:$0]  %s8472_s4, 16384, %s44_s18, [#allocation13], %s6466_s13, %s6466_s13, %s6467_s14  }
  0x23   :  { %6449 = dma.done.wait [#allocation10], 8192  }
  0x24   :  { %6450 = vsyncadd [#allocation10], 4294959104 }
  0x25   :  { %6451 = dma.done.wait [#allocation13], 16384  }
  0x26   :  { %6452 = vsyncadd [#allocation13], 4294950912  ;;  %s65_s28 = sld [smem:[#allocation0]]   ;;  %s6469_s29 = smov 256   ;;  %v8481_v0 = vmov 0  }
  0x27   :  { %77 = sst [smem:[#allocation16]] %s6469_s29  ;;  %696 = vmatprep.mubr.bf16.mxu0 %v8481_v0  ;;  %737 = vmatprep.mubr.bf16.mxu1 %v8481_v0  ;;  %s6471_s30 = smov 2  }
  0x28   :  { %79 = sst [smem:[#allocation16 + $0x1]] %s6469_s29  ;;  %s6472_s15 = smov 64  }
  0x29   :  { %81 = sst [smem:[#allocation16 + $0x2]] %s6471_s30  ;;  %s6473_s4 = smov 128  }
  0x2a   :  { %83 = sst [smem:[#allocation16 + $0x3]] %s6472_s15  ;;  %s6474_s14 = smov [#allocation3]  }
  0x2b   :  { %85 = sst [smem:[#allocation16 + $0x4]] %s6473_s4  ;;  %s73_s16 = sshll.u32 %s6474_s14, 4  ;;  %s74_s16 = int_to_ptr.vmem [resolvable:$true] %s73_s16 }
  0x2c   :  { %87 = sst [smem:[#allocation16 + $0x5]] %s6471_s30  ;;  %s5974_s17 = sshll.u32 %s65_s28, 26 }
  0x2d   :  { %89 = sst [smem:[#allocation16 + $0x6]] %s6473_s4  ;;  %s6595_s18 = sadd.s32 134217728, %s5974_s17 }
  0x2e   :  { %91 = sst [smem:[#allocation16 + $0x7]] %s6472_s15  ;;  %s6475_s19 = smov 4  }
  0x2f   :  { %93 = sst [smem:[#allocation16 + $0x8]] %s6475_s19  ;;  %s6476_s20 = smov [#allocation8]  }
  0x30   :  { %s6477_s21 = smov [#allocation15]   ;;  %s6478_s25 = smov [#allocation4]  }
  0x31   :  { %95 = dma.general %s8475_s7, 18432, %s74_s16, %s6476_s20, %s6477_s21, [#allocation16], %s6595_s18, 0  }
  0x32   :  { %112 = sst [smem:[#allocation18]] %s6469_s29  ;;  %s108_s26 = sshll.u32 %s6478_s25, 4  ;;  %s109_s26 = int_to_ptr.vmem [resolvable:$true] %s108_s26 }
  0x33   :  { %114 = sst [smem:[#allocation18 + $0x1]] %s6469_s29  ;;  %s6479_s7 = smov [#allocation8 + $0x1]  }
  0x34   :  { %116 = sst [smem:[#allocation18 + $0x2]] %s6471_s30  ;;  %s6480_s27 = smov [#allocation17]  }
  0x35   :  { %118 = sst [smem:[#allocation18 + $0x3]] %s6472_s15  ;;  %s6481_s28 = smov [#allocation5]  }
  0x36   :  { %120 = sst [smem:[#allocation18 + $0x4]] %s6473_s4  ;;  %s143_s14 = sshll.u32 %s6481_s28, 4  ;;  %s144_s14 = int_to_ptr.vmem [resolvable:$true] %s143_s14 }
  0x37   :  { %122 = sst [smem:[#allocation18 + $0x5]] %s6471_s30  ;;  %s6483_s16 = smov [#allocation19]  }
  0x38   :  { %124 = sst [smem:[#allocation18 + $0x6]] %s6473_s4  ;;  %s6484_s21 = smov 1024  }
  0x39   :  { %126 = sst [smem:[#allocation18 + $0x7]] %s6472_s15  ;;  %s6485_s23 = smov [#allocation6]  }
  0x3a   :  { %128 = sst [smem:[#allocation18 + $0x8]] %s6475_s19  ;;  %s178_s24 = sshll.u32 %s6485_s23, 4  ;;  %s179_s24 = int_to_ptr.vmem [resolvable:$true] %s178_s24 }
  0x3b   :  { %130 = dma.general %s8476_s8, 4096, %s109_s26, %s6479_s7, %s6480_s27, [#allocation18], %s6595_s18, 0  }
  0x3c   :  { %147 = sst [smem:[#allocation20]] %s6469_s29  ;;  %s6482_s8 = smov [#allocation8 + $0x2]  }
  0x3d   :  { %149 = sst [smem:[#allocation20 + $0x1]] %s6469_s29  ;;  %s6486_s25 = smov 8  }
  0x3e   :  { %151 = sst [smem:[#allocation20 + $0x2]] %s6471_s30  ;;  %s6488_s26 = smov [#allocation21]  }
  0x3f   :  { %153 = sst [smem:[#allocation20 + $0x3]] %s6472_s15  ;;  %s6489_s3 = smov [#allocation7]  }
  0x40   :  { %155 = sst [smem:[#allocation20 + $0x4]] %s6473_s4  ;;  %s213_s22 = sshll.u32 %s6489_s3, 4  ;;  %s214_s22 = int_to_ptr.vmem [resolvable:$true] %s213_s22 }
  0x41   :  { %157 = sst [smem:[#allocation20 + $0x5]] %s6471_s30 }
  0x42   :  { %159 = sst [smem:[#allocation20 + $0x6]] %s6473_s4 }
  0x43   :  { %161 = sst [smem:[#allocation20 + $0x7]] %s6472_s15 }
  0x44   :  { %163 = sst [smem:[#allocation20 + $0x8]] %s6475_s19 }
  0x45   :  { %165 = dma.general %s8477_s9, 16384, %s144_s14, %s6482_s8, %s6483_s16, [#allocation20], %s6595_s18, 0  }
  0x46   :  { %182 = sst [smem:[#allocation22]] %s6484_s21  ;;  %s6487_s9 = smov [#allocation8 + $0x3]  }
  0x47   :  { %184 = sst [smem:[#allocation22 + $0x1]] %s6484_s21 }
  0x48   :  { %186 = sst [smem:[#allocation22 + $0x2]] %s6486_s25 }
  0x49   :  { %188 = sst [smem:[#allocation22 + $0x3]] %s6472_s15 }
  0x4a   :  { %190 = sst [smem:[#allocation22 + $0x4]] %s6473_s4 }
  0x4b   :  { %192 = sst [smem:[#allocation22 + $0x5]] %s6471_s30 }
  0x4c   :  { %194 = sst [smem:[#allocation22 + $0x6]] %s6466_s13  ;;  %s6491_s13 = smov [#allocation23]  }
  0x4d   :  { %196 = sst [smem:[#allocation22 + $0x7]] %s6472_s15 }
  0x4e   :  { %198 = sst [smem:[#allocation22 + $0x8]] %s6475_s19 }
  0x4f   :  { %200 = dma.general %s8478_s10, 32768, %s179_s24, %s6487_s9, %s6488_s26, [#allocation22], %s6595_s18, 0  }
  0x50   :  { %217 = sst [smem:[#allocation24]] %s6469_s29  ;;  %s6490_s10 = smov [#allocation8 + $0x4]  }
  0x51   :  { %219 = sst [smem:[#allocation24 + $0x1]] %s6469_s29 }
  0x52   :  { %221 = sst [smem:[#allocation24 + $0x2]] %s6471_s30 }
  0x53   :  { %223 = sst [smem:[#allocation24 + $0x3]] %s6472_s15 }
  0x54   :  { %225 = sst [smem:[#allocation24 + $0x4]] %s6473_s4 }
  0x55   :  { %227 = sst [smem:[#allocation24 + $0x5]] %s6471_s30 }
  0x56   :  { %229 = sst [smem:[#allocation24 + $0x6]] %s6473_s4 }
  0x57   :  { %231 = sst [smem:[#allocation24 + $0x7]] %s6472_s15 }
  0x58   :  { %233 = sst [smem:[#allocation24 + $0x8]] %s6475_s19 }
  0x59   :  { %235 = dma.general %s8479_s11, 32768, %s214_s22, %s6490_s10, %s6491_s13, [#allocation24], %s6595_s18, 0  }
  0x5a   :  { %v6655_v1 = vld [vmem:[%s8473_s5 + $0x10] sm:$0xff]  ;;  %v6660_v2 = vld [vmem:[%s8473_s5 + $0x18] sm:$0xff]  ;;  %v6665_v3 = vld [vmem:[%s8473_s5 + $0x20] ss:$0 sm:$0xff] }
  0x5b   :  { %8775 = vst [vmem:[#allocation33_spill] sm:$0xff] %v6655_v1  ;;  %8776 = vst [vmem:[#allocation34_spill] sm:$0xff] %v6660_v2  ;;  %v6670_v4 = vld [vmem:[%s8473_s5 + $0x28] ss:$0 sm:$0xff]  ;;  %v238_v5 = vld [vmem:[#allocation9] sm:$0xff] }
  0x5c   :  { %8777 = vst [vmem:[#allocation35_spill] sm:$0xff] %v6665_v3  ;;  %8778 = vst [vmem:[#allocation36_spill] sm:$0xff] %v6670_v4  ;;  %v242_v6 = vld [vmem:[#allocation9 + $0x20] sm:$0xff]  ;;  %v239_v8 = vld [vmem:[#allocation9 + $0x8] sm:$0xff] }
  0x5d   :  { %v5985_v7 = vcombine.high %v238_v5, %v242_v6  ;;  %v243_v9 = vld [vmem:[#allocation9 + $0x28] sm:$0xff]  ;;  %v5984_v10 = vcombine.low %v238_v5, %v242_v6  ;;  %v246_v11 = vld [vmem:[#allocation9 + $0x40] sm:$0xff] }
  0x5e   :  { %v5987_v12 = vcombine.high %v239_v8, %v243_v9  ;;  %v5986_v13 = vcombine.low %v239_v8, %v243_v9  ;;  %v250_v14 = vld [vmem:[#allocation9 + $0x60] sm:$0xff]  ;;  %v247_v15 = vld [vmem:[#allocation9 + $0x48] sm:$0xff]  ;;  %v240_v8 = vld [vmem:[#allocation9 + $0x10] sm:$0xff] }
  0x5f   :  { %v251_v16 = vld [vmem:[#allocation9 + $0x68] sm:$0xff]  ;;  %664 = vmatprep.subr.bf16.mxu0 %v5985_v7  ;;  %v5993_v17 = vcombine.high %v246_v11, %v250_v14  ;;  %v254_v19 = vld [vmem:[#allocation9 + $0x80] sm:$0xff]  ;;  %v5992_v22 = vcombine.low %v246_v11, %v250_v14  ;;  %v244_v9 = vld [vmem:[#allocation9 + $0x30] sm:$0xff] }
  0x60   :  { %v5995_v18 = vcombine.high %v247_v15, %v251_v16  ;;  %v258_v20 = vld [vmem:[#allocation9 + $0xa0] sm:$0xff]  ;;  %v255_v21 = vld [vmem:[#allocation9 + $0x88] sm:$0xff]  ;;  %705 = vmatprep.subr.bf16.mxu1 %v5987_v12  ;;  %665 = vmatpush1.bf16.msra.mxu0 %v5984_v10  ;;  %v5994_v24 = vcombine.low %v247_v15, %v251_v16  ;;  %v241_v10 = vld [vmem:[#allocation9 + $0x18] sm:$0xff]  ;;  %v5989_v15 = vcombine.high %v240_v8, %v244_v9 }
  0x61   :  { %v259_v23 = vld [vmem:[#allocation9 + $0xa8] sm:$0xff]  ;;  %706 = vmatpush1.bf16.msra.mxu1 %v5986_v13  ;;  %666 = vmatprep.subr.bf16.mxu0 %v5993_v17  ;;  %v6001_v25 = vcombine.high %v254_v19, %v258_v20  ;;  %v262_v27 = vld [vmem:[#allocation9 + $0xc0] sm:$0xff]  ;;  %v6000_v31 = vcombine.low %v254_v19, %v258_v20  ;;  %v245_v11 = vld [vmem:[#allocation9 + $0x38] sm:$0xff] }
  0x62   :  { %707 = vmatprep.subr.bf16.mxu1 %v5995_v18  ;;  %v6003_v26 = vcombine.high %v255_v21, %v259_v23  ;;  %v266_v28 = vld [vmem:[#allocation9 + $0xe0] sm:$0xff]  ;;  %v263_v29 = vld [vmem:[#allocation9 + $0xc8] sm:$0xff]  ;;  %v6002_v32 = vcombine.low %v255_v21, %v259_v23  ;;  %v236_v13 = vld [vmem:[%s8468_s0] sm:$0xff]  ;;  %v5991_v16 = vcombine.high %v241_v10, %v245_v11  ;;  %v5990_v23 = vcombine.low %v241_v10, %v245_v11 }
  0x63   :  { %v267_v30 = vld [vmem:[#allocation9 + $0xe8] sm:$0xff]  ;;  %v6009_v33 = vcombine.high %v262_v27, %v266_v28  ;;  %v270_v35 = vld [vmem:[#allocation9 + $0x100] sm:$0xff]  ;;  %v6008_v39 = vcombine.low %v262_v27, %v266_v28  ;;  %v248_v17 = vld [vmem:[#allocation9 + $0x50] sm:$0xff]  ;;  %v6675_v19 = vpack.c.bf16 %v236_v13, %v236_v13 }
  0x64   :  { %667 = vmatpush1.bf16.msra.mxu0 %v5992_v22  ;;  %v6011_v34 = vcombine.high %v263_v29, %v267_v30  ;;  %v274_v36 = vld [vmem:[#allocation9 + $0x120] sm:$0xff]  ;;  %v271_v37 = vld [vmem:[#allocation9 + $0x108] sm:$0xff]  ;;  %v6010_v40 = vcombine.low %v263_v29, %v267_v30  ;;  %v252_v18 = vld [vmem:[#allocation9 + $0x70] sm:$0xff]  ;;  %v5988_v22 = vcombine.low %v240_v8, %v244_v9 }
  0x65   :  { %708 = vmatpush1.bf16.msra.mxu1 %v5994_v24  ;;  %668 = vmatprep.subr.bf16.mxu0 %v6001_v25  ;;  %v275_v38 = vld [vmem:[#allocation9 + $0x128] sm:$0xff]  ;;  %v6017_v41 = vcombine.high %v270_v35, %v274_v36  ;;  %v278_v43 = vld [vmem:[#allocation9 + $0x140] sm:$0xff]  ;;  %v6016_v47 = vcombine.low %v270_v35, %v274_v36  ;;  %v249_v20 = vld [vmem:[#allocation9 + $0x58] sm:$0xff]  ;;  %v5997_v24 = vcombine.high %v248_v17, %v252_v18 }
  0x66   :  { %709 = vmatprep.subr.bf16.mxu1 %v6003_v26  ;;  %v6019_v42 = vcombine.high %v271_v37, %v275_v38  ;;  %v282_v44 = vld [vmem:[#allocation9 + $0x160] sm:$0xff]  ;;  %v279_v45 = vld [vmem:[#allocation9 + $0x148] sm:$0xff]  ;;  %v6018_v48 = vcombine.low %v271_v37, %v275_v38  ;;  %v253_v21 = vld [vmem:[#allocation9 + $0x78] sm:$0xff]  ;;  %v5996_v30 = vcombine.low %v248_v17, %v252_v18 }
  0x67   :  { %v283_v46 = vld [vmem:[#allocation9 + $0x168] sm:$0xff]  ;;  %v6025_v49 = vcombine.high %v278_v43, %v282_v44  ;;  %v286_v51 = vld [vmem:[#allocation9 + $0x180] sm:$0xff]  ;;  %v6024_v55 = vcombine.low %v278_v43, %v282_v44  ;;  %v5999_v25 = vcombine.high %v249_v20, %v253_v21  ;;  %v256_v26 = vld [vmem:[#allocation9 + $0x90] sm:$0xff] }
  0x68   :  { %669 = vmatpush1.bf16.msra.mxu0 %v6000_v31  ;;  %v6027_v50 = vcombine.high %v279_v45, %v283_v46  ;;  %v290_v52 = vld [vmem:[#allocation9 + $0x1a0] sm:$0xff]  ;;  %v287_v53 = vld [vmem:[#allocation9 + $0x188] sm:$0xff]  ;;  %v6026_v56 = vcombine.low %v279_v45, %v283_v46  ;;  %v260_v27 = vld [vmem:[#allocation9 + $0xb0] sm:$0xff]  ;;  %v5998_v31 = vcombine.low %v249_v20, %v253_v21 }
  0x69   :  { %710 = vmatpush1.bf16.msra.mxu1 %v6002_v32  ;;  %670 = vmatprep.subr.bf16.mxu0 %v6009_v33  ;;  %v291_v54 = vld [vmem:[#allocation9 + $0x1a8] sm:$0xff]  ;;  %v6033_v57 = vcombine.high %v286_v51, %v290_v52  ;;  %v294_v59 = vld [vmem:[#allocation9 + $0x1c0] sm:$0xff]  ;;  %v6032_v63 = vcombine.low %v286_v51, %v290_v52  ;;  %v257_v28 = vld [vmem:[#allocation9 + $0x98] sm:$0xff]  ;;  %v6005_v32 = vcombine.high %v256_v26, %v260_v27 }
  0x6a   :  { %711 = vmatprep.subr.bf16.mxu1 %v6011_v34  ;;  %v6035_v58 = vcombine.high %v287_v53, %v291_v54  ;;  %v298_v60 = vld [vmem:[#allocation9 + $0x1e0] sm:$0xff]  ;;  %v295_v61 = vld [vmem:[#allocation9 + $0x1c8] sm:$0xff]  ;;  %v6034_v5 = vcombine.low %v287_v53, %v291_v54  ;;  %v261_v29 = vld [vmem:[#allocation9 + $0xb8] sm:$0xff]  ;;  %v6004_v38 = vcombine.low %v256_v26, %v260_v27 }
  0x6b   :  { %v299_v62 = vld [vmem:[#allocation9 + $0x1e8] sm:$0xff]  ;;  %v6041_v6 = vcombine.high %v294_v59, %v298_v60  ;;  %v6040_v12 = vcombine.low %v294_v59, %v298_v60  ;;  %v6007_v33 = vcombine.high %v257_v28, %v261_v29  ;;  %v264_v34 = vld [vmem:[#allocation9 + $0xd0] sm:$0xff]  ;;  %v265_v36 = vld [vmem:[#allocation9 + $0xd8] sm:$0xff] }
  0x6c   :  { %671 = vmatpush1.bf16.msra.mxu0 %v6008_v39  ;;  %v6043_v7 = vcombine.high %v295_v61, %v299_v62  ;;  %v6042_v14 = vcombine.low %v295_v61, %v299_v62  ;;  %v268_v35 = vld [vmem:[#allocation9 + $0xf0] sm:$0xff]  ;;  %v269_v37 = vld [vmem:[#allocation9 + $0xf8] sm:$0xff]  ;;  %v6006_v39 = vcombine.low %v257_v28, %v261_v29  ;;  %v829_v17 = vld [vmem:[#allocation12 + $0x8] sm:$0xff] }
  0x6d   :  { %712 = vmatpush1.bf16.msra.mxu1 %v6010_v40  ;;  %672 = vmatprep.subr.bf16.mxu0 %v6017_v41  ;;  %v6013_v40 = vcombine.high %v264_v34, %v268_v35  ;;  %v6015_v41 = vcombine.high %v265_v36, %v269_v37  ;;  %v276_v43 = vld [vmem:[#allocation9 + $0x130] sm:$0xff]  ;;  %v273_v44 = vld [vmem:[#allocation9 + $0x118] sm:$0xff]  ;;  %v6012_v46 = vcombine.low %v264_v34, %v268_v35  ;;  %v833_v18 = vld [vmem:[#allocation12 + $0x28] sm:$0xff] }
  0x6e   :  { %713 = vmatprep.subr.bf16.mxu1 %v6019_v42  ;;  %v272_v42 = vld [vmem:[#allocation9 + $0x110] sm:$0xff]  ;;  %v277_v45 = vld [vmem:[#allocation9 + $0x138] sm:$0xff]  ;;  %v837_v26 = vld [vmem:[#allocation12 + $0x48] sm:$0xff]  ;;  %v6688_v29 = vcombine.low %v829_v17, %v833_v18 }
  0x6f   :  { %v284_v51 = vld [vmem:[#allocation9 + $0x170] sm:$0xff]  ;;  %v281_v52 = vld [vmem:[#allocation9 + $0x158] sm:$0xff]  ;;  %v6020_v54 = vcombine.low %v272_v42, %v276_v43  ;;  %v841_v27 = vld [vmem:[#allocation12 + $0x68] sm:$0xff] }
  0x70   :  { %673 = vmatpush1.bf16.msra.mxu0 %v6016_v47  ;;  %v6014_v47 = vcombine.low %v265_v36, %v269_v37  ;;  %v285_v53 = vld [vmem:[#allocation9 + $0x178] sm:$0xff]  ;;  %v292_v59 = vld [vmem:[#allocation9 + $0x1b0] sm:$0xff]  ;;  %8782 = vst [vmem:[#allocation40_spill] sm:$0xff] %v6688_v29  ;;  %v845_v34 = vld [vmem:[#allocation12 + $0x88] sm:$0xff]  ;;  %v6702_v37 = vcombine.low %v837_v26, %v841_v27 }
  0x71   :  { %714 = vmatpush1.bf16.msra.mxu1 %v6018_v48  ;;  %674 = vmatprep.subr.bf16.mxu0 %v6025_v49  ;;  %v6021_v48 = vcombine.high %v272_v42, %v276_v43  ;;  %v6023_v49 = vcombine.high %v273_v44, %v277_v45  ;;  %v289_v60 = vld [vmem:[#allocation9 + $0x198] sm:$0xff]  ;;  %v300_v8 = vld [vmem:[#allocation9 + $0x1f0] sm:$0xff]  ;;  %v849_v35 = vld [vmem:[#allocation12 + $0xa8] sm:$0xff] }
  0x72   :  { %715 = vmatprep.subr.bf16.mxu1 %v6027_v50  ;;  %v280_v50 = vld [vmem:[#allocation9 + $0x150] sm:$0xff]  ;;  %v293_v61 = vld [vmem:[#allocation9 + $0x1b8] sm:$0xff]  ;;  %8786 = vst [vmem:[#allocation44_spill] sm:$0xff] %v6702_v37  ;;  %v857_v42 = vld [vmem:[#allocation12 + $0xe8] sm:$0xff] }
  0x73   :  { %v6028_v62 = vcombine.low %v280_v50, %v284_v51  ;;  %v297_v9 = vld [vmem:[#allocation9 + $0x1d8] sm:$0xff]  ;;  %v933_v4 = vld [vmem:[#allocation12 + $0x348] sm:$0xff]  ;;  %v940_v2 = vld [vmem:[#allocation12 + $0x380] sm:$0xff] }
  0x74   :  { %675 = vmatpush1.bf16.msra.mxu0 %v6024_v55  ;;  %v6022_v55 = vcombine.low %v273_v44, %v277_v45  ;;  %v301_v10 = vld [vmem:[#allocation9 + $0x1f8] sm:$0xff]  ;;  %v6716_v44 = vcombine.low %v845_v34, %v849_v35  ;;  %v937_v3 = vld [vmem:[#allocation12 + $0x368] sm:$0xff]  ;;  %v944_v1 = vld [vmem:[#allocation12 + $0x3a0] sm:$0xff] }
  0x75   :  { %716 = vmatpush1.bf16.msra.mxu1 %v6026_v56  ;;  %676 = vmatprep.subr.bf16.mxu0 %v6033_v57  ;;  %v6029_v56 = vcombine.high %v280_v50, %v284_v51  ;;  %v6031_v57 = vcombine.high %v281_v52, %v285_v53  ;;  %v6046_v21 = vcombine.low %v297_v9, %v301_v10  ;;  %v865_v50 = vld [vmem:[#allocation12 + $0x128] sm:$0xff] }
  0x76   :  { %717 = vmatprep.subr.bf16.mxu1 %v6035_v58  ;;  %v288_v58 = vld [vmem:[#allocation9 + $0x190] sm:$0xff]  ;;  %8790 = vst [vmem:[#allocation48_spill] sm:$0xff] %v6716_v44 }
  0x77   :  { %v6036_v11 = vcombine.low %v288_v58, %v292_v59 }
  0x78   :  { %677 = vmatpush1.bf16.msra.mxu0 %v6032_v63  ;;  %v6030_v63 = vcombine.low %v281_v52, %v285_v53 }
  0x79   :  { %718 = vmatpush1.bf16.msra.mxu1 %v6034_v5  ;;  %678 = vmatprep.subr.bf16.mxu0 %v6041_v6  ;;  %v6037_v5 = vcombine.high %v288_v58, %v292_v59  ;;  %v6039_v6 = vcombine.high %v289_v60, %v293_v61  ;;  %v873_v58 = vld [vmem:[#allocation12 + $0x168] sm:$0xff] }
  0x7a   :  { %719 = vmatprep.subr.bf16.mxu1 %v6043_v7  ;;  %v296_v7 = vld [vmem:[#allocation9 + $0x1d0] sm:$0xff] }
  0x7b   :  { %v6045_v13 = vcombine.high %v296_v7, %v300_v8  ;;  %v6044_v20 = vcombine.low %v296_v7, %v300_v8  ;;  %v881_v7 = vld [vmem:[#allocation12 + $0x1a8] sm:$0xff] }
  0x7c   :  { %679 = vmatpush1.bf16.msra.mxu0 %v6040_v12  ;;  %v6038_v12 = vcombine.low %v289_v60, %v293_v61 }
  0x7d   :  { %720 = vmatpush1.bf16.msra.mxu1 %v6042_v14  ;;  %746 = vmatprep.subr.bf16.mxu0 %v5989_v15  ;;  %v6047_v14 = vcombine.high %v297_v9, %v301_v10  ;;  %v828_v15 = vld [vmem:[#allocation12] sm:$0xff] }
  0x7e   :  { %787 = vmatprep.subr.bf16.mxu1 %v5991_v16  ;;  %v832_v16 = vld [vmem:[#allocation12 + $0x20] sm:$0xff] }
  0x7f   :  { %697 = vmatmul.mubr.bf16.vlgmr.msra.gmra.mrb[0].mxu0 %v6675_v19  ;;  %v6685_v28 = vcombine.low %v828_v15, %v832_v16 }
  0x80   :  { %738 = vmatmul.mubr.bf16.vlgmr.msra.gmra.mrb[0].mxu1 %v6675_v19  ;;  %747 = vmatpush1.bf16.msra.mxu0 %v5988_v22  ;;  %v6681_v22 = vcombine.high %v828_v15, %v832_v16  ;;  %v889_v15 = vld [vmem:[#allocation12 + $0x1e8] sm:$0xff] }
  0x81   :  { %788 = vmatpush1.bf16.msra.mxu1 %v5990_v23  ;;  %748 = vmatprep.subr.bf16.mxu0 %v5997_v24  ;;  %v6683_v23 = vcombine.high %v829_v17, %v833_v18  ;;  %v836_v24 = vld [vmem:[#allocation12 + $0x40] sm:$0xff]  ;;  %8781 = vst [vmem:[#allocation39_spill] sm:$0xff] %v6685_v28 }
  0x82   :  { %789 = vmatprep.subr.bf16.mxu1 %v5999_v25  ;;  %778 = vmatprep.mubr.bf16.mxu0 %v8481_v0  ;;  %8779 = vst [vmem:[#allocation37_spill] sm:$0xff] %v6681_v22  ;;  %v840_v25 = vld [vmem:[#allocation12 + $0x60] sm:$0xff] }
  0x83   :  { %819 = vmatprep.mubr.bf16.mxu1 %v8481_v0  ;;  %8780 = vst [vmem:[#allocation38_spill] sm:$0xff] %v6683_v23  ;;  %v6698_v36 = vcombine.low %v836_v24, %v840_v25 }
  0x84   :  { %749 = vmatpush1.bf16.msra.mxu0 %v5996_v30  ;;  %v6690_v30 = vcombine.high %v836_v24, %v840_v25  ;;  %v896_v24 = vld [vmem:[#allocation12 + $0x220] sm:$0xff]  ;;  %v893_v25 = vld [vmem:[#allocation12 + $0x208] sm:$0xff] }
  0x85   :  { %790 = vmatpush1.bf16.msra.mxu1 %v5998_v31  ;;  %750 = vmatprep.subr.bf16.mxu0 %v6005_v32  ;;  %v6693_v31 = vcombine.high %v837_v26, %v841_v27  ;;  %v844_v32 = vld [vmem:[#allocation12 + $0x80] sm:$0xff]  ;;  %8785 = vst [vmem:[#allocation43_spill] sm:$0xff] %v6698_v36  ;;  %v897_v26 = vld [vmem:[#allocation12 + $0x228] sm:$0xff] }
  0x86   :  { %791 = vmatprep.subr.bf16.mxu1 %v6007_v33  ;;  %8783 = vst [vmem:[#allocation41_spill] sm:$0xff] %v6690_v30  ;;  %v848_v33 = vld [vmem:[#allocation12 + $0xa0] sm:$0xff] }
  0x87   :  { %8784 = vst [vmem:[#allocation42_spill] sm:$0xff] %v6693_v31  ;;  %v6712_v43 = vcombine.low %v844_v32, %v848_v33 }
  0x88   :  { %751 = vmatpush1.bf16.msra.mxu0 %v6004_v38  ;;  %v6704_v38 = vcombine.high %v844_v32, %v848_v33 }
  0x89   :  { %792 = vmatpush1.bf16.msra.mxu1 %v6006_v39  ;;  %752 = vmatprep.subr.bf16.mxu0 %v6013_v40  ;;  %v6707_v39 = vcombine.high %v845_v34, %v849_v35  ;;  %v852_v40 = vld [vmem:[#allocation12 + $0xc0] sm:$0xff]  ;;  %8789 = vst [vmem:[#allocation47_spill] sm:$0xff] %v6712_v43  ;;  %v6781_v34 = vcombine.high %v893_v25, %v897_v26 }
  0x8a   :  { %793 = vmatprep.subr.bf16.mxu1 %v6015_v41  ;;  %8787 = vst [vmem:[#allocation45_spill] sm:$0xff] %v6704_v38  ;;  %v856_v41 = vld [vmem:[#allocation12 + $0xe0] sm:$0xff] }
  0x8b   :  { %8788 = vst [vmem:[#allocation46_spill] sm:$0xff] %v6707_v39  ;;  %v6718_v45 = vcombine.high %v852_v40, %v856_v41  ;;  %v6724_v51 = vcombine.low %v852_v40, %v856_v41  ;;  %8812 = vst [vmem:[#allocation70_spill] sm:$0xff] %v6781_v34  ;;  %v900_v35 = vld [vmem:[#allocation12 + $0x240] sm:$0xff]  ;;  %v901_v41 = vld [vmem:[#allocation12 + $0x248] sm:$0xff] }
  0x8c   :  { %753 = vmatpush1.bf16.msra.mxu0 %v6012_v46  ;;  %v904_v40 = vld [vmem:[#allocation12 + $0x260] sm:$0xff] }
  0x8d   :  { %794 = vmatpush1.bf16.msra.mxu1 %v6014_v47  ;;  %754 = vmatprep.subr.bf16.mxu0 %v6021_v48  ;;  %8791 = vst [vmem:[#allocation49_spill] sm:$0xff] %v6718_v45  ;;  %v860_v47 = vld [vmem:[#allocation12 + $0x100] sm:$0xff]  ;;  %8793 = vst [vmem:[#allocation51_spill] sm:$0xff] %v6724_v51 }
  0x8e   :  { %795 = vmatprep.subr.bf16.mxu1 %v6023_v49  ;;  %v864_v48 = vld [vmem:[#allocation12 + $0x120] sm:$0xff]  ;;  %v861_v49 = vld [vmem:[#allocation12 + $0x108] sm:$0xff] }
  0x8f   :  { %v6730_v53 = vcombine.high %v860_v47, %v864_v48  ;;  %v6736_v59 = vcombine.low %v860_v47, %v864_v48  ;;  %v6740_v60 = vcombine.low %v861_v49, %v865_v50  ;;  %v6788_v47 = vcombine.low %v893_v25, %v897_v26  ;;  %v924_v26 = vld [vmem:[#allocation12 + $0x300] sm:$0xff] }
  0x90   :  { %755 = vmatpush1.bf16.msra.mxu0 %v6020_v54  ;;  %v6733_v54 = vcombine.high %v861_v49, %v865_v50  ;;  %v6790_v48 = vcombine.high %v900_v35, %v904_v40  ;;  %v908_v50 = vld [vmem:[#allocation12 + $0x280] sm:$0xff] }
  0x91   :  { %796 = vmatpush1.bf16.msra.mxu1 %v6022_v55  ;;  %756 = vmatprep.subr.bf16.mxu0 %v6029_v56  ;;  %8795 = vst [vmem:[#allocation53_spill] sm:$0xff] %v6730_v53  ;;  %v868_v55 = vld [vmem:[#allocation12 + $0x140] sm:$0xff]  ;;  %8797 = vst [vmem:[#allocation55_spill] sm:$0xff] %v6736_v59 }
  0x92   :  { %797 = vmatprep.subr.bf16.mxu1 %v6031_v57  ;;  %8796 = vst [vmem:[#allocation54_spill] sm:$0xff] %v6733_v54  ;;  %v872_v56 = vld [vmem:[#allocation12 + $0x160] sm:$0xff]  ;;  %v869_v57 = vld [vmem:[#allocation12 + $0x148] sm:$0xff]  ;;  %8798 = vst [vmem:[#allocation56_spill] sm:$0xff] %v6740_v60 }
  0x93   :  { %v6742_v61 = vcombine.high %v868_v55, %v872_v56  ;;  %v6748_v8 = vcombine.low %v868_v55, %v872_v56  ;;  %v6752_v9 = vcombine.low %v869_v57, %v873_v58  ;;  %8814 = vst [vmem:[#allocation72_spill] sm:$0xff] %v6788_v47  ;;  %8815 = vst [vmem:[#allocation73_spill] sm:$0xff] %v6790_v48  ;;  %v912_v55 = vld [vmem:[#allocation12 + $0x2a0] sm:$0xff]  ;;  %v909_v56 = vld [vmem:[#allocation12 + $0x288] sm:$0xff] }
  0x94   :  { %757 = vmatpush1.bf16.msra.mxu0 %v6028_v62  ;;  %v6745_v62 = vcombine.high %v869_v57, %v873_v58  ;;  %v913_v57 = vld [vmem:[#allocation12 + $0x2a8] sm:$0xff]  ;;  %v6796_v58 = vcombine.low %v900_v35, %v904_v40  ;;  %v928_v35 = vld [vmem:[#allocation12 + $0x320] sm:$0xff] }
  0x95   :  { %798 = vmatpush1.bf16.msra.mxu1 %v6030_v63  ;;  %758 = vmatprep.subr.bf16.mxu0 %v6037_v5  ;;  %8799 = vst [vmem:[#allocation57_spill] sm:$0xff] %v6742_v61  ;;  %v876_v63 = vld [vmem:[#allocation12 + $0x180] sm:$0xff]  ;;  %8801 = vst [vmem:[#allocation59_spill] sm:$0xff] %v6748_v8  ;;  %v925_v40 = vld [vmem:[#allocation12 + $0x308] sm:$0xff] }
  0x96   :  { %799 = vmatprep.subr.bf16.mxu1 %v6039_v6  ;;  %8800 = vst [vmem:[#allocation58_spill] sm:$0xff] %v6745_v62  ;;  %v880_v5 = vld [vmem:[#allocation12 + $0x1a0] sm:$0xff]  ;;  %v877_v6 = vld [vmem:[#allocation12 + $0x188] sm:$0xff]  ;;  %8802 = vst [vmem:[#allocation60_spill] sm:$0xff] %v6752_v9 }
  0x97   :  { %v6754_v10 = vcombine.high %v876_v63, %v880_v5  ;;  %v6760_v16 = vcombine.low %v876_v63, %v880_v5  ;;  %v6764_v17 = vcombine.low %v877_v6, %v881_v7  ;;  %8817 = vst [vmem:[#allocation75_spill] sm:$0xff] %v6796_v58  ;;  %v6802_v5 = vcombine.high %v908_v50, %v912_v55 }
  0x98   :  { %759 = vmatpush1.bf16.msra.mxu0 %v6036_v11  ;;  %v6757_v11 = vcombine.high %v877_v6, %v881_v7  ;;  %v6805_v6 = vcombine.high %v909_v56, %v913_v57  ;;  %v916_v7 = vld [vmem:[#allocation12 + $0x2c0] sm:$0xff] }
  0x99   :  { %800 = vmatpush1.bf16.msra.mxu1 %v6038_v12  ;;  %760 = vmatprep.subr.bf16.mxu0 %v6045_v13  ;;  %8803 = vst [vmem:[#allocation61_spill] sm:$0xff] %v6754_v10  ;;  %v884_v12 = vld [vmem:[#allocation12 + $0x1c0] sm:$0xff]  ;;  %8805 = vst [vmem:[#allocation63_spill] sm:$0xff] %v6760_v16 }
  0x9a   :  { %801 = vmatprep.subr.bf16.mxu1 %v6047_v14  ;;  %8804 = vst [vmem:[#allocation62_spill] sm:$0xff] %v6757_v11  ;;  %v888_v13 = vld [vmem:[#allocation12 + $0x1e0] sm:$0xff]  ;;  %v885_v14 = vld [vmem:[#allocation12 + $0x1c8] sm:$0xff]  ;;  %8806 = vst [vmem:[#allocation64_spill] sm:$0xff] %v6764_v17 }
  0x9b   :  { %v6766_v18 = vcombine.high %v884_v12, %v888_v13  ;;  %v6772_v27 = vcombine.low %v884_v12, %v888_v13  ;;  %v6776_v32 = vcombine.low %v885_v14, %v889_v15  ;;  %8819 = vst [vmem:[#allocation77_spill] sm:$0xff] %v6802_v5  ;;  %8820 = vst [vmem:[#allocation78_spill] sm:$0xff] %v6805_v6  ;;  %v920_v12 = vld [vmem:[#allocation12 + $0x2e0] sm:$0xff]  ;;  %v917_v13 = vld [vmem:[#allocation12 + $0x2c8] sm:$0xff] }
  0x9c   :  { %761 = vmatpush1.bf16.msra.mxu0 %v6044_v20  ;;  %v6769_v20 = vcombine.high %v885_v14, %v889_v15  ;;  %v921_v14 = vld [vmem:[#allocation12 + $0x2e8] sm:$0xff]  ;;  %v6808_v15 = vcombine.low %v908_v50, %v912_v55  ;;  %v6826_v55 = vcombine.high %v924_v26, %v928_v35 }
  0x9d   :  { %802 = vmatpush1.bf16.msra.mxu1 %v6046_v21  ;;  %1596 = vmatprep.subr.bf16.mxu0 %v6681_v22  ;;  %8807 = vst [vmem:[#allocation65_spill] sm:$0xff] %v6766_v18  ;;  %v892_v21 = vld [vmem:[#allocation12 + $0x200] sm:$0xff]  ;;  %8809 = vst [vmem:[#allocation67_spill] sm:$0xff] %v6772_v27  ;;  %v6817_v25 = vcombine.high %v917_v13, %v921_v14  ;;  %v6824_v50 = vcombine.low %v917_v13, %v921_v14 }
  0x9e   :  { %1637 = vmatprep.subr.bf16.mxu1 %v6683_v23  ;;  %8808 = vst [vmem:[#allocation66_spill] sm:$0xff] %v6769_v20  ;;  %8810 = vst [vmem:[#allocation68_spill] sm:$0xff] %v6776_v32  ;;  %v6778_v33 = vcombine.high %v892_v21, %v896_v24  ;;  %v6841_v14 = vcombine.high %v933_v4, %v937_v3 }
  0x9f   :  { %779 = vmatmul.mubr.bf16.vlgmr.msra.gmra.mrb[4].mxu0 %v6675_v19  ;;  %8821 = vst [vmem:[#allocation79_spill] sm:$0xff] %v6808_v15  ;;  %8824 = vst [vmem:[#allocation82_spill] sm:$0xff] %v6817_v25 }
  0xa0   :  { %820 = vmatmul.mubr.bf16.vlgmr.msra.gmra.mrb[4].mxu1 %v6675_v19  ;;  %1597 = vmatpush1.bf16.msra.mxu0 %v6685_v28  ;;  %v853_v19 = vld [vmem:[#allocation12 + $0xc8] sm:$0xff]  ;;  %8811 = vst [vmem:[#allocation69_spill] sm:$0xff] %v6778_v33  ;;  %8826 = vst [vmem:[#allocation84_spill] sm:$0xff] %v6824_v50 }
  0xa1   :  { %1638 = vmatpush1.bf16.msra.mxu1 %v6688_v29  ;;  %1598 = vmatprep.subr.bf16.mxu0 %v6690_v30  ;;  %v6721_v46 = vcombine.high %v853_v19, %v857_v42  ;;  %v6728_v52 = vcombine.low %v853_v19, %v857_v42  ;;  %v905_v19 = vld [vmem:[#allocation12 + $0x268] sm:$0xff]  ;;  %v6784_v42 = vcombine.low %v892_v21, %v896_v24 }
  0xa2   :  { %1639 = vmatprep.subr.bf16.mxu1 %v6693_v31  ;;  %1628 = vmatprep.mubr.bf16.mxu0 %v8481_v0  ;;  %v6793_v49 = vcombine.high %v901_v41, %v905_v19  ;;  %v6800_v63 = vcombine.low %v901_v41, %v905_v19  ;;  %v6812_v21 = vcombine.low %v909_v56, %v913_v57  ;;  %v929_v41 = vld [vmem:[#allocation12 + $0x328] sm:$0xff]  ;;  %v932_v57 = vld [vmem:[#allocation12 + $0x340] sm:$0xff] }
  0xa3   :  { %1669 = vmatprep.mubr.bf16.mxu1 %v8481_v0  ;;  %8792 = vst [vmem:[#allocation50_spill] sm:$0xff] %v6721_v46  ;;  %8794 = vst [vmem:[#allocation52_spill] sm:$0xff] %v6728_v52  ;;  %v6814_v24 = vcombine.high %v916_v7, %v920_v12  ;;  %v6820_v19 = vcombine.low %v916_v7, %v920_v12  ;;  %v6829_v56 = vcombine.high %v925_v40, %v929_v41  ;;  %v936_v0 = vld [vmem:[#allocation12 + $0x360] sm:$0xff] }
  0xa4   :  { %1599 = vmatpush1.bf16.msra.mxu0 %v6698_v36  ;;  %8813 = vst [vmem:[#allocation71_spill] sm:$0xff] %v6784_v42  ;;  %8816 = vst [vmem:[#allocation74_spill] sm:$0xff] %v6793_v49  ;;  %v6832_v7 = vcombine.low %v924_v26, %v928_v35  ;;  %v6836_v12 = vcombine.low %v925_v40, %v929_v41  ;;  %v6838_v13 = vcombine.high %v932_v57, %v936_v0 }
  0xa5   :  { %1640 = vmatpush1.bf16.msra.mxu1 %v6702_v37  ;;  %1600 = vmatprep.subr.bf16.mxu0 %v6704_v38  ;;  %8818 = vst [vmem:[#allocation76_spill] sm:$0xff] %v6800_v63  ;;  %8822 = vst [vmem:[#allocation80_spill] sm:$0xff] %v6812_v21  ;;  %v6844_v26 = vcombine.low %v932_v57, %v936_v0  ;;  %v6848_v35 = vcombine.low %v933_v4, %v937_v3 }
  0xa6   :  { %1641 = vmatprep.subr.bf16.mxu1 %v6707_v39  ;;  %8823 = vst [vmem:[#allocation81_spill] sm:$0xff] %v6814_v24  ;;  %8825 = vst [vmem:[#allocation83_spill] sm:$0xff] %v6820_v19  ;;  %v6850_v40 = vcombine.high %v940_v2, %v944_v1  ;;  %v6856_v0 = vcombine.low %v940_v2, %v944_v1 }
  0xa7   :  { %8827 = vst [vmem:[#allocation85_spill] sm:$0xff] %v6826_v55  ;;  %8828 = vst [vmem:[#allocation86_spill] sm:$0xff] %v6829_v56 }
  0xa8   :  { %1601 = vmatpush1.bf16.msra.mxu0 %v6712_v43  ;;  %8829 = vst [vmem:[#allocation87_spill] sm:$0xff] %v6832_v7  ;;  %8830 = vst [vmem:[#allocation88_spill] sm:$0xff] %v6836_v12 }
  0xa9   :  { %1642 = vmatpush1.bf16.msra.mxu1 %v6716_v44  ;;  %1602 = vmatprep.subr.bf16.mxu0 %v6718_v45  ;;  %8831 = vst [vmem:[#allocation89_spill] sm:$0xff] %v6838_v13  ;;  %8832 = vst [vmem:[#allocation90_spill] sm:$0xff] %v6841_v14 }
  0xaa   :  { %1643 = vmatprep.subr.bf16.mxu1 %v6721_v46  ;;  %8833 = vst [vmem:[#allocation91_spill] sm:$0xff] %v6844_v26  ;;  %8834 = vst [vmem:[#allocation92_spill] sm:$0xff] %v6848_v35 }
  0xab   :  { %8835 = vst [vmem:[#allocation93_spill] sm:$0xff] %v6850_v40  ;;  %8837 = vst [vmem:[#allocation95_spill] sm:$0xff] %v6856_v0 }
  0xac   :  { %1603 = vmatpush1.bf16.msra.mxu0 %v6724_v51 }
  0xad   :  { %1644 = vmatpush1.bf16.msra.mxu1 %v6728_v52  ;;  %1604 = vmatprep.subr.bf16.mxu0 %v6730_v53 }
  0xae   :  { %1645 = vmatprep.subr.bf16.mxu1 %v6733_v54 }
  0xb0   :  { %1605 = vmatpush1.bf16.msra.mxu0 %v6736_v59 }
  0xb1   :  { %1646 = vmatpush1.bf16.msra.mxu1 %v6740_v60  ;;  %1606 = vmatprep.subr.bf16.mxu0 %v6742_v61 }
  0xb2   :  { %1647 = vmatprep.subr.bf16.mxu1 %v6745_v62 }
  0xb4   :  { %1607 = vmatpush1.bf16.msra.mxu0 %v6748_v8 }
  0xb5   :  { %1648 = vmatpush1.bf16.msra.mxu1 %v6752_v9  ;;  %1608 = vmatprep.subr.bf16.mxu0 %v6754_v10 }
  0xb6   :  { %1649 = vmatprep.subr.bf16.mxu1 %v6757_v11 }
  0xb8   :  { %1609 = vmatpush1.bf16.msra.mxu0 %v6760_v16 }
  0xb9   :  { %1650 = vmatpush1.bf16.msra.mxu1 %v6764_v17  ;;  %1610 = vmatprep.subr.bf16.mxu0 %v6766_v18 }
  0xba   :  { %1651 = vmatprep.subr.bf16.mxu1 %v6769_v20 }
  0xbc   :  { %1611 = vmatpush1.bf16.msra.mxu0 %v6772_v27 }
  0xbd   :  { %1652 = vmatpush1.bf16.msra.mxu1 %v6776_v32  ;;  %1612 = vmatprep.subr.bf16.mxu0 %v6778_v33 }
  0xbe   :  { %1653 = vmatprep.subr.bf16.mxu1 %v6781_v34 }
  0xc0   :  { %1613 = vmatpush1.bf16.msra.mxu0 %v6784_v42 }
  0xc1   :  { %1654 = vmatpush1.bf16.msra.mxu1 %v6788_v47  ;;  %1614 = vmatprep.subr.bf16.mxu0 %v6790_v48 }
  0xc2   :  { %1655 = vmatprep.subr.bf16.mxu1 %v6793_v49 }
  0xc4   :  { %1615 = vmatpush1.bf16.msra.mxu0 %v6796_v58 }
  0xc5   :  { %1656 = vmatpush1.bf16.msra.mxu1 %v6800_v63  ;;  %1616 = vmatprep.subr.bf16.mxu0 %v6802_v5 }
  0xc6   :  { %1657 = vmatprep.subr.bf16.mxu1 %v6805_v6 }
  0xc8   :  { %1617 = vmatpush1.bf16.msra.mxu0 %v6808_v15 }
  0xc9   :  { %1658 = vmatpush1.bf16.msra.mxu1 %v6812_v21  ;;  %1618 = vmatprep.subr.bf16.mxu0 %v6814_v24  ;;  %v945_v24 = vld [vmem:[#allocation12 + $0x3a8] sm:$0xff]  ;;  %v867_v21 = vld [vmem:[#allocation12 + $0x138] sm:$0xff] }
  0xca   :  { %1659 = vmatprep.subr.bf16.mxu1 %v6817_v25  ;;  %v941_v25 = vld [vmem:[#allocation12 + $0x388] sm:$0xff] }
  0xcb   :  { %v6853_v41 = vcombine.high %v941_v25, %v945_v24  ;;  %v6860_v3 = vcombine.low %v941_v25, %v945_v24 }
  0xcc   :  { %1619 = vmatpush1.bf16.msra.mxu0 %v6820_v19  ;;  %v953_v19 = vld [vmem:[#allocation12 + $0x3e8] sm:$0xff] }
  0xcd   :  { %1660 = vmatpush1.bf16.msra.mxu1 %v6824_v50  ;;  %1620 = vmatprep.subr.bf16.mxu0 %v6826_v55  ;;  %8836 = vst [vmem:[#allocation94_spill] sm:$0xff] %v6853_v41  ;;  %v952_v55 = vld [vmem:[#allocation12 + $0x3e0] sm:$0xff]  ;;  %v949_v50 = vld [vmem:[#allocation12 + $0x3c8] sm:$0xff]  ;;  %8838 = vst [vmem:[#allocation96_spill] sm:$0xff] %v6860_v3 }
  0xce   :  { %1661 = vmatprep.subr.bf16.mxu1 %v6829_v56  ;;  %v948_v56 = vld [vmem:[#allocation12 + $0x3c0] sm:$0xff]  ;;  %v6865_v57 = vcombine.high %v949_v50, %v953_v19  ;;  %v6872_v2 = vcombine.low %v949_v50, %v953_v19 }
  0xcf   :  { %v6862_v4 = vcombine.high %v948_v56, %v952_v55  ;;  %v6868_v1 = vcombine.low %v948_v56, %v952_v55 }
  0xd0   :  { %1621 = vmatpush1.bf16.msra.mxu0 %v6832_v7  ;;  %8840 = vst [vmem:[#allocation98_spill] sm:$0xff] %v6865_v57  ;;  %v835_v7 = vld [vmem:[#allocation12 + $0x38] sm:$0xff]  ;;  %8842 = vst [vmem:[#allocation100_spill] sm:$0xff] %v6872_v2 }
  0xd1   :  { %1662 = vmatpush1.bf16.msra.mxu1 %v6836_v12  ;;  %1622 = vmatprep.subr.bf16.mxu0 %v6838_v13  ;;  %8839 = vst [vmem:[#allocation97_spill] sm:$0xff] %v6862_v4  ;;  %v834_v13 = vld [vmem:[#allocation12 + $0x30] sm:$0xff]  ;;  %v831_v12 = vld [vmem:[#allocation12 + $0x18] sm:$0xff]  ;;  %8841 = vst [vmem:[#allocation99_spill] sm:$0xff] %v6868_v1 }
  0xd2   :  { %1663 = vmatprep.subr.bf16.mxu1 %v6841_v14  ;;  %v830_v14 = vld [vmem:[#allocation12 + $0x10] sm:$0xff]  ;;  %v6877_v25 = vcombine.high %v831_v12, %v835_v7  ;;  %v6884_v19 = vcombine.low %v831_v12, %v835_v7 }
  0xd3   :  { %v6874_v24 = vcombine.high %v830_v14, %v834_v13  ;;  %v6880_v55 = vcombine.low %v830_v14, %v834_v13 }
  0xd4   :  { %1623 = vmatpush1.bf16.msra.mxu0 %v6844_v26  ;;  %8844 = vst [vmem:[#allocation102_spill] sm:$0xff] %v6877_v25  ;;  %v843_v26 = vld [vmem:[#allocation12 + $0x78] sm:$0xff]  ;;  %8846 = vst [vmem:[#allocation104_spill] sm:$0xff] %v6884_v19 }
  0xd5   :  { %1664 = vmatpush1.bf16.msra.mxu1 %v6848_v35  ;;  %1624 = vmatprep.subr.bf16.mxu0 %v6850_v40  ;;  %8843 = vst [vmem:[#allocation101_spill] sm:$0xff] %v6874_v24  ;;  %v842_v40 = vld [vmem:[#allocation12 + $0x70] sm:$0xff]  ;;  %v839_v35 = vld [vmem:[#allocation12 + $0x58] sm:$0xff]  ;;  %8845 = vst [vmem:[#allocation103_spill] sm:$0xff] %v6880_v55 }
  0xd6   :  { %1665 = vmatprep.subr.bf16.mxu1 %v6853_v41  ;;  %v838_v41 = vld [vmem:[#allocation12 + $0x50] sm:$0xff]  ;;  %v6889_v56 = vcombine.high %v839_v35, %v843_v26  ;;  %v6898_v7 = vcombine.low %v839_v35, %v843_v26 }
  0xd7   :  { %v6886_v50 = vcombine.high %v838_v41, %v842_v40  ;;  %v6894_v13 = vcombine.low %v838_v41, %v842_v40 }
  0xd8   :  { %1625 = vmatpush1.bf16.msra.mxu0 %v6856_v0  ;;  %8848 = vst [vmem:[#allocation106_spill] sm:$0xff] %v6889_v56  ;;  %v847_v0 = vld [vmem:[#allocation12 + $0x98] sm:$0xff]  ;;  %8851 = vst [vmem:[#allocation108_spill] sm:$0xff] %v6898_v7 }
  0xd9   :  { %1666 = vmatpush1.bf16.msra.mxu1 %v6860_v3  ;;  %1626 = vmatprep.subr.bf16.mxu0 %v6862_v4  ;;  %8847 = vst [vmem:[#allocation105_spill] sm:$0xff] %v6886_v50  ;;  %v850_v4 = vld [vmem:[#allocation12 + $0xb0] sm:$0xff]  ;;  %v8849_v3 = vmov 0   ;;  %8850 = vst [vmem:[#allocation107_spill] sm:$0xff] %v6894_v13 }
  0xda   :  { %1667 = vmatprep.subr.bf16.mxu1 %v6865_v57  ;;  %v846_v57 = vld [vmem:[#allocation12 + $0x90] sm:$0xff] }
  0xdb   :  { %v6900_v12 = vcombine.high %v846_v57, %v850_v4  ;;  %v6908_v40 = vcombine.low %v846_v57, %v850_v4 }
  0xdc   :  { %1627 = vmatpush1.bf16.msra.mxu0 %v6868_v1  ;;  %v851_v1 = vld [vmem:[#allocation12 + $0xb8] sm:$0xff] }
  0xdd   :  { %1668 = vmatpush1.bf16.msra.mxu1 %v6872_v2  ;;  %1678 = vmatprep.subr.bf16.mxu0 %v6874_v24  ;;  %8852 = vst [vmem:[#allocation109_spill] sm:$0xff] %v6900_v12  ;;  %v6903_v14 = vcombine.high %v847_v0, %v851_v1  ;;  %v858_v24 = vld [vmem:[#allocation12 + $0xf0] sm:$0xff]  ;;  %v855_v2 = vld [vmem:[#allocation12 + $0xd8] sm:$0xff]  ;;  %8854 = vst [vmem:[#allocation111_spill] sm:$0xff] %v6908_v40  ;;  %v6912_v26 = vcombine.low %v847_v0, %v851_v1 }
  0xde   :  { %1719 = vmatprep.subr.bf16.mxu1 %v6877_v25  ;;  %v854_v25 = vld [vmem:[#allocation12 + $0xd0] sm:$0xff] }
  0xdf   :  { %1629 = vmatmul.mubr.bf16.vlgmr.msra.gmra.mrb[8].mxu0 %v8849_v3  ;;  %8853 = vst [vmem:[#allocation110_spill] sm:$0xff] %v6903_v14  ;;  %8855 = vst [vmem:[#allocation112_spill] sm:$0xff] %v6912_v26  ;;  %v6914_v35 = vcombine.high %v854_v25, %v858_v24  ;;  %v6920_v4 = vcombine.low %v854_v25, %v858_v24 }
  0xe0   :  { %1670 = vmatmul.mubr.bf16.vlgmr.msra.gmra.mrb[8].mxu1 %v8849_v3  ;;  %1679 = vmatpush1.bf16.msra.mxu0 %v6880_v55  ;;  %v859_v55 = vld [vmem:[#allocation12 + $0xf8] sm:$0xff] }
  0xe1   :  { %1720 = vmatpush1.bf16.msra.mxu1 %v6884_v19  ;;  %1680 = vmatprep.subr.bf16.mxu0 %v6886_v50  ;;  %8856 = vst [vmem:[#allocation113_spill] sm:$0xff] %v6914_v35  ;;  %v6917_v41 = vcombine.high %v855_v2, %v859_v55  ;;  %v866_v50 = vld [vmem:[#allocation12 + $0x130] sm:$0xff]  ;;  %v863_v19 = vld [vmem:[#allocation12 + $0x118] sm:$0xff]  ;;  %8858 = vst [vmem:[#allocation115_spill] sm:$0xff] %v6920_v4  ;;  %v6924_v0 = vcombine.low %v855_v2, %v859_v55 }
  0xe2   :  { %1721 = vmatprep.subr.bf16.mxu1 %v6889_v56  ;;  %1710 = vmatprep.mubr.bf16.mxu0 %v8849_v3  ;;  %v862_v56 = vld [vmem:[#allocation12 + $0x110] sm:$0xff]  ;;  %v6929_v1 = vcombine.high %v863_v19, %v867_v21  ;;  %v6936_v2 = vcombine.low %v863_v19, %v867_v21 }
  0xe3   :  { %1751 = vmatprep.mubr.bf16.mxu1 %v8849_v3  ;;  %8857 = vst [vmem:[#allocation114_spill] sm:$0xff] %v6917_v41  ;;  %8859 = vst [vmem:[#allocation116_spill] sm:$0xff] %v6924_v0  ;;  %v6926_v57 = vcombine.high %v862_v56, %v866_v50  ;;  %v6932_v24 = vcombine.low %v862_v56, %v866_v50 }
  0xe4   :  { %1681 = vmatpush1.bf16.msra.mxu0 %v6894_v13  ;;  %8861 = vst [vmem:[#allocation118_spill] sm:$0xff] %v6929_v1  ;;  %v875_v13 = vld [vmem:[#allocation12 + $0x178] sm:$0xff]  ;;  %8863 = vst [vmem:[#allocation120_spill] sm:$0xff] %v6936_v2 }
  0xe5   :  { %1722 = vmatpush1.bf16.msra.mxu1 %v6898_v7  ;;  %1682 = vmatprep.subr.bf16.mxu0 %v6900_v12  ;;  %8860 = vst [vmem:[#allocation117_spill] sm:$0xff] %v6926_v57  ;;  %v874_v12 = vld [vmem:[#allocation12 + $0x170] sm:$0xff]  ;;  %v871_v7 = vld [vmem:[#allocation12 + $0x158] sm:$0xff]  ;;  %8862 = vst [vmem:[#allocation119_spill] sm:$0xff] %v6932_v24 }
  0xe6   :  { %1723 = vmatprep.subr.bf16.mxu1 %v6903_v14  ;;  %v870_v14 = vld [vmem:[#allocation12 + $0x150] sm:$0xff]  ;;  %v6941_v55 = vcombine.high %v871_v7, %v875_v13  ;;  %v6948_v21 = vcombine.low %v871_v7, %v875_v13 }
  0xe7   :  { %v6938_v25 = vcombine.high %v870_v14, %v874_v12  ;;  %v6944_v50 = vcombine.low %v870_v14, %v874_v12 }
  0xe8   :  { %1683 = vmatpush1.bf16.msra.mxu0 %v6908_v40  ;;  %8865 = vst [vmem:[#allocation122_spill] sm:$0xff] %v6941_v55  ;;  %v883_v40 = vld [vmem:[#allocation12 + $0x1b8] sm:$0xff]  ;;  %8867 = vst [vmem:[#allocation124_spill] sm:$0xff] %v6948_v21 }
  0xe9   :  { %1724 = vmatpush1.bf16.msra.mxu1 %v6912_v26  ;;  %1684 = vmatprep.subr.bf16.mxu0 %v6914_v35  ;;  %8864 = vst [vmem:[#allocation121_spill] sm:$0xff] %v6938_v25  ;;  %v882_v35 = vld [vmem:[#allocation12 + $0x1b0] sm:$0xff]  ;;  %v879_v26 = vld [vmem:[#allocation12 + $0x198] sm:$0xff]  ;;  %8866 = vst [vmem:[#allocation123_spill] sm:$0xff] %v6944_v50 }
  0xea   :  { %1725 = vmatprep.subr.bf16.mxu1 %v6917_v41  ;;  %v878_v41 = vld [vmem:[#allocation12 + $0x190] sm:$0xff]  ;;  %v6953_v56 = vcombine.high %v879_v26, %v883_v40  ;;  %v6960_v13 = vcombine.low %v879_v26, %v883_v40 }
  0xeb   :  { %v6950_v19 = vcombine.high %v878_v41, %v882_v35  ;;  %v6956_v12 = vcombine.low %v878_v41, %v882_v35 }
  0xec   :  { %1685 = vmatpush1.bf16.msra.mxu0 %v6920_v4  ;;  %8869 = vst [vmem:[#allocation126_spill] sm:$0xff] %v6953_v56  ;;  %v891_v4 = vld [vmem:[#allocation12 + $0x1f8] sm:$0xff]  ;;  %8871 = vst [vmem:[#allocation128_spill] sm:$0xff] %v6960_v13 }
  0xed   :  { %1726 = vmatpush1.bf16.msra.mxu1 %v6924_v0  ;;  %1686 = vmatprep.subr.bf16.mxu0 %v6926_v57  ;;  %8868 = vst [vmem:[#allocation125_spill] sm:$0xff] %v6950_v19  ;;  %v890_v57 = vld [vmem:[#allocation12 + $0x1f0] sm:$0xff]  ;;  %v887_v0 = vld [vmem:[#allocation12 + $0x1d8] sm:$0xff]  ;;  %8870 = vst [vmem:[#allocation127_spill] sm:$0xff] %v6956_v12 }
  0xee   :  { %1727 = vmatprep.subr.bf16.mxu1 %v6929_v1  ;;  %v886_v1 = vld [vmem:[#allocation12 + $0x1d0] sm:$0xff]  ;;  %v6965_v14 = vcombine.high %v887_v0, %v891_v4  ;;  %v6972_v40 = vcombine.low %v887_v0, %v891_v4 }
  0xef   :  { %v6962_v7 = vcombine.high %v886_v1, %v890_v57  ;;  %v6968_v35 = vcombine.low %v886_v1, %v890_v57 }
  0xf0   :  { %1687 = vmatpush1.bf16.msra.mxu0 %v6932_v24  ;;  %8873 = vst [vmem:[#allocation130_spill] sm:$0xff] %v6965_v14  ;;  %v899_v24 = vld [vmem:[#allocation12 + $0x238] sm:$0xff]  ;;  %8875 = vst [vmem:[#allocation132_spill] sm:$0xff] %v6972_v40 }
  0xf1   :  { %1728 = vmatpush1.bf16.msra.mxu1 %v6936_v2  ;;  %1688 = vmatprep.subr.bf16.mxu0 %v6938_v25  ;;  %8872 = vst [vmem:[#allocation129_spill] sm:$0xff] %v6962_v7  ;;  %v898_v25 = vld [vmem:[#allocation12 + $0x230] sm:$0xff]  ;;  %v895_v2 = vld [vmem:[#allocation12 + $0x218] sm:$0xff]  ;;  %8874 = vst [vmem:[#allocation131_spill] sm:$0xff] %v6968_v35 }
  0xf2   :  { %1729 = vmatprep.subr.bf16.mxu1 %v6941_v55  ;;  %v894_v55 = vld [vmem:[#allocation12 + $0x210] sm:$0xff]  ;;  %v6977_v41 = vcombine.high %v895_v2, %v899_v24  ;;  %v6984_v4 = vcombine.low %v895_v2, %v899_v24 }
  0xf3   :  { %v6974_v26 = vcombine.high %v894_v55, %v898_v25  ;;  %v6980_v57 = vcombine.low %v894_v55, %v898_v25 }
  0xf4   :  { %1689 = vmatpush1.bf16.msra.mxu0 %v6944_v50  ;;  %8877 = vst [vmem:[#allocation134_spill] sm:$0xff] %v6977_v41  ;;  %v907_v50 = vld [vmem:[#allocation12 + $0x278] sm:$0xff]  ;;  %8879 = vst [vmem:[#allocation136_spill] sm:$0xff] %v6984_v4 }
  0xf5   :  { %1730 = vmatpush1.bf16.msra.mxu1 %v6948_v21  ;;  %1690 = vmatprep.subr.bf16.mxu0 %v6950_v19  ;;  %8876 = vst [vmem:[#allocation133_spill] sm:$0xff] %v6974_v26  ;;  %v906_v19 = vld [vmem:[#allocation12 + $0x270] sm:$0xff]  ;;  %v903_v21 = vld [vmem:[#allocation12 + $0x258] sm:$0xff]  ;;  %8878 = vst [vmem:[#allocation135_spill] sm:$0xff] %v6980_v57 }
  0xf6   :  { %1731 = vmatprep.subr.bf16.mxu1 %v6953_v56  ;;  %v902_v56 = vld [vmem:[#allocation12 + $0x250] sm:$0xff]  ;;  %v6989_v1 = vcombine.high %v903_v21, %v907_v50  ;;  %v6996_v24 = vcombine.low %v903_v21, %v907_v50 }
  0xf7   :  { %v6986_v0 = vcombine.high %v902_v56, %v906_v19  ;;  %v6992_v25 = vcombine.low %v902_v56, %v906_v19 }
  0xf8   :  { %1691 = vmatpush1.bf16.msra.mxu0 %v6956_v12  ;;  %8881 = vst [vmem:[#allocation138_spill] sm:$0xff] %v6989_v1  ;;  %v915_v12 = vld [vmem:[#allocation12 + $0x2b8] sm:$0xff]  ;;  %8883 = vst [vmem:[#allocation140_spill] sm:$0xff] %v6996_v24 }
  0xf9   :  { %1732 = vmatpush1.bf16.msra.mxu1 %v6960_v13  ;;  %1692 = vmatprep.subr.bf16.mxu0 %v6962_v7  ;;  %8880 = vst [vmem:[#allocation137_spill] sm:$0xff] %v6986_v0  ;;  %v914_v7 = vld [vmem:[#allocation12 + $0x2b0] sm:$0xff]  ;;  %v911_v13 = vld [vmem:[#allocation12 + $0x298] sm:$0xff]  ;;  %8882 = vst [vmem:[#allocation139_spill] sm:$0xff] %v6992_v25 }
  0xfa   :  { %1733 = vmatprep.subr.bf16.mxu1 %v6965_v14  ;;  %v910_v14 = vld [vmem:[#allocation12 + $0x290] sm:$0xff]  ;;  %v7001_v55 = vcombine.high %v911_v13, %v915_v12  ;;  %v7008_v50 = vcombine.low %v911_v13, %v915_v12 }
  0xfb   :  { %v6998_v2 = vcombine.high %v910_v14, %v914_v7  ;;  %v7004_v19 = vcombine.low %v910_v14, %v914_v7 }
  0xfc   :  { %1693 = vmatpush1.bf16.msra.mxu0 %v6968_v35  ;;  %8885 = vst [vmem:[#allocation142_spill] sm:$0xff] %v7001_v55  ;;  %v923_v35 = vld [vmem:[#allocation12 + $0x2f8] sm:$0xff]  ;;  %8887 = vst [vmem:[#allocation144_spill] sm:$0xff] %v7008_v50 }
  0xfd   :  { %1734 = vmatpush1.bf16.msra.mxu1 %v6972_v40  ;;  %1694 = vmatprep.subr.bf16.mxu0 %v6974_v26  ;;  %8884 = vst [vmem:[#allocation141_spill] sm:$0xff] %v6998_v2  ;;  %v922_v26 = vld [vmem:[#allocation12 + $0x2f0] sm:$0xff]  ;;  %v919_v40 = vld [vmem:[#allocation12 + $0x2d8] sm:$0xff]  ;;  %8886 = vst [vmem:[#allocation143_spill] sm:$0xff] %v7004_v19 }
  0xfe   :  { %1735 = vmatprep.subr.bf16.mxu1 %v6977_v41  ;;  %v918_v41 = vld [vmem:[#allocation12 + $0x2d0] sm:$0xff]  ;;  %v7013_v56 = vcombine.high %v919_v40, %v923_v35  ;;  %v7020_v12 = vcombine.low %v919_v40, %v923_v35 }
  0xff   :  { %v7010_v21 = vcombine.high %v918_v41, %v922_v26  ;;  %v7016_v7 = vcombine.low %v918_v41, %v922_v26 }
 0x100   :  { %1695 = vmatpush1.bf16.msra.mxu0 %v6980_v57  ;;  %8889 = vst [vmem:[#allocation146_spill] sm:$0xff] %v7013_v56  ;;  %v931_v57 = vld [vmem:[#allocation12 + $0x338] sm:$0xff]  ;;  %8891 = vst [vmem:[#allocation148_spill] sm:$0xff] %v7020_v12 }
 0x101   :  { %1736 = vmatpush1.bf16.msra.mxu1 %v6984_v4  ;;  %1696 = vmatprep.subr.bf16.mxu0 %v6986_v0  ;;  %8888 = vst [vmem:[#allocation145_spill] sm:$0xff] %v7010_v21  ;;  %v930_v0 = vld [vmem:[#allocation12 + $0x330] sm:$0xff]  ;;  %v927_v4 = vld [vmem:[#allocation12 + $0x318] sm:$0xff]  ;;  %8890 = vst [vmem:[#allocation147_spill] sm:$0xff] %v7016_v7 }
 0x102   :  { %1737 = vmatprep.subr.bf16.mxu1 %v6989_v1  ;;  %v926_v1 = vld [vmem:[#allocation12 + $0x310] sm:$0xff]  ;;  %v7025_v14 = vcombine.high %v927_v4, %v931_v57  ;;  %v7032_v35 = vcombine.low %v927_v4, %v931_v57 }
 0x103   :  { %v7022_v13 = vcombine.high %v926_v1, %v930_v0  ;;  %v7028_v26 = vcombine.low %v926_v1, %v930_v0 }
 0x104   :  { %1697 = vmatpush1.bf16.msra.mxu0 %v6992_v25  ;;  %8893 = vst [vmem:[#allocation150_spill] sm:$0xff] %v7025_v14  ;;  %v939_v25 = vld [vmem:[#allocation12 + $0x378] sm:$0xff]  ;;  %8895 = vst [vmem:[#allocation152_spill] sm:$0xff] %v7032_v35 }
 0x105   :  { %1738 = vmatpush1.bf16.msra.mxu1 %v6996_v24  ;;  %1698 = vmatprep.subr.bf16.mxu0 %v6998_v2  ;;  %8892 = vst [vmem:[#allocation149_spill] sm:$0xff] %v7022_v13  ;;  %v938_v2 = vld [vmem:[#allocation12 + $0x370] sm:$0xff]  ;;  %v935_v24 = vld [vmem:[#allocation12 + $0x358] sm:$0xff]  ;;  %8894 = vst [vmem:[#allocation151_spill] sm:$0xff] %v7028_v26 }
 0x106   :  { %1739 = vmatprep.subr.bf16.mxu1 %v7001_v55  ;;  %v934_v55 = vld [vmem:[#allocation12 + $0x350] sm:$0xff]  ;;  %v7037_v41 = vcombine.high %v935_v24, %v939_v25  ;;  %v7044_v57 = vcombine.low %v935_v24, %v939_v25 }
 0x107   :  { %v7034_v40 = vcombine.high %v934_v55, %v938_v2  ;;  %v7040_v0 = vcombine.low %v934_v55, %v938_v2 }
 0x108   :  { %1699 = vmatpush1.bf16.msra.mxu0 %v7004_v19  ;;  %8897 = vst [vmem:[#allocation154_spill] sm:$0xff] %v7037_v41  ;;  %v947_v19 = vld [vmem:[#allocation12 + $0x3b8] sm:$0xff]  ;;  %8899 = vst [vmem:[#allocation156_spill] sm:$0xff] %v7044_v57 }
 0x109   :  { %1740 = vmatpush1.bf16.msra.mxu1 %v7008_v50  ;;  %1700 = vmatprep.subr.bf16.mxu0 %v7010_v21  ;;  %8896 = vst [vmem:[#allocation153_spill] sm:$0xff] %v7034_v40  ;;  %v946_v21 = vld [vmem:[#allocation12 + $0x3b0] sm:$0xff]  ;;  %v943_v50 = vld [vmem:[#allocation12 + $0x398] sm:$0xff]  ;;  %8898 = vst [vmem:[#allocation155_spill] sm:$0xff] %v7040_v0 }
 0x10a   :  { %1741 = vmatprep.subr.bf16.mxu1 %v7013_v56  ;;  %v942_v56 = vld [vmem:[#allocation12 + $0x390] sm:$0xff]  ;;  %v7049_v1 = vcombine.high %v943_v50, %v947_v19  ;;  %v7056_v25 = vcombine.low %v943_v50, %v947_v19  ;;  %v8908_v19 = vld [vmem:[#allocation80_spill] sm:$0xff]  ;;  %v8909_v50 = vld [vmem:[#allocation81_spill] sm:$0xff] }
 0x10b   :  { %v7046_v4 = vcombine.high %v942_v56, %v946_v21  ;;  %v7052_v2 = vcombine.low %v942_v56, %v946_v21  ;;  %v8910_v56 = vld [vmem:[#allocation82_spill] sm:$0xff] }
 0x10c   :  { %1701 = vmatpush1.bf16.msra.mxu0 %v7016_v7  ;;  %8901 = vst [vmem:[#allocation158_spill] sm:$0xff] %v7049_v1  ;;  %v955_v7 = vld [vmem:[#allocation12 + $0x3f8] sm:$0xff]  ;;  %8903 = vst [vmem:[#allocation160_spill] sm:$0xff] %v7056_v25 }
 0x10d   :  { %1742 = vmatpush1.bf16.msra.mxu1 %v7020_v12  ;;  %1702 = vmatprep.subr.bf16.mxu0 %v7022_v13  ;;  %8900 = vst [vmem:[#allocation157_spill] sm:$0xff] %v7046_v4  ;;  %v954_v13 = vld [vmem:[#allocation12 + $0x3f0] sm:$0xff]  ;;  %v951_v12 = vld [vmem:[#allocation12 + $0x3d8] sm:$0xff]  ;;  %8902 = vst [vmem:[#allocation159_spill] sm:$0xff] %v7052_v2 }
 0x10e   :  { %1743 = vmatprep.subr.bf16.mxu1 %v7025_v14  ;;  %v950_v14 = vld [vmem:[#allocation12 + $0x3d0] sm:$0xff]  ;;  %v7061_v55 = vcombine.high %v951_v12, %v955_v7  ;;  %v7068_v21 = vcombine.low %v951_v12, %v955_v7  ;;  %v8912_v12 = vld [vmem:[#allocation84_spill] sm:$0xff] }
 0x10f   :  { %v7058_v24 = vcombine.high %v950_v14, %v954_v13  ;;  %v8911_v7 = vld [vmem:[#allocation83_spill] sm:$0xff] }
 0x110   :  { %1703 = vmatpush1.bf16.msra.mxu0 %v7028_v26  ;;  %8905 = vst [vmem:[#allocation162_spill] sm:$0xff] %v7061_v55  ;;  %8907 = vst [vmem:[#allocation164_spill] sm:$0xff] %v7068_v21 }
 0x111   :  { %1744 = vmatpush1.bf16.msra.mxu1 %v7032_v35  ;;  %1704 = vmatprep.subr.bf16.mxu0 %v7034_v40  ;;  %8904 = vst [vmem:[#allocation161_spill] sm:$0xff] %v7058_v24 }
 0x112   :  { %1745 = vmatprep.subr.bf16.mxu1 %v7037_v41  ;;  %v7064_v41 = vcombine.low %v950_v14, %v954_v13  ;;  %v8913_v13 = vld [vmem:[#allocation85_spill] sm:$0xff]  ;;  %v8914_v14 = vld [vmem:[#allocation86_spill] sm:$0xff] }
 0x114   :  { %1705 = vmatpush1.bf16.msra.mxu0 %v7040_v0  ;;  %8906 = vst [vmem:[#allocation163_spill] sm:$0xff] %v7064_v41 }
 0x115   :  { %1746 = vmatpush1.bf16.msra.mxu1 %v7044_v57  ;;  %1706 = vmatprep.subr.bf16.mxu0 %v7046_v4 }
 0x116   :  { %1747 = vmatprep.subr.bf16.mxu1 %v7049_v1 }
 0x118   :  { %1707 = vmatpush1.bf16.msra.mxu0 %v7052_v2 }
 0x119   :  { %1748 = vmatpush1.bf16.msra.mxu1 %v7056_v25  ;;  %1708 = vmatprep.subr.bf16.mxu0 %v7058_v24 }
 0x11a   :  { %1749 = vmatprep.subr.bf16.mxu1 %v7061_v55 }
 0x11c   :  { %1709 = vmatpush1.bf16.msra.mxu0 %v7064_v41 }
 0x11d   :  { %1750 = vmatpush1.bf16.msra.mxu1 %v7068_v21  ;;  %1808 = vmatprep.subr.bf16.mxu0 %v6681_v22 }
 0x11e   :  { %1849 = vmatprep.subr.bf16.mxu1 %v6683_v23 }
 0x11f   :  { %1711 = vmatmul.mubr.bf16.vlgmr.msra.gmra.mrb[12].mxu0 %v8849_v3 }
 0x120   :  { %1752 = vmatmul.mubr.bf16.vlgmr.msra.gmra.mrb[12].mxu1 %v8849_v3  ;;  %1809 = vmatpush1.bf16.msra.mxu0 %v6685_v28  ;;  %v8915_v3 = vld [vmem:[#allocation87_spill] sm:$0xff] }
 0x121   :  { %1850 = vmatpush1.bf16.msra.mxu1 %v6688_v29  ;;  %1810 = vmatprep.subr.bf16.mxu0 %v6690_v30 }
 0x122   :  { %1851 = vmatprep.subr.bf16.mxu1 %v6693_v31 }
 0x124   :  { %1811 = vmatpush1.bf16.msra.mxu0 %v6698_v36 }
 0x125   :  { %1852 = vmatpush1.bf16.msra.mxu1 %v6702_v37  ;;  %1812 = vmatprep.subr.bf16.mxu0 %v6704_v38 }
 0x126   :  { %1853 = vmatprep.subr.bf16.mxu1 %v6707_v39 }
 0x128   :  { %1813 = vmatpush1.bf16.msra.mxu0 %v6712_v43 }
 0x129   :  { %1854 = vmatpush1.bf16.msra.mxu1 %v6716_v44  ;;  %1814 = vmatprep.subr.bf16.mxu0 %v6718_v45 }
 0x12a   :  { %1855 = vmatprep.subr.bf16.mxu1 %v6721_v46 }
 0x12c   :  { %1815 = vmatpush1.bf16.msra.mxu0 %v6724_v51 }
 0x12d   :  { %1856 = vmatpush1.bf16.msra.mxu1 %v6728_v52  ;;  %1816 = vmatprep.subr.bf16.mxu0 %v6730_v53 }
 0x12e   :  { %1857 = vmatprep.subr.bf16.mxu1 %v6733_v54 }
 0x130   :  { %1817 = vmatpush1.bf16.msra.mxu0 %v6736_v59 }
 0x131   :  { %1858 = vmatpush1.bf16.msra.mxu1 %v6740_v60  ;;  %1818 = vmatprep.subr.bf16.mxu0 %v6742_v61 }
 0x132   :  { %1859 = vmatprep.subr.bf16.mxu1 %v6745_v62 }
 0x134   :  { %1819 = vmatpush1.bf16.msra.mxu0 %v6748_v8 }
 0x135   :  { %1860 = vmatpush1.bf16.msra.mxu1 %v6752_v9  ;;  %1820 = vmatprep.subr.bf16.mxu0 %v6754_v10 }
 0x136   :  { %1861 = vmatprep.subr.bf16.mxu1 %v6757_v11 }
 0x138   :  { %1821 = vmatpush1.bf16.msra.mxu0 %v6760_v16 }
 0x139   :  { %1862 = vmatpush1.bf16.msra.mxu1 %v6764_v17  ;;  %1822 = vmatprep.subr.bf16.mxu0 %v6766_v18  ;;  %v304_v18 = vlaneseq }
 0x13a   :  { %1863 = vmatprep.subr.bf16.mxu1 %v6769_v20 }
 0x13c   :  { %1823 = vmatpush1.bf16.msra.mxu0 %v6772_v27 }
 0x13d   :  { %1864 = vmatpush1.bf16.msra.mxu1 %v6776_v32  ;;  %1824 = vmatprep.subr.bf16.mxu0 %v6778_v33 }
 0x13e   :  { %1865 = vmatprep.subr.bf16.mxu1 %v6781_v34 }
 0x140   :  { %1825 = vmatpush1.bf16.msra.mxu0 %v6784_v42 }
 0x141   :  { %1866 = vmatpush1.bf16.msra.mxu1 %v6788_v47  ;;  %1826 = vmatprep.subr.bf16.mxu0 %v6790_v48  ;;  %v8922_v48 = vld [vmem:[#allocation94_spill] sm:$0xff] }
 0x142   :  { %1867 = vmatprep.subr.bf16.mxu1 %v6793_v49  ;;  %v8926_v47 = vld [vmem:[#allocation98_spill] sm:$0xff] }
 0x144   :  { %1827 = vmatpush1.bf16.msra.mxu0 %v6796_v58 }
 0x145   :  { %1868 = vmatpush1.bf16.msra.mxu1 %v6800_v63  ;;  %1828 = vmatprep.subr.bf16.mxu0 %v6802_v5  ;;  %v8916_v5 = vld [vmem:[#allocation88_spill] sm:$0xff] }
 0x146   :  { %1869 = vmatprep.subr.bf16.mxu1 %v6805_v6  ;;  %v8917_v6 = vld [vmem:[#allocation89_spill] sm:$0xff] }
 0x148   :  { %1829 = vmatpush1.bf16.msra.mxu0 %v6808_v15 }
 0x149   :  { %1870 = vmatpush1.bf16.msra.mxu1 %v8908_v19  ;;  %1830 = vmatprep.subr.bf16.mxu0 %v8909_v50  ;;  %v8918_v19 = vld [vmem:[#allocation90_spill] sm:$0xff] }
 0x14a   :  { %1871 = vmatprep.subr.bf16.mxu1 %v8910_v56 }
 0x14c   :  { %1831 = vmatpush1.bf16.msra.mxu0 %v8911_v7  ;;  %v8919_v7 = vld [vmem:[#allocation91_spill] sm:$0xff] }
 0x14d   :  { %1872 = vmatpush1.bf16.msra.mxu1 %v8912_v12  ;;  %1832 = vmatprep.subr.bf16.mxu0 %v8913_v13  ;;  %v8920_v13 = vld [vmem:[#allocation92_spill] sm:$0xff] }
 0x14e   :  { %1873 = vmatprep.subr.bf16.mxu1 %v8914_v14  ;;  %v8921_v14 = vld [vmem:[#allocation93_spill] sm:$0xff] }
 0x150   :  { %1833 = vmatpush1.bf16.msra.mxu0 %v8915_v3 }
 0x151   :  { %1874 = vmatpush1.bf16.msra.mxu1 %v8916_v5  ;;  %1834 = vmatprep.subr.bf16.mxu0 %v8917_v6  ;;  %v8923_v5 = vld [vmem:[#allocation95_spill] sm:$0xff]  ;;  %v8924_v6 = vld [vmem:[#allocation96_spill] sm:$0xff] }
 0x152   :  { %v698_v15 = vpop.f32.mrb[0].mxu0  ;;  %1875 = vmatprep.subr.bf16.mxu1 %v8918_v19  ;;  %v8925_v19 = vld [vmem:[#allocation97_spill] sm:$0xff] }
 0x153   :  { %v700_v50 = vpop.f32.mrb[1].mxu0  ;;  %v739_v63 = vpop.f32.mrb[0].mxu1 }
 0x154   :  { %v702_v56 = vpop.f32.mrb[2].mxu0  ;;  %v741_v58 = vpop.f32.mrb[1].mxu1  ;;  %1835 = vmatpush1.bf16.msra.mxu0 %v8919_v7  ;;  %v8928_v7 = vld [vmem:[#allocation100_spill] sm:$0xff] }
 0x155   :  { %v703_v12 = vpop.f32.mrb[3].mxu0  ;;  %v743_v49 = vpop.f32.mrb[2].mxu1  ;;  %1876 = vmatpush1.bf16.msra.mxu1 %v8920_v13  ;;  %1836 = vmatprep.subr.bf16.mxu0 %v8921_v14  ;;  %v8927_v56 = vld [vmem:[#allocation99_spill] sm:$0xff] }
 0x156   :  { %v744_v3 = vpop.f32.mrb[3].mxu1  ;;  %1877 = vmatprep.subr.bf16.mxu1 %v8922_v48  ;;  %v8929_v49 = vld [vmem:[#allocation101_spill] sm:$0xff]  ;;  %v8930_v12 = vld [vmem:[#allocation102_spill] sm:$0xff] }
 0x158   :  { %1837 = vmatpush1.bf16.msra.mxu0 %v8923_v5 }
 0x159   :  { %1878 = vmatpush1.bf16.msra.mxu1 %v8924_v6  ;;  %1838 = vmatprep.subr.bf16.mxu0 %v8925_v19 }
 0x15a   :  { %1879 = vmatprep.subr.bf16.mxu1 %v8926_v47 }
 0x15c   :  { %1839 = vmatpush1.bf16.msra.mxu0 %v8927_v56 }
 0x15d   :  { %1880 = vmatpush1.bf16.msra.mxu1 %v8928_v7  ;;  %1890 = vmatprep.subr.bf16.mxu0 %v8929_v49  ;;  %v305_v49 = vshrl.u32 %v304_v18, 7 }
 0x15e   :  { %1931 = vmatprep.subr.bf16.mxu1 %v8930_v12 }
 0x15f   :  { %v7141_v17 = vsub.s32 2, %v305_v49  ;;  %v7143_v12 = vsub.s32 3, %v305_v49  ;;  %v7145_v16 = vsub.s32 0, %v305_v49  ;;  %v7168_v62 = vsub.s32 4, %v305_v49 }
 0x161   :  { %8931 = vst [vmem:[#allocation165_spill] sm:$0xff] %v7141_v17  ;;  %8932 = vst [vmem:[#allocation166_spill] sm:$0xff] %v7143_v12 }
 0x162   :  { %8933 = vst [vmem:[#allocation167_spill] sm:$0xff] %v7145_v16  ;;  %8935 = vst [vmem:[#allocation169_spill] sm:$0xff] %v7168_v62 }
 0x172   :  { %v780_v14 = vpop.f32.mrb[4].mxu0 }
 0x173   :  { %v782_v3 = vpop.f32.mrb[5].mxu0  ;;  %v821_v13 = vpop.f32.mrb[4].mxu1 }
 0x174   :  { %v784_v48 = vpop.f32.mrb[6].mxu0  ;;  %v823_v42 = vpop.f32.mrb[5].mxu1 }
 0x175   :  { %v785_v5 = vpop.f32.mrb[7].mxu0  ;;  %v825_v34 = vpop.f32.mrb[6].mxu1  ;;  %v7150_v48 = vsub.s32 1, %v305_v49 }
 0x176   :  { %v826_v6 = vpop.f32.mrb[7].mxu1  ;;  %v302_v34 = vld [vmem:[%s8474_s6] ss:$4 sm:$0xff] }
 0x177   :  { %8934 = vst [vmem:[#allocation168_spill] sm:$0xff] %v7150_v48  ;;  %v315_v5 = vrot.slane %v302_v34, %v7141_v17  ;;  %v311_v18 = vrot.slane %v302_v34, %v7150_v48 }
 0x179   :  { %v7156_v6 = vadd.f32 %v739_v63, %v315_v5  ;;  %v7163_v10 = vadd.f32 %v700_v50, %v311_v18  ;;  %v7170_v5 = vsub.s32 5, %v305_v49 }
 0x17b   :  { %8936 = vst [vmem:[#allocation170_spill] sm:$0xff] %v7170_v5 }
 0x1b2   :  { %v1630_v33 = vpop.f32.mrb[8].mxu0 }
 0x1b3   :  { %v1671_v19 = vpop.f32.mrb[8].mxu1  ;;  %v1632_v32 = vpop.f32.mrb[9].mxu0 }
 0x1b4   :  { %v1673_v47 = vpop.f32.mrb[9].mxu1  ;;  %v1634_v27 = vpop.f32.mrb[10].mxu0  ;;  %v1762_v11 = vadd.f32 %v1671_v19, %v7156_v6 }
 0x1b5   :  { %v1635_v56 = vpop.f32.mrb[11].mxu0  ;;  %v1675_v20 = vpop.f32.mrb[10].mxu1  ;;  %v319_v27 = vrot.slane %v302_v34, %v7143_v12  ;;  %v1761_v12 = vadd.f32 %v1632_v32, %v7163_v10 }
 0x1b6   :  { %v1676_v7 = vpop.f32.mrb[11].mxu1  ;;  %v307_v20 = vrot.slane %v302_v34, %v7145_v16  ;;  %v1776_v8 = vmul.f32 0.5, %v1762_v11 }
 0x1b7   :  { %v7158_v7 = vadd.f32 %v741_v58, %v319_v27  ;;  %v7172_v58 = vsub.s32 6, %v305_v49  ;;  %v7174_v27 = vsub.s32 7, %v305_v49 }
 0x1b8   :  { %v7160_v56 = vadd.f32 %v698_v15, %v307_v20  ;;  %v1769_v15 = vmul.f32 0.5, %v1761_v12  ;;  %6213 = vtanh.f32 %v1776_v8 }
 0x1b9   :  { %v1763_v9 = vadd.f32 %v1673_v47, %v7158_v7  ;;  %8937 = vst [vmem:[#allocation171_spill] sm:$0xff] %v7172_v58  ;;  %8938 = vst [vmem:[#allocation172_spill] sm:$0xff] %v7174_v27  ;;  %v323_v47 = vrot.slane %v302_v34, %v7168_v62  ;;  %v331_v11 = vrot.slane %v302_v34, %v7172_v58 }
 0x1ba   :  { %v1760_v17 = vadd.f32 %v1630_v33, %v7160_v56  ;;  %v327_v33 = vrot.slane %v302_v34, %v7170_v5 }
 0x1bb   :  { %v1777_v16 = vmul.f32 0.5, %v1763_v9  ;;  %v335_v9 = vrot.slane %v302_v34, %v7174_v27  ;;  %v7184_v19 = vadd.f32 %v821_v13, %v331_v11 }
 0x1bc   :  { %v1768_v63 = vmul.f32 0.5, %v1760_v17  ;;  %v7180_v17 = vadd.f32 %v780_v14, %v323_v47  ;;  %v7182_v32 = vadd.f32 %v782_v3, %v327_v33 }
 0x1bd   :  { %6215 = vtanh.f32 %v1777_v16  ;;  %8939 = vst [vmem:[#allocation173_spill] sm:$0xff] %v7184_v19  ;;  %v7186_v49 = vadd.f32 %v823_v42, %v335_v9 }
 0x1be   :  { %6217 = vtanh.f32 %v1768_v63 }
 0x1bf   :  { %6219 = vtanh.f32 %v1769_v15  ;;  %8940 = vst [vmem:[#allocation174_spill] sm:$0xff] %v7186_v49 }
 0x1c2   :  { %v6214_v34 = vpop.eup %6213 }
 0x1c3   :  { %v1780_v9 = vmul.f32 0.5, %v6214_v34 }
 0x1c7   :  { %v6216_v47 = vpop.eup %6215 }
 0x1c8   :  { %v6218_v33 = vpop.eup %6217  ;;  %v1781_v27 = vmul.f32 0.5, %v6216_v47 }
 0x1c9   :  { %v6220_v11 = vpop.eup %6219 }
 0x1ca   :  { %v1773_v5 = vmul.f32 0.5, %v6220_v11 }
 0x1f2   :  { %v1712_v50 = vpop.f32.mrb[12].mxu0 }
 0x1f3   :  { %v1764_v8 = vadd.f32 %v1712_v50, %v7180_v17  ;;  %v1753_v16 = vpop.f32.mrb[12].mxu1  ;;  %v1714_v12 = vpop.f32.mrb[13].mxu0 }
 0x1f4   :  { %v1766_v20 = vadd.f32 %v1753_v16, %v7184_v19  ;;  %v1765_v18 = vadd.f32 %v1714_v12, %v7182_v32  ;;  %v1755_v63 = vpop.f32.mrb[13].mxu1  ;;  %v1716_v15 = vpop.f32.mrb[14].mxu0  ;;  %v1772_v16 = vmul.f32 0.5, %v6218_v33  ;;  %v1782_v12 = vadd.f32 0.5, %v1780_v9 }
 0x1f5   :  { %6221 = vtanh.f32 %v1764_v8  ;;  %v1767_v14 = vadd.f32 %v1755_v63, %v7186_v49  ;;  %v1717_v3 = vpop.f32.mrb[15].mxu0  ;;  %v1757_v13 = vpop.f32.mrb[14].mxu1  ;;  %v1783_v15 = vadd.f32 0.5, %v1781_v27  ;;  %v1775_v63 = vadd.f32 0.5, %v1773_v5 }
 0x1f6   :  { %6223 = vtanh.f32 %v1765_v18  ;;  %v1758_v42 = vpop.f32.mrb[15].mxu1  ;;  %v1786_v50 = vmul.f32 0.5, %v1766_v20  ;;  %v1774_v8 = vadd.f32 0.5, %v1772_v16  ;;  %v1794_v13 = vmul.f32 0.0, %v1782_v12  ;;  %v8941_v16 = vld [vmem:[#allocation103_spill] sm:$0xff]  ;;  %v8942_v12 = vld [vmem:[#allocation104_spill] sm:$0xff] }
 0x1f7   :  { %v1787_v58 = vmul.f32 0.5, %v1767_v14  ;;  %v1795_v18 = vmul.f32 0.0, %v1783_v15  ;;  %v8943_v15 = vld [vmem:[#allocation105_spill] sm:$0xff] }
 0x1f8   :  { %6225 = vtanh.f32 %v1786_v50 }
 0x1f9   :  { %6227 = vtanh.f32 %v1787_v58 }
 0x1ff   :  { %v6222_v62 = vpop.eup %6221 }
 0x200   :  { %v6224_v3 = vpop.eup %6223  ;;  %v1796_v48 = vmul.f32 %v6222_v62, %v1774_v8  ;;  %v8944_v8 = vld [vmem:[#allocation106_spill] sm:$0xff] }
 0x201   :  { %v1797_v42 = vmul.f32 %v6224_v3, %v1775_v63  ;;  %v8945_v63 = vld [vmem:[#allocation107_spill] sm:$0xff]  ;;  %v8946_v3 = vld [vmem:[#allocation108_spill] sm:$0xff] }
 0x202   :  { %v7192_v49 = vadd.f32 %v1796_v48, %v1794_v13  ;;  %v6226_v20 = vpop.eup %6225  ;;  %v8947_v13 = vld [vmem:[#allocation109_spill] sm:$0xff] }
 0x203   :  { %v7194_v34 = vadd.f32 %v1797_v42, %v1795_v18  ;;  %v6228_v14 = vpop.eup %6227  ;;  %v1790_v27 = vmul.f32 0.5, %v6226_v20  ;;  %v8948_v18 = vld [vmem:[#allocation110_spill] sm:$0xff]  ;;  %v8949_v42 = vld [vmem:[#allocation111_spill] sm:$0xff]  ;;  %v8950_v20 = vld [vmem:[#allocation112_spill] sm:$0xff] }
 0x204   :  { %6229 = vtanh.f32 %v7192_v49  ;;  %v1791_v58 = vmul.f32 0.5, %v6228_v14  ;;  %v8951_v14 = vld [vmem:[#allocation113_spill] sm:$0xff] }
 0x205   :  { %6231 = vtanh.f32 %v7194_v34  ;;  %v1792_v47 = vadd.f32 0.5, %v1790_v27  ;;  %v8952_v27 = vld [vmem:[#allocation114_spill] sm:$0xff] }
 0x206   :  { %v1793_v5 = vadd.f32 0.5, %v1791_v58  ;;  %v8953_v58 = vld [vmem:[#allocation115_spill] sm:$0xff] }
 0x20e   :  { %v6230_v33 = vpop.eup %6229 }
 0x20f   :  { %v6232_v11 = vpop.eup %6231  ;;  %v1802_v9 = vmul.f32 %v6230_v33, %v1792_v47  ;;  %v8954_v47 = vld [vmem:[#allocation116_spill] sm:$0xff]  ;;  %v8955_v33 = vld [vmem:[#allocation117_spill] sm:$0xff] }
 0x210   :  { %v1803_v62 = vmul.f32 %v6232_v11, %v1793_v5  ;;  %v8956_v5 = vld [vmem:[#allocation118_spill] sm:$0xff]  ;;  %v8957_v11 = vld [vmem:[#allocation119_spill] sm:$0xff] }
 0x211   :  { %1804 = vst [vmem:[#allocation2] sm:$0x1] %v1802_v9  ;;  %v7198_v50 = vpack.c.bf16 %v1802_v9, %v1802_v9  ;;  %v8958_v9 = vld [vmem:[#allocation120_spill] sm:$0xff] }
 0x212   :  { %1805 = vst [vmem:[#allocation2 + $0xf] sm:$0x1] %v1803_v62  ;;  %v1807_v48 = vpack.c.bf16 %v1803_v62, %v1803_v62  ;;  %v8959_v62 = vld [vmem:[#allocation121_spill] sm:$0xff] }
 0x214   :  { %1840 = vmatprep.mubr.bf16.mxu0 %v1807_v48  ;;  %1881 = vmatprep.mubr.bf16.mxu1 %v1807_v48 }
 0x215   :  { %1841 = vmatmul.mubr.bf16.vlgmr.msra.gmra.mrb[16].mxu0 %v7198_v50  ;;  %1882 = vmatmul.mubr.bf16.vlgmr.msra.gmra.mrb[16].mxu1 %v7198_v50 }
 0x216   :  { %1891 = vmatpush1.bf16.msra.mxu0 %v8941_v16  ;;  %1932 = vmatpush1.bf16.msra.mxu1 %v8942_v12 }
 0x217   :  { %1922 = vmatprep.mubr.bf16.mxu0 %v1807_v48  ;;  %1963 = vmatprep.mubr.bf16.mxu1 %v1807_v48  ;;  %v8960_v48 = vld [vmem:[#allocation122_spill] sm:$0xff] }
 0x218   :  { %1892 = vmatprep.subr.bf16.mxu0 %v8943_v15  ;;  %1933 = vmatprep.subr.bf16.mxu1 %v8944_v8 }
 0x21a   :  { %1893 = vmatpush1.bf16.msra.mxu0 %v8945_v63  ;;  %1934 = vmatpush1.bf16.msra.mxu1 %v8946_v3 }
 0x21b   :  { %1894 = vmatprep.subr.bf16.mxu0 %v8947_v13  ;;  %1935 = vmatprep.subr.bf16.mxu1 %v8948_v18 }
 0x21e   :  { %1895 = vmatpush1.bf16.msra.mxu0 %v8949_v42  ;;  %1936 = vmatpush1.bf16.msra.mxu1 %v8950_v20  ;;  %v8961_v20 = vld [vmem:[#allocation123_spill] sm:$0xff] }
 0x21f   :  { %1896 = vmatprep.subr.bf16.mxu0 %v8951_v14  ;;  %1937 = vmatprep.subr.bf16.mxu1 %v8952_v27  ;;  %v8962_v14 = vld [vmem:[#allocation124_spill] sm:$0xff]  ;;  %v8963_v27 = vld [vmem:[#allocation125_spill] sm:$0xff] }
 0x222   :  { %1897 = vmatpush1.bf16.msra.mxu0 %v8953_v58  ;;  %1938 = vmatpush1.bf16.msra.mxu1 %v8954_v47  ;;  %v8964_v58 = vld [vmem:[#allocation126_spill] sm:$0xff]  ;;  %v8965_v47 = vld [vmem:[#allocation127_spill] sm:$0xff] }
 0x223   :  { %1898 = vmatprep.subr.bf16.mxu0 %v8955_v33  ;;  %1939 = vmatprep.subr.bf16.mxu1 %v8956_v5  ;;  %v8966_v33 = vld [vmem:[#allocation128_spill] sm:$0xff]  ;;  %v8967_v5 = vld [vmem:[#allocation129_spill] sm:$0xff] }
 0x226   :  { %1899 = vmatpush1.bf16.msra.mxu0 %v8957_v11  ;;  %1940 = vmatpush1.bf16.msra.mxu1 %v8958_v9  ;;  %v8968_v11 = vld [vmem:[#allocation130_spill] sm:$0xff]  ;;  %v8969_v9 = vld [vmem:[#allocation131_spill] sm:$0xff] }
 0x227   :  { %1900 = vmatprep.subr.bf16.mxu0 %v8959_v62  ;;  %1941 = vmatprep.subr.bf16.mxu1 %v8960_v48  ;;  %v8970_v62 = vld [vmem:[#allocation132_spill] sm:$0xff]  ;;  %v8971_v48 = vld [vmem:[#allocation133_spill] sm:$0xff] }
 0x22a   :  { %1901 = vmatpush1.bf16.msra.mxu0 %v8961_v20  ;;  %1942 = vmatpush1.bf16.msra.mxu1 %v8962_v14  ;;  %v8972_v20 = vld [vmem:[#allocation134_spill] sm:$0xff]  ;;  %v8973_v14 = vld [vmem:[#allocation135_spill] sm:$0xff] }
 0x22b   :  { %1902 = vmatprep.subr.bf16.mxu0 %v8963_v27  ;;  %1943 = vmatprep.subr.bf16.mxu1 %v8964_v58  ;;  %v8974_v27 = vld [vmem:[#allocation136_spill] sm:$0xff]  ;;  %v8975_v58 = vld [vmem:[#allocation137_spill] sm:$0xff] }
 0x22e   :  { %1903 = vmatpush1.bf16.msra.mxu0 %v8965_v47  ;;  %1944 = vmatpush1.bf16.msra.mxu1 %v8966_v33  ;;  %v8976_v47 = vld [vmem:[#allocation138_spill] sm:$0xff]  ;;  %v8977_v33 = vld [vmem:[#allocation139_spill] sm:$0xff] }
 0x22f   :  { %1904 = vmatprep.subr.bf16.mxu0 %v8967_v5  ;;  %1945 = vmatprep.subr.bf16.mxu1 %v8968_v11  ;;  %v8978_v5 = vld [vmem:[#allocation140_spill] sm:$0xff]  ;;  %v8979_v11 = vld [vmem:[#allocation141_spill] sm:$0xff] }
 0x232   :  { %1905 = vmatpush1.bf16.msra.mxu0 %v8969_v9  ;;  %1946 = vmatpush1.bf16.msra.mxu1 %v8970_v62  ;;  %v8980_v9 = vld [vmem:[#allocation142_spill] sm:$0xff]  ;;  %v8981_v62 = vld [vmem:[#allocation143_spill] sm:$0xff] }
 0x233   :  { %1906 = vmatprep.subr.bf16.mxu0 %v8971_v48  ;;  %1947 = vmatprep.subr.bf16.mxu1 %v8972_v20  ;;  %v8982_v48 = vld [vmem:[#allocation144_spill] sm:$0xff]  ;;  %v8983_v20 = vld [vmem:[#allocation145_spill] sm:$0xff] }
 0x236   :  { %1907 = vmatpush1.bf16.msra.mxu0 %v8973_v14  ;;  %1948 = vmatpush1.bf16.msra.mxu1 %v8974_v27  ;;  %v8984_v14 = vld [vmem:[#allocation146_spill] sm:$0xff]  ;;  %v8985_v27 = vld [vmem:[#allocation147_spill] sm:$0xff] }
 0x237   :  { %1908 = vmatprep.subr.bf16.mxu0 %v8975_v58  ;;  %1949 = vmatprep.subr.bf16.mxu1 %v8976_v47  ;;  %v8986_v58 = vld [vmem:[#allocation148_spill] sm:$0xff]  ;;  %v8987_v47 = vld [vmem:[#allocation149_spill] sm:$0xff] }
 0x23a   :  { %1909 = vmatpush1.bf16.msra.mxu0 %v8977_v33  ;;  %1950 = vmatpush1.bf16.msra.mxu1 %v8978_v5  ;;  %v8988_v33 = vld [vmem:[#allocation150_spill] sm:$0xff] }
 0x23b   :  { %1910 = vmatprep.subr.bf16.mxu0 %v8979_v11  ;;  %1951 = vmatprep.subr.bf16.mxu1 %v8980_v9 }
 0x23e   :  { %1911 = vmatpush1.bf16.msra.mxu0 %v8981_v62  ;;  %1952 = vmatpush1.bf16.msra.mxu1 %v8982_v48  ;;  %v8989_v62 = vld [vmem:[#allocation154_spill] sm:$0xff] }
 0x23f   :  { %1912 = vmatprep.subr.bf16.mxu0 %v8983_v20  ;;  %1953 = vmatprep.subr.bf16.mxu1 %v8984_v14 }
 0x242   :  { %1913 = vmatpush1.bf16.msra.mxu0 %v8985_v27  ;;  %1954 = vmatpush1.bf16.msra.mxu1 %v8986_v58 }
 0x243   :  { %1914 = vmatprep.subr.bf16.mxu0 %v8987_v47  ;;  %1955 = vmatprep.subr.bf16.mxu1 %v8988_v33 }
 0x246   :  { %1915 = vmatpush1.bf16.msra.mxu0 %v7028_v26  ;;  %1956 = vmatpush1.bf16.msra.mxu1 %v7032_v35 }
 0x247   :  { %1916 = vmatprep.subr.bf16.mxu0 %v7034_v40  ;;  %1957 = vmatprep.subr.bf16.mxu1 %v8989_v62 }
 0x24a   :  { %1917 = vmatpush1.bf16.msra.mxu0 %v7040_v0  ;;  %1958 = vmatpush1.bf16.msra.mxu1 %v7044_v57 }
 0x24b   :  { %1918 = vmatprep.subr.bf16.mxu0 %v7046_v4  ;;  %1959 = vmatprep.subr.bf16.mxu1 %v7049_v1 }
 0x24e   :  { %1919 = vmatpush1.bf16.msra.mxu0 %v7052_v2  ;;  %1960 = vmatpush1.bf16.msra.mxu1 %v7056_v25 }
 0x24f   :  { %1920 = vmatprep.subr.bf16.mxu0 %v7058_v24  ;;  %1961 = vmatprep.subr.bf16.mxu1 %v7061_v55 }
 0x252   :  { %1921 = vmatpush1.bf16.msra.mxu0 %v7064_v41  ;;  %1962 = vmatpush1.bf16.msra.mxu1 %v7068_v21 }
 0x253   :  { %2064 = vmatprep.subr.bf16.mxu0 %v6681_v22  ;;  %2105 = vmatprep.subr.bf16.mxu1 %v6683_v23 }
 0x255   :  { %1923 = vmatmul.mubr.bf16.vlgmr.msra.gmra.mrb[20].mxu0 %v7198_v50  ;;  %1964 = vmatmul.mubr.bf16.vlgmr.msra.gmra.mrb[20].mxu1 %v7198_v50  ;;  %v8990_v50 = vld [vmem:[#allocation58_spill] sm:$0xff] }
 0x256   :  { %2065 = vmatpush1.bf16.msra.mxu0 %v6685_v28  ;;  %2106 = vmatpush1.bf16.msra.mxu1 %v6688_v29 }
 0x257   :  { %2066 = vmatprep.subr.bf16.mxu0 %v6690_v30  ;;  %2107 = vmatprep.subr.bf16.mxu1 %v6693_v31 }
 0x25a   :  { %2067 = vmatpush1.bf16.msra.mxu0 %v6698_v36  ;;  %2108 = vmatpush1.bf16.msra.mxu1 %v6702_v37 }
 0x25b   :  { %2068 = vmatprep.subr.bf16.mxu0 %v6704_v38  ;;  %2109 = vmatprep.subr.bf16.mxu1 %v6707_v39 }
 0x25e   :  { %2069 = vmatpush1.bf16.msra.mxu0 %v6712_v43  ;;  %2110 = vmatpush1.bf16.msra.mxu1 %v6716_v44  ;;  %v8991_v44 = vld [vmem:[#allocation59_spill] sm:$0xff] }
 0x25f   :  { %2070 = vmatprep.subr.bf16.mxu0 %v6718_v45  ;;  %2111 = vmatprep.subr.bf16.mxu1 %v6721_v46  ;;  %v8992_v45 = vld [vmem:[#allocation60_spill] sm:$0xff]  ;;  %v8993_v46 = vld [vmem:[#allocation61_spill] sm:$0xff] }
 0x262   :  { %2071 = vmatpush1.bf16.msra.mxu0 %v6724_v51  ;;  %2112 = vmatpush1.bf16.msra.mxu1 %v6728_v52  ;;  %v8994_v51 = vld [vmem:[#allocation62_spill] sm:$0xff]  ;;  %v8995_v52 = vld [vmem:[#allocation63_spill] sm:$0xff] }
 0x263   :  { %2072 = vmatprep.subr.bf16.mxu0 %v6730_v53  ;;  %2113 = vmatprep.subr.bf16.mxu1 %v6733_v54  ;;  %v8996_v53 = vld [vmem:[#allocation64_spill] sm:$0xff]  ;;  %v8997_v54 = vld [vmem:[#allocation65_spill] sm:$0xff] }
 0x266   :  { %2073 = vmatpush1.bf16.msra.mxu0 %v6736_v59  ;;  %2114 = vmatpush1.bf16.msra.mxu1 %v6740_v60  ;;  %v8998_v59 = vld [vmem:[#allocation66_spill] sm:$0xff]  ;;  %v8999_v60 = vld [vmem:[#allocation67_spill] sm:$0xff] }
 0x267   :  { %2074 = vmatprep.subr.bf16.mxu0 %v6742_v61  ;;  %2115 = vmatprep.subr.bf16.mxu1 %v8990_v50  ;;  %v9000_v61 = vld [vmem:[#allocation68_spill] sm:$0xff]  ;;  %v9001_v50 = vld [vmem:[#allocation69_spill] sm:$0xff] }
 0x26a   :  { %2075 = vmatpush1.bf16.msra.mxu0 %v8991_v44  ;;  %2116 = vmatpush1.bf16.msra.mxu1 %v8992_v45  ;;  %v9002_v44 = vld [vmem:[#allocation70_spill] sm:$0xff]  ;;  %v9003_v45 = vld [vmem:[#allocation71_spill] sm:$0xff] }
 0x26b   :  { %2076 = vmatprep.subr.bf16.mxu0 %v8993_v46  ;;  %2117 = vmatprep.subr.bf16.mxu1 %v8994_v51  ;;  %v9004_v46 = vld [vmem:[#allocation72_spill] sm:$0xff]  ;;  %v9005_v51 = vld [vmem:[#allocation73_spill] sm:$0xff] }
 0x26e   :  { %2077 = vmatpush1.bf16.msra.mxu0 %v8995_v52  ;;  %2118 = vmatpush1.bf16.msra.mxu1 %v8996_v53  ;;  %v9006_v52 = vld [vmem:[#allocation74_spill] sm:$0xff]  ;;  %v9007_v53 = vld [vmem:[#allocation75_spill] sm:$0xff] }
 0x26f   :  { %2078 = vmatprep.subr.bf16.mxu0 %v8997_v54  ;;  %2119 = vmatprep.subr.bf16.mxu1 %v8998_v59  ;;  %v9008_v54 = vld [vmem:[#allocation76_spill] sm:$0xff]  ;;  %v9009_v59 = vld [vmem:[#allocation77_spill] sm:$0xff] }
 0x272   :  { %2079 = vmatpush1.bf16.msra.mxu0 %v8999_v60  ;;  %2120 = vmatpush1.bf16.msra.mxu1 %v9000_v61  ;;  %v9010_v60 = vld [vmem:[#allocation78_spill] sm:$0xff]  ;;  %v9011_v61 = vld [vmem:[#allocation79_spill] sm:$0xff] }
 0x273   :  { %2080 = vmatprep.subr.bf16.mxu0 %v9001_v50  ;;  %2121 = vmatprep.subr.bf16.mxu1 %v9002_v44  ;;  %v9012_v50 = vld [vmem:[#allocation80_spill] sm:$0xff]  ;;  %v9013_v44 = vld [vmem:[#allocation81_spill] sm:$0xff] }
 0x276   :  { %2081 = vmatpush1.bf16.msra.mxu0 %v9003_v45  ;;  %2122 = vmatpush1.bf16.msra.mxu1 %v9004_v46  ;;  %v9014_v45 = vld [vmem:[#allocation82_spill] sm:$0xff]  ;;  %v9015_v46 = vld [vmem:[#allocation83_spill] sm:$0xff] }
 0x277   :  { %2082 = vmatprep.subr.bf16.mxu0 %v9005_v51  ;;  %2123 = vmatprep.subr.bf16.mxu1 %v9006_v52  ;;  %v9016_v51 = vld [vmem:[#allocation84_spill] sm:$0xff]  ;;  %v9017_v52 = vld [vmem:[#allocation85_spill] sm:$0xff] }
 0x27a   :  { %2083 = vmatpush1.bf16.msra.mxu0 %v9007_v53  ;;  %2124 = vmatpush1.bf16.msra.mxu1 %v9008_v54  ;;  %v9018_v53 = vld [vmem:[#allocation86_spill] sm:$0xff]  ;;  %v9019_v54 = vld [vmem:[#allocation87_spill] sm:$0xff] }
 0x27b   :  { %2084 = vmatprep.subr.bf16.mxu0 %v9009_v59  ;;  %2125 = vmatprep.subr.bf16.mxu1 %v9010_v60  ;;  %v9020_v59 = vld [vmem:[#allocation88_spill] sm:$0xff]  ;;  %v9021_v60 = vld [vmem:[#allocation89_spill] sm:$0xff] }
 0x27e   :  { %2085 = vmatpush1.bf16.msra.mxu0 %v9011_v61  ;;  %2126 = vmatpush1.bf16.msra.mxu1 %v9012_v50  ;;  %v9022_v61 = vld [vmem:[#allocation90_spill] sm:$0xff]  ;;  %v9023_v50 = vld [vmem:[#allocation91_spill] sm:$0xff] }
 0x27f   :  { %2086 = vmatprep.subr.bf16.mxu0 %v9013_v44  ;;  %2127 = vmatprep.subr.bf16.mxu1 %v9014_v45  ;;  %v9024_v44 = vld [vmem:[#allocation92_spill] sm:$0xff]  ;;  %v9025_v45 = vld [vmem:[#allocation93_spill] sm:$0xff] }
 0x282   :  { %2087 = vmatpush1.bf16.msra.mxu0 %v9015_v46  ;;  %2128 = vmatpush1.bf16.msra.mxu1 %v9016_v51  ;;  %v9026_v46 = vld [vmem:[#allocation94_spill] sm:$0xff]  ;;  %v9027_v51 = vld [vmem:[#allocation95_spill] sm:$0xff] }
 0x283   :  { %2088 = vmatprep.subr.bf16.mxu0 %v9017_v52  ;;  %2129 = vmatprep.subr.bf16.mxu1 %v9018_v53  ;;  %v9028_v52 = vld [vmem:[#allocation96_spill] sm:$0xff]  ;;  %v9029_v53 = vld [vmem:[#allocation97_spill] sm:$0xff] }
 0x286   :  { %2089 = vmatpush1.bf16.msra.mxu0 %v9019_v54  ;;  %2130 = vmatpush1.bf16.msra.mxu1 %v9020_v59  ;;  %v9030_v54 = vld [vmem:[#allocation98_spill] sm:$0xff]  ;;  %v9031_v59 = vld [vmem:[#allocation99_spill] sm:$0xff] }
 0x287   :  { %2090 = vmatprep.subr.bf16.mxu0 %v9021_v60  ;;  %2131 = vmatprep.subr.bf16.mxu1 %v9022_v61  ;;  %v9032_v60 = vld [vmem:[#allocation100_spill] sm:$0xff]  ;;  %v9033_v61 = vld [vmem:[#allocation101_spill] sm:$0xff] }
 0x28a   :  { %2091 = vmatpush1.bf16.msra.mxu0 %v9023_v50  ;;  %2132 = vmatpush1.bf16.msra.mxu1 %v9024_v44  ;;  %v9034_v50 = vld [vmem:[#allocation102_spill] sm:$0xff] }
 0x28b   :  { %2092 = vmatprep.subr.bf16.mxu0 %v9025_v45  ;;  %2133 = vmatprep.subr.bf16.mxu1 %v9026_v46 }
 0x28e   :  { %2093 = vmatpush1.bf16.msra.mxu0 %v9027_v51  ;;  %2134 = vmatpush1.bf16.msra.mxu1 %v9028_v52 }
 0x28f   :  { %2094 = vmatprep.subr.bf16.mxu0 %v9029_v53  ;;  %2135 = vmatprep.subr.bf16.mxu1 %v9030_v54 }
 0x292   :  { %2095 = vmatpush1.bf16.msra.mxu0 %v9031_v59  ;;  %2136 = vmatpush1.bf16.msra.mxu1 %v9032_v60 }
 0x293   :  { %2146 = vmatprep.subr.bf16.mxu0 %v9033_v61  ;;  %2187 = vmatprep.subr.bf16.mxu1 %v9034_v50 }
 0x2e8   :  { %v1842_v44 = vpop.f32.mrb[16].mxu0  ;;  %v1883_v45 = vpop.f32.mrb[16].mxu1 }
 0x2e9   :  { %v1982_v43 = vrot.slane %v1883_v45, 7  ;;  %v1844_v46 = vpop.f32.mrb[17].mxu0  ;;  %v1885_v39 = vpop.f32.mrb[17].mxu1  ;;  %v2032_v45 = vrot.slane %v7192_v49, 7 }
 0x2ea   :  { %v1983_v51 = vrot.slane %v1885_v39, 7  ;;  %v1846_v38 = vpop.f32.mrb[18].mxu0  ;;  %v1887_v52 = vpop.f32.mrb[18].mxu1 }
 0x2eb   :  { %v1998_v53 = vadd.f32 %v1982_v43, %v7156_v6  ;;  %v1847_v37 = vpop.f32.mrb[19].mxu0  ;;  %v1888_v54 = vpop.f32.mrb[19].mxu1  ;;  %v2033_v52 = vrot.slane %v7194_v34, 7 }
 0x2ec   :  { %v1999_v59 = vadd.f32 %v1983_v51, %v7158_v7  ;;  %v1980_v37 = vrot.slane %v1842_v44, 7  ;;  %v1981_v54 = vrot.slane %v1844_v46, 7 }
 0x2ed   :  { %v2012_v36 = vmul.f32 0.5, %v1998_v53 }
 0x2ee   :  { %v2013_v60 = vmul.f32 0.5, %v1999_v59  ;;  %v1996_v51 = vadd.f32 %v1980_v37, %v7160_v56  ;;  %v1997_v53 = vadd.f32 %v1981_v54, %v7163_v10 }
 0x2ef   :  { %6233 = vtanh.f32 %v2012_v36 }
 0x2f0   :  { %6235 = vtanh.f32 %v2013_v60  ;;  %v2004_v36 = vmul.f32 0.5, %v1996_v51  ;;  %v2005_v59 = vmul.f32 0.5, %v1997_v53  ;;  %v9035_v51 = vld [vmem:[#allocation174_spill] sm:$0xff] }
 0x2f2   :  { %6237 = vtanh.f32 %v2004_v36 }
 0x2f3   :  { %6239 = vtanh.f32 %v2005_v59 }
 0x2f9   :  { %v6234_v61 = vpop.eup %6233 }
 0x2fa   :  { %v2016_v50 = vmul.f32 0.5, %v6234_v61  ;;  %v6236_v31 = vpop.eup %6235 }
 0x2fb   :  { %v2017_v29 = vmul.f32 0.5, %v6236_v31 }
 0x2fc   :  { %v2018_v30 = vadd.f32 0.5, %v2016_v50  ;;  %v6238_v36 = vpop.eup %6237 }
 0x2fd   :  { %v2019_v38 = vadd.f32 0.5, %v2017_v29  ;;  %v6240_v59 = vpop.eup %6239 }
 0x2fe   :  { %v2036_v39 = vmul.f32 %v2032_v45, %v2018_v30 }
 0x2ff   :  { %v2037_v43 = vmul.f32 %v2033_v52, %v2019_v38 }
 0x328   :  { %v1924_v60 = vpop.f32.mrb[20].mxu0  ;;  %v1965_v61 = vpop.f32.mrb[20].mxu1 }
 0x329   :  { %v1984_v50 = vrot.slane %v1924_v60, 7  ;;  %v1986_v49 = vrot.slane %v1965_v61, 7  ;;  %v1926_v31 = vpop.f32.mrb[21].mxu0  ;;  %v1967_v30 = vpop.f32.mrb[21].mxu1 }
 0x32a   :  { %v1985_v29 = vrot.slane %v1926_v31, 7  ;;  %v1987_v45 = vrot.slane %v1967_v30, 7  ;;  %v1928_v34 = vpop.f32.mrb[22].mxu0  ;;  %v1969_v38 = vpop.f32.mrb[22].mxu1  ;;  %v2008_v31 = vmul.f32 0.5, %v6238_v36  ;;  %v2009_v30 = vmul.f32 0.5, %v6240_v59 }
 0x32b   :  { %v2000_v44 = vadd.f32 %v1984_v50, %v7180_v17  ;;  %v1929_v46 = vpop.f32.mrb[23].mxu0  ;;  %v1970_v52 = vpop.f32.mrb[23].mxu1  ;;  %v2002_v37 = vadd.f32 %v1986_v49, %v7184_v19 }
 0x32c   :  { %v2001_v54 = vadd.f32 %v1985_v29, %v7182_v32  ;;  %v2003_v53 = vadd.f32 %v1987_v45, %v9035_v51  ;;  %v2010_v34 = vadd.f32 0.5, %v2008_v31  ;;  %v2011_v38 = vadd.f32 0.5, %v2009_v30 }
 0x32d   :  { %6241 = vtanh.f32 %v2000_v44  ;;  %v2022_v60 = vmul.f32 0.5, %v2002_v37 }
 0x32e   :  { %6243 = vtanh.f32 %v2001_v54  ;;  %v2023_v61 = vmul.f32 0.5, %v2003_v53 }
 0x32f   :  { %6245 = vtanh.f32 %v2022_v60 }
 0x330   :  { %6247 = vtanh.f32 %v2023_v61 }
 0x337   :  { %v6242_v50 = vpop.eup %6241 }
 0x338   :  { %v6244_v46 = vpop.eup %6243  ;;  %v2038_v52 = vmul.f32 %v6242_v50, %v2010_v34 }
 0x339   :  { %v2039_v49 = vmul.f32 %v6244_v46, %v2011_v38  ;;  %v6246_v45 = vpop.eup %6245  ;;  %v9036_v46 = vld [vmem:[#allocation112_spill] sm:$0xff] }
 0x33a   :  { %v7342_v19 = vadd.f32 %v2038_v52, %v2036_v39  ;;  %v6248_v44 = vpop.eup %6247  ;;  %v2026_v37 = vmul.f32 0.5, %v6246_v45  ;;  %v9037_v52 = vld [vmem:[#allocation113_spill] sm:$0xff]  ;;  %v9039_v45 = vld [vmem:[#allocation115_spill] sm:$0xff] }
 0x33b   :  { %v7344_v29 = vadd.f32 %v2039_v49, %v2037_v43  ;;  %v2027_v54 = vmul.f32 0.5, %v6248_v44  ;;  %v9038_v49 = vld [vmem:[#allocation114_spill] sm:$0xff]  ;;  %v9040_v44 = vld [vmem:[#allocation116_spill] sm:$0xff] }
 0x33c   :  { %6249 = vtanh.f32 %v7342_v19  ;;  %v2028_v53 = vadd.f32 0.5, %v2026_v37  ;;  %v9041_v37 = vld [vmem:[#allocation117_spill] sm:$0xff] }
 0x33d   :  { %6251 = vtanh.f32 %v7344_v29  ;;  %v2029_v59 = vadd.f32 0.5, %v2027_v54  ;;  %v9042_v54 = vld [vmem:[#allocation118_spill] sm:$0xff] }
 0x346   :  { %v6250_v36 = vpop.eup %6249 }
 0x347   :  { %v6252_v60 = vpop.eup %6251  ;;  %v2044_v61 = vmul.f32 %v6250_v36, %v2028_v53  ;;  %v9043_v53 = vld [vmem:[#allocation119_spill] sm:$0xff]  ;;  %v9044_v36 = vld [vmem:[#allocation120_spill] sm:$0xff] }
 0x348   :  { %v2045_v31 = vmul.f32 %v6252_v60, %v2029_v59  ;;  %v9045_v59 = vld [vmem:[#allocation121_spill] sm:$0xff]  ;;  %v9046_v60 = vld [vmem:[#allocation122_spill] sm:$0xff] }
 0x349   :  { %v2047_v30 = vrot.slane %v2044_v61, 1  ;;  %v2054_v34 = vpack.c.bf16 %v2044_v61, %v2044_v61  ;;  %v9047_v61 = vld [vmem:[#allocation123_spill] sm:$0xff] }
 0x34a   :  { %v2051_v39 = vrot.slane %v2045_v31, 1  ;;  %v2055_v50 = vpack.c.bf16 %v2045_v31, %v2045_v31  ;;  %v9048_v31 = vld [vmem:[#allocation124_spill] sm:$0xff] }
 0x34b   :  { %2049 = vst [vmem:[#allocation2 + $0x1] sm:$0x1] %v2047_v30  ;;  %v7348_v38 = vshrl.u32 %v2054_v34, 16  ;;  %v9049_v30 = vld [vmem:[#allocation125_spill] sm:$0xff]  ;;  %v9050_v34 = vld [vmem:[#allocation126_spill] sm:$0xff] }
 0x34c   :  { %2053 = vst [vmem:[#allocation2 + $0xe] sm:$0x1] %v2051_v39  ;;  %v2060_v43 = vshrl.u32 %v2055_v50, 16  ;;  %v9051_v39 = vld [vmem:[#allocation127_spill] sm:$0xff]  ;;  %v9052_v50 = vld [vmem:[#allocation128_spill] sm:$0xff] }
 0x34e   :  { %2096 = vmatprep.mubr.bf16.mxu0 %v2060_v43  ;;  %2137 = vmatprep.mubr.bf16.mxu1 %v2060_v43 }
 0x34f   :  { %2097 = vmatmul.mubr.bf16.vlgmr.msra.gmra.mrb[24].mxu0 %v7348_v38  ;;  %2138 = vmatmul.mubr.bf16.vlgmr.msra.gmra.mrb[24].mxu1 %v7348_v38 }
 0x350   :  { %2147 = vmatpush1.bf16.msra.mxu0 %v8941_v16  ;;  %2188 = vmatpush1.bf16.msra.mxu1 %v8942_v12 }
 0x351   :  { %2178 = vmatprep.mubr.bf16.mxu0 %v2060_v43  ;;  %2219 = vmatprep.mubr.bf16.mxu1 %v2060_v43  ;;  %v9053_v43 = vld [vmem:[#allocation129_spill] sm:$0xff] }
 0x352   :  { %2148 = vmatprep.subr.bf16.mxu0 %v8943_v15  ;;  %2189 = vmatprep.subr.bf16.mxu1 %v8944_v8 }
 0x354   :  { %2149 = vmatpush1.bf16.msra.mxu0 %v8945_v63  ;;  %2190 = vmatpush1.bf16.msra.mxu1 %v8946_v3 }
 0x355   :  { %2150 = vmatprep.subr.bf16.mxu0 %v8947_v13  ;;  %2191 = vmatprep.subr.bf16.mxu1 %v8948_v18 }
 0x358   :  { %2151 = vmatpush1.bf16.msra.mxu0 %v8949_v42  ;;  %2192 = vmatpush1.bf16.msra.mxu1 %v9036_v46 }
 0x359   :  { %2152 = vmatprep.subr.bf16.mxu0 %v9037_v52  ;;  %2193 = vmatprep.subr.bf16.mxu1 %v9038_v49 }
 0x35c   :  { %2153 = vmatpush1.bf16.msra.mxu0 %v9039_v45  ;;  %2194 = vmatpush1.bf16.msra.mxu1 %v9040_v44 }
 0x35d   :  { %2154 = vmatprep.subr.bf16.mxu0 %v9041_v37  ;;  %2195 = vmatprep.subr.bf16.mxu1 %v9042_v54 }
 0x360   :  { %2155 = vmatpush1.bf16.msra.mxu0 %v9043_v53  ;;  %2196 = vmatpush1.bf16.msra.mxu1 %v9044_v36  ;;  %v9054_v53 = vld [vmem:[#allocation130_spill] sm:$0xff]  ;;  %v9055_v36 = vld [vmem:[#allocation131_spill] sm:$0xff] }
 0x361   :  { %2156 = vmatprep.subr.bf16.mxu0 %v9045_v59  ;;  %2197 = vmatprep.subr.bf16.mxu1 %v9046_v60  ;;  %v9056_v59 = vld [vmem:[#allocation132_spill] sm:$0xff]  ;;  %v9057_v60 = vld [vmem:[#allocation133_spill] sm:$0xff] }
 0x364   :  { %2157 = vmatpush1.bf16.msra.mxu0 %v9047_v61  ;;  %2198 = vmatpush1.bf16.msra.mxu1 %v9048_v31  ;;  %v9058_v61 = vld [vmem:[#allocation134_spill] sm:$0xff]  ;;  %v9059_v31 = vld [vmem:[#allocation135_spill] sm:$0xff] }
 0x365   :  { %2158 = vmatprep.subr.bf16.mxu0 %v9049_v30  ;;  %2199 = vmatprep.subr.bf16.mxu1 %v9050_v34  ;;  %v9060_v30 = vld [vmem:[#allocation136_spill] sm:$0xff]  ;;  %v9061_v34 = vld [vmem:[#allocation137_spill] sm:$0xff] }
 0x368   :  { %2159 = vmatpush1.bf16.msra.mxu0 %v9051_v39  ;;  %2200 = vmatpush1.bf16.msra.mxu1 %v9052_v50  ;;  %v9062_v39 = vld [vmem:[#allocation138_spill] sm:$0xff]  ;;  %v9063_v50 = vld [vmem:[#allocation139_spill] sm:$0xff] }
 0x369   :  { %2160 = vmatprep.subr.bf16.mxu0 %v9053_v43  ;;  %2201 = vmatprep.subr.bf16.mxu1 %v9054_v53 }
 0x36c   :  { %2161 = vmatpush1.bf16.msra.mxu0 %v9055_v36  ;;  %2202 = vmatpush1.bf16.msra.mxu1 %v9056_v59  ;;  %v9064_v59 = vld [vmem:[#allocation143_spill] sm:$0xff] }
 0x36d   :  { %2162 = vmatprep.subr.bf16.mxu0 %v9057_v60  ;;  %2203 = vmatprep.subr.bf16.mxu1 %v9058_v61 }
 0x370   :  { %2163 = vmatpush1.bf16.msra.mxu0 %v9059_v31  ;;  %2204 = vmatpush1.bf16.msra.mxu1 %v9060_v30 }
 0x371   :  { %2164 = vmatprep.subr.bf16.mxu0 %v9061_v34  ;;  %2205 = vmatprep.subr.bf16.mxu1 %v9062_v39 }
 0x374   :  { %2165 = vmatpush1.bf16.msra.mxu0 %v9063_v50  ;;  %2206 = vmatpush1.bf16.msra.mxu1 %v8978_v5 }
 0x375   :  { %2166 = vmatprep.subr.bf16.mxu0 %v8979_v11  ;;  %2207 = vmatprep.subr.bf16.mxu1 %v8980_v9 }
 0x378   :  { %2167 = vmatpush1.bf16.msra.mxu0 %v9064_v59  ;;  %2208 = vmatpush1.bf16.msra.mxu1 %v8982_v48 }
 0x379   :  { %2168 = vmatprep.subr.bf16.mxu0 %v8983_v20  ;;  %2209 = vmatprep.subr.bf16.mxu1 %v8984_v14 }
 0x37c   :  { %2169 = vmatpush1.bf16.msra.mxu0 %v8985_v27  ;;  %2210 = vmatpush1.bf16.msra.mxu1 %v8986_v58 }
 0x37d   :  { %2170 = vmatprep.subr.bf16.mxu0 %v8987_v47  ;;  %2211 = vmatprep.subr.bf16.mxu1 %v8988_v33 }
 0x380   :  { %2171 = vmatpush1.bf16.msra.mxu0 %v7028_v26  ;;  %2212 = vmatpush1.bf16.msra.mxu1 %v7032_v35 }
 0x381   :  { %2172 = vmatprep.subr.bf16.mxu0 %v7034_v40  ;;  %2213 = vmatprep.subr.bf16.mxu1 %v8989_v62 }
 0x384   :  { %2173 = vmatpush1.bf16.msra.mxu0 %v7040_v0  ;;  %2214 = vmatpush1.bf16.msra.mxu1 %v7044_v57 }
 0x385   :  { %2174 = vmatprep.subr.bf16.mxu0 %v7046_v4  ;;  %2215 = vmatprep.subr.bf16.mxu1 %v7049_v1  ;;  %v9073_v1 = vld [vmem:[#allocation48_spill] sm:$0xff] }
 0x388   :  { %2175 = vmatpush1.bf16.msra.mxu0 %v7052_v2  ;;  %2216 = vmatpush1.bf16.msra.mxu1 %v7056_v25  ;;  %v9065_v2 = vld [vmem:[#allocation40_spill] sm:$0xff]  ;;  %v9066_v25 = vld [vmem:[#allocation41_spill] sm:$0xff] }
 0x389   :  { %2176 = vmatprep.subr.bf16.mxu0 %v7058_v24  ;;  %2217 = vmatprep.subr.bf16.mxu1 %v7061_v55  ;;  %v9067_v24 = vld [vmem:[#allocation42_spill] sm:$0xff]  ;;  %v9068_v55 = vld [vmem:[#allocation43_spill] sm:$0xff] }
 0x38c   :  { %2177 = vmatpush1.bf16.msra.mxu0 %v7064_v41  ;;  %2218 = vmatpush1.bf16.msra.mxu1 %v7068_v21  ;;  %v9069_v41 = vld [vmem:[#allocation44_spill] sm:$0xff]  ;;  %v9070_v21 = vld [vmem:[#allocation45_spill] sm:$0xff] }
 0x38d   :  { %2318 = vmatprep.subr.bf16.mxu0 %v6681_v22  ;;  %2359 = vmatprep.subr.bf16.mxu1 %v6683_v23  ;;  %v9071_v22 = vld [vmem:[#allocation46_spill] sm:$0xff]  ;;  %v9072_v23 = vld [vmem:[#allocation47_spill] sm:$0xff] }
 0x38f   :  { %2179 = vmatmul.mubr.bf16.vlgmr.msra.gmra.mrb[28].mxu0 %v7348_v38  ;;  %2220 = vmatmul.mubr.bf16.vlgmr.msra.gmra.mrb[28].mxu1 %v7348_v38  ;;  %v9074_v38 = vld [vmem:[#allocation49_spill] sm:$0xff] }
 0x390   :  { %2319 = vmatpush1.bf16.msra.mxu0 %v6685_v28  ;;  %2360 = vmatpush1.bf16.msra.mxu1 %v9065_v2  ;;  %v9075_v28 = vld [vmem:[#allocation50_spill] sm:$0xff]  ;;  %v9076_v2 = vld [vmem:[#allocation51_spill] sm:$0xff] }
 0x391   :  { %2320 = vmatprep.subr.bf16.mxu0 %v9066_v25  ;;  %2361 = vmatprep.subr.bf16.mxu1 %v9067_v24  ;;  %v9077_v25 = vld [vmem:[#allocation52_spill] sm:$0xff]  ;;  %v9078_v24 = vld [vmem:[#allocation53_spill] sm:$0xff] }
 0x394   :  { %2321 = vmatpush1.bf16.msra.mxu0 %v9068_v55  ;;  %2362 = vmatpush1.bf16.msra.mxu1 %v9069_v41  ;;  %v9079_v55 = vld [vmem:[#allocation54_spill] sm:$0xff]  ;;  %v9080_v41 = vld [vmem:[#allocation55_spill] sm:$0xff] }
 0x395   :  { %2322 = vmatprep.subr.bf16.mxu0 %v9070_v21  ;;  %2363 = vmatprep.subr.bf16.mxu1 %v9071_v22  ;;  %v9081_v21 = vld [vmem:[#allocation56_spill] sm:$0xff]  ;;  %v9082_v22 = vld [vmem:[#allocation57_spill] sm:$0xff] }
 0x398   :  { %2323 = vmatpush1.bf16.msra.mxu0 %v9072_v23  ;;  %2364 = vmatpush1.bf16.msra.mxu1 %v9073_v1  ;;  %v9083_v23 = vld [vmem:[#allocation58_spill] sm:$0xff]  ;;  %v9084_v1 = vld [vmem:[#allocation59_spill] sm:$0xff] }
 0x399   :  { %2324 = vmatprep.subr.bf16.mxu0 %v9074_v38  ;;  %2365 = vmatprep.subr.bf16.mxu1 %v9075_v28  ;;  %v9085_v38 = vld [vmem:[#allocation60_spill] sm:$0xff]  ;;  %v9086_v28 = vld [vmem:[#allocation61_spill] sm:$0xff] }
 0x39c   :  { %2325 = vmatpush1.bf16.msra.mxu0 %v9076_v2  ;;  %2366 = vmatpush1.bf16.msra.mxu1 %v9077_v25  ;;  %v9087_v2 = vld [vmem:[#allocation62_spill] sm:$0xff]  ;;  %v9088_v25 = vld [vmem:[#allocation63_spill] sm:$0xff] }
 0x39d   :  { %2326 = vmatprep.subr.bf16.mxu0 %v9078_v24  ;;  %2367 = vmatprep.subr.bf16.mxu1 %v9079_v55  ;;  %v9089_v24 = vld [vmem:[#allocation64_spill] sm:$0xff]  ;;  %v9090_v55 = vld [vmem:[#allocation65_spill] sm:$0xff] }
 0x3a0   :  { %2327 = vmatpush1.bf16.msra.mxu0 %v9080_v41  ;;  %2368 = vmatpush1.bf16.msra.mxu1 %v9081_v21  ;;  %v9091_v41 = vld [vmem:[#allocation66_spill] sm:$0xff]  ;;  %v9092_v21 = vld [vmem:[#allocation67_spill] sm:$0xff] }
 0x3a1   :  { %2328 = vmatprep.subr.bf16.mxu0 %v9082_v22  ;;  %2369 = vmatprep.subr.bf16.mxu1 %v9083_v23  ;;  %v9093_v22 = vld [vmem:[#allocation68_spill] sm:$0xff]  ;;  %v9094_v23 = vld [vmem:[#allocation69_spill] sm:$0xff] }
 0x3a4   :  { %2329 = vmatpush1.bf16.msra.mxu0 %v9084_v1  ;;  %2370 = vmatpush1.bf16.msra.mxu1 %v9085_v38  ;;  %v9095_v1 = vld [vmem:[#allocation70_spill] sm:$0xff]  ;;  %v9096_v38 = vld [vmem:[#allocation71_spill] sm:$0xff] }
 0x3a5   :  { %2330 = vmatprep.subr.bf16.mxu0 %v9086_v28  ;;  %2371 = vmatprep.subr.bf16.mxu1 %v9087_v2  ;;  %v9097_v28 = vld [vmem:[#allocation72_spill] sm:$0xff]  ;;  %v9098_v2 = vld [vmem:[#allocation73_spill] sm:$0xff] }
 0x3a8   :  { %2331 = vmatpush1.bf16.msra.mxu0 %v9088_v25  ;;  %2372 = vmatpush1.bf16.msra.mxu1 %v9089_v24  ;;  %v9099_v25 = vld [vmem:[#allocation74_spill] sm:$0xff]  ;;  %v9100_v24 = vld [vmem:[#allocation75_spill] sm:$0xff] }
 0x3a9   :  { %2332 = vmatprep.subr.bf16.mxu0 %v9090_v55  ;;  %2373 = vmatprep.subr.bf16.mxu1 %v9091_v41  ;;  %v9101_v55 = vld [vmem:[#allocation76_spill] sm:$0xff]  ;;  %v9102_v41 = vld [vmem:[#allocation77_spill] sm:$0xff] }
 0x3ac   :  { %2333 = vmatpush1.bf16.msra.mxu0 %v9092_v21  ;;  %2374 = vmatpush1.bf16.msra.mxu1 %v9093_v22  ;;  %v9103_v21 = vld [vmem:[#allocation78_spill] sm:$0xff]  ;;  %v9104_v22 = vld [vmem:[#allocation79_spill] sm:$0xff] }
 0x3ad   :  { %2334 = vmatprep.subr.bf16.mxu0 %v9094_v23  ;;  %2375 = vmatprep.subr.bf16.mxu1 %v9095_v1  ;;  %v9105_v23 = vld [vmem:[#allocation80_spill] sm:$0xff]  ;;  %v9106_v1 = vld [vmem:[#allocation81_spill] sm:$0xff] }
 0x3b0   :  { %2335 = vmatpush1.bf16.msra.mxu0 %v9096_v38  ;;  %2376 = vmatpush1.bf16.msra.mxu1 %v9097_v28  ;;  %v9107_v38 = vld [vmem:[#allocation82_spill] sm:$0xff]  ;;  %v9108_v28 = vld [vmem:[#allocation83_spill] sm:$0xff] }
 0x3b1   :  { %2336 = vmatprep.subr.bf16.mxu0 %v9098_v2  ;;  %2377 = vmatprep.subr.bf16.mxu1 %v9099_v25  ;;  %v9109_v2 = vld [vmem:[#allocation84_spill] sm:$0xff]  ;;  %v9110_v25 = vld [vmem:[#allocation85_spill] sm:$0xff] }
 0x3b4   :  { %2337 = vmatpush1.bf16.msra.mxu0 %v9100_v24  ;;  %2378 = vmatpush1.bf16.msra.mxu1 %v9101_v55  ;;  %v9111_v24 = vld [vmem:[#allocation86_spill] sm:$0xff]  ;;  %v9112_v55 = vld [vmem:[#allocation87_spill] sm:$0xff] }
 0x3b5   :  { %2338 = vmatprep.subr.bf16.mxu0 %v9102_v41  ;;  %2379 = vmatprep.subr.bf16.mxu1 %v9103_v21  ;;  %v9113_v41 = vld [vmem:[#allocation88_spill] sm:$0xff]  ;;  %v9114_v21 = vld [vmem:[#allocation89_spill] sm:$0xff] }
 0x3b8   :  { %2339 = vmatpush1.bf16.msra.mxu0 %v9104_v22  ;;  %2380 = vmatpush1.bf16.msra.mxu1 %v9105_v23  ;;  %v9115_v22 = vld [vmem:[#allocation90_spill] sm:$0xff]  ;;  %v9116_v23 = vld [vmem:[#allocation91_spill] sm:$0xff] }
 0x3b9   :  { %2340 = vmatprep.subr.bf16.mxu0 %v9106_v1  ;;  %2381 = vmatprep.subr.bf16.mxu1 %v9107_v38  ;;  %v9117_v1 = vld [vmem:[#allocation92_spill] sm:$0xff]  ;;  %v9118_v38 = vld [vmem:[#allocation93_spill] sm:$0xff] }
 0x3bc   :  { %2341 = vmatpush1.bf16.msra.mxu0 %v9108_v28  ;;  %2382 = vmatpush1.bf16.msra.mxu1 %v9109_v2  ;;  %v9119_v28 = vld [vmem:[#allocation94_spill] sm:$0xff]  ;;  %v9120_v2 = vld [vmem:[#allocation95_spill] sm:$0xff] }
 0x3bd   :  { %2342 = vmatprep.subr.bf16.mxu0 %v9110_v25  ;;  %2383 = vmatprep.subr.bf16.mxu1 %v9111_v24  ;;  %v9121_v25 = vld [vmem:[#allocation96_spill] sm:$0xff]  ;;  %v9122_v24 = vld [vmem:[#allocation97_spill] sm:$0xff] }
 0x3c0   :  { %2343 = vmatpush1.bf16.msra.mxu0 %v9112_v55  ;;  %2384 = vmatpush1.bf16.msra.mxu1 %v9113_v41  ;;  %v9123_v55 = vld [vmem:[#allocation98_spill] sm:$0xff]  ;;  %v9124_v41 = vld [vmem:[#allocation99_spill] sm:$0xff] }
 0x3c1   :  { %2344 = vmatprep.subr.bf16.mxu0 %v9114_v21  ;;  %2385 = vmatprep.subr.bf16.mxu1 %v9115_v22  ;;  %v9125_v21 = vld [vmem:[#allocation100_spill] sm:$0xff]  ;;  %v9126_v22 = vld [vmem:[#allocation101_spill] sm:$0xff] }
 0x3c4   :  { %2345 = vmatpush1.bf16.msra.mxu0 %v9116_v23  ;;  %2386 = vmatpush1.bf16.msra.mxu1 %v9117_v1  ;;  %v9127_v23 = vld [vmem:[#allocation102_spill] sm:$0xff] }
 0x3c5   :  { %2346 = vmatprep.subr.bf16.mxu0 %v9118_v38  ;;  %2387 = vmatprep.subr.bf16.mxu1 %v9119_v28 }
 0x3c8   :  { %2347 = vmatpush1.bf16.msra.mxu0 %v9120_v2  ;;  %2388 = vmatpush1.bf16.msra.mxu1 %v9121_v25 }
 0x3c9   :  { %2348 = vmatprep.subr.bf16.mxu0 %v9122_v24  ;;  %2389 = vmatprep.subr.bf16.mxu1 %v9123_v55 }
 0x3cc   :  { %2349 = vmatpush1.bf16.msra.mxu0 %v9124_v41  ;;  %2390 = vmatpush1.bf16.msra.mxu1 %v9125_v21 }
 0x3cd   :  { %2400 = vmatprep.subr.bf16.mxu0 %v9126_v22  ;;  %2441 = vmatprep.subr.bf16.mxu1 %v9127_v23 }
 0x422   :  { %v2098_v1 = vpop.f32.mrb[24].mxu0  ;;  %v2139_v38 = vpop.f32.mrb[24].mxu1 }
 0x423   :  { %v2238_v4 = vrot.slane %v2139_v38, 6  ;;  %v2100_v28 = vpop.f32.mrb[25].mxu0  ;;  %v2141_v57 = vpop.f32.mrb[25].mxu1  ;;  %v2288_v38 = vrot.slane %v7342_v19, 7 }
 0x424   :  { %v2239_v2 = vrot.slane %v2141_v57, 6  ;;  %v2102_v0 = vpop.f32.mrb[26].mxu0  ;;  %v2143_v25 = vpop.f32.mrb[26].mxu1 }
 0x425   :  { %v2254_v24 = vadd.f32 %v2238_v4, %v7156_v6  ;;  %v2103_v62 = vpop.f32.mrb[27].mxu0  ;;  %v2144_v55 = vpop.f32.mrb[27].mxu1  ;;  %v2289_v25 = vrot.slane %v7344_v29, 7 }
 0x426   :  { %v2255_v41 = vadd.f32 %v2239_v2, %v7158_v7  ;;  %v2236_v62 = vrot.slane %v2098_v1, 6  ;;  %v2237_v55 = vrot.slane %v2100_v28, 6 }
 0x427   :  { %v2268_v40 = vmul.f32 0.5, %v2254_v24 }
 0x428   :  { %v2269_v21 = vmul.f32 0.5, %v2255_v41  ;;  %v2252_v2 = vadd.f32 %v2236_v62, %v7160_v56  ;;  %v2253_v41 = vadd.f32 %v2237_v55, %v7163_v10  ;;  %v9128_v62 = vld [vmem:[#allocation173_spill] sm:$0xff] }
 0x429   :  { %6253 = vtanh.f32 %v2268_v40 }
 0x42a   :  { %6255 = vtanh.f32 %v2269_v21  ;;  %v2260_v40 = vmul.f32 0.5, %v2252_v2  ;;  %v2261_v24 = vmul.f32 0.5, %v2253_v41 }
 0x42c   :  { %6257 = vtanh.f32 %v2260_v40 }
 0x42d   :  { %6259 = vtanh.f32 %v2261_v24 }
 0x433   :  { %v6254_v22 = vpop.eup %6253 }
 0x434   :  { %v2272_v23 = vmul.f32 0.5, %v6254_v22  ;;  %v6256_v35 = vpop.eup %6255 }
 0x435   :  { %v2273_v33 = vmul.f32 0.5, %v6256_v35 }
 0x436   :  { %v2274_v26 = vadd.f32 0.5, %v2272_v23  ;;  %v6258_v40 = vpop.eup %6257 }
 0x437   :  { %v2275_v0 = vadd.f32 0.5, %v2273_v33  ;;  %v6260_v24 = vpop.eup %6259 }
 0x438   :  { %v2292_v57 = vmul.f32 %v2288_v38, %v2274_v26 }
 0x439   :  { %v2293_v4 = vmul.f32 %v2289_v25, %v2275_v0 }
 0x462   :  { %v2180_v22 = vpop.f32.mrb[28].mxu0  ;;  %v2221_v23 = vpop.f32.mrb[28].mxu1 }
 0x463   :  { %v2240_v21 = vrot.slane %v2180_v22, 6  ;;  %v2242_v19 = vrot.slane %v2221_v23, 6  ;;  %v2182_v35 = vpop.f32.mrb[29].mxu0  ;;  %v2223_v26 = vpop.f32.mrb[29].mxu1 }
 0x464   :  { %v2241_v33 = vrot.slane %v2182_v35, 6  ;;  %v2243_v38 = vrot.slane %v2223_v26, 6  ;;  %v2184_v29 = vpop.f32.mrb[30].mxu0  ;;  %v2225_v0 = vpop.f32.mrb[30].mxu1  ;;  %v2264_v35 = vmul.f32 0.5, %v6258_v40  ;;  %v2265_v26 = vmul.f32 0.5, %v6260_v24 }
 0x465   :  { %v2256_v28 = vadd.f32 %v2240_v21, %v7180_v17  ;;  %v2185_v1 = vpop.f32.mrb[31].mxu0  ;;  %v2226_v25 = vpop.f32.mrb[31].mxu1  ;;  %v2258_v55 = vadd.f32 %v2242_v19, %v9128_v62 }
 0x466   :  { %v2257_v2 = vadd.f32 %v2241_v33, %v7182_v32  ;;  %v2259_v41 = vadd.f32 %v2243_v38, %v9035_v51  ;;  %v2266_v29 = vadd.f32 0.5, %v2264_v35  ;;  %v2267_v0 = vadd.f32 0.5, %v2265_v26 }
 0x467   :  { %6261 = vtanh.f32 %v2256_v28  ;;  %v2278_v22 = vmul.f32 0.5, %v2258_v55 }
 0x468   :  { %6263 = vtanh.f32 %v2257_v2  ;;  %v2279_v23 = vmul.f32 0.5, %v2259_v41 }
 0x469   :  { %6265 = vtanh.f32 %v2278_v22 }
 0x46a   :  { %6267 = vtanh.f32 %v2279_v23 }
 0x471   :  { %v6262_v21 = vpop.eup %6261 }
 0x472   :  { %v6264_v1 = vpop.eup %6263  ;;  %v2294_v25 = vmul.f32 %v6262_v21, %v2266_v29 }
 0x473   :  { %v2295_v19 = vmul.f32 %v6264_v1, %v2267_v0  ;;  %v6266_v38 = vpop.eup %6265  ;;  %v9129_v1 = vld [vmem:[#allocation119_spill] sm:$0xff] }
 0x474   :  { %v7492_v62 = vadd.f32 %v2294_v25, %v2292_v57  ;;  %v6268_v28 = vpop.eup %6267  ;;  %v2282_v55 = vmul.f32 0.5, %v6266_v38  ;;  %v9130_v25 = vld [vmem:[#allocation120_spill] sm:$0xff]  ;;  %v9132_v38 = vld [vmem:[#allocation122_spill] sm:$0xff] }
 0x475   :  { %v7494_v33 = vadd.f32 %v2295_v19, %v2293_v4  ;;  %v2283_v2 = vmul.f32 0.5, %v6268_v28  ;;  %v9131_v19 = vld [vmem:[#allocation121_spill] sm:$0xff]  ;;  %v9133_v28 = vld [vmem:[#allocation123_spill] sm:$0xff] }
 0x476   :  { %6269 = vtanh.f32 %v7492_v62  ;;  %v2284_v41 = vadd.f32 0.5, %v2282_v55  ;;  %v9134_v55 = vld [vmem:[#allocation124_spill] sm:$0xff] }
 0x477   :  { %6271 = vtanh.f32 %v7494_v33  ;;  %v2285_v24 = vadd.f32 0.5, %v2283_v2  ;;  %v9135_v2 = vld [vmem:[#allocation125_spill] sm:$0xff] }
 0x480   :  { %v6270_v40 = vpop.eup %6269 }
 0x481   :  { %v6272_v22 = vpop.eup %6271  ;;  %v2300_v23 = vmul.f32 %v6270_v40, %v2284_v41  ;;  %v9136_v41 = vld [vmem:[#allocation126_spill] sm:$0xff]  ;;  %v9137_v40 = vld [vmem:[#allocation127_spill] sm:$0xff] }
 0x482   :  { %v2301_v35 = vmul.f32 %v6272_v22, %v2285_v24  ;;  %v9138_v24 = vld [vmem:[#allocation128_spill] sm:$0xff] }
 0x483   :  { %v2303_v26 = vrot.slane %v2300_v23, 2  ;;  %v2310_v29 = vpack.c.bf16 %v2300_v23, %v2300_v23  ;;  %v9139_v22 = vld [vmem:[#allocation132_spill] sm:$0xff]  ;;  %v9140_v23 = vld [vmem:[#allocation150_spill] sm:$0xff] }
 0x484   :  { %v2307_v57 = vrot.slane %v2301_v35, 2  ;;  %v2311_v21 = vpack.c.bf16 %v2301_v35, %v2301_v35  ;;  %v9141_v35 = vld [vmem:[#allocation151_spill] sm:$0xff] }
 0x485   :  { %2305 = vst [vmem:[#allocation2 + $0x2] sm:$0x1] %v2303_v26  ;;  %v7498_v0 = vrot.slane %v2310_v29, 1  ;;  %v9142_v26 = vld [vmem:[#allocation152_spill] sm:$0xff]  ;;  %v9143_v29 = vld [vmem:[#allocation153_spill] sm:$0xff] }
 0x486   :  { %2309 = vst [vmem:[#allocation2 + $0xd] sm:$0x1] %v2307_v57  ;;  %v2315_v4 = vrot.slane %v2311_v21, 1  ;;  %v9144_v57 = vld [vmem:[#allocation154_spill] sm:$0xff]  ;;  %v9145_v21 = vld [vmem:[#allocation155_spill] sm:$0xff] }
 0x488   :  { %2350 = vmatprep.mubr.bf16.mxu0 %v2315_v4  ;;  %2391 = vmatprep.mubr.bf16.mxu1 %v2315_v4 }
 0x489   :  { %2351 = vmatmul.mubr.bf16.vlgmr.msra.gmra.mrb[32].mxu0 %v7498_v0  ;;  %2392 = vmatmul.mubr.bf16.vlgmr.msra.gmra.mrb[32].mxu1 %v7498_v0 }
 0x48a   :  { %2401 = vmatpush1.bf16.msra.mxu0 %v8941_v16  ;;  %2442 = vmatpush1.bf16.msra.mxu1 %v8942_v12 }
 0x48b   :  { %2432 = vmatprep.mubr.bf16.mxu0 %v2315_v4  ;;  %2473 = vmatprep.mubr.bf16.mxu1 %v2315_v4  ;;  %v9146_v4 = vld [vmem:[#allocation156_spill] sm:$0xff] }
 0x48c   :  { %2402 = vmatprep.subr.bf16.mxu0 %v8943_v15  ;;  %2443 = vmatprep.subr.bf16.mxu1 %v8944_v8 }
 0x48e   :  { %2403 = vmatpush1.bf16.msra.mxu0 %v8945_v63  ;;  %2444 = vmatpush1.bf16.msra.mxu1 %v8946_v3 }
 0x48f   :  { %2404 = vmatprep.subr.bf16.mxu0 %v8947_v13  ;;  %2445 = vmatprep.subr.bf16.mxu1 %v8948_v18 }
 0x492   :  { %2405 = vmatpush1.bf16.msra.mxu0 %v8949_v42  ;;  %2446 = vmatpush1.bf16.msra.mxu1 %v9036_v46 }
 0x493   :  { %2406 = vmatprep.subr.bf16.mxu0 %v9037_v52  ;;  %2447 = vmatprep.subr.bf16.mxu1 %v9038_v49 }
 0x496   :  { %2407 = vmatpush1.bf16.msra.mxu0 %v9039_v45  ;;  %2448 = vmatpush1.bf16.msra.mxu1 %v9040_v44 }
 0x497   :  { %2408 = vmatprep.subr.bf16.mxu0 %v9041_v37  ;;  %2449 = vmatprep.subr.bf16.mxu1 %v9042_v54 }
 0x49a   :  { %2409 = vmatpush1.bf16.msra.mxu0 %v9129_v1  ;;  %2450 = vmatpush1.bf16.msra.mxu1 %v9130_v25 }
 0x49b   :  { %2410 = vmatprep.subr.bf16.mxu0 %v9131_v19  ;;  %2451 = vmatprep.subr.bf16.mxu1 %v9132_v38 }
 0x49e   :  { %2411 = vmatpush1.bf16.msra.mxu0 %v9133_v28  ;;  %2452 = vmatpush1.bf16.msra.mxu1 %v9134_v55 }
 0x49f   :  { %2412 = vmatprep.subr.bf16.mxu0 %v9135_v2  ;;  %2453 = vmatprep.subr.bf16.mxu1 %v9136_v41 }
 0x4a2   :  { %2413 = vmatpush1.bf16.msra.mxu0 %v9137_v40  ;;  %2454 = vmatpush1.bf16.msra.mxu1 %v9138_v24 }
 0x4a3   :  { %2414 = vmatprep.subr.bf16.mxu0 %v9053_v43  ;;  %2455 = vmatprep.subr.bf16.mxu1 %v9054_v53 }
 0x4a6   :  { %2415 = vmatpush1.bf16.msra.mxu0 %v9055_v36  ;;  %2456 = vmatpush1.bf16.msra.mxu1 %v9139_v22 }
 0x4a7   :  { %2416 = vmatprep.subr.bf16.mxu0 %v9057_v60  ;;  %2457 = vmatprep.subr.bf16.mxu1 %v9058_v61 }
 0x4aa   :  { %2417 = vmatpush1.bf16.msra.mxu0 %v9059_v31  ;;  %2458 = vmatpush1.bf16.msra.mxu1 %v9060_v30 }
 0x4ab   :  { %2418 = vmatprep.subr.bf16.mxu0 %v9061_v34  ;;  %2459 = vmatprep.subr.bf16.mxu1 %v9062_v39 }
 0x4ae   :  { %2419 = vmatpush1.bf16.msra.mxu0 %v9063_v50  ;;  %2460 = vmatpush1.bf16.msra.mxu1 %v8978_v5 }
 0x4af   :  { %2420 = vmatprep.subr.bf16.mxu0 %v8979_v11  ;;  %2461 = vmatprep.subr.bf16.mxu1 %v8980_v9 }
 0x4b2   :  { %2421 = vmatpush1.bf16.msra.mxu0 %v9064_v59  ;;  %2462 = vmatpush1.bf16.msra.mxu1 %v8982_v48 }
 0x4b3   :  { %2422 = vmatprep.subr.bf16.mxu0 %v8983_v20  ;;  %2463 = vmatprep.subr.bf16.mxu1 %v8984_v14  ;;  %v9147_v14 = vld [vmem:[#allocation157_spill] sm:$0xff] }
 0x4b6   :  { %2423 = vmatpush1.bf16.msra.mxu0 %v8985_v27  ;;  %2464 = vmatpush1.bf16.msra.mxu1 %v8986_v58  ;;  %v9148_v27 = vld [vmem:[#allocation158_spill] sm:$0xff]  ;;  %v9149_v58 = vld [vmem:[#allocation159_spill] sm:$0xff] }
 0x4b7   :  { %2424 = vmatprep.subr.bf16.mxu0 %v8987_v47  ;;  %2465 = vmatprep.subr.bf16.mxu1 %v9140_v23  ;;  %v9150_v47 = vld [vmem:[#allocation160_spill] sm:$0xff]  ;;  %v9151_v23 = vld [vmem:[#allocation161_spill] sm:$0xff] }
 0x4ba   :  { %2425 = vmatpush1.bf16.msra.mxu0 %v9141_v35  ;;  %2466 = vmatpush1.bf16.msra.mxu1 %v9142_v26  ;;  %v9152_v35 = vld [vmem:[#allocation162_spill] sm:$0xff]  ;;  %v9153_v26 = vld [vmem:[#allocation163_spill] sm:$0xff] }
 0x4bb   :  { %2426 = vmatprep.subr.bf16.mxu0 %v9143_v29  ;;  %2467 = vmatprep.subr.bf16.mxu1 %v9144_v57  ;;  %v9154_v29 = vld [vmem:[#allocation164_spill] sm:$0xff]  ;;  %v9155_v57 = vld [vmem:[#allocation37_spill] sm:$0xff] }
 0x4be   :  { %2427 = vmatpush1.bf16.msra.mxu0 %v9145_v21  ;;  %2468 = vmatpush1.bf16.msra.mxu1 %v9146_v4  ;;  %v9156_v21 = vld [vmem:[#allocation38_spill] sm:$0xff] }
 0x4bf   :  { %2428 = vmatprep.subr.bf16.mxu0 %v9147_v14  ;;  %2469 = vmatprep.subr.bf16.mxu1 %v9148_v27  ;;  %v9157_v27 = vld [vmem:[#allocation39_spill] sm:$0xff]  ;;  %v9166_v14 = vld [vmem:[#allocation48_spill] sm:$0xff] }
 0x4c2   :  { %2429 = vmatpush1.bf16.msra.mxu0 %v9149_v58  ;;  %2470 = vmatpush1.bf16.msra.mxu1 %v9150_v47  ;;  %v9158_v58 = vld [vmem:[#allocation40_spill] sm:$0xff]  ;;  %v9159_v47 = vld [vmem:[#allocation41_spill] sm:$0xff] }
 0x4c3   :  { %2430 = vmatprep.subr.bf16.mxu0 %v9151_v23  ;;  %2471 = vmatprep.subr.bf16.mxu1 %v9152_v35  ;;  %v9160_v23 = vld [vmem:[#allocation42_spill] sm:$0xff]  ;;  %v9161_v35 = vld [vmem:[#allocation43_spill] sm:$0xff] }
 0x4c6   :  { %2431 = vmatpush1.bf16.msra.mxu0 %v9153_v26  ;;  %2472 = vmatpush1.bf16.msra.mxu1 %v9154_v29  ;;  %v9162_v26 = vld [vmem:[#allocation44_spill] sm:$0xff]  ;;  %v9163_v29 = vld [vmem:[#allocation45_spill] sm:$0xff] }
 0x4c7   :  { %2576 = vmatprep.subr.bf16.mxu0 %v9155_v57  ;;  %2617 = vmatprep.subr.bf16.mxu1 %v9156_v21  ;;  %v9164_v57 = vld [vmem:[#allocation46_spill] sm:$0xff]  ;;  %v9165_v21 = vld [vmem:[#allocation47_spill] sm:$0xff] }
 0x4c9   :  { %2433 = vmatmul.mubr.bf16.vlgmr.msra.gmra.mrb[36].mxu0 %v7498_v0  ;;  %2474 = vmatmul.mubr.bf16.vlgmr.msra.gmra.mrb[36].mxu1 %v7498_v0  ;;  %v9167_v0 = vld [vmem:[#allocation49_spill] sm:$0xff] }
 0x4ca   :  { %2577 = vmatpush1.bf16.msra.mxu0 %v9157_v27  ;;  %2618 = vmatpush1.bf16.msra.mxu1 %v9158_v58  ;;  %v9168_v27 = vld [vmem:[#allocation50_spill] sm:$0xff]  ;;  %v9169_v58 = vld [vmem:[#allocation51_spill] sm:$0xff] }
 0x4cb   :  { %2578 = vmatprep.subr.bf16.mxu0 %v9159_v47  ;;  %2619 = vmatprep.subr.bf16.mxu1 %v9160_v23  ;;  %v9170_v47 = vld [vmem:[#allocation52_spill] sm:$0xff]  ;;  %v9171_v23 = vld [vmem:[#allocation53_spill] sm:$0xff] }
 0x4ce   :  { %2579 = vmatpush1.bf16.msra.mxu0 %v9161_v35  ;;  %2620 = vmatpush1.bf16.msra.mxu1 %v9162_v26  ;;  %v9172_v35 = vld [vmem:[#allocation54_spill] sm:$0xff]  ;;  %v9173_v26 = vld [vmem:[#allocation55_spill] sm:$0xff] }
 0x4cf   :  { %2580 = vmatprep.subr.bf16.mxu0 %v9163_v29  ;;  %2621 = vmatprep.subr.bf16.mxu1 %v9164_v57  ;;  %v9174_v29 = vld [vmem:[#allocation56_spill] sm:$0xff]  ;;  %v9175_v57 = vld [vmem:[#allocation57_spill] sm:$0xff] }
 0x4d2   :  { %2581 = vmatpush1.bf16.msra.mxu0 %v9165_v21  ;;  %2622 = vmatpush1.bf16.msra.mxu1 %v9166_v14  ;;  %v9176_v21 = vld [vmem:[#allocation58_spill] sm:$0xff]  ;;  %v9177_v14 = vld [vmem:[#allocation59_spill] sm:$0xff] }
 0x4d3   :  { %2582 = vmatprep.subr.bf16.mxu0 %v9167_v0  ;;  %2623 = vmatprep.subr.bf16.mxu1 %v9168_v27  ;;  %v9178_v0 = vld [vmem:[#allocation60_spill] sm:$0xff]  ;;  %v9179_v27 = vld [vmem:[#allocation61_spill] sm:$0xff] }
 0x4d6   :  { %2583 = vmatpush1.bf16.msra.mxu0 %v9169_v58  ;;  %2624 = vmatpush1.bf16.msra.mxu1 %v9170_v47  ;;  %v9180_v58 = vld [vmem:[#allocation62_spill] sm:$0xff]  ;;  %v9181_v47 = vld [vmem:[#allocation63_spill] sm:$0xff] }
 0x4d7   :  { %2584 = vmatprep.subr.bf16.mxu0 %v9171_v23  ;;  %2625 = vmatprep.subr.bf16.mxu1 %v9172_v35  ;;  %v9182_v23 = vld [vmem:[#allocation64_spill] sm:$0xff]  ;;  %v9183_v35 = vld [vmem:[#allocation65_spill] sm:$0xff] }
 0x4da   :  { %2585 = vmatpush1.bf16.msra.mxu0 %v9173_v26  ;;  %2626 = vmatpush1.bf16.msra.mxu1 %v9174_v29  ;;  %v9184_v26 = vld [vmem:[#allocation66_spill] sm:$0xff]  ;;  %v9185_v29 = vld [vmem:[#allocation67_spill] sm:$0xff] }
 0x4db   :  { %2586 = vmatprep.subr.bf16.mxu0 %v9175_v57  ;;  %2627 = vmatprep.subr.bf16.mxu1 %v9176_v21  ;;  %v9186_v57 = vld [vmem:[#allocation68_spill] sm:$0xff]  ;;  %v9187_v21 = vld [vmem:[#allocation69_spill] sm:$0xff] }
 0x4de   :  { %2587 = vmatpush1.bf16.msra.mxu0 %v9177_v14  ;;  %2628 = vmatpush1.bf16.msra.mxu1 %v9178_v0  ;;  %v9188_v14 = vld [vmem:[#allocation70_spill] sm:$0xff]  ;;  %v9189_v0 = vld [vmem:[#allocation71_spill] sm:$0xff] }
 0x4df   :  { %2588 = vmatprep.subr.bf16.mxu0 %v9179_v27  ;;  %2629 = vmatprep.subr.bf16.mxu1 %v9180_v58  ;;  %v9190_v27 = vld [vmem:[#allocation72_spill] sm:$0xff]  ;;  %v9191_v58 = vld [vmem:[#allocation73_spill] sm:$0xff] }
 0x4e2   :  { %2589 = vmatpush1.bf16.msra.mxu0 %v9181_v47  ;;  %2630 = vmatpush1.bf16.msra.mxu1 %v9182_v23  ;;  %v9192_v47 = vld [vmem:[#allocation74_spill] sm:$0xff]  ;;  %v9193_v23 = vld [vmem:[#allocation75_spill] sm:$0xff] }
 0x4e3   :  { %2590 = vmatprep.subr.bf16.mxu0 %v9183_v35  ;;  %2631 = vmatprep.subr.bf16.mxu1 %v9184_v26  ;;  %v9194_v35 = vld [vmem:[#allocation76_spill] sm:$0xff]  ;;  %v9195_v26 = vld [vmem:[#allocation77_spill] sm:$0xff] }
 0x4e6   :  { %2591 = vmatpush1.bf16.msra.mxu0 %v9185_v29  ;;  %2632 = vmatpush1.bf16.msra.mxu1 %v9186_v57  ;;  %v9196_v29 = vld [vmem:[#allocation78_spill] sm:$0xff]  ;;  %v9197_v57 = vld [vmem:[#allocation79_spill] sm:$0xff] }
 0x4e7   :  { %2592 = vmatprep.subr.bf16.mxu0 %v9187_v21  ;;  %2633 = vmatprep.subr.bf16.mxu1 %v9188_v14  ;;  %v9198_v21 = vld [vmem:[#allocation80_spill] sm:$0xff]  ;;  %v9199_v14 = vld [vmem:[#allocation81_spill] sm:$0xff] }
 0x4ea   :  { %2593 = vmatpush1.bf16.msra.mxu0 %v9189_v0  ;;  %2634 = vmatpush1.bf16.msra.mxu1 %v9190_v27  ;;  %v9200_v0 = vld [vmem:[#allocation82_spill] sm:$0xff]  ;;  %v9201_v27 = vld [vmem:[#allocation83_spill] sm:$0xff] }
 0x4eb   :  { %2594 = vmatprep.subr.bf16.mxu0 %v9191_v58  ;;  %2635 = vmatprep.subr.bf16.mxu1 %v9192_v47  ;;  %v9202_v58 = vld [vmem:[#allocation84_spill] sm:$0xff]  ;;  %v9203_v47 = vld [vmem:[#allocation85_spill] sm:$0xff] }
 0x4ee   :  { %2595 = vmatpush1.bf16.msra.mxu0 %v9193_v23  ;;  %2636 = vmatpush1.bf16.msra.mxu1 %v9194_v35  ;;  %v9204_v23 = vld [vmem:[#allocation86_spill] sm:$0xff]  ;;  %v9205_v35 = vld [vmem:[#allocation87_spill] sm:$0xff] }
 0x4ef   :  { %2596 = vmatprep.subr.bf16.mxu0 %v9195_v26  ;;  %2637 = vmatprep.subr.bf16.mxu1 %v9196_v29  ;;  %v9206_v26 = vld [vmem:[#allocation88_spill] sm:$0xff]  ;;  %v9207_v29 = vld [vmem:[#allocation89_spill] sm:$0xff] }
 0x4f2   :  { %2597 = vmatpush1.bf16.msra.mxu0 %v9197_v57  ;;  %2638 = vmatpush1.bf16.msra.mxu1 %v9198_v21  ;;  %v9208_v57 = vld [vmem:[#allocation90_spill] sm:$0xff]  ;;  %v9209_v21 = vld [vmem:[#allocation91_spill] sm:$0xff] }
 0x4f3   :  { %2598 = vmatprep.subr.bf16.mxu0 %v9199_v14  ;;  %2639 = vmatprep.subr.bf16.mxu1 %v9200_v0  ;;  %v9210_v14 = vld [vmem:[#allocation92_spill] sm:$0xff]  ;;  %v9211_v0 = vld [vmem:[#allocation93_spill] sm:$0xff] }
 0x4f6   :  { %2599 = vmatpush1.bf16.msra.mxu0 %v9201_v27  ;;  %2640 = vmatpush1.bf16.msra.mxu1 %v9202_v58  ;;  %v9212_v27 = vld [vmem:[#allocation94_spill] sm:$0xff]  ;;  %v9213_v58 = vld [vmem:[#allocation95_spill] sm:$0xff] }
 0x4f7   :  { %2600 = vmatprep.subr.bf16.mxu0 %v9203_v47  ;;  %2641 = vmatprep.subr.bf16.mxu1 %v9204_v23  ;;  %v9214_v47 = vld [vmem:[#allocation96_spill] sm:$0xff]  ;;  %v9215_v23 = vld [vmem:[#allocation97_spill] sm:$0xff] }
 0x4fa   :  { %2601 = vmatpush1.bf16.msra.mxu0 %v9205_v35  ;;  %2642 = vmatpush1.bf16.msra.mxu1 %v9206_v26  ;;  %v9216_v35 = vld [vmem:[#allocation98_spill] sm:$0xff]  ;;  %v9217_v26 = vld [vmem:[#allocation99_spill] sm:$0xff] }
 0x4fb   :  { %2602 = vmatprep.subr.bf16.mxu0 %v9207_v29  ;;  %2643 = vmatprep.subr.bf16.mxu1 %v9208_v57  ;;  %v9218_v29 = vld [vmem:[#allocation100_spill] sm:$0xff]  ;;  %v9219_v57 = vld [vmem:[#allocation101_spill] sm:$0xff] }
 0x4fe   :  { %2603 = vmatpush1.bf16.msra.mxu0 %v9209_v21  ;;  %2644 = vmatpush1.bf16.msra.mxu1 %v9210_v14  ;;  %v9220_v21 = vld [vmem:[#allocation102_spill] sm:$0xff] }
 0x4ff   :  { %2604 = vmatprep.subr.bf16.mxu0 %v9211_v0  ;;  %2645 = vmatprep.subr.bf16.mxu1 %v9212_v27 }
 0x502   :  { %2605 = vmatpush1.bf16.msra.mxu0 %v9213_v58  ;;  %2646 = vmatpush1.bf16.msra.mxu1 %v9214_v47 }
 0x503   :  { %2606 = vmatprep.subr.bf16.mxu0 %v9215_v23  ;;  %2647 = vmatprep.subr.bf16.mxu1 %v9216_v35 }
 0x506   :  { %2607 = vmatpush1.bf16.msra.mxu0 %v9217_v26  ;;  %2648 = vmatpush1.bf16.msra.mxu1 %v9218_v29 }
 0x507   :  { %2658 = vmatprep.subr.bf16.mxu0 %v9219_v57  ;;  %2699 = vmatprep.subr.bf16.mxu1 %v9220_v21 }
 0x55c   :  { %v2352_v14 = vpop.f32.mrb[32].mxu0  ;;  %v2393_v0 = vpop.f32.mrb[32].mxu1 }
 0x55d   :  { %v2492_v4 = vrot.slane %v2393_v0, 5  ;;  %v2354_v27 = vpop.f32.mrb[33].mxu0  ;;  %v2395_v20 = vpop.f32.mrb[33].mxu1  ;;  %v2542_v0 = vrot.slane %v7492_v62, 7 }
 0x55e   :  { %v2493_v58 = vrot.slane %v2395_v20, 5  ;;  %v2356_v48 = vpop.f32.mrb[34].mxu0  ;;  %v2397_v47 = vpop.f32.mrb[34].mxu1 }
 0x55f   :  { %v2508_v23 = vadd.f32 %v2492_v4, %v7156_v6  ;;  %v2357_v59 = vpop.f32.mrb[35].mxu0  ;;  %v2398_v35 = vpop.f32.mrb[35].mxu1  ;;  %v2543_v47 = vrot.slane %v7494_v33, 7 }
 0x560   :  { %v2509_v26 = vadd.f32 %v2493_v58, %v7158_v7  ;;  %v2490_v59 = vrot.slane %v2352_v14, 5  ;;  %v2491_v35 = vrot.slane %v2354_v27, 5 }
 0x561   :  { %v2522_v9 = vmul.f32 0.5, %v2508_v23 }
 0x562   :  { %v2523_v29 = vmul.f32 0.5, %v2509_v26  ;;  %v2506_v58 = vadd.f32 %v2490_v59, %v7160_v56  ;;  %v2507_v23 = vadd.f32 %v2491_v35, %v7163_v10  ;;  %v9221_v59 = vld [vmem:[#allocation173_spill] sm:$0xff] }
 0x563   :  { %6273 = vtanh.f32 %v2522_v9 }
 0x564   :  { %6275 = vtanh.f32 %v2523_v29  ;;  %v2514_v9 = vmul.f32 0.5, %v2506_v58  ;;  %v2515_v26 = vmul.f32 0.5, %v2507_v23 }
 0x566   :  { %6277 = vtanh.f32 %v2514_v9 }
 0x567   :  { %6279 = vtanh.f32 %v2515_v26 }
 0x56d   :  { %v6274_v57 = vpop.eup %6273 }
 0x56e   :  { %v2526_v21 = vmul.f32 0.5, %v6274_v57  ;;  %v6276_v11 = vpop.eup %6275 }
 0x56f   :  { %v2527_v50 = vmul.f32 0.5, %v6276_v11 }
 0x570   :  { %v2528_v5 = vadd.f32 0.5, %v2526_v21  ;;  %v6278_v9 = vpop.eup %6277 }
 0x571   :  { %v2529_v48 = vadd.f32 0.5, %v2527_v50  ;;  %v6280_v26 = vpop.eup %6279 }
 0x572   :  { %v2546_v20 = vmul.f32 %v2542_v0, %v2528_v5 }
 0x573   :  { %v2547_v4 = vmul.f32 %v2543_v47, %v2529_v48 }
 0x59c   :  { %v2434_v29 = vpop.f32.mrb[36].mxu0  ;;  %v2475_v57 = vpop.f32.mrb[36].mxu1 }
 0x59d   :  { %v2494_v21 = vrot.slane %v2434_v29, 5  ;;  %v2496_v62 = vrot.slane %v2475_v57, 5  ;;  %v2436_v11 = vpop.f32.mrb[37].mxu0  ;;  %v2477_v5 = vpop.f32.mrb[37].mxu1 }
 0x59e   :  { %v2495_v50 = vrot.slane %v2436_v11, 5  ;;  %v2497_v0 = vrot.slane %v2477_v5, 5  ;;  %v2438_v33 = vpop.f32.mrb[38].mxu0  ;;  %v2479_v48 = vpop.f32.mrb[38].mxu1  ;;  %v2518_v11 = vmul.f32 0.5, %v6278_v9  ;;  %v2519_v5 = vmul.f32 0.5, %v6280_v26 }
 0x59f   :  { %v2510_v14 = vadd.f32 %v2494_v21, %v7180_v17  ;;  %v2439_v27 = vpop.f32.mrb[39].mxu0  ;;  %v2480_v47 = vpop.f32.mrb[39].mxu1  ;;  %v2512_v35 = vadd.f32 %v2496_v62, %v9221_v59 }
 0x5a0   :  { %v2511_v58 = vadd.f32 %v2495_v50, %v7182_v32  ;;  %v2513_v23 = vadd.f32 %v2497_v0, %v9035_v51  ;;  %v2520_v33 = vadd.f32 0.5, %v2518_v11  ;;  %v2521_v48 = vadd.f32 0.5, %v2519_v5 }
 0x5a1   :  { %6281 = vtanh.f32 %v2510_v14  ;;  %v2532_v29 = vmul.f32 0.5, %v2512_v35 }
 0x5a2   :  { %6283 = vtanh.f32 %v2511_v58  ;;  %v2533_v57 = vmul.f32 0.5, %v2513_v23 }
 0x5a3   :  { %6285 = vtanh.f32 %v2532_v29 }
 0x5a4   :  { %6287 = vtanh.f32 %v2533_v57 }
 0x5ab   :  { %v6282_v21 = vpop.eup %6281 }
 0x5ac   :  { %v6284_v27 = vpop.eup %6283  ;;  %v2548_v47 = vmul.f32 %v6282_v21, %v2520_v33 }
 0x5ad   :  { %v2549_v62 = vmul.f32 %v6284_v27, %v2521_v48  ;;  %v6286_v0 = vpop.eup %6285 }
 0x5ae   :  { %v7642_v59 = vadd.f32 %v2548_v47, %v2546_v20  ;;  %v6288_v14 = vpop.eup %6287  ;;  %v2536_v35 = vmul.f32 0.5, %v6286_v0  ;;  %v9223_v0 = vld [vmem:[#allocation140_spill] sm:$0xff] }
 0x5af   :  { %v7644_v50 = vadd.f32 %v2549_v62, %v2547_v4  ;;  %v2537_v58 = vmul.f32 0.5, %v6288_v14  ;;  %v9222_v62 = vld [vmem:[#allocation139_spill] sm:$0xff]  ;;  %v9224_v14 = vld [vmem:[#allocation141_spill] sm:$0xff] }
 0x5b0   :  { %6289 = vtanh.f32 %v7642_v59  ;;  %v2538_v23 = vadd.f32 0.5, %v2536_v35  ;;  %v9225_v35 = vld [vmem:[#allocation142_spill] sm:$0xff] }
 0x5b1   :  { %6291 = vtanh.f32 %v7644_v50  ;;  %v2539_v26 = vadd.f32 0.5, %v2537_v58  ;;  %v9226_v58 = vld [vmem:[#allocation143_spill] sm:$0xff] }
 0x5ba   :  { %v6290_v9 = vpop.eup %6289 }
 0x5bb   :  { %v6292_v29 = vpop.eup %6291  ;;  %v2554_v57 = vmul.f32 %v6290_v9, %v2538_v23  ;;  %v9227_v23 = vld [vmem:[#allocation144_spill] sm:$0xff]  ;;  %v9228_v9 = vld [vmem:[#allocation145_spill] sm:$0xff] }
 0x5bc   :  { %v2555_v11 = vmul.f32 %v6292_v29, %v2539_v26  ;;  %v9229_v26 = vld [vmem:[#allocation146_spill] sm:$0xff]  ;;  %v9230_v29 = vld [vmem:[#allocation147_spill] sm:$0xff] }
 0x5bd   :  { %v2557_v5 = vrot.slane %v2554_v57, 3  ;;  %v2564_v33 = vpack.c.bf16 %v2554_v57, %v2554_v57  ;;  %v9231_v57 = vld [vmem:[#allocation148_spill] sm:$0xff] }
 0x5be   :  { %v2561_v20 = vrot.slane %v2555_v11, 3  ;;  %v2565_v21 = vpack.c.bf16 %v2555_v11, %v2555_v11  ;;  %v9232_v11 = vld [vmem:[#allocation149_spill] sm:$0xff] }
 0x5bf   :  { %2559 = vst [vmem:[#allocation2 + $0x3] sm:$0x1] %v2557_v5  ;;  %v2567_v4 = vshrl.u32 %v2564_v33, 16  ;;  %v9233_v5 = vld [vmem:[#allocation150_spill] sm:$0xff]  ;;  %v9234_v33 = vld [vmem:[#allocation151_spill] sm:$0xff] }
 0x5c0   :  { %2563 = vst [vmem:[#allocation2 + $0xc] sm:$0x1] %v2561_v20  ;;  %v2571_v48 = vshrl.u32 %v2565_v21, 16  ;;  %v9235_v20 = vld [vmem:[#allocation152_spill] sm:$0xff]  ;;  %v9236_v21 = vld [vmem:[#allocation153_spill] sm:$0xff] }
 0x5c1   :  { %v7648_v47 = vrot.slane %v2567_v4, 1  ;;  %v9237_v4 = vld [vmem:[#allocation154_spill] sm:$0xff] }
 0x5c2   :  { %v2573_v27 = vrot.slane %v2571_v48, 1  ;;  %v9238_v48 = vld [vmem:[#allocation155_spill] sm:$0xff] }
 0x5c4   :  { %2608 = vmatprep.mubr.bf16.mxu0 %v2573_v27  ;;  %2649 = vmatprep.mubr.bf16.mxu1 %v2573_v27 }
 0x5c5   :  { %2609 = vmatmul.mubr.bf16.vlgmr.msra.gmra.mrb[40].mxu0 %v7648_v47  ;;  %2650 = vmatmul.mubr.bf16.vlgmr.msra.gmra.mrb[40].mxu1 %v7648_v47 }
 0x5c6   :  { %2659 = vmatpush1.bf16.msra.mxu0 %v8941_v16  ;;  %2700 = vmatpush1.bf16.msra.mxu1 %v8942_v12 }
 0x5c7   :  { %2690 = vmatprep.mubr.bf16.mxu0 %v2573_v27  ;;  %2731 = vmatprep.mubr.bf16.mxu1 %v2573_v27  ;;  %v9239_v27 = vld [vmem:[#allocation156_spill] sm:$0xff] }
 0x5c8   :  { %2660 = vmatprep.subr.bf16.mxu0 %v8943_v15  ;;  %2701 = vmatprep.subr.bf16.mxu1 %v8944_v8 }
 0x5ca   :  { %2661 = vmatpush1.bf16.msra.mxu0 %v8945_v63  ;;  %2702 = vmatpush1.bf16.msra.mxu1 %v8946_v3 }
 0x5cb   :  { %2662 = vmatprep.subr.bf16.mxu0 %v8947_v13  ;;  %2703 = vmatprep.subr.bf16.mxu1 %v8948_v18 }
 0x5ce   :  { %2663 = vmatpush1.bf16.msra.mxu0 %v8949_v42  ;;  %2704 = vmatpush1.bf16.msra.mxu1 %v9036_v46 }
 0x5cf   :  { %2664 = vmatprep.subr.bf16.mxu0 %v9037_v52  ;;  %2705 = vmatprep.subr.bf16.mxu1 %v9038_v49 }
 0x5d2   :  { %2665 = vmatpush1.bf16.msra.mxu0 %v9039_v45  ;;  %2706 = vmatpush1.bf16.msra.mxu1 %v9040_v44 }
 0x5d3   :  { %2666 = vmatprep.subr.bf16.mxu0 %v9041_v37  ;;  %2707 = vmatprep.subr.bf16.mxu1 %v9042_v54 }
 0x5d6   :  { %2667 = vmatpush1.bf16.msra.mxu0 %v9129_v1  ;;  %2708 = vmatpush1.bf16.msra.mxu1 %v9130_v25 }
 0x5d7   :  { %2668 = vmatprep.subr.bf16.mxu0 %v9131_v19  ;;  %2709 = vmatprep.subr.bf16.mxu1 %v9132_v38 }
 0x5da   :  { %2669 = vmatpush1.bf16.msra.mxu0 %v9133_v28  ;;  %2710 = vmatpush1.bf16.msra.mxu1 %v9134_v55 }
 0x5db   :  { %2670 = vmatprep.subr.bf16.mxu0 %v9135_v2  ;;  %2711 = vmatprep.subr.bf16.mxu1 %v9136_v41 }
 0x5de   :  { %2671 = vmatpush1.bf16.msra.mxu0 %v9137_v40  ;;  %2712 = vmatpush1.bf16.msra.mxu1 %v9138_v24 }
 0x5df   :  { %2672 = vmatprep.subr.bf16.mxu0 %v9053_v43  ;;  %2713 = vmatprep.subr.bf16.mxu1 %v9054_v53 }
 0x5e2   :  { %2673 = vmatpush1.bf16.msra.mxu0 %v9055_v36  ;;  %2714 = vmatpush1.bf16.msra.mxu1 %v9139_v22 }
 0x5e3   :  { %2674 = vmatprep.subr.bf16.mxu0 %v9057_v60  ;;  %2715 = vmatprep.subr.bf16.mxu1 %v9058_v61 }
 0x5e6   :  { %2675 = vmatpush1.bf16.msra.mxu0 %v9059_v31  ;;  %2716 = vmatpush1.bf16.msra.mxu1 %v9060_v30 }
 0x5e7   :  { %2676 = vmatprep.subr.bf16.mxu0 %v9061_v34  ;;  %2717 = vmatprep.subr.bf16.mxu1 %v9062_v39 }
 0x5ea   :  { %2677 = vmatpush1.bf16.msra.mxu0 %v9222_v62  ;;  %2718 = vmatpush1.bf16.msra.mxu1 %v9223_v0 }
 0x5eb   :  { %2678 = vmatprep.subr.bf16.mxu0 %v9224_v14  ;;  %2719 = vmatprep.subr.bf16.mxu1 %v9225_v35 }
 0x5ee   :  { %2679 = vmatpush1.bf16.msra.mxu0 %v9226_v58  ;;  %2720 = vmatpush1.bf16.msra.mxu1 %v9227_v23 }
 0x5ef   :  { %2680 = vmatprep.subr.bf16.mxu0 %v9228_v9  ;;  %2721 = vmatprep.subr.bf16.mxu1 %v9229_v26  ;;  %v9240_v26 = vld [vmem:[#allocation157_spill] sm:$0xff] }
 0x5f2   :  { %2681 = vmatpush1.bf16.msra.mxu0 %v9230_v29  ;;  %2722 = vmatpush1.bf16.msra.mxu1 %v9231_v57  ;;  %v9241_v29 = vld [vmem:[#allocation158_spill] sm:$0xff]  ;;  %v9242_v57 = vld [vmem:[#allocation159_spill] sm:$0xff] }
 0x5f3   :  { %2682 = vmatprep.subr.bf16.mxu0 %v9232_v11  ;;  %2723 = vmatprep.subr.bf16.mxu1 %v9233_v5  ;;  %v9243_v11 = vld [vmem:[#allocation160_spill] sm:$0xff]  ;;  %v9244_v5 = vld [vmem:[#allocation161_spill] sm:$0xff] }
 0x5f6   :  { %2683 = vmatpush1.bf16.msra.mxu0 %v9234_v33  ;;  %2724 = vmatpush1.bf16.msra.mxu1 %v9235_v20  ;;  %v9245_v33 = vld [vmem:[#allocation162_spill] sm:$0xff]  ;;  %v9246_v20 = vld [vmem:[#allocation163_spill] sm:$0xff] }
 0x5f7   :  { %2684 = vmatprep.subr.bf16.mxu0 %v9236_v21  ;;  %2725 = vmatprep.subr.bf16.mxu1 %v9237_v4  ;;  %v9247_v21 = vld [vmem:[#allocation164_spill] sm:$0xff]  ;;  %v9248_v4 = vld [vmem:[#allocation37_spill] sm:$0xff] }
 0x5fa   :  { %2685 = vmatpush1.bf16.msra.mxu0 %v9238_v48  ;;  %2726 = vmatpush1.bf16.msra.mxu1 %v9239_v27  ;;  %v9249_v48 = vld [vmem:[#allocation38_spill] sm:$0xff] }
 0x5fb   :  { %2686 = vmatprep.subr.bf16.mxu0 %v9240_v26  ;;  %2727 = vmatprep.subr.bf16.mxu1 %v9241_v29  ;;  %v9250_v29 = vld [vmem:[#allocation39_spill] sm:$0xff]  ;;  %v9259_v26 = vld [vmem:[#allocation48_spill] sm:$0xff] }
 0x5fe   :  { %2687 = vmatpush1.bf16.msra.mxu0 %v9242_v57  ;;  %2728 = vmatpush1.bf16.msra.mxu1 %v9243_v11  ;;  %v9251_v57 = vld [vmem:[#allocation40_spill] sm:$0xff]  ;;  %v9252_v11 = vld [vmem:[#allocation41_spill] sm:$0xff] }
 0x5ff   :  { %2688 = vmatprep.subr.bf16.mxu0 %v9244_v5  ;;  %2729 = vmatprep.subr.bf16.mxu1 %v9245_v33  ;;  %v9253_v5 = vld [vmem:[#allocation42_spill] sm:$0xff]  ;;  %v9254_v33 = vld [vmem:[#allocation43_spill] sm:$0xff] }
 0x602   :  { %2689 = vmatpush1.bf16.msra.mxu0 %v9246_v20  ;;  %2730 = vmatpush1.bf16.msra.mxu1 %v9247_v21  ;;  %v9255_v20 = vld [vmem:[#allocation44_spill] sm:$0xff]  ;;  %v9256_v21 = vld [vmem:[#allocation45_spill] sm:$0xff] }
 0x603   :  { %2830 = vmatprep.subr.bf16.mxu0 %v9248_v4  ;;  %2871 = vmatprep.subr.bf16.mxu1 %v9249_v48  ;;  %v9257_v4 = vld [vmem:[#allocation46_spill] sm:$0xff]  ;;  %v9258_v48 = vld [vmem:[#allocation47_spill] sm:$0xff] }
 0x605   :  { %2691 = vmatmul.mubr.bf16.vlgmr.msra.gmra.mrb[44].mxu0 %v7648_v47  ;;  %2732 = vmatmul.mubr.bf16.vlgmr.msra.gmra.mrb[44].mxu1 %v7648_v47  ;;  %v9260_v47 = vld [vmem:[#allocation49_spill] sm:$0xff] }
 0x606   :  { %2831 = vmatpush1.bf16.msra.mxu0 %v9250_v29  ;;  %2872 = vmatpush1.bf16.msra.mxu1 %v9251_v57  ;;  %v9261_v29 = vld [vmem:[#allocation50_spill] sm:$0xff]  ;;  %v9262_v57 = vld [vmem:[#allocation51_spill] sm:$0xff] }
 0x607   :  { %2832 = vmatprep.subr.bf16.mxu0 %v9252_v11  ;;  %2873 = vmatprep.subr.bf16.mxu1 %v9253_v5  ;;  %v9263_v11 = vld [vmem:[#allocation52_spill] sm:$0xff]  ;;  %v9264_v5 = vld [vmem:[#allocation53_spill] sm:$0xff] }
 0x60a   :  { %2833 = vmatpush1.bf16.msra.mxu0 %v9254_v33  ;;  %2874 = vmatpush1.bf16.msra.mxu1 %v9255_v20  ;;  %v9265_v33 = vld [vmem:[#allocation54_spill] sm:$0xff]  ;;  %v9266_v20 = vld [vmem:[#allocation55_spill] sm:$0xff] }
 0x60b   :  { %2834 = vmatprep.subr.bf16.mxu0 %v9256_v21  ;;  %2875 = vmatprep.subr.bf16.mxu1 %v9257_v4  ;;  %v9267_v21 = vld [vmem:[#allocation56_spill] sm:$0xff]  ;;  %v9268_v4 = vld [vmem:[#allocation57_spill] sm:$0xff] }
 0x60e   :  { %2835 = vmatpush1.bf16.msra.mxu0 %v9258_v48  ;;  %2876 = vmatpush1.bf16.msra.mxu1 %v9259_v26  ;;  %v9269_v48 = vld [vmem:[#allocation58_spill] sm:$0xff]  ;;  %v9270_v26 = vld [vmem:[#allocation59_spill] sm:$0xff] }
 0x60f   :  { %2836 = vmatprep.subr.bf16.mxu0 %v9260_v47  ;;  %2877 = vmatprep.subr.bf16.mxu1 %v9261_v29  ;;  %v9271_v47 = vld [vmem:[#allocation60_spill] sm:$0xff]  ;;  %v9272_v29 = vld [vmem:[#allocation61_spill] sm:$0xff] }
 0x612   :  { %2837 = vmatpush1.bf16.msra.mxu0 %v9262_v57  ;;  %2878 = vmatpush1.bf16.msra.mxu1 %v9263_v11  ;;  %v9273_v57 = vld [vmem:[#allocation62_spill] sm:$0xff]  ;;  %v9274_v11 = vld [vmem:[#allocation63_spill] sm:$0xff] }
 0x613   :  { %2838 = vmatprep.subr.bf16.mxu0 %v9264_v5  ;;  %2879 = vmatprep.subr.bf16.mxu1 %v9265_v33  ;;  %v9275_v5 = vld [vmem:[#allocation64_spill] sm:$0xff]  ;;  %v9276_v33 = vld [vmem:[#allocation65_spill] sm:$0xff] }
 0x616   :  { %2839 = vmatpush1.bf16.msra.mxu0 %v9266_v20  ;;  %2880 = vmatpush1.bf16.msra.mxu1 %v9267_v21  ;;  %v9277_v20 = vld [vmem:[#allocation66_spill] sm:$0xff]  ;;  %v9278_v21 = vld [vmem:[#allocation67_spill] sm:$0xff] }
 0x617   :  { %2840 = vmatprep.subr.bf16.mxu0 %v9268_v4  ;;  %2881 = vmatprep.subr.bf16.mxu1 %v9269_v48  ;;  %v9279_v4 = vld [vmem:[#allocation68_spill] sm:$0xff]  ;;  %v9280_v48 = vld [vmem:[#allocation69_spill] sm:$0xff] }
 0x61a   :  { %2841 = vmatpush1.bf16.msra.mxu0 %v9270_v26  ;;  %2882 = vmatpush1.bf16.msra.mxu1 %v9271_v47  ;;  %v9281_v26 = vld [vmem:[#allocation70_spill] sm:$0xff]  ;;  %v9282_v47 = vld [vmem:[#allocation71_spill] sm:$0xff] }
 0x61b   :  { %2842 = vmatprep.subr.bf16.mxu0 %v9272_v29  ;;  %2883 = vmatprep.subr.bf16.mxu1 %v9273_v57  ;;  %v9283_v29 = vld [vmem:[#allocation72_spill] sm:$0xff]  ;;  %v9284_v57 = vld [vmem:[#allocation73_spill] sm:$0xff] }
 0x61e   :  { %2843 = vmatpush1.bf16.msra.mxu0 %v9274_v11  ;;  %2884 = vmatpush1.bf16.msra.mxu1 %v9275_v5  ;;  %v9285_v11 = vld [vmem:[#allocation74_spill] sm:$0xff]  ;;  %v9286_v5 = vld [vmem:[#allocation75_spill] sm:$0xff] }
 0x61f   :  { %2844 = vmatprep.subr.bf16.mxu0 %v9276_v33  ;;  %2885 = vmatprep.subr.bf16.mxu1 %v9277_v20  ;;  %v9287_v33 = vld [vmem:[#allocation76_spill] sm:$0xff]  ;;  %v9288_v20 = vld [vmem:[#allocation77_spill] sm:$0xff] }
 0x622   :  { %2845 = vmatpush1.bf16.msra.mxu0 %v9278_v21  ;;  %2886 = vmatpush1.bf16.msra.mxu1 %v9279_v4  ;;  %v9289_v21 = vld [vmem:[#allocation78_spill] sm:$0xff]  ;;  %v9290_v4 = vld [vmem:[#allocation79_spill] sm:$0xff] }
 0x623   :  { %2846 = vmatprep.subr.bf16.mxu0 %v9280_v48  ;;  %2887 = vmatprep.subr.bf16.mxu1 %v9281_v26  ;;  %v9291_v48 = vld [vmem:[#allocation80_spill] sm:$0xff]  ;;  %v9292_v26 = vld [vmem:[#allocation81_spill] sm:$0xff] }
 0x626   :  { %2847 = vmatpush1.bf16.msra.mxu0 %v9282_v47  ;;  %2888 = vmatpush1.bf16.msra.mxu1 %v9283_v29  ;;  %v9293_v47 = vld [vmem:[#allocation82_spill] sm:$0xff]  ;;  %v9294_v29 = vld [vmem:[#allocation83_spill] sm:$0xff] }
 0x627   :  { %2848 = vmatprep.subr.bf16.mxu0 %v9284_v57  ;;  %2889 = vmatprep.subr.bf16.mxu1 %v9285_v11  ;;  %v9295_v57 = vld [vmem:[#allocation84_spill] sm:$0xff]  ;;  %v9296_v11 = vld [vmem:[#allocation85_spill] sm:$0xff] }
 0x62a   :  { %2849 = vmatpush1.bf16.msra.mxu0 %v9286_v5  ;;  %2890 = vmatpush1.bf16.msra.mxu1 %v9287_v33  ;;  %v9297_v5 = vld [vmem:[#allocation86_spill] sm:$0xff]  ;;  %v9298_v33 = vld [vmem:[#allocation87_spill] sm:$0xff] }
 0x62b   :  { %2850 = vmatprep.subr.bf16.mxu0 %v9288_v20  ;;  %2891 = vmatprep.subr.bf16.mxu1 %v9289_v21  ;;  %v9299_v20 = vld [vmem:[#allocation88_spill] sm:$0xff]  ;;  %v9300_v21 = vld [vmem:[#allocation89_spill] sm:$0xff] }
 0x62e   :  { %2851 = vmatpush1.bf16.msra.mxu0 %v9290_v4  ;;  %2892 = vmatpush1.bf16.msra.mxu1 %v9291_v48  ;;  %v9301_v4 = vld [vmem:[#allocation90_spill] sm:$0xff]  ;;  %v9302_v48 = vld [vmem:[#allocation91_spill] sm:$0xff] }
 0x62f   :  { %2852 = vmatprep.subr.bf16.mxu0 %v9292_v26  ;;  %2893 = vmatprep.subr.bf16.mxu1 %v9293_v47  ;;  %v9303_v26 = vld [vmem:[#allocation92_spill] sm:$0xff]  ;;  %v9304_v47 = vld [vmem:[#allocation93_spill] sm:$0xff] }
 0x632   :  { %2853 = vmatpush1.bf16.msra.mxu0 %v9294_v29  ;;  %2894 = vmatpush1.bf16.msra.mxu1 %v9295_v57  ;;  %v9305_v29 = vld [vmem:[#allocation94_spill] sm:$0xff]  ;;  %v9306_v57 = vld [vmem:[#allocation95_spill] sm:$0xff] }
 0x633   :  { %2854 = vmatprep.subr.bf16.mxu0 %v9296_v11  ;;  %2895 = vmatprep.subr.bf16.mxu1 %v9297_v5  ;;  %v9307_v11 = vld [vmem:[#allocation96_spill] sm:$0xff]  ;;  %v9308_v5 = vld [vmem:[#allocation97_spill] sm:$0xff] }
 0x636   :  { %2855 = vmatpush1.bf16.msra.mxu0 %v9298_v33  ;;  %2896 = vmatpush1.bf16.msra.mxu1 %v9299_v20  ;;  %v9309_v33 = vld [vmem:[#allocation98_spill] sm:$0xff]  ;;  %v9310_v20 = vld [vmem:[#allocation99_spill] sm:$0xff] }
 0x637   :  { %2856 = vmatprep.subr.bf16.mxu0 %v9300_v21  ;;  %2897 = vmatprep.subr.bf16.mxu1 %v9301_v4  ;;  %v9311_v21 = vld [vmem:[#allocation100_spill] sm:$0xff]  ;;  %v9312_v4 = vld [vmem:[#allocation101_spill] sm:$0xff] }
 0x63a   :  { %2857 = vmatpush1.bf16.msra.mxu0 %v9302_v48  ;;  %2898 = vmatpush1.bf16.msra.mxu1 %v9303_v26  ;;  %v9313_v48 = vld [vmem:[#allocation102_spill] sm:$0xff] }
 0x63b   :  { %2858 = vmatprep.subr.bf16.mxu0 %v9304_v47  ;;  %2899 = vmatprep.subr.bf16.mxu1 %v9305_v29 }
 0x63e   :  { %2859 = vmatpush1.bf16.msra.mxu0 %v9306_v57  ;;  %2900 = vmatpush1.bf16.msra.mxu1 %v9307_v11 }
 0x63f   :  { %2860 = vmatprep.subr.bf16.mxu0 %v9308_v5  ;;  %2901 = vmatprep.subr.bf16.mxu1 %v9309_v33 }
 0x642   :  { %2861 = vmatpush1.bf16.msra.mxu0 %v9310_v20  ;;  %2902 = vmatpush1.bf16.msra.mxu1 %v9311_v21 }
 0x643   :  { %2912 = vmatprep.subr.bf16.mxu0 %v9312_v4  ;;  %2953 = vmatprep.subr.bf16.mxu1 %v9313_v48 }
 0x698   :  { %v2610_v26 = vpop.f32.mrb[40].mxu0  ;;  %v2651_v47 = vpop.f32.mrb[40].mxu1 }
 0x699   :  { %v2750_v27 = vrot.slane %v2651_v47, 4  ;;  %v2612_v29 = vpop.f32.mrb[41].mxu0  ;;  %v2653_v9 = vpop.f32.mrb[41].mxu1  ;;  %v2800_v47 = vrot.slane %v7642_v59, 7 }
 0x69a   :  { %v2751_v57 = vrot.slane %v2653_v9, 4  ;;  %v2614_v23 = vpop.f32.mrb[42].mxu0  ;;  %v2655_v11 = vpop.f32.mrb[42].mxu1 }
 0x69b   :  { %v2766_v5 = vadd.f32 %v2750_v27, %v7156_v6  ;;  %v2615_v58 = vpop.f32.mrb[43].mxu0  ;;  %v2656_v33 = vpop.f32.mrb[43].mxu1  ;;  %v2801_v11 = vrot.slane %v7644_v50, 7 }
 0x69c   :  { %v2767_v20 = vadd.f32 %v2751_v57, %v7158_v7  ;;  %v2748_v58 = vrot.slane %v2610_v26, 4  ;;  %v2749_v33 = vrot.slane %v2612_v29, 4 }
 0x69d   :  { %v2780_v35 = vmul.f32 0.5, %v2766_v5 }
 0x69e   :  { %v2781_v21 = vmul.f32 0.5, %v2767_v20  ;;  %v2764_v57 = vadd.f32 %v2748_v58, %v7160_v56  ;;  %v2765_v5 = vadd.f32 %v2749_v33, %v7163_v10  ;;  %v9314_v58 = vld [vmem:[#allocation173_spill] sm:$0xff] }
 0x69f   :  { %6293 = vtanh.f32 %v2780_v35 }
 0x6a0   :  { %6295 = vtanh.f32 %v2781_v21  ;;  %v2772_v35 = vmul.f32 0.5, %v2764_v57  ;;  %v2773_v20 = vmul.f32 0.5, %v2765_v5 }
 0x6a2   :  { %6297 = vtanh.f32 %v2772_v35 }
 0x6a3   :  { %6299 = vtanh.f32 %v2773_v20 }
 0x6a9   :  { %v6294_v4 = vpop.eup %6293 }
 0x6aa   :  { %v2784_v48 = vmul.f32 0.5, %v6294_v4  ;;  %v6296_v14 = vpop.eup %6295 }
 0x6ab   :  { %v2785_v62 = vmul.f32 0.5, %v6296_v14 }
 0x6ac   :  { %v2786_v0 = vadd.f32 0.5, %v2784_v48  ;;  %v6298_v35 = vpop.eup %6297 }
 0x6ad   :  { %v2787_v23 = vadd.f32 0.5, %v2785_v62  ;;  %v6300_v20 = vpop.eup %6299 }
 0x6ae   :  { %v2804_v9 = vmul.f32 %v2800_v47, %v2786_v0 }
 0x6af   :  { %v2805_v27 = vmul.f32 %v2801_v11, %v2787_v23 }
 0x6d8   :  { %v2692_v21 = vpop.f32.mrb[44].mxu0  ;;  %v2733_v4 = vpop.f32.mrb[44].mxu1 }
 0x6d9   :  { %v2752_v48 = vrot.slane %v2692_v21, 4  ;;  %v2754_v59 = vrot.slane %v2733_v4, 4  ;;  %v2694_v14 = vpop.f32.mrb[45].mxu0  ;;  %v2735_v0 = vpop.f32.mrb[45].mxu1 }
 0x6da   :  { %v2753_v62 = vrot.slane %v2694_v14, 4  ;;  %v2755_v47 = vrot.slane %v2735_v0, 4  ;;  %v2696_v50 = vpop.f32.mrb[46].mxu0  ;;  %v2737_v23 = vpop.f32.mrb[46].mxu1  ;;  %v2776_v14 = vmul.f32 0.5, %v6298_v35  ;;  %v2777_v0 = vmul.f32 0.5, %v6300_v20 }
 0x6db   :  { %v2768_v26 = vadd.f32 %v2752_v48, %v7180_v17  ;;  %v2697_v29 = vpop.f32.mrb[47].mxu0  ;;  %v2738_v11 = vpop.f32.mrb[47].mxu1  ;;  %v2770_v33 = vadd.f32 %v2754_v59, %v9314_v58 }
 0x6dc   :  { %v2769_v57 = vadd.f32 %v2753_v62, %v7182_v32  ;;  %v2771_v5 = vadd.f32 %v2755_v47, %v9035_v51  ;;  %v2778_v50 = vadd.f32 0.5, %v2776_v14  ;;  %v2779_v23 = vadd.f32 0.5, %v2777_v0 }
 0x6dd   :  { %6301 = vtanh.f32 %v2768_v26  ;;  %v2790_v21 = vmul.f32 0.5, %v2770_v33 }
 0x6de   :  { %6303 = vtanh.f32 %v2769_v57  ;;  %v2791_v4 = vmul.f32 0.5, %v2771_v5 }
 0x6df   :  { %6305 = vtanh.f32 %v2790_v21 }
 0x6e0   :  { %6307 = vtanh.f32 %v2791_v4 }
 0x6e7   :  { %v6302_v48 = vpop.eup %6301 }
 0x6e8   :  { %v6304_v29 = vpop.eup %6303  ;;  %v2806_v11 = vmul.f32 %v6302_v48, %v2778_v50 }
 0x6e9   :  { %v2807_v59 = vmul.f32 %v6304_v29, %v2779_v23  ;;  %v6306_v47 = vpop.eup %6305  ;;  %v9315_v29 = vld [vmem:[#allocation139_spill] sm:$0xff] }
 0x6ea   :  { %v7792_v58 = vadd.f32 %v2806_v11, %v2804_v9  ;;  %v6308_v26 = vpop.eup %6307  ;;  %v2794_v33 = vmul.f32 0.5, %v6306_v47  ;;  %v9316_v11 = vld [vmem:[#allocation140_spill] sm:$0xff]  ;;  %v9318_v47 = vld [vmem:[#allocation142_spill] sm:$0xff] }
 0x6eb   :  { %v7794_v62 = vadd.f32 %v2807_v59, %v2805_v27  ;;  %v2795_v57 = vmul.f32 0.5, %v6308_v26  ;;  %v9317_v59 = vld [vmem:[#allocation141_spill] sm:$0xff]  ;;  %v9319_v26 = vld [vmem:[#allocation143_spill] sm:$0xff] }
 0x6ec   :  { %6309 = vtanh.f32 %v7792_v58  ;;  %v2796_v5 = vadd.f32 0.5, %v2794_v33  ;;  %v9320_v33 = vld [vmem:[#allocation144_spill] sm:$0xff] }
 0x6ed   :  { %6311 = vtanh.f32 %v7794_v62  ;;  %v2797_v20 = vadd.f32 0.5, %v2795_v57  ;;  %v9321_v57 = vld [vmem:[#allocation145_spill] sm:$0xff] }
 0x6f6   :  { %v6310_v35 = vpop.eup %6309 }
 0x6f7   :  { %v6312_v21 = vpop.eup %6311  ;;  %v2812_v4 = vmul.f32 %v6310_v35, %v2796_v5  ;;  %v9322_v5 = vld [vmem:[#allocation146_spill] sm:$0xff]  ;;  %v9323_v35 = vld [vmem:[#allocation147_spill] sm:$0xff] }
 0x6f8   :  { %v2813_v14 = vmul.f32 %v6312_v21, %v2797_v20  ;;  %v9324_v20 = vld [vmem:[#allocation148_spill] sm:$0xff]  ;;  %v9325_v21 = vld [vmem:[#allocation149_spill] sm:$0xff] }
 0x6f9   :  { %v2815_v0 = vrot.slane %v2812_v4, 4  ;;  %v2822_v50 = vpack.c.bf16 %v2812_v4, %v2812_v4  ;;  %v9326_v4 = vld [vmem:[#allocation150_spill] sm:$0xff] }
 0x6fa   :  { %v2819_v9 = vrot.slane %v2813_v14, 4  ;;  %v2823_v48 = vpack.c.bf16 %v2813_v14, %v2813_v14  ;;  %v9327_v14 = vld [vmem:[#allocation151_spill] sm:$0xff] }
 0x6fb   :  { %2817 = vst [vmem:[#allocation2 + $0x4] sm:$0x1] %v2815_v0  ;;  %v7798_v23 = vrot.slane %v2822_v50, 2  ;;  %v9328_v0 = vld [vmem:[#allocation152_spill] sm:$0xff]  ;;  %v9329_v50 = vld [vmem:[#allocation153_spill] sm:$0xff] }
 0x6fc   :  { %2821 = vst [vmem:[#allocation2 + $0xb] sm:$0x1] %v2819_v9  ;;  %v2827_v27 = vrot.slane %v2823_v48, 2  ;;  %v9330_v9 = vld [vmem:[#allocation154_spill] sm:$0xff]  ;;  %v9331_v48 = vld [vmem:[#allocation155_spill] sm:$0xff] }
 0x6fe   :  { %2862 = vmatprep.mubr.bf16.mxu0 %v2827_v27  ;;  %2903 = vmatprep.mubr.bf16.mxu1 %v2827_v27 }
 0x6ff   :  { %2863 = vmatmul.mubr.bf16.vlgmr.msra.gmra.mrb[48].mxu0 %v7798_v23  ;;  %2904 = vmatmul.mubr.bf16.vlgmr.msra.gmra.mrb[48].mxu1 %v7798_v23 }
 0x700   :  { %2913 = vmatpush1.bf16.msra.mxu0 %v8941_v16  ;;  %2954 = vmatpush1.bf16.msra.mxu1 %v8942_v12 }
 0x701   :  { %2944 = vmatprep.mubr.bf16.mxu0 %v2827_v27  ;;  %2985 = vmatprep.mubr.bf16.mxu1 %v2827_v27  ;;  %v9332_v27 = vld [vmem:[#allocation156_spill] sm:$0xff] }
 0x702   :  { %2914 = vmatprep.subr.bf16.mxu0 %v8943_v15  ;;  %2955 = vmatprep.subr.bf16.mxu1 %v8944_v8 }
 0x704   :  { %2915 = vmatpush1.bf16.msra.mxu0 %v8945_v63  ;;  %2956 = vmatpush1.bf16.msra.mxu1 %v8946_v3 }
 0x705   :  { %2916 = vmatprep.subr.bf16.mxu0 %v8947_v13  ;;  %2957 = vmatprep.subr.bf16.mxu1 %v8948_v18 }
 0x708   :  { %2917 = vmatpush1.bf16.msra.mxu0 %v8949_v42  ;;  %2958 = vmatpush1.bf16.msra.mxu1 %v9036_v46 }
 0x709   :  { %2918 = vmatprep.subr.bf16.mxu0 %v9037_v52  ;;  %2959 = vmatprep.subr.bf16.mxu1 %v9038_v49 }
 0x70c   :  { %2919 = vmatpush1.bf16.msra.mxu0 %v9039_v45  ;;  %2960 = vmatpush1.bf16.msra.mxu1 %v9040_v44 }
 0x70d   :  { %2920 = vmatprep.subr.bf16.mxu0 %v9041_v37  ;;  %2961 = vmatprep.subr.bf16.mxu1 %v9042_v54 }
 0x710   :  { %2921 = vmatpush1.bf16.msra.mxu0 %v9129_v1  ;;  %2962 = vmatpush1.bf16.msra.mxu1 %v9130_v25 }
 0x711   :  { %2922 = vmatprep.subr.bf16.mxu0 %v9131_v19  ;;  %2963 = vmatprep.subr.bf16.mxu1 %v9132_v38 }
 0x714   :  { %2923 = vmatpush1.bf16.msra.mxu0 %v9133_v28  ;;  %2964 = vmatpush1.bf16.msra.mxu1 %v9134_v55 }
 0x715   :  { %2924 = vmatprep.subr.bf16.mxu0 %v9135_v2  ;;  %2965 = vmatprep.subr.bf16.mxu1 %v9136_v41 }
 0x718   :  { %2925 = vmatpush1.bf16.msra.mxu0 %v9137_v40  ;;  %2966 = vmatpush1.bf16.msra.mxu1 %v9138_v24 }
 0x719   :  { %2926 = vmatprep.subr.bf16.mxu0 %v9053_v43  ;;  %2967 = vmatprep.subr.bf16.mxu1 %v9054_v53 }
 0x71c   :  { %2927 = vmatpush1.bf16.msra.mxu0 %v9055_v36  ;;  %2968 = vmatpush1.bf16.msra.mxu1 %v9139_v22 }
 0x71d   :  { %2928 = vmatprep.subr.bf16.mxu0 %v9057_v60  ;;  %2969 = vmatprep.subr.bf16.mxu1 %v9058_v61 }
 0x720   :  { %2929 = vmatpush1.bf16.msra.mxu0 %v9059_v31  ;;  %2970 = vmatpush1.bf16.msra.mxu1 %v9060_v30 }
 0x721   :  { %2930 = vmatprep.subr.bf16.mxu0 %v9061_v34  ;;  %2971 = vmatprep.subr.bf16.mxu1 %v9062_v39 }
 0x724   :  { %2931 = vmatpush1.bf16.msra.mxu0 %v9315_v29  ;;  %2972 = vmatpush1.bf16.msra.mxu1 %v9316_v11 }
 0x725   :  { %2932 = vmatprep.subr.bf16.mxu0 %v9317_v59  ;;  %2973 = vmatprep.subr.bf16.mxu1 %v9318_v47 }
 0x728   :  { %2933 = vmatpush1.bf16.msra.mxu0 %v9319_v26  ;;  %2974 = vmatpush1.bf16.msra.mxu1 %v9320_v33 }
 0x729   :  { %2934 = vmatprep.subr.bf16.mxu0 %v9321_v57  ;;  %2975 = vmatprep.subr.bf16.mxu1 %v9322_v5  ;;  %v9333_v5 = vld [vmem:[#allocation157_spill] sm:$0xff] }
 0x72c   :  { %2935 = vmatpush1.bf16.msra.mxu0 %v9323_v35  ;;  %2976 = vmatpush1.bf16.msra.mxu1 %v9324_v20  ;;  %v9334_v35 = vld [vmem:[#allocation158_spill] sm:$0xff]  ;;  %v9335_v20 = vld [vmem:[#allocation159_spill] sm:$0xff] }
 0x72d   :  { %2936 = vmatprep.subr.bf16.mxu0 %v9325_v21  ;;  %2977 = vmatprep.subr.bf16.mxu1 %v9326_v4  ;;  %v9336_v21 = vld [vmem:[#allocation160_spill] sm:$0xff]  ;;  %v9337_v4 = vld [vmem:[#allocation161_spill] sm:$0xff] }
 0x730   :  { %2937 = vmatpush1.bf16.msra.mxu0 %v9327_v14  ;;  %2978 = vmatpush1.bf16.msra.mxu1 %v9328_v0  ;;  %v9338_v14 = vld [vmem:[#allocation162_spill] sm:$0xff]  ;;  %v9339_v0 = vld [vmem:[#allocation163_spill] sm:$0xff] }
 0x731   :  { %2938 = vmatprep.subr.bf16.mxu0 %v9329_v50  ;;  %2979 = vmatprep.subr.bf16.mxu1 %v9330_v9  ;;  %v9340_v50 = vld [vmem:[#allocation164_spill] sm:$0xff]  ;;  %v9341_v9 = vld [vmem:[#allocation37_spill] sm:$0xff] }
 0x734   :  { %2939 = vmatpush1.bf16.msra.mxu0 %v9331_v48  ;;  %2980 = vmatpush1.bf16.msra.mxu1 %v9332_v27  ;;  %v9342_v48 = vld [vmem:[#allocation38_spill] sm:$0xff] }
 0x735   :  { %2940 = vmatprep.subr.bf16.mxu0 %v9333_v5  ;;  %2981 = vmatprep.subr.bf16.mxu1 %v9334_v35  ;;  %v9343_v35 = vld [vmem:[#allocation39_spill] sm:$0xff]  ;;  %v9352_v5 = vld [vmem:[#allocation48_spill] sm:$0xff] }
 0x738   :  { %2941 = vmatpush1.bf16.msra.mxu0 %v9335_v20  ;;  %2982 = vmatpush1.bf16.msra.mxu1 %v9336_v21  ;;  %v9344_v20 = vld [vmem:[#allocation40_spill] sm:$0xff]  ;;  %v9345_v21 = vld [vmem:[#allocation41_spill] sm:$0xff] }
 0x739   :  { %2942 = vmatprep.subr.bf16.mxu0 %v9337_v4  ;;  %2983 = vmatprep.subr.bf16.mxu1 %v9338_v14  ;;  %v9346_v4 = vld [vmem:[#allocation42_spill] sm:$0xff]  ;;  %v9347_v14 = vld [vmem:[#allocation43_spill] sm:$0xff] }
 0x73c   :  { %2943 = vmatpush1.bf16.msra.mxu0 %v9339_v0  ;;  %2984 = vmatpush1.bf16.msra.mxu1 %v9340_v50  ;;  %v9348_v0 = vld [vmem:[#allocation44_spill] sm:$0xff]  ;;  %v9349_v50 = vld [vmem:[#allocation45_spill] sm:$0xff] }
 0x73d   :  { %3088 = vmatprep.subr.bf16.mxu0 %v9341_v9  ;;  %3129 = vmatprep.subr.bf16.mxu1 %v9342_v48  ;;  %v9350_v9 = vld [vmem:[#allocation46_spill] sm:$0xff]  ;;  %v9351_v48 = vld [vmem:[#allocation47_spill] sm:$0xff] }
 0x73f   :  { %2945 = vmatmul.mubr.bf16.vlgmr.msra.gmra.mrb[52].mxu0 %v7798_v23  ;;  %2986 = vmatmul.mubr.bf16.vlgmr.msra.gmra.mrb[52].mxu1 %v7798_v23  ;;  %v9353_v23 = vld [vmem:[#allocation49_spill] sm:$0xff] }
 0x740   :  { %3089 = vmatpush1.bf16.msra.mxu0 %v9343_v35  ;;  %3130 = vmatpush1.bf16.msra.mxu1 %v9344_v20  ;;  %v9354_v35 = vld [vmem:[#allocation50_spill] sm:$0xff]  ;;  %v9355_v20 = vld [vmem:[#allocation51_spill] sm:$0xff] }
 0x741   :  { %3090 = vmatprep.subr.bf16.mxu0 %v9345_v21  ;;  %3131 = vmatprep.subr.bf16.mxu1 %v9346_v4  ;;  %v9356_v21 = vld [vmem:[#allocation52_spill] sm:$0xff]  ;;  %v9357_v4 = vld [vmem:[#allocation53_spill] sm:$0xff] }
 0x744   :  { %3091 = vmatpush1.bf16.msra.mxu0 %v9347_v14  ;;  %3132 = vmatpush1.bf16.msra.mxu1 %v9348_v0  ;;  %v9358_v14 = vld [vmem:[#allocation54_spill] sm:$0xff]  ;;  %v9359_v0 = vld [vmem:[#allocation55_spill] sm:$0xff] }
 0x745   :  { %3092 = vmatprep.subr.bf16.mxu0 %v9349_v50  ;;  %3133 = vmatprep.subr.bf16.mxu1 %v9350_v9  ;;  %v9360_v50 = vld [vmem:[#allocation56_spill] sm:$0xff]  ;;  %v9361_v9 = vld [vmem:[#allocation57_spill] sm:$0xff] }
 0x748   :  { %3093 = vmatpush1.bf16.msra.mxu0 %v9351_v48  ;;  %3134 = vmatpush1.bf16.msra.mxu1 %v9352_v5  ;;  %v9362_v48 = vld [vmem:[#allocation58_spill] sm:$0xff]  ;;  %v9363_v5 = vld [vmem:[#allocation59_spill] sm:$0xff] }
 0x749   :  { %3094 = vmatprep.subr.bf16.mxu0 %v9353_v23  ;;  %3135 = vmatprep.subr.bf16.mxu1 %v9354_v35  ;;  %v9364_v23 = vld [vmem:[#allocation60_spill] sm:$0xff]  ;;  %v9365_v35 = vld [vmem:[#allocation61_spill] sm:$0xff] }
 0x74c   :  { %3095 = vmatpush1.bf16.msra.mxu0 %v9355_v20  ;;  %3136 = vmatpush1.bf16.msra.mxu1 %v9356_v21  ;;  %v9366_v20 = vld [vmem:[#allocation62_spill] sm:$0xff]  ;;  %v9367_v21 = vld [vmem:[#allocation63_spill] sm:$0xff] }
 0x74d   :  { %3096 = vmatprep.subr.bf16.mxu0 %v9357_v4  ;;  %3137 = vmatprep.subr.bf16.mxu1 %v9358_v14  ;;  %v9368_v4 = vld [vmem:[#allocation64_spill] sm:$0xff]  ;;  %v9369_v14 = vld [vmem:[#allocation65_spill] sm:$0xff] }
 0x750   :  { %3097 = vmatpush1.bf16.msra.mxu0 %v9359_v0  ;;  %3138 = vmatpush1.bf16.msra.mxu1 %v9360_v50  ;;  %v9370_v0 = vld [vmem:[#allocation66_spill] sm:$0xff]  ;;  %v9371_v50 = vld [vmem:[#allocation67_spill] sm:$0xff] }
 0x751   :  { %3098 = vmatprep.subr.bf16.mxu0 %v9361_v9  ;;  %3139 = vmatprep.subr.bf16.mxu1 %v9362_v48  ;;  %v9372_v9 = vld [vmem:[#allocation68_spill] sm:$0xff]  ;;  %v9373_v48 = vld [vmem:[#allocation69_spill] sm:$0xff] }
 0x754   :  { %3099 = vmatpush1.bf16.msra.mxu0 %v9363_v5  ;;  %3140 = vmatpush1.bf16.msra.mxu1 %v9364_v23  ;;  %v9374_v5 = vld [vmem:[#allocation70_spill] sm:$0xff]  ;;  %v9375_v23 = vld [vmem:[#allocation71_spill] sm:$0xff] }
 0x755   :  { %3100 = vmatprep.subr.bf16.mxu0 %v9365_v35  ;;  %3141 = vmatprep.subr.bf16.mxu1 %v9366_v20  ;;  %v9376_v35 = vld [vmem:[#allocation72_spill] sm:$0xff]  ;;  %v9377_v20 = vld [vmem:[#allocation73_spill] sm:$0xff] }
 0x758   :  { %3101 = vmatpush1.bf16.msra.mxu0 %v9367_v21  ;;  %3142 = vmatpush1.bf16.msra.mxu1 %v9368_v4  ;;  %v9378_v21 = vld [vmem:[#allocation74_spill] sm:$0xff]  ;;  %v9379_v4 = vld [vmem:[#allocation75_spill] sm:$0xff] }
 0x759   :  { %3102 = vmatprep.subr.bf16.mxu0 %v9369_v14  ;;  %3143 = vmatprep.subr.bf16.mxu1 %v9370_v0  ;;  %v9380_v14 = vld [vmem:[#allocation76_spill] sm:$0xff]  ;;  %v9381_v0 = vld [vmem:[#allocation77_spill] sm:$0xff] }
 0x75c   :  { %3103 = vmatpush1.bf16.msra.mxu0 %v9371_v50  ;;  %3144 = vmatpush1.bf16.msra.mxu1 %v9372_v9  ;;  %v9382_v50 = vld [vmem:[#allocation78_spill] sm:$0xff]  ;;  %v9383_v9 = vld [vmem:[#allocation79_spill] sm:$0xff] }
 0x75d   :  { %3104 = vmatprep.subr.bf16.mxu0 %v9373_v48  ;;  %3145 = vmatprep.subr.bf16.mxu1 %v9374_v5  ;;  %v9384_v48 = vld [vmem:[#allocation80_spill] sm:$0xff]  ;;  %v9385_v5 = vld [vmem:[#allocation81_spill] sm:$0xff] }
 0x760   :  { %3105 = vmatpush1.bf16.msra.mxu0 %v9375_v23  ;;  %3146 = vmatpush1.bf16.msra.mxu1 %v9376_v35  ;;  %v9386_v23 = vld [vmem:[#allocation82_spill] sm:$0xff]  ;;  %v9387_v35 = vld [vmem:[#allocation83_spill] sm:$0xff] }
 0x761   :  { %3106 = vmatprep.subr.bf16.mxu0 %v9377_v20  ;;  %3147 = vmatprep.subr.bf16.mxu1 %v9378_v21  ;;  %v9388_v20 = vld [vmem:[#allocation84_spill] sm:$0xff]  ;;  %v9389_v21 = vld [vmem:[#allocation85_spill] sm:$0xff] }
 0x764   :  { %3107 = vmatpush1.bf16.msra.mxu0 %v9379_v4  ;;  %3148 = vmatpush1.bf16.msra.mxu1 %v9380_v14  ;;  %v9390_v4 = vld [vmem:[#allocation86_spill] sm:$0xff]  ;;  %v9391_v14 = vld [vmem:[#allocation87_spill] sm:$0xff] }
 0x765   :  { %3108 = vmatprep.subr.bf16.mxu0 %v9381_v0  ;;  %3149 = vmatprep.subr.bf16.mxu1 %v9382_v50  ;;  %v9392_v0 = vld [vmem:[#allocation88_spill] sm:$0xff]  ;;  %v9393_v50 = vld [vmem:[#allocation89_spill] sm:$0xff] }
 0x768   :  { %3109 = vmatpush1.bf16.msra.mxu0 %v9383_v9  ;;  %3150 = vmatpush1.bf16.msra.mxu1 %v9384_v48  ;;  %v9394_v9 = vld [vmem:[#allocation90_spill] sm:$0xff]  ;;  %v9395_v48 = vld [vmem:[#allocation91_spill] sm:$0xff] }
 0x769   :  { %3110 = vmatprep.subr.bf16.mxu0 %v9385_v5  ;;  %3151 = vmatprep.subr.bf16.mxu1 %v9386_v23  ;;  %v9396_v5 = vld [vmem:[#allocation92_spill] sm:$0xff]  ;;  %v9397_v23 = vld [vmem:[#allocation93_spill] sm:$0xff] }
 0x76c   :  { %3111 = vmatpush1.bf16.msra.mxu0 %v9387_v35  ;;  %3152 = vmatpush1.bf16.msra.mxu1 %v9388_v20  ;;  %v9398_v35 = vld [vmem:[#allocation94_spill] sm:$0xff]  ;;  %v9399_v20 = vld [vmem:[#allocation95_spill] sm:$0xff] }
 0x76d   :  { %3112 = vmatprep.subr.bf16.mxu0 %v9389_v21  ;;  %3153 = vmatprep.subr.bf16.mxu1 %v9390_v4  ;;  %v9400_v21 = vld [vmem:[#allocation96_spill] sm:$0xff]  ;;  %v9401_v4 = vld [vmem:[#allocation97_spill] sm:$0xff] }
 0x770   :  { %3113 = vmatpush1.bf16.msra.mxu0 %v9391_v14  ;;  %3154 = vmatpush1.bf16.msra.mxu1 %v9392_v0  ;;  %v9402_v14 = vld [vmem:[#allocation98_spill] sm:$0xff]  ;;  %v9403_v0 = vld [vmem:[#allocation99_spill] sm:$0xff] }
 0x771   :  { %3114 = vmatprep.subr.bf16.mxu0 %v9393_v50  ;;  %3155 = vmatprep.subr.bf16.mxu1 %v9394_v9  ;;  %v9404_v50 = vld [vmem:[#allocation100_spill] sm:$0xff]  ;;  %v9405_v9 = vld [vmem:[#allocation101_spill] sm:$0xff] }
 0x774   :  { %3115 = vmatpush1.bf16.msra.mxu0 %v9395_v48  ;;  %3156 = vmatpush1.bf16.msra.mxu1 %v9396_v5  ;;  %v9406_v48 = vld [vmem:[#allocation102_spill] sm:$0xff] }
 0x775   :  { %3116 = vmatprep.subr.bf16.mxu0 %v9397_v23  ;;  %3157 = vmatprep.subr.bf16.mxu1 %v9398_v35 }
 0x778   :  { %3117 = vmatpush1.bf16.msra.mxu0 %v9399_v20  ;;  %3158 = vmatpush1.bf16.msra.mxu1 %v9400_v21 }
 0x779   :  { %3118 = vmatprep.subr.bf16.mxu0 %v9401_v4  ;;  %3159 = vmatprep.subr.bf16.mxu1 %v9402_v14 }
 0x77c   :  { %3119 = vmatpush1.bf16.msra.mxu0 %v9403_v0  ;;  %3160 = vmatpush1.bf16.msra.mxu1 %v9404_v50 }
 0x77d   :  { %3170 = vmatprep.subr.bf16.mxu0 %v9405_v9  ;;  %3211 = vmatprep.subr.bf16.mxu1 %v9406_v48 }
 0x7d2   :  { %v2864_v5 = vpop.f32.mrb[48].mxu0  ;;  %v2905_v23 = vpop.f32.mrb[48].mxu1 }
 0x7d3   :  { %v3004_v27 = vrot.slane %v2905_v23, 3  ;;  %v2866_v35 = vpop.f32.mrb[49].mxu0  ;;  %v2907_v57 = vpop.f32.mrb[49].mxu1  ;;  %v3054_v23 = vrot.slane %v7792_v58, 7 }
 0x7d4   :  { %v3005_v20 = vrot.slane %v2907_v57, 3  ;;  %v2868_v33 = vpop.f32.mrb[50].mxu0  ;;  %v2909_v21 = vpop.f32.mrb[50].mxu1 }
 0x7d5   :  { %v3020_v4 = vadd.f32 %v3004_v27, %v7156_v6  ;;  %v2869_v26 = vpop.f32.mrb[51].mxu0  ;;  %v2910_v14 = vpop.f32.mrb[51].mxu1  ;;  %v3055_v21 = vrot.slane %v7794_v62, 7 }
 0x7d6   :  { %v3021_v0 = vadd.f32 %v3005_v20, %v7158_v7  ;;  %v3002_v26 = vrot.slane %v2864_v5, 3  ;;  %v3003_v14 = vrot.slane %v2866_v35, 3 }
 0x7d7   :  { %v3034_v47 = vmul.f32 0.5, %v3020_v4 }
 0x7d8   :  { %v3035_v50 = vmul.f32 0.5, %v3021_v0  ;;  %v3018_v20 = vadd.f32 %v3002_v26, %v7160_v56  ;;  %v3019_v4 = vadd.f32 %v3003_v14, %v7163_v10  ;;  %v9407_v26 = vld [vmem:[#allocation173_spill] sm:$0xff] }
 0x7d9   :  { %6313 = vtanh.f32 %v3034_v47 }
 0x7da   :  { %6315 = vtanh.f32 %v3035_v50  ;;  %v3026_v47 = vmul.f32 0.5, %v3018_v20  ;;  %v3027_v0 = vmul.f32 0.5, %v3019_v4 }
 0x7dc   :  { %6317 = vtanh.f32 %v3026_v47 }
 0x7dd   :  { %6319 = vtanh.f32 %v3027_v0 }
 0x7e3   :  { %v6314_v9 = vpop.eup %6313 }
 0x7e4   :  { %v3038_v48 = vmul.f32 0.5, %v6314_v9  ;;  %v6316_v59 = vpop.eup %6315 }
 0x7e5   :  { %v3039_v29 = vmul.f32 0.5, %v6316_v59 }
 0x7e6   :  { %v3040_v11 = vadd.f32 0.5, %v3038_v48  ;;  %v6318_v47 = vpop.eup %6317 }
 0x7e7   :  { %v3041_v33 = vadd.f32 0.5, %v3039_v29  ;;  %v6320_v0 = vpop.eup %6319 }
 0x7e8   :  { %v3058_v57 = vmul.f32 %v3054_v23, %v3040_v11 }
 0x7e9   :  { %v3059_v27 = vmul.f32 %v3055_v21, %v3041_v33 }
 0x812   :  { %v2946_v50 = vpop.f32.mrb[52].mxu0  ;;  %v2987_v9 = vpop.f32.mrb[52].mxu1 }
 0x813   :  { %v3006_v48 = vrot.slane %v2946_v50, 3  ;;  %v3008_v58 = vrot.slane %v2987_v9, 3  ;;  %v2948_v59 = vpop.f32.mrb[53].mxu0  ;;  %v2989_v11 = vpop.f32.mrb[53].mxu1 }
 0x814   :  { %v3007_v29 = vrot.slane %v2948_v59, 3  ;;  %v3009_v23 = vrot.slane %v2989_v11, 3  ;;  %v2950_v62 = vpop.f32.mrb[54].mxu0  ;;  %v2991_v33 = vpop.f32.mrb[54].mxu1  ;;  %v3030_v59 = vmul.f32 0.5, %v6318_v47  ;;  %v3031_v11 = vmul.f32 0.5, %v6320_v0 }
 0x815   :  { %v3022_v5 = vadd.f32 %v3006_v48, %v7180_v17  ;;  %v2951_v35 = vpop.f32.mrb[55].mxu0  ;;  %v2992_v21 = vpop.f32.mrb[55].mxu1  ;;  %v3024_v14 = vadd.f32 %v3008_v58, %v9407_v26 }
 0x816   :  { %v3023_v20 = vadd.f32 %v3007_v29, %v7182_v32  ;;  %v3025_v4 = vadd.f32 %v3009_v23, %v9035_v51  ;;  %v3032_v62 = vadd.f32 0.5, %v3030_v59  ;;  %v3033_v33 = vadd.f32 0.5, %v3031_v11 }
 0x817   :  { %6321 = vtanh.f32 %v3022_v5  ;;  %v3044_v50 = vmul.f32 0.5, %v3024_v14 }
 0x818   :  { %6323 = vtanh.f32 %v3023_v20  ;;  %v3045_v9 = vmul.f32 0.5, %v3025_v4 }
 0x819   :  { %6325 = vtanh.f32 %v3044_v50 }
 0x81a   :  { %6327 = vtanh.f32 %v3045_v9 }
 0x821   :  { %v6322_v48 = vpop.eup %6321 }
 0x822   :  { %v6324_v35 = vpop.eup %6323  ;;  %v3060_v21 = vmul.f32 %v6322_v48, %v3032_v62 }
 0x823   :  { %v3061_v58 = vmul.f32 %v6324_v35, %v3033_v33  ;;  %v6326_v23 = vpop.eup %6325 }
 0x824   :  { %v7942_v26 = vadd.f32 %v3060_v21, %v3058_v57  ;;  %v6328_v5 = vpop.eup %6327  ;;  %v3048_v14 = vmul.f32 0.5, %v6326_v23  ;;  %v9409_v23 = vld [vmem:[#allocation140_spill] sm:$0xff] }
 0x825   :  { %v7944_v29 = vadd.f32 %v3061_v58, %v3059_v27  ;;  %v3049_v20 = vmul.f32 0.5, %v6328_v5  ;;  %v9408_v58 = vld [vmem:[#allocation139_spill] sm:$0xff]  ;;  %v9410_v5 = vld [vmem:[#allocation141_spill] sm:$0xff] }
 0x826   :  { %6329 = vtanh.f32 %v7942_v26  ;;  %v3050_v4 = vadd.f32 0.5, %v3048_v14  ;;  %v9411_v14 = vld [vmem:[#allocation142_spill] sm:$0xff] }
 0x827   :  { %6331 = vtanh.f32 %v7944_v29  ;;  %v3051_v0 = vadd.f32 0.5, %v3049_v20  ;;  %v9412_v20 = vld [vmem:[#allocation143_spill] sm:$0xff] }
 0x830   :  { %v6330_v47 = vpop.eup %6329 }
 0x831   :  { %v6332_v50 = vpop.eup %6331  ;;  %v3066_v9 = vmul.f32 %v6330_v47, %v3050_v4  ;;  %v9413_v4 = vld [vmem:[#allocation144_spill] sm:$0xff]  ;;  %v9414_v47 = vld [vmem:[#allocation145_spill] sm:$0xff] }
 0x832   :  { %v3067_v59 = vmul.f32 %v6332_v50, %v3051_v0  ;;  %v9415_v0 = vld [vmem:[#allocation146_spill] sm:$0xff]  ;;  %v9416_v50 = vld [vmem:[#allocation147_spill] sm:$0xff] }
 0x833   :  { %v3069_v11 = vrot.slane %v3066_v9, 5  ;;  %v3076_v62 = vpack.c.bf16 %v3066_v9, %v3066_v9  ;;  %v9417_v9 = vld [vmem:[#allocation148_spill] sm:$0xff] }
 0x834   :  { %v3073_v57 = vrot.slane %v3067_v59, 5  ;;  %v3077_v48 = vpack.c.bf16 %v3067_v59, %v3067_v59  ;;  %v9418_v59 = vld [vmem:[#allocation149_spill] sm:$0xff] }
 0x835   :  { %3071 = vst [vmem:[#allocation2 + $0x5] sm:$0x1] %v3069_v11  ;;  %v3079_v27 = vshrl.u32 %v3076_v62, 16  ;;  %v9419_v11 = vld [vmem:[#allocation150_spill] sm:$0xff]  ;;  %v9420_v62 = vld [vmem:[#allocation151_spill] sm:$0xff] }
 0x836   :  { %3075 = vst [vmem:[#allocation2 + $0xa] sm:$0x1] %v3073_v57  ;;  %v3083_v33 = vshrl.u32 %v3077_v48, 16  ;;  %v9421_v57 = vld [vmem:[#allocation152_spill] sm:$0xff]  ;;  %v9422_v48 = vld [vmem:[#allocation153_spill] sm:$0xff] }
 0x837   :  { %v7948_v21 = vrot.slane %v3079_v27, 2  ;;  %v9423_v27 = vld [vmem:[#allocation154_spill] sm:$0xff] }
 0x838   :  { %v3085_v35 = vrot.slane %v3083_v33, 2  ;;  %v9424_v33 = vld [vmem:[#allocation155_spill] sm:$0xff] }
 0x83a   :  { %3120 = vmatprep.mubr.bf16.mxu0 %v3085_v35  ;;  %3161 = vmatprep.mubr.bf16.mxu1 %v3085_v35 }
 0x83b   :  { %3121 = vmatmul.mubr.bf16.vlgmr.msra.gmra.mrb[56].mxu0 %v7948_v21  ;;  %3162 = vmatmul.mubr.bf16.vlgmr.msra.gmra.mrb[56].mxu1 %v7948_v21 }
 0x83c   :  { %3171 = vmatpush1.bf16.msra.mxu0 %v8941_v16  ;;  %3212 = vmatpush1.bf16.msra.mxu1 %v8942_v12 }
 0x83d   :  { %3202 = vmatprep.mubr.bf16.mxu0 %v3085_v35  ;;  %3243 = vmatprep.mubr.bf16.mxu1 %v3085_v35  ;;  %v9425_v35 = vld [vmem:[#allocation156_spill] sm:$0xff] }
 0x83e   :  { %3172 = vmatprep.subr.bf16.mxu0 %v8943_v15  ;;  %3213 = vmatprep.subr.bf16.mxu1 %v8944_v8 }
 0x840   :  { %3173 = vmatpush1.bf16.msra.mxu0 %v8945_v63  ;;  %3214 = vmatpush1.bf16.msra.mxu1 %v8946_v3 }
 0x841   :  { %3174 = vmatprep.subr.bf16.mxu0 %v8947_v13  ;;  %3215 = vmatprep.subr.bf16.mxu1 %v8948_v18 }
 0x844   :  { %3175 = vmatpush1.bf16.msra.mxu0 %v8949_v42  ;;  %3216 = vmatpush1.bf16.msra.mxu1 %v9036_v46 }
 0x845   :  { %3176 = vmatprep.subr.bf16.mxu0 %v9037_v52  ;;  %3217 = vmatprep.subr.bf16.mxu1 %v9038_v49 }
 0x848   :  { %3177 = vmatpush1.bf16.msra.mxu0 %v9039_v45  ;;  %3218 = vmatpush1.bf16.msra.mxu1 %v9040_v44 }
 0x849   :  { %3178 = vmatprep.subr.bf16.mxu0 %v9041_v37  ;;  %3219 = vmatprep.subr.bf16.mxu1 %v9042_v54 }
 0x84c   :  { %3179 = vmatpush1.bf16.msra.mxu0 %v9129_v1  ;;  %3220 = vmatpush1.bf16.msra.mxu1 %v9130_v25 }
 0x84d   :  { %3180 = vmatprep.subr.bf16.mxu0 %v9131_v19  ;;  %3221 = vmatprep.subr.bf16.mxu1 %v9132_v38 }
 0x850   :  { %3181 = vmatpush1.bf16.msra.mxu0 %v9133_v28  ;;  %3222 = vmatpush1.bf16.msra.mxu1 %v9134_v55 }
 0x851   :  { %3182 = vmatprep.subr.bf16.mxu0 %v9135_v2  ;;  %3223 = vmatprep.subr.bf16.mxu1 %v9136_v41 }
 0x854   :  { %3183 = vmatpush1.bf16.msra.mxu0 %v9137_v40  ;;  %3224 = vmatpush1.bf16.msra.mxu1 %v9138_v24 }
 0x855   :  { %3184 = vmatprep.subr.bf16.mxu0 %v9053_v43  ;;  %3225 = vmatprep.subr.bf16.mxu1 %v9054_v53 }
 0x858   :  { %3185 = vmatpush1.bf16.msra.mxu0 %v9055_v36  ;;  %3226 = vmatpush1.bf16.msra.mxu1 %v9139_v22 }
 0x859   :  { %3186 = vmatprep.subr.bf16.mxu0 %v9057_v60  ;;  %3227 = vmatprep.subr.bf16.mxu1 %v9058_v61 }
 0x85c   :  { %3187 = vmatpush1.bf16.msra.mxu0 %v9059_v31  ;;  %3228 = vmatpush1.bf16.msra.mxu1 %v9060_v30 }
 0x85d   :  { %3188 = vmatprep.subr.bf16.mxu0 %v9061_v34  ;;  %3229 = vmatprep.subr.bf16.mxu1 %v9062_v39 }
 0x860   :  { %3189 = vmatpush1.bf16.msra.mxu0 %v9408_v58  ;;  %3230 = vmatpush1.bf16.msra.mxu1 %v9409_v23 }
 0x861   :  { %3190 = vmatprep.subr.bf16.mxu0 %v9410_v5  ;;  %3231 = vmatprep.subr.bf16.mxu1 %v9411_v14 }
 0x864   :  { %3191 = vmatpush1.bf16.msra.mxu0 %v9412_v20  ;;  %3232 = vmatpush1.bf16.msra.mxu1 %v9413_v4 }
 0x865   :  { %3192 = vmatprep.subr.bf16.mxu0 %v9414_v47  ;;  %3233 = vmatprep.subr.bf16.mxu1 %v9415_v0  ;;  %v9426_v0 = vld [vmem:[#allocation157_spill] sm:$0xff] }
 0x868   :  { %3193 = vmatpush1.bf16.msra.mxu0 %v9416_v50  ;;  %3234 = vmatpush1.bf16.msra.mxu1 %v9417_v9  ;;  %v9427_v50 = vld [vmem:[#allocation158_spill] sm:$0xff]  ;;  %v9428_v9 = vld [vmem:[#allocation159_spill] sm:$0xff] }
 0x869   :  { %3194 = vmatprep.subr.bf16.mxu0 %v9418_v59  ;;  %3235 = vmatprep.subr.bf16.mxu1 %v9419_v11  ;;  %v9429_v59 = vld [vmem:[#allocation160_spill] sm:$0xff]  ;;  %v9430_v11 = vld [vmem:[#allocation161_spill] sm:$0xff] }
 0x86c   :  { %3195 = vmatpush1.bf16.msra.mxu0 %v9420_v62  ;;  %3236 = vmatpush1.bf16.msra.mxu1 %v9421_v57  ;;  %v9431_v62 = vld [vmem:[#allocation162_spill] sm:$0xff]  ;;  %v9432_v57 = vld [vmem:[#allocation163_spill] sm:$0xff] }
 0x86d   :  { %3196 = vmatprep.subr.bf16.mxu0 %v9422_v48  ;;  %3237 = vmatprep.subr.bf16.mxu1 %v9423_v27  ;;  %v9433_v48 = vld [vmem:[#allocation164_spill] sm:$0xff]  ;;  %v9434_v27 = vld [vmem:[#allocation37_spill] sm:$0xff] }
 0x870   :  { %3197 = vmatpush1.bf16.msra.mxu0 %v9424_v33  ;;  %3238 = vmatpush1.bf16.msra.mxu1 %v9425_v35  ;;  %v9435_v33 = vld [vmem:[#allocation38_spill] sm:$0xff] }
 0x871   :  { %3198 = vmatprep.subr.bf16.mxu0 %v9426_v0  ;;  %3239 = vmatprep.subr.bf16.mxu1 %v9427_v50  ;;  %v9436_v50 = vld [vmem:[#allocation39_spill] sm:$0xff]  ;;  %v9445_v0 = vld [vmem:[#allocation48_spill] sm:$0xff] }
 0x874   :  { %3199 = vmatpush1.bf16.msra.mxu0 %v9428_v9  ;;  %3240 = vmatpush1.bf16.msra.mxu1 %v9429_v59  ;;  %v9437_v9 = vld [vmem:[#allocation40_spill] sm:$0xff]  ;;  %v9438_v59 = vld [vmem:[#allocation41_spill] sm:$0xff] }
 0x875   :  { %3200 = vmatprep.subr.bf16.mxu0 %v9430_v11  ;;  %3241 = vmatprep.subr.bf16.mxu1 %v9431_v62  ;;  %v9439_v11 = vld [vmem:[#allocation42_spill] sm:$0xff]  ;;  %v9440_v62 = vld [vmem:[#allocation43_spill] sm:$0xff] }
 0x878   :  { %3201 = vmatpush1.bf16.msra.mxu0 %v9432_v57  ;;  %3242 = vmatpush1.bf16.msra.mxu1 %v9433_v48  ;;  %v9441_v57 = vld [vmem:[#allocation44_spill] sm:$0xff]  ;;  %v9442_v48 = vld [vmem:[#allocation45_spill] sm:$0xff] }
 0x879   :  { %3342 = vmatprep.subr.bf16.mxu0 %v9434_v27  ;;  %3383 = vmatprep.subr.bf16.mxu1 %v9435_v33  ;;  %v9443_v27 = vld [vmem:[#allocation46_spill] sm:$0xff]  ;;  %v9444_v33 = vld [vmem:[#allocation47_spill] sm:$0xff] }
 0x87b   :  { %3203 = vmatmul.mubr.bf16.vlgmr.msra.gmra.mrb[60].mxu0 %v7948_v21  ;;  %3244 = vmatmul.mubr.bf16.vlgmr.msra.gmra.mrb[60].mxu1 %v7948_v21  ;;  %v9446_v21 = vld [vmem:[#allocation49_spill] sm:$0xff] }
 0x87c   :  { %3343 = vmatpush1.bf16.msra.mxu0 %v9436_v50  ;;  %3384 = vmatpush1.bf16.msra.mxu1 %v9437_v9  ;;  %v9447_v50 = vld [vmem:[#allocation50_spill] sm:$0xff]  ;;  %v9448_v9 = vld [vmem:[#allocation51_spill] sm:$0xff] }
 0x87d   :  { %3344 = vmatprep.subr.bf16.mxu0 %v9438_v59  ;;  %3385 = vmatprep.subr.bf16.mxu1 %v9439_v11  ;;  %v9449_v59 = vld [vmem:[#allocation52_spill] sm:$0xff]  ;;  %v9450_v11 = vld [vmem:[#allocation53_spill] sm:$0xff] }
 0x880   :  { %3345 = vmatpush1.bf16.msra.mxu0 %v9440_v62  ;;  %3386 = vmatpush1.bf16.msra.mxu1 %v9441_v57  ;;  %v9451_v62 = vld [vmem:[#allocation54_spill] sm:$0xff]  ;;  %v9452_v57 = vld [vmem:[#allocation55_spill] sm:$0xff] }
 0x881   :  { %3346 = vmatprep.subr.bf16.mxu0 %v9442_v48  ;;  %3387 = vmatprep.subr.bf16.mxu1 %v9443_v27  ;;  %v9453_v48 = vld [vmem:[#allocation56_spill] sm:$0xff]  ;;  %v9454_v27 = vld [vmem:[#allocation57_spill] sm:$0xff] }
 0x884   :  { %3347 = vmatpush1.bf16.msra.mxu0 %v9444_v33  ;;  %3388 = vmatpush1.bf16.msra.mxu1 %v9445_v0  ;;  %v9455_v33 = vld [vmem:[#allocation58_spill] sm:$0xff]  ;;  %v9456_v0 = vld [vmem:[#allocation59_spill] sm:$0xff] }
 0x885   :  { %3348 = vmatprep.subr.bf16.mxu0 %v9446_v21  ;;  %3389 = vmatprep.subr.bf16.mxu1 %v9447_v50  ;;  %v9457_v21 = vld [vmem:[#allocation60_spill] sm:$0xff]  ;;  %v9458_v50 = vld [vmem:[#allocation61_spill] sm:$0xff] }
 0x888   :  { %3349 = vmatpush1.bf16.msra.mxu0 %v9448_v9  ;;  %3390 = vmatpush1.bf16.msra.mxu1 %v9449_v59  ;;  %v9459_v9 = vld [vmem:[#allocation62_spill] sm:$0xff]  ;;  %v9460_v59 = vld [vmem:[#allocation63_spill] sm:$0xff] }
 0x889   :  { %3350 = vmatprep.subr.bf16.mxu0 %v9450_v11  ;;  %3391 = vmatprep.subr.bf16.mxu1 %v9451_v62  ;;  %v9461_v11 = vld [vmem:[#allocation64_spill] sm:$0xff]  ;;  %v9462_v62 = vld [vmem:[#allocation65_spill] sm:$0xff] }
 0x88c   :  { %3351 = vmatpush1.bf16.msra.mxu0 %v9452_v57  ;;  %3392 = vmatpush1.bf16.msra.mxu1 %v9453_v48  ;;  %v9463_v57 = vld [vmem:[#allocation66_spill] sm:$0xff]  ;;  %v9464_v48 = vld [vmem:[#allocation67_spill] sm:$0xff] }
 0x88d   :  { %3352 = vmatprep.subr.bf16.mxu0 %v9454_v27  ;;  %3393 = vmatprep.subr.bf16.mxu1 %v9455_v33  ;;  %v9465_v27 = vld [vmem:[#allocation68_spill] sm:$0xff]  ;;  %v9466_v33 = vld [vmem:[#allocation69_spill] sm:$0xff] }
 0x890   :  { %3353 = vmatpush1.bf16.msra.mxu0 %v9456_v0  ;;  %3394 = vmatpush1.bf16.msra.mxu1 %v9457_v21  ;;  %v9467_v0 = vld [vmem:[#allocation70_spill] sm:$0xff]  ;;  %v9468_v21 = vld [vmem:[#allocation71_spill] sm:$0xff] }
 0x891   :  { %3354 = vmatprep.subr.bf16.mxu0 %v9458_v50  ;;  %3395 = vmatprep.subr.bf16.mxu1 %v9459_v9  ;;  %v9469_v50 = vld [vmem:[#allocation72_spill] sm:$0xff]  ;;  %v9470_v9 = vld [vmem:[#allocation73_spill] sm:$0xff] }
 0x894   :  { %3355 = vmatpush1.bf16.msra.mxu0 %v9460_v59  ;;  %3396 = vmatpush1.bf16.msra.mxu1 %v9461_v11  ;;  %v9471_v59 = vld [vmem:[#allocation74_spill] sm:$0xff]  ;;  %v9472_v11 = vld [vmem:[#allocation75_spill] sm:$0xff] }
 0x895   :  { %3356 = vmatprep.subr.bf16.mxu0 %v9462_v62  ;;  %3397 = vmatprep.subr.bf16.mxu1 %v9463_v57  ;;  %v9473_v62 = vld [vmem:[#allocation76_spill] sm:$0xff]  ;;  %v9474_v57 = vld [vmem:[#allocation77_spill] sm:$0xff] }
 0x898   :  { %3357 = vmatpush1.bf16.msra.mxu0 %v9464_v48  ;;  %3398 = vmatpush1.bf16.msra.mxu1 %v9465_v27  ;;  %v9475_v48 = vld [vmem:[#allocation78_spill] sm:$0xff]  ;;  %v9476_v27 = vld [vmem:[#allocation79_spill] sm:$0xff] }
 0x899   :  { %3358 = vmatprep.subr.bf16.mxu0 %v9466_v33  ;;  %3399 = vmatprep.subr.bf16.mxu1 %v9467_v0  ;;  %v9477_v33 = vld [vmem:[#allocation80_spill] sm:$0xff]  ;;  %v9478_v0 = vld [vmem:[#allocation81_spill] sm:$0xff] }
 0x89c   :  { %3359 = vmatpush1.bf16.msra.mxu0 %v9468_v21  ;;  %3400 = vmatpush1.bf16.msra.mxu1 %v9469_v50  ;;  %v9479_v21 = vld [vmem:[#allocation82_spill] sm:$0xff]  ;;  %v9480_v50 = vld [vmem:[#allocation83_spill] sm:$0xff] }
 0x89d   :  { %3360 = vmatprep.subr.bf16.mxu0 %v9470_v9  ;;  %3401 = vmatprep.subr.bf16.mxu1 %v9471_v59  ;;  %v9481_v9 = vld [vmem:[#allocation84_spill] sm:$0xff]  ;;  %v9482_v59 = vld [vmem:[#allocation85_spill] sm:$0xff] }
 0x8a0   :  { %3361 = vmatpush1.bf16.msra.mxu0 %v9472_v11  ;;  %3402 = vmatpush1.bf16.msra.mxu1 %v9473_v62  ;;  %v9483_v11 = vld [vmem:[#allocation86_spill] sm:$0xff]  ;;  %v9484_v62 = vld [vmem:[#allocation87_spill] sm:$0xff] }
 0x8a1   :  { %3362 = vmatprep.subr.bf16.mxu0 %v9474_v57  ;;  %3403 = vmatprep.subr.bf16.mxu1 %v9475_v48  ;;  %v9485_v57 = vld [vmem:[#allocation88_spill] sm:$0xff]  ;;  %v9486_v48 = vld [vmem:[#allocation89_spill] sm:$0xff] }
 0x8a4   :  { %3363 = vmatpush1.bf16.msra.mxu0 %v9476_v27  ;;  %3404 = vmatpush1.bf16.msra.mxu1 %v9477_v33  ;;  %v9487_v27 = vld [vmem:[#allocation90_spill] sm:$0xff]  ;;  %v9488_v33 = vld [vmem:[#allocation91_spill] sm:$0xff] }
 0x8a5   :  { %3364 = vmatprep.subr.bf16.mxu0 %v9478_v0  ;;  %3405 = vmatprep.subr.bf16.mxu1 %v9479_v21  ;;  %v9489_v0 = vld [vmem:[#allocation92_spill] sm:$0xff]  ;;  %v9490_v21 = vld [vmem:[#allocation93_spill] sm:$0xff] }
 0x8a8   :  { %3365 = vmatpush1.bf16.msra.mxu0 %v9480_v50  ;;  %3406 = vmatpush1.bf16.msra.mxu1 %v9481_v9  ;;  %v9491_v50 = vld [vmem:[#allocation94_spill] sm:$0xff]  ;;  %v9492_v9 = vld [vmem:[#allocation95_spill] sm:$0xff] }
 0x8a9   :  { %3366 = vmatprep.subr.bf16.mxu0 %v9482_v59  ;;  %3407 = vmatprep.subr.bf16.mxu1 %v9483_v11  ;;  %v9493_v59 = vld [vmem:[#allocation96_spill] sm:$0xff]  ;;  %v9494_v11 = vld [vmem:[#allocation97_spill] sm:$0xff] }
 0x8ac   :  { %3367 = vmatpush1.bf16.msra.mxu0 %v9484_v62  ;;  %3408 = vmatpush1.bf16.msra.mxu1 %v9485_v57  ;;  %v9495_v62 = vld [vmem:[#allocation98_spill] sm:$0xff]  ;;  %v9496_v57 = vld [vmem:[#allocation99_spill] sm:$0xff] }
 0x8ad   :  { %3368 = vmatprep.subr.bf16.mxu0 %v9486_v48  ;;  %3409 = vmatprep.subr.bf16.mxu1 %v9487_v27  ;;  %v9497_v48 = vld [vmem:[#allocation100_spill] sm:$0xff]  ;;  %v9498_v27 = vld [vmem:[#allocation101_spill] sm:$0xff] }
 0x8b0   :  { %3369 = vmatpush1.bf16.msra.mxu0 %v9488_v33  ;;  %3410 = vmatpush1.bf16.msra.mxu1 %v9489_v0  ;;  %v9499_v33 = vld [vmem:[#allocation102_spill] sm:$0xff] }
 0x8b1   :  { %3370 = vmatprep.subr.bf16.mxu0 %v9490_v21  ;;  %3411 = vmatprep.subr.bf16.mxu1 %v9491_v50 }
 0x8b4   :  { %3371 = vmatpush1.bf16.msra.mxu0 %v9492_v9  ;;  %3412 = vmatpush1.bf16.msra.mxu1 %v9493_v59 }
 0x8b5   :  { %3372 = vmatprep.subr.bf16.mxu0 %v9494_v11  ;;  %3413 = vmatprep.subr.bf16.mxu1 %v9495_v62 }
 0x8b8   :  { %3373 = vmatpush1.bf16.msra.mxu0 %v9496_v57  ;;  %3414 = vmatpush1.bf16.msra.mxu1 %v9497_v48 }
 0x8b9   :  { %3424 = vmatprep.subr.bf16.mxu0 %v9498_v27  ;;  %3465 = vmatprep.subr.bf16.mxu1 %v9499_v33 }
 0x90e   :  { %v3122_v0 = vpop.f32.mrb[56].mxu0  ;;  %v3163_v21 = vpop.f32.mrb[56].mxu1 }
 0x90f   :  { %v3262_v35 = vrot.slane %v3163_v21, 2  ;;  %v3124_v50 = vpop.f32.mrb[57].mxu0  ;;  %v3165_v47 = vpop.f32.mrb[57].mxu1  ;;  %v3312_v21 = vrot.slane %v7942_v26, 7 }
 0x910   :  { %v3263_v9 = vrot.slane %v3165_v47, 2  ;;  %v3126_v4 = vpop.f32.mrb[58].mxu0  ;;  %v3167_v59 = vpop.f32.mrb[58].mxu1 }
 0x911   :  { %v3278_v11 = vadd.f32 %v3262_v35, %v7156_v6  ;;  %v3127_v20 = vpop.f32.mrb[59].mxu0  ;;  %v3168_v62 = vpop.f32.mrb[59].mxu1  ;;  %v3313_v59 = vrot.slane %v7944_v29, 7 }
 0x912   :  { %v3279_v57 = vadd.f32 %v3263_v9, %v7158_v7  ;;  %v3260_v20 = vrot.slane %v3122_v0, 2  ;;  %v3261_v62 = vrot.slane %v3124_v50, 2 }
 0x913   :  { %v3292_v14 = vmul.f32 0.5, %v3278_v11 }
 0x914   :  { %v3293_v48 = vmul.f32 0.5, %v3279_v57  ;;  %v3276_v9 = vadd.f32 %v3260_v20, %v7160_v56  ;;  %v3277_v11 = vadd.f32 %v3261_v62, %v7163_v10  ;;  %v9500_v20 = vld [vmem:[#allocation173_spill] sm:$0xff] }
 0x915   :  { %6333 = vtanh.f32 %v3292_v14 }
 0x916   :  { %6335 = vtanh.f32 %v3293_v48  ;;  %v3284_v14 = vmul.f32 0.5, %v3276_v9  ;;  %v3285_v57 = vmul.f32 0.5, %v3277_v11 }
 0x918   :  { %6337 = vtanh.f32 %v3284_v14 }
 0x919   :  { %6339 = vtanh.f32 %v3285_v57 }
 0x91f   :  { %v6334_v27 = vpop.eup %6333 }
 0x920   :  { %v3296_v33 = vmul.f32 0.5, %v6334_v27  ;;  %v6336_v5 = vpop.eup %6335 }
 0x921   :  { %v3297_v58 = vmul.f32 0.5, %v6336_v5 }
 0x922   :  { %v3298_v23 = vadd.f32 0.5, %v3296_v33  ;;  %v6338_v14 = vpop.eup %6337 }
 0x923   :  { %v3299_v4 = vadd.f32 0.5, %v3297_v58  ;;  %v6340_v57 = vpop.eup %6339 }
 0x924   :  { %v3316_v47 = vmul.f32 %v3312_v21, %v3298_v23 }
 0x925   :  { %v3317_v35 = vmul.f32 %v3313_v59, %v3299_v4 }
 0x94e   :  { %v3204_v48 = vpop.f32.mrb[60].mxu0  ;;  %v3245_v27 = vpop.f32.mrb[60].mxu1 }
 0x94f   :  { %v3264_v33 = vrot.slane %v3204_v48, 2  ;;  %v3266_v26 = vrot.slane %v3245_v27, 2  ;;  %v3206_v5 = vpop.f32.mrb[61].mxu0  ;;  %v3247_v23 = vpop.f32.mrb[61].mxu1 }
 0x950   :  { %v3265_v58 = vrot.slane %v3206_v5, 2  ;;  %v3267_v21 = vrot.slane %v3247_v23, 2  ;;  %v3208_v29 = vpop.f32.mrb[62].mxu0  ;;  %v3249_v4 = vpop.f32.mrb[62].mxu1  ;;  %v3288_v5 = vmul.f32 0.5, %v6338_v14  ;;  %v3289_v23 = vmul.f32 0.5, %v6340_v57 }
 0x951   :  { %v3280_v0 = vadd.f32 %v3264_v33, %v7180_v17  ;;  %v3209_v50 = vpop.f32.mrb[63].mxu0  ;;  %v3250_v59 = vpop.f32.mrb[63].mxu1  ;;  %v3282_v62 = vadd.f32 %v3266_v26, %v9500_v20 }
 0x952   :  { %v3281_v9 = vadd.f32 %v3265_v58, %v7182_v32  ;;  %v3283_v11 = vadd.f32 %v3267_v21, %v9035_v51  ;;  %v3290_v29 = vadd.f32 0.5, %v3288_v5  ;;  %v3291_v4 = vadd.f32 0.5, %v3289_v23 }
 0x953   :  { %6341 = vtanh.f32 %v3280_v0  ;;  %v3302_v48 = vmul.f32 0.5, %v3282_v62 }
 0x954   :  { %6343 = vtanh.f32 %v3281_v9  ;;  %v3303_v27 = vmul.f32 0.5, %v3283_v11 }
 0x955   :  { %6345 = vtanh.f32 %v3302_v48 }
 0x956   :  { %6347 = vtanh.f32 %v3303_v27 }
 0x95d   :  { %v6342_v33 = vpop.eup %6341 }
 0x95e   :  { %v6344_v50 = vpop.eup %6343  ;;  %v3318_v59 = vmul.f32 %v6342_v33, %v3290_v29 }
 0x95f   :  { %v3319_v26 = vmul.f32 %v6344_v50, %v3291_v4  ;;  %v6346_v21 = vpop.eup %6345 }
 0x960   :  { %v8092_v20 = vadd.f32 %v3318_v59, %v3316_v47  ;;  %v6348_v0 = vpop.eup %6347  ;;  %v3306_v62 = vmul.f32 0.5, %v6346_v21 }
 0x961   :  { %v8094_v58 = vadd.f32 %v3319_v26, %v3317_v35  ;;  %v3307_v9 = vmul.f32 0.5, %v6348_v0 }
 0x962   :  { %6349 = vtanh.f32 %v8092_v20  ;;  %v3308_v11 = vadd.f32 0.5, %v3306_v62 }
 0x963   :  { %6351 = vtanh.f32 %v8094_v58  ;;  %v3309_v57 = vadd.f32 0.5, %v3307_v9 }
 0x96c   :  { %v6350_v14 = vpop.eup %6349 }
 0x96d   :  { %v6352_v48 = vpop.eup %6351  ;;  %v3324_v27 = vmul.f32 %v6350_v14, %v3308_v11  ;;  %v3566_v14 = vrot.slane %v8092_v20, 7 }
 0x96e   :  { %v3325_v5 = vmul.f32 %v6352_v48, %v3309_v57 }
 0x96f   :  { %v3327_v23 = vrot.slane %v3324_v27, 6  ;;  %v3334_v29 = vpack.c.bf16 %v3324_v27, %v3324_v27 }
 0x970   :  { %v3331_v47 = vrot.slane %v3325_v5, 6  ;;  %v3335_v33 = vpack.c.bf16 %v3325_v5, %v3325_v5  ;;  %v3567_v5 = vrot.slane %v8094_v58, 7 }
 0x971   :  { %3329 = vst [vmem:[#allocation2 + $0x6] sm:$0x1] %v3327_v23  ;;  %v8098_v4 = vrot.slane %v3334_v29, 3 }
 0x972   :  { %3333 = vst [vmem:[#allocation2 + $0x9] sm:$0x1] %v3331_v47  ;;  %v3339_v35 = vrot.slane %v3335_v33, 3 }
 0x974   :  { %3374 = vmatprep.mubr.bf16.mxu0 %v3339_v35  ;;  %3415 = vmatprep.mubr.bf16.mxu1 %v3339_v35 }
 0x975   :  { %3375 = vmatmul.mubr.bf16.vlgmr.msra.gmra.mrb[64].mxu0 %v8098_v4  ;;  %3416 = vmatmul.mubr.bf16.vlgmr.msra.gmra.mrb[64].mxu1 %v8098_v4 }
 0x976   :  { %3425 = vmatpush1.bf16.msra.mxu0 %v8941_v16  ;;  %3466 = vmatpush1.bf16.msra.mxu1 %v8942_v12  ;;  %v9501_v16 = vld [vmem:[#allocation139_spill] sm:$0xff]  ;;  %v9502_v12 = vld [vmem:[#allocation140_spill] sm:$0xff] }
 0x977   :  { %3456 = vmatprep.mubr.bf16.mxu0 %v3339_v35  ;;  %3497 = vmatprep.mubr.bf16.mxu1 %v3339_v35 }
 0x978   :  { %3426 = vmatprep.subr.bf16.mxu0 %v8943_v15  ;;  %3467 = vmatprep.subr.bf16.mxu1 %v8944_v8  ;;  %v9503_v15 = vld [vmem:[#allocation141_spill] sm:$0xff]  ;;  %v9504_v8 = vld [vmem:[#allocation142_spill] sm:$0xff] }
 0x97a   :  { %3427 = vmatpush1.bf16.msra.mxu0 %v8945_v63  ;;  %3468 = vmatpush1.bf16.msra.mxu1 %v8946_v3  ;;  %v9505_v63 = vld [vmem:[#allocation143_spill] sm:$0xff]  ;;  %v9506_v3 = vld [vmem:[#allocation144_spill] sm:$0xff] }
 0x97b   :  { %3428 = vmatprep.subr.bf16.mxu0 %v8947_v13  ;;  %3469 = vmatprep.subr.bf16.mxu1 %v8948_v18  ;;  %v9507_v13 = vld [vmem:[#allocation145_spill] sm:$0xff]  ;;  %v9508_v18 = vld [vmem:[#allocation146_spill] sm:$0xff] }
 0x97e   :  { %3429 = vmatpush1.bf16.msra.mxu0 %v8949_v42  ;;  %3470 = vmatpush1.bf16.msra.mxu1 %v9036_v46  ;;  %v9509_v42 = vld [vmem:[#allocation147_spill] sm:$0xff]  ;;  %v9510_v46 = vld [vmem:[#allocation148_spill] sm:$0xff] }
 0x97f   :  { %3430 = vmatprep.subr.bf16.mxu0 %v9037_v52  ;;  %3471 = vmatprep.subr.bf16.mxu1 %v9038_v49  ;;  %v9511_v52 = vld [vmem:[#allocation149_spill] sm:$0xff]  ;;  %v9512_v49 = vld [vmem:[#allocation150_spill] sm:$0xff] }
 0x982   :  { %3431 = vmatpush1.bf16.msra.mxu0 %v9039_v45  ;;  %3472 = vmatpush1.bf16.msra.mxu1 %v9040_v44  ;;  %v9513_v45 = vld [vmem:[#allocation151_spill] sm:$0xff]  ;;  %v9514_v44 = vld [vmem:[#allocation152_spill] sm:$0xff] }
 0x983   :  { %3432 = vmatprep.subr.bf16.mxu0 %v9041_v37  ;;  %3473 = vmatprep.subr.bf16.mxu1 %v9042_v54  ;;  %v9515_v37 = vld [vmem:[#allocation153_spill] sm:$0xff]  ;;  %v9516_v54 = vld [vmem:[#allocation154_spill] sm:$0xff] }
 0x986   :  { %3433 = vmatpush1.bf16.msra.mxu0 %v9129_v1  ;;  %3474 = vmatpush1.bf16.msra.mxu1 %v9130_v25  ;;  %v9526_v1 = vld [vmem:[#allocation164_spill] sm:$0xff] }
 0x987   :  { %3434 = vmatprep.subr.bf16.mxu0 %v9131_v19  ;;  %3475 = vmatprep.subr.bf16.mxu1 %v9132_v38 }
 0x98a   :  { %3435 = vmatpush1.bf16.msra.mxu0 %v9133_v28  ;;  %3476 = vmatpush1.bf16.msra.mxu1 %v9134_v55 }
 0x98b   :  { %3436 = vmatprep.subr.bf16.mxu0 %v9135_v2  ;;  %3477 = vmatprep.subr.bf16.mxu1 %v9136_v41 }
 0x98e   :  { %3437 = vmatpush1.bf16.msra.mxu0 %v9137_v40  ;;  %3478 = vmatpush1.bf16.msra.mxu1 %v9138_v24 }
 0x98f   :  { %3438 = vmatprep.subr.bf16.mxu0 %v9053_v43  ;;  %3479 = vmatprep.subr.bf16.mxu1 %v9054_v53  ;;  %v9517_v53 = vld [vmem:[#allocation155_spill] sm:$0xff] }
 0x990   :  { %v9525_v43 = vld [vmem:[#allocation163_spill] sm:$0xff] }
 0x992   :  { %3439 = vmatpush1.bf16.msra.mxu0 %v9055_v36  ;;  %3480 = vmatpush1.bf16.msra.mxu1 %v9139_v22  ;;  %v9518_v36 = vld [vmem:[#allocation156_spill] sm:$0xff] }
 0x993   :  { %3440 = vmatprep.subr.bf16.mxu0 %v9057_v60  ;;  %3481 = vmatprep.subr.bf16.mxu1 %v9058_v61  ;;  %v9519_v60 = vld [vmem:[#allocation157_spill] sm:$0xff]  ;;  %v9520_v61 = vld [vmem:[#allocation158_spill] sm:$0xff] }
 0x996   :  { %3441 = vmatpush1.bf16.msra.mxu0 %v9059_v31  ;;  %3482 = vmatpush1.bf16.msra.mxu1 %v9060_v30  ;;  %v9521_v31 = vld [vmem:[#allocation159_spill] sm:$0xff]  ;;  %v9522_v30 = vld [vmem:[#allocation160_spill] sm:$0xff] }
 0x997   :  { %3442 = vmatprep.subr.bf16.mxu0 %v9061_v34  ;;  %3483 = vmatprep.subr.bf16.mxu1 %v9062_v39  ;;  %v9523_v34 = vld [vmem:[#allocation161_spill] sm:$0xff]  ;;  %v9524_v39 = vld [vmem:[#allocation162_spill] sm:$0xff] }
 0x99a   :  { %3443 = vmatpush1.bf16.msra.mxu0 %v9501_v16  ;;  %3484 = vmatpush1.bf16.msra.mxu1 %v9502_v12 }
 0x99b   :  { %3444 = vmatprep.subr.bf16.mxu0 %v9503_v15  ;;  %3485 = vmatprep.subr.bf16.mxu1 %v9504_v8 }
 0x99e   :  { %3445 = vmatpush1.bf16.msra.mxu0 %v9505_v63  ;;  %3486 = vmatpush1.bf16.msra.mxu1 %v9506_v3 }
 0x99f   :  { %3446 = vmatprep.subr.bf16.mxu0 %v9507_v13  ;;  %3487 = vmatprep.subr.bf16.mxu1 %v9508_v18 }
 0x9a2   :  { %3447 = vmatpush1.bf16.msra.mxu0 %v9509_v42  ;;  %3488 = vmatpush1.bf16.msra.mxu1 %v9510_v46  ;;  %v9527_v46 = vld [vmem:[#allocation173_spill] sm:$0xff] }
 0x9a3   :  { %3448 = vmatprep.subr.bf16.mxu0 %v9511_v52  ;;  %3489 = vmatprep.subr.bf16.mxu1 %v9512_v49 }
 0x9a6   :  { %3449 = vmatpush1.bf16.msra.mxu0 %v9513_v45  ;;  %3490 = vmatpush1.bf16.msra.mxu1 %v9514_v44 }
 0x9a7   :  { %3450 = vmatprep.subr.bf16.mxu0 %v9515_v37  ;;  %3491 = vmatprep.subr.bf16.mxu1 %v9516_v54 }
 0x9aa   :  { %3451 = vmatpush1.bf16.msra.mxu0 %v9517_v53  ;;  %3492 = vmatpush1.bf16.msra.mxu1 %v9518_v36 }
 0x9ab   :  { %3452 = vmatprep.subr.bf16.mxu0 %v9519_v60  ;;  %3493 = vmatprep.subr.bf16.mxu1 %v9520_v61 }
 0x9ae   :  { %3453 = vmatpush1.bf16.msra.mxu0 %v9521_v31  ;;  %3494 = vmatpush1.bf16.msra.mxu1 %v9522_v30 }
 0x9af   :  { %3454 = vmatprep.subr.bf16.mxu0 %v9523_v34  ;;  %3495 = vmatprep.subr.bf16.mxu1 %v9524_v39 }
 0x9b2   :  { %3455 = vmatpush1.bf16.msra.mxu0 %v9525_v43  ;;  %3496 = vmatpush1.bf16.msra.mxu1 %v9526_v1 }
 0x9b5   :  { %3457 = vmatmul.mubr.bf16.vlgmr.msra.gmra.mrb[68].mxu0 %v8098_v4  ;;  %3498 = vmatmul.mubr.bf16.vlgmr.msra.gmra.mrb[68].mxu1 %v8098_v4 }
 0xa48   :  { %v3376_v25 = vpop.f32.mrb[64].mxu0  ;;  %v3417_v19 = vpop.f32.mrb[64].mxu1 }
 0xa49   :  { %v3516_v38 = vrot.slane %v3417_v19, 1  ;;  %v3378_v28 = vpop.f32.mrb[65].mxu0  ;;  %v3419_v55 = vpop.f32.mrb[65].mxu1  ;;  %v3514_v23 = vrot.slane %v3376_v25, 1 }
 0xa4a   :  { %v3517_v2 = vrot.slane %v3419_v55, 1  ;;  %v3380_v41 = vpop.f32.mrb[66].mxu0  ;;  %v3421_v40 = vpop.f32.mrb[66].mxu1  ;;  %v3515_v29 = vrot.slane %v3378_v28, 1 }
 0xa4b   :  { %v3532_v24 = vadd.f32 %v3516_v38, %v7156_v6  ;;  %v3381_v22 = vpop.f32.mrb[67].mxu0  ;;  %v3422_v50 = vpop.f32.mrb[67].mxu1 }
 0xa4c   :  { %v3533_v59 = vadd.f32 %v3517_v2, %v7158_v7  ;;  %v3530_v7 = vadd.f32 %v3514_v23, %v7160_v56  ;;  %v3531_v47 = vadd.f32 %v3515_v29, %v7163_v10  ;;  %v9528_v23 = vld [vmem:[#allocation167_spill] sm:$0xff] }
 0xa4d   :  { %v3546_v26 = vmul.f32 0.5, %v3532_v24 }
 0xa4e   :  { %v3547_v21 = vmul.f32 0.5, %v3533_v59  ;;  %v3538_v33 = vmul.f32 0.5, %v3530_v7  ;;  %v3539_v35 = vmul.f32 0.5, %v3531_v47 }
 0xa4f   :  { %6353 = vtanh.f32 %v3546_v26 }
 0xa50   :  { %6355 = vtanh.f32 %v3547_v21 }
 0xa51   :  { %6357 = vtanh.f32 %v3538_v33  ;;  %v9529_v33 = vld [vmem:[#allocation168_spill] sm:$0xff] }
 0xa52   :  { %6359 = vtanh.f32 %v3539_v35 }
 0xa59   :  { %v6354_v0 = vpop.eup %6353 }
 0xa5a   :  { %v3550_v62 = vmul.f32 0.5, %v6354_v0  ;;  %v6356_v9 = vpop.eup %6355 }
 0xa5b   :  { %v3551_v57 = vmul.f32 0.5, %v6356_v9  ;;  %v6358_v45 = vpop.eup %6357 }
 0xa5c   :  { %v3552_v11 = vadd.f32 0.5, %v3550_v62  ;;  %v6360_v44 = vpop.eup %6359  ;;  %v3542_v53 = vmul.f32 0.5, %v6358_v45 }
 0xa5d   :  { %v3553_v27 = vadd.f32 0.5, %v3551_v57  ;;  %v3543_v36 = vmul.f32 0.5, %v6360_v44 }
 0xa5e   :  { %v3570_v48 = vmul.f32 %v3566_v14, %v3552_v11  ;;  %v3544_v60 = vadd.f32 0.5, %v3542_v53 }
 0xa5f   :  { %v3571_v6 = vmul.f32 %v3567_v5, %v3553_v27  ;;  %v3545_v61 = vadd.f32 0.5, %v3543_v36  ;;  %v8179_v5 = vld [vmem:[%s8473_s5] sm:$0xff] }
 0xa60   :  { %v3616_v29 = vrot.slane %v8179_v5, %v9528_v23  ;;  %v3626_v35 = vrot.slane %v8179_v5, %v9529_v33 }
 0xa88   :  { %v3458_v4 = vpop.f32.mrb[68].mxu0  ;;  %v3499_v16 = vpop.f32.mrb[68].mxu1 }
 0xa89   :  { %v3518_v12 = vrot.slane %v3458_v4, 1  ;;  %v3520_v20 = vrot.slane %v3499_v16, 1  ;;  %v3460_v15 = vpop.f32.mrb[69].mxu0  ;;  %v3501_v8 = vpop.f32.mrb[69].mxu1 }
 0xa8a   :  { %v3519_v63 = vrot.slane %v3460_v15, 1  ;;  %v3521_v3 = vrot.slane %v3501_v8, 1  ;;  %v3462_v58 = vpop.f32.mrb[70].mxu0  ;;  %v3503_v13 = vpop.f32.mrb[70].mxu1 }
 0xa8b   :  { %v3534_v18 = vadd.f32 %v3518_v12, %v7180_v17  ;;  %v3463_v42 = vpop.f32.mrb[71].mxu0  ;;  %v3504_v56 = vpop.f32.mrb[71].mxu1  ;;  %v3536_v10 = vadd.f32 %v3520_v20, %v9527_v46 }
 0xa8c   :  { %v3535_v52 = vadd.f32 %v3519_v63, %v7182_v32  ;;  %v3537_v49 = vadd.f32 %v3521_v3, %v9035_v51 }
 0xa8d   :  { %6361 = vtanh.f32 %v3534_v18  ;;  %v3556_v37 = vmul.f32 0.5, %v3536_v10 }
 0xa8e   :  { %6363 = vtanh.f32 %v3535_v52  ;;  %v3557_v54 = vmul.f32 0.5, %v3537_v49 }
 0xa8f   :  { %6365 = vtanh.f32 %v3556_v37 }
 0xa90   :  { %6367 = vtanh.f32 %v3557_v54 }
 0xa97   :  { %v6362_v17 = vpop.eup %6361 }
 0xa98   :  { %v6364_v31 = vpop.eup %6363  ;;  %v3572_v30 = vmul.f32 %v6362_v17, %v3544_v60 }
 0xa99   :  { %v3573_v34 = vmul.f32 %v6364_v31, %v3545_v61  ;;  %v6366_v51 = vpop.eup %6365 }
 0xa9a   :  { %v3574_v39 = vadd.f32 %v3572_v30, %v3570_v48  ;;  %v6368_v43 = vpop.eup %6367  ;;  %v3560_v1 = vmul.f32 0.5, %v6366_v51 }
 0xa9b   :  { %v3575_v32 = vadd.f32 %v3573_v34, %v3571_v6  ;;  %v3561_v25 = vmul.f32 0.5, %v6368_v43  ;;  %v8184_v6 = vld [vmem:[%s8473_s5 + $0x8] sm:$0xff] }
 0xa9c   :  { %6369 = vtanh.f32 %v3574_v39  ;;  %v3562_v19 = vadd.f32 0.5, %v3560_v1  ;;  %v3620_v7 = vrot.slane %v8184_v6, %v9528_v23  ;;  %v3630_v4 = vrot.slane %v8184_v6, %v9529_v33 }
 0xa9d   :  { %6371 = vtanh.f32 %v3575_v32  ;;  %v3563_v28 = vadd.f32 0.5, %v3561_v25 }
 0xaa6   :  { %v6370_v38 = vpop.eup %6369 }
 0xaa7   :  { %v6372_v55 = vpop.eup %6371  ;;  %v3578_v2 = vmul.f32 %v6370_v38, %v3562_v19 }
 0xaa8   :  { %v3579_v41 = vmul.f32 %v6372_v55, %v3563_v28 }
 0xaa9   :  { %v3581_v40 = vrot.slane %v3578_v2, 7 }
 0xaaa   :  { %v3585_v24 = vrot.slane %v3579_v41, 7 }
 0xaab   :  { %3583 = vst [vmem:[#allocation2 + $0x7] sm:$0x1] %v3581_v40 }
 0xaac   :  { %3587 = vst [vmem:[#allocation2 + $0x8] sm:$0x1] %v3585_v24 }
 0xab2   :  { %v3588_v22 = vld [vmem:[#allocation2] sm:$0xff] }
 0xab3   :  { %v3589_v50 = vld [vmem:[#allocation2 + $0x8] sm:$0xff] }
 0xab4   :  { %v3596_v59 = vadd.f32 %v3589_v50, %v3588_v22 }
 0xab6   :  { %3597 = vadd.xlane.f32.xlu0 %v3596_v59 }
 0xb43   :  { %v3598_v26 = vpop.xlane.xlu0 %3597 }
 0xb44   :  { %v3600_v21 = vmul.f32 0.00390625, %v3598_v26 }
 0xb46   :  { %v3601_v0 = vsub.f32 %v3588_v22, %v3600_v21  ;;  %v3602_v62 = vsub.f32 %v3589_v50, %v3600_v21 }
 0xb48   :  { %v3603_v9 = vmul.f32 %v3601_v0, %v3601_v0  ;;  %v3604_v11 = vmul.f32 %v3602_v62, %v3602_v62 }
 0xb4a   :  { %v3605_v14 = vadd.f32 %v3604_v11, %v3603_v9 }
 0xb4c   :  { %3606 = vadd.xlane.f32.xlu0 %v3605_v14 }
 0xbd9   :  { %v3607_v57 = vpop.xlane.xlu0 %3606 }
 0xbda   :  { %v3608_v48 = vmul.f32 0.00390625, %v3607_v57 }
 0xbdc   :  { %v3609_v27 = vadd.f32 1e-05, %v3608_v48 }
 0xbde   :  { %6373 = vrsqrt.f32 %v3609_v27 }
 0xbe8   :  { %v6374_v47 = vpop.eup %6373 }
 0xbe9   :  { %v3611_v16 = vmul.f32 %v6374_v47, %v3601_v0  ;;  %v3612_v12 = vmul.f32 %v6374_v47, %v3602_v62 }
 0xbeb   :  { %v3621_v20 = vmul.f32 %v3616_v29, %v3611_v16  ;;  %v3622_v15 = vmul.f32 %v3620_v7, %v3612_v12 }
 0xbed   :  { %v8194_v8 = vadd.f32 %v3626_v35, %v3621_v20  ;;  %v8196_v63 = vadd.f32 %v3630_v4, %v3622_v15 }
 0xbee   :  { %6453 = dma.done.wait [#allocation8], 18432 }
 0xbef   :  { %6454 = vsyncadd [#allocation8], 4294948864 }
 0xbf0   :  { %6455 = dma.done.wait [#allocation8 + $0x1], 4096 }
 0xbf1   :  { %6456 = vsyncadd [#allocation8 + $0x1], 4294963200  ;;  %v3808_v3 = vld [vmem:[#allocation4 + $0x8] sm:$0xff]  ;;  %v3807_v13 = vld [vmem:[#allocation4] sm:$0xff] }
 0xbf2   :  { %v3660_v58 = vld [vmem:[#allocation3 + $0x8] sm:$0xff]  ;;  %3839 = vmatprep.subr.bf16.mxu0 %v3808_v3  ;;  %v3659_v18 = vld [vmem:[#allocation3] sm:$0xff]  ;;  %v3810_v42 = vld [vmem:[#allocation4 + $0x18] sm:$0xff] }
 0xbf3   :  { %3880 = vmatprep.subr.bf16.mxu1 %v3660_v58  ;;  %v3662_v56 = vld [vmem:[#allocation3 + $0x18] sm:$0xff]  ;;  %3840 = vmatpush1.bf16.msra.mxu0 %v3807_v13  ;;  %v3809_v46 = vld [vmem:[#allocation4 + $0x10] sm:$0xff]  ;;  %v3812_v52 = vld [vmem:[#allocation4 + $0x28] sm:$0xff] }
 0xbf4   :  { %3881 = vmatpush1.bf16.msra.mxu1 %v3659_v18  ;;  %3841 = vmatprep.subr.bf16.mxu0 %v3810_v42  ;;  %v3661_v10 = vld [vmem:[#allocation3 + $0x10] sm:$0xff]  ;;  %v3664_v49 = vld [vmem:[#allocation3 + $0x28] sm:$0xff]  ;;  %v3811_v45 = vld [vmem:[#allocation4 + $0x20] sm:$0xff] }
 0xbf5   :  { %3882 = vmatprep.subr.bf16.mxu1 %v3662_v56  ;;  %v3663_v44 = vld [vmem:[#allocation3 + $0x20] sm:$0xff]  ;;  %v3814_v37 = vld [vmem:[#allocation4 + $0x38] sm:$0xff]  ;;  %v3813_v53 = vld [vmem:[#allocation4 + $0x30] sm:$0xff] }
 0xbf6   :  { %v3666_v54 = vld [vmem:[#allocation3 + $0x38] sm:$0xff]  ;;  %v3665_v36 = vld [vmem:[#allocation3 + $0x30] sm:$0xff]  ;;  %v3816_v60 = vld [vmem:[#allocation4 + $0x48] sm:$0xff] }
 0xbf7   :  { %3842 = vmatpush1.bf16.msra.mxu0 %v3809_v46  ;;  %v3668_v17 = vld [vmem:[#allocation3 + $0x48] sm:$0xff]  ;;  %v3815_v61 = vld [vmem:[#allocation4 + $0x40] sm:$0xff]  ;;  %v3818_v30 = vld [vmem:[#allocation4 + $0x58] sm:$0xff] }
 0xbf8   :  { %3883 = vmatpush1.bf16.msra.mxu1 %v3661_v10  ;;  %3843 = vmatprep.subr.bf16.mxu0 %v3812_v52  ;;  %v3667_v31 = vld [vmem:[#allocation3 + $0x40] sm:$0xff]  ;;  %v3670_v34 = vld [vmem:[#allocation3 + $0x58] sm:$0xff]  ;;  %v3817_v39 = vld [vmem:[#allocation4 + $0x50] sm:$0xff] }
 0xbf9   :  { %3884 = vmatprep.subr.bf16.mxu1 %v3664_v49  ;;  %v3669_v32 = vld [vmem:[#allocation3 + $0x50] sm:$0xff]  ;;  %v3820_v51 = vld [vmem:[#allocation4 + $0x68] sm:$0xff]  ;;  %v3804_v1 = vld [vmem:[%s8469_s1 + $0x8] sm:$0xff] }
 0xbfa   :  { %v3672_v43 = vld [vmem:[#allocation3 + $0x68] sm:$0xff]  ;;  %v3642_v25 = vld [vmem:[%s8470_s2 + $0x8] sm:$0xff]  ;;  %v3806_v19 = vpack.c.bf16 %v3804_v1, %v3804_v1  ;;  %v3819_v28 = vld [vmem:[#allocation4 + $0x60] sm:$0xff] }
 0xbfb   :  { %3844 = vmatpush1.bf16.msra.mxu0 %v3811_v45  ;;  %v3651_v38 = vpack.c.bf16 %v3642_v25, %v3642_v25  ;;  %v3671_v55 = vld [vmem:[#allocation3 + $0x60] sm:$0xff]  ;;  %v3822_v2 = vld [vmem:[#allocation4 + $0x78] sm:$0xff]  ;;  %v3821_v40 = vld [vmem:[#allocation4 + $0x70] sm:$0xff] }
 0xbfc   :  { %3885 = vmatpush1.bf16.msra.mxu1 %v3663_v44  ;;  %3845 = vmatprep.subr.bf16.mxu0 %v3814_v37  ;;  %v3674_v41 = vld [vmem:[#allocation3 + $0x78] sm:$0xff]  ;;  %v3673_v24 = vld [vmem:[#allocation3 + $0x70] sm:$0xff]  ;;  %v3824_v22 = vld [vmem:[#allocation4 + $0x88] sm:$0xff] }
 0xbfd   :  { %3886 = vmatprep.subr.bf16.mxu1 %v3666_v54  ;;  %3871 = vmatprep.mubr.bf16.mxu0 %v3806_v19  ;;  %v3676_v50 = vld [vmem:[#allocation3 + $0x88] sm:$0xff]  ;;  %v3823_v59 = vld [vmem:[#allocation4 + $0x80] sm:$0xff]  ;;  %v3826_v21 = vld [vmem:[#allocation4 + $0x98] sm:$0xff] }
 0xbfe   :  { %3912 = vmatprep.mubr.bf16.mxu1 %v3651_v38  ;;  %v3675_v26 = vld [vmem:[#allocation3 + $0x80] sm:$0xff]  ;;  %v3678_v0 = vld [vmem:[#allocation3 + $0x98] sm:$0xff]  ;;  %v3825_v62 = vld [vmem:[#allocation4 + $0x90] sm:$0xff] }
 0xbff   :  { %3846 = vmatpush1.bf16.msra.mxu0 %v3813_v53  ;;  %v3677_v9 = vld [vmem:[#allocation3 + $0x90] sm:$0xff]  ;;  %v3828_v11 = vld [vmem:[#allocation4 + $0xa8] sm:$0xff]  ;;  %v3827_v57 = vld [vmem:[#allocation4 + $0xa0] sm:$0xff] }
 0xc00   :  { %3887 = vmatpush1.bf16.msra.mxu1 %v3665_v36  ;;  %3847 = vmatprep.subr.bf16.mxu0 %v3816_v60  ;;  %v3680_v14 = vld [vmem:[#allocation3 + $0xa8] sm:$0xff]  ;;  %v3679_v48 = vld [vmem:[#allocation3 + $0xa0] sm:$0xff]  ;;  %v3830_v27 = vld [vmem:[#allocation4 + $0xb8] sm:$0xff] }
 0xc01   :  { %3888 = vmatprep.subr.bf16.mxu1 %v3668_v17  ;;  %v3682_v29 = vld [vmem:[#allocation3 + $0xb8] sm:$0xff]  ;;  %v3829_v7 = vld [vmem:[#allocation4 + $0xb0] sm:$0xff]  ;;  %v3832_v35 = vld [vmem:[#allocation4 + $0xc8] sm:$0xff] }
 0xc02   :  { %v3681_v47 = vld [vmem:[#allocation3 + $0xb0] sm:$0xff]  ;;  %v3684_v4 = vld [vmem:[#allocation3 + $0xc8] sm:$0xff]  ;;  %v3831_v16 = vld [vmem:[#allocation4 + $0xc0] sm:$0xff] }
 0xc03   :  { %3848 = vmatpush1.bf16.msra.mxu0 %v3815_v61  ;;  %v3683_v12 = vld [vmem:[#allocation3 + $0xc0] sm:$0xff]  ;;  %v3834_v20 = vld [vmem:[#allocation4 + $0xd8] sm:$0xff]  ;;  %v3833_v3 = vld [vmem:[#allocation4 + $0xd0] sm:$0xff] }
 0xc04   :  { %3889 = vmatpush1.bf16.msra.mxu1 %v3667_v31  ;;  %3849 = vmatprep.subr.bf16.mxu0 %v3818_v30  ;;  %v3686_v15 = vld [vmem:[#allocation3 + $0xd8] sm:$0xff]  ;;  %v3685_v58 = vld [vmem:[#allocation3 + $0xd0] sm:$0xff]  ;;  %v3836_v13 = vld [vmem:[#allocation4 + $0xe8] sm:$0xff] }
 0xc05   :  { %3890 = vmatprep.subr.bf16.mxu1 %v3670_v34  ;;  %v3688_v18 = vld [vmem:[#allocation3 + $0xe8] sm:$0xff]  ;;  %v3835_v42 = vld [vmem:[#allocation4 + $0xe0] sm:$0xff]  ;;  %v3838_v46 = vld [vmem:[#allocation4 + $0xf8] sm:$0xff] }
 0xc06   :  { %v3687_v56 = vld [vmem:[#allocation3 + $0xe0] sm:$0xff]  ;;  %v3690_v10 = vld [vmem:[#allocation3 + $0xf8] sm:$0xff]  ;;  %v3803_v52 = vld [vmem:[%s8469_s1] sm:$0xff] }
 0xc07   :  { %3850 = vmatpush1.bf16.msra.mxu0 %v3817_v39  ;;  %v3641_v49 = vld [vmem:[%s8470_s2] sm:$0xff]  ;;  %v3692_v37 = vld [vmem:[#allocation3 + $0x108] sm:$0xff]  ;;  %v3805_v53 = vpack.c.bf16 %v3803_v52, %v3803_v52  ;;  %v3646_v17 = vld [vmem:[%s8470_s2 + $0x28] sm:$0xff] }
 0xc08   :  { %3891 = vmatpush1.bf16.msra.mxu1 %v3669_v32  ;;  %3851 = vmatprep.subr.bf16.mxu0 %v3820_v51  ;;  %v3837_v45 = vld [vmem:[#allocation4 + $0xf0] sm:$0xff]  ;;  %v3724_v54 = vld [vmem:[#allocation3 + $0x208] sm:$0xff]  ;;  %v3650_v36 = vpack.c.bf16 %v3641_v49, %v3641_v49  ;;  %v3691_v61 = vld [vmem:[#allocation3 + $0x100] sm:$0xff]  ;;  %v3655_v32 = vpack.c.bf16 %v3646_v17, %v3646_v17 }
 0xc09   :  { %3892 = vmatprep.subr.bf16.mxu1 %v3672_v43  ;;  %v3689_v44 = vld [vmem:[#allocation3 + $0xf0] sm:$0xff]  ;;  %v3644_v60 = vld [vmem:[%s8470_s2 + $0x18] sm:$0xff]  ;;  %v3723_v31 = vld [vmem:[#allocation3 + $0x200] sm:$0xff] }
 0xc0a   :  { %v3694_v30 = vld [vmem:[#allocation3 + $0x118] sm:$0xff]  ;;  %v3653_v39 = vpack.c.bf16 %v3644_v60, %v3644_v60  ;;  %v3693_v51 = vld [vmem:[#allocation3 + $0x110] sm:$0xff]  ;;  %v3696_v1 = vld [vmem:[#allocation3 + $0x128] sm:$0xff] }
 0xc0b   :  { %3852 = vmatpush1.bf16.msra.mxu0 %v3819_v28  ;;  %v3726_v34 = vld [vmem:[#allocation3 + $0x218] sm:$0xff]  ;;  %v3725_v43 = vld [vmem:[#allocation3 + $0x210] sm:$0xff]  ;;  %v3728_v25 = vld [vmem:[#allocation3 + $0x228] sm:$0xff] }
 0xc0c   :  { %3893 = vmatpush1.bf16.msra.mxu1 %v3671_v55  ;;  %3853 = vmatprep.subr.bf16.mxu0 %v3822_v2  ;;  %v3695_v19 = vld [vmem:[#allocation3 + $0x120] sm:$0xff]  ;;  %v3698_v28 = vld [vmem:[#allocation3 + $0x138] sm:$0xff]  ;;  %v3697_v2 = vld [vmem:[#allocation3 + $0x130] sm:$0xff] }
 0xc0d   :  { %3894 = vmatprep.subr.bf16.mxu1 %v3674_v41  ;;  %v3727_v38 = vld [vmem:[#allocation3 + $0x220] sm:$0xff]  ;;  %v3730_v55 = vld [vmem:[#allocation3 + $0x238] sm:$0xff]  ;;  %v3729_v41 = vld [vmem:[#allocation3 + $0x230] sm:$0xff] }
 0xc0e   :  { %v3716_v52 = vld [vmem:[#allocation3 + $0x1c8] sm:$0xff] }
 0xc0f   :  { %3854 = vmatpush1.bf16.msra.mxu0 %v3821_v40  ;;  %v3700_v40 = vld [vmem:[#allocation3 + $0x148] sm:$0xff] }
 0xc10   :  { %3895 = vmatpush1.bf16.msra.mxu1 %v3673_v24  ;;  %3855 = vmatprep.subr.bf16.mxu0 %v3824_v22  ;;  %v3732_v24 = vld [vmem:[#allocation3 + $0x248] sm:$0xff]  ;;  %v3699_v22 = vld [vmem:[#allocation3 + $0x140] sm:$0xff] }
 0xc11   :  { %3896 = vmatprep.subr.bf16.mxu1 %v3676_v50  ;;  %v3731_v50 = vld [vmem:[#allocation3 + $0x240] sm:$0xff]  ;;  %v3748_v49 = vld [vmem:[#allocation3 + $0x2c8] sm:$0xff] }
 0xc12   :  { %v3720_v60 = vld [vmem:[#allocation3 + $0x1e8] sm:$0xff] }
 0xc13   :  { %3856 = vmatpush1.bf16.msra.mxu0 %v3823_v59  ;;  %v3702_v59 = vld [vmem:[#allocation3 + $0x158] sm:$0xff]  ;;  %v3752_v17 = vld [vmem:[#allocation3 + $0x2e8] sm:$0xff] }
 0xc14   :  { %3897 = vmatpush1.bf16.msra.mxu1 %v3675_v26  ;;  %3857 = vmatprep.subr.bf16.mxu0 %v3826_v21  ;;  %v3734_v26 = vld [vmem:[#allocation3 + $0x258] sm:$0xff]  ;;  %v3701_v21 = vld [vmem:[#allocation3 + $0x150] sm:$0xff] }
 0xc15   :  { %3898 = vmatprep.subr.bf16.mxu1 %v3678_v0  ;;  %v3733_v0 = vld [vmem:[#allocation3 + $0x250] sm:$0xff] }
 0xc17   :  { %3858 = vmatpush1.bf16.msra.mxu0 %v3825_v62  ;;  %v3704_v62 = vld [vmem:[#allocation3 + $0x168] sm:$0xff] }
 0xc18   :  { %3899 = vmatpush1.bf16.msra.mxu1 %v3677_v9  ;;  %3859 = vmatprep.subr.bf16.mxu0 %v3828_v11  ;;  %v3736_v9 = vld [vmem:[#allocation3 + $0x268] sm:$0xff]  ;;  %v3703_v11 = vld [vmem:[#allocation3 + $0x160] sm:$0xff] }
 0xc19   :  { %3900 = vmatprep.subr.bf16.mxu1 %v3680_v14  ;;  %v3735_v14 = vld [vmem:[#allocation3 + $0x260] sm:$0xff] }
 0xc1b   :  { %3860 = vmatpush1.bf16.msra.mxu0 %v3827_v57  ;;  %v3706_v57 = vld [vmem:[#allocation3 + $0x178] sm:$0xff] }
 0xc1c   :  { %3901 = vmatpush1.bf16.msra.mxu1 %v3679_v48  ;;  %3861 = vmatprep.subr.bf16.mxu0 %v3830_v27  ;;  %v3738_v48 = vld [vmem:[#allocation3 + $0x278] sm:$0xff]  ;;  %v3705_v27 = vld [vmem:[#allocation3 + $0x170] sm:$0xff] }
 0xc1d   :  { %3902 = vmatprep.subr.bf16.mxu1 %v3682_v29  ;;  %v3737_v29 = vld [vmem:[#allocation3 + $0x270] sm:$0xff] }
 0xc1f   :  { %3862 = vmatpush1.bf16.msra.mxu0 %v3829_v7  ;;  %v3708_v7 = vld [vmem:[#allocation3 + $0x188] sm:$0xff] }
 0xc20   :  { %3903 = vmatpush1.bf16.msra.mxu1 %v3681_v47  ;;  %3863 = vmatprep.subr.bf16.mxu0 %v3832_v35  ;;  %v3740_v47 = vld [vmem:[#allocation3 + $0x288] sm:$0xff]  ;;  %v3707_v35 = vld [vmem:[#allocation3 + $0x180] sm:$0xff] }
 0xc21   :  { %3904 = vmatprep.subr.bf16.mxu1 %v3684_v4  ;;  %v3739_v4 = vld [vmem:[#allocation3 + $0x280] sm:$0xff] }
 0xc23   :  { %3864 = vmatpush1.bf16.msra.mxu0 %v3831_v16  ;;  %v3710_v16 = vld [vmem:[#allocation3 + $0x198] sm:$0xff] }
 0xc24   :  { %3905 = vmatpush1.bf16.msra.mxu1 %v3683_v12  ;;  %3865 = vmatprep.subr.bf16.mxu0 %v3834_v20  ;;  %v3742_v12 = vld [vmem:[#allocation3 + $0x298] sm:$0xff]  ;;  %v3709_v20 = vld [vmem:[#allocation3 + $0x190] sm:$0xff] }
 0xc25   :  { %3906 = vmatprep.subr.bf16.mxu1 %v3686_v15  ;;  %v3741_v15 = vld [vmem:[#allocation3 + $0x290] sm:$0xff] }
 0xc27   :  { %3866 = vmatpush1.bf16.msra.mxu0 %v3833_v3  ;;  %v3712_v3 = vld [vmem:[#allocation3 + $0x1a8] sm:$0xff] }
 0xc28   :  { %3907 = vmatpush1.bf16.msra.mxu1 %v3685_v58  ;;  %3867 = vmatprep.subr.bf16.mxu0 %v3836_v13  ;;  %v3744_v58 = vld [vmem:[#allocation3 + $0x2a8] sm:$0xff]  ;;  %v3711_v13 = vld [vmem:[#allocation3 + $0x1a0] sm:$0xff] }
 0xc29   :  { %3908 = vmatprep.subr.bf16.mxu1 %v3688_v18  ;;  %v3743_v18 = vld [vmem:[#allocation3 + $0x2a0] sm:$0xff] }
 0xc2b   :  { %3868 = vmatpush1.bf16.msra.mxu0 %v3835_v42  ;;  %v3714_v42 = vld [vmem:[#allocation3 + $0x1b8] sm:$0xff] }
 0xc2c   :  { %3909 = vmatpush1.bf16.msra.mxu1 %v3687_v56  ;;  %3869 = vmatprep.subr.bf16.mxu0 %v3838_v46  ;;  %v3746_v56 = vld [vmem:[#allocation3 + $0x2b8] sm:$0xff]  ;;  %v3713_v46 = vld [vmem:[#allocation3 + $0x1b0] sm:$0xff] }
 0xc2d   :  { %3910 = vmatprep.subr.bf16.mxu1 %v3690_v10  ;;  %v3745_v10 = vld [vmem:[#allocation3 + $0x2b0] sm:$0xff] }
 0xc2f   :  { %3870 = vmatpush1.bf16.msra.mxu0 %v3837_v45  ;;  %v3715_v45 = vld [vmem:[#allocation3 + $0x1c0] sm:$0xff] }
 0xc30   :  { %3911 = vmatpush1.bf16.msra.mxu1 %v3689_v44  ;;  %3921 = vmatprep.subr.bf16.mxu0 %v3692_v37  ;;  %v3747_v44 = vld [vmem:[#allocation3 + $0x2c0] sm:$0xff]  ;;  %v3718_v37 = vld [vmem:[#allocation3 + $0x1d8] sm:$0xff] }
 0xc31   :  { %3962 = vmatprep.subr.bf16.mxu1 %v3724_v54  ;;  %v3750_v54 = vld [vmem:[#allocation3 + $0x2d8] sm:$0xff] }
 0xc32   :  { %3872 = vmatmul.mubr.bf16.vlgmr.msra.gmra.mrb[72].mxu0 %v3805_v53  ;;  %v3717_v53 = vld [vmem:[#allocation3 + $0x1d0] sm:$0xff] }
 0xc33   :  { %3913 = vmatmul.mubr.bf16.vlgmr.msra.gmra.mrb[72].mxu1 %v3650_v36  ;;  %3922 = vmatpush1.bf16.msra.mxu0 %v3691_v61  ;;  %v3749_v36 = vld [vmem:[#allocation3 + $0x2d0] sm:$0xff]  ;;  %v3719_v61 = vld [vmem:[#allocation3 + $0x1e0] sm:$0xff] }
 0xc34   :  { %3963 = vmatpush1.bf16.msra.mxu1 %v3723_v31  ;;  %3923 = vmatprep.subr.bf16.mxu0 %v3694_v30  ;;  %v3751_v31 = vld [vmem:[#allocation3 + $0x2e0] sm:$0xff]  ;;  %v3722_v30 = vld [vmem:[#allocation3 + $0x1f8] sm:$0xff] }
 0xc35   :  { %3964 = vmatprep.subr.bf16.mxu1 %v3726_v34  ;;  %3953 = vmatprep.mubr.bf16.mxu0 %v3653_v39  ;;  %v3754_v34 = vld [vmem:[#allocation3 + $0x2f8] sm:$0xff]  ;;  %v3643_v39 = vld [vmem:[%s8470_s2 + $0x10] sm:$0xff] }
 0xc36   :  { %3994 = vmatprep.mubr.bf16.mxu1 %v3655_v32  ;;  %v3645_v32 = vld [vmem:[%s8470_s2 + $0x20] sm:$0xff] }
 0xc37   :  { %3924 = vmatpush1.bf16.msra.mxu0 %v3693_v51  ;;  %v3721_v51 = vld [vmem:[#allocation3 + $0x1f0] sm:$0xff] }
 0xc38   :  { %3965 = vmatpush1.bf16.msra.mxu1 %v3725_v43  ;;  %3925 = vmatprep.subr.bf16.mxu0 %v3696_v1  ;;  %v3753_v43 = vld [vmem:[#allocation3 + $0x2f0] sm:$0xff]  ;;  %v3756_v1 = vld [vmem:[#allocation3 + $0x308] sm:$0xff] }
 0xc39   :  { %3966 = vmatprep.subr.bf16.mxu1 %v3728_v25  ;;  %v3788_v25 = vld [vmem:[#allocation3 + $0x408] sm:$0xff] }
 0xc3b   :  { %3926 = vmatpush1.bf16.msra.mxu0 %v3695_v19  ;;  %v3652_v19 = vpack.c.bf16 %v3643_v39, %v3643_v39  ;;  %v3647_v39 = vld [vmem:[%s8470_s2 + $0x30] sm:$0xff] }
 0xc3c   :  { %3967 = vmatpush1.bf16.msra.mxu1 %v3727_v38  ;;  %3927 = vmatprep.subr.bf16.mxu0 %v3698_v28  ;;  %v3654_v38 = vpack.c.bf16 %v3645_v32, %v3645_v32  ;;  %v3648_v28 = vld [vmem:[%s8470_s2 + $0x38] sm:$0xff]  ;;  %v3785_v32 = vld [vmem:[#allocation3 + $0x3f0] sm:$0xff] }
 0xc3d   :  { %3968 = vmatprep.subr.bf16.mxu1 %v3730_v55  ;;  %v3755_v55 = vld [vmem:[#allocation3 + $0x300] sm:$0xff] }
 0xc3f   :  { %3928 = vmatpush1.bf16.msra.mxu0 %v3697_v2  ;;  %v3787_v2 = vld [vmem:[#allocation3 + $0x400] sm:$0xff] }
 0xc40   :  { %3969 = vmatpush1.bf16.msra.mxu1 %v3729_v41  ;;  %3929 = vmatprep.subr.bf16.mxu0 %v3700_v40  ;;  %v3758_v41 = vld [vmem:[#allocation3 + $0x318] sm:$0xff] }
 0xc41   :  { %3970 = vmatprep.subr.bf16.mxu1 %v3732_v24  ;;  %v3790_v40 = vld [vmem:[#allocation3 + $0x418] sm:$0xff]  ;;  %v3657_v24 = vpack.c.bf16 %v3648_v28, %v3648_v28 }
 0xc43   :  { %3930 = vmatpush1.bf16.msra.mxu0 %v3699_v22  ;;  %v3757_v22 = vld [vmem:[#allocation3 + $0x310] sm:$0xff] }
 0xc44   :  { %3971 = vmatpush1.bf16.msra.mxu1 %v3731_v50  ;;  %3931 = vmatprep.subr.bf16.mxu0 %v3702_v59  ;;  %v3789_v50 = vld [vmem:[#allocation3 + $0x410] sm:$0xff]  ;;  %v3760_v59 = vld [vmem:[#allocation3 + $0x328] sm:$0xff] }
 0xc45   :  { %3972 = vmatprep.subr.bf16.mxu1 %v3734_v26  ;;  %v3792_v26 = vld [vmem:[#allocation3 + $0x428] sm:$0xff] }
 0xc47   :  { %3932 = vmatpush1.bf16.msra.mxu0 %v3701_v21  ;;  %v9530_v21 = vmov 0  }
 0xc48   :  { %3973 = vmatpush1.bf16.msra.mxu1 %v3733_v0  ;;  %3933 = vmatprep.subr.bf16.mxu0 %v3704_v62  ;;  %v3759_v0 = vld [vmem:[#allocation3 + $0x320] sm:$0xff] }
 0xc49   :  { %3974 = vmatprep.subr.bf16.mxu1 %v3736_v9  ;;  %v3791_v62 = vld [vmem:[#allocation3 + $0x420] sm:$0xff]  ;;  %v3762_v9 = vld [vmem:[#allocation3 + $0x338] sm:$0xff] }
 0xc4b   :  { %3934 = vmatpush1.bf16.msra.mxu0 %v3703_v11  ;;  %v3794_v11 = vld [vmem:[#allocation3 + $0x438] sm:$0xff] }
 0xc4c   :  { %3975 = vmatpush1.bf16.msra.mxu1 %v3735_v14  ;;  %3935 = vmatprep.subr.bf16.mxu0 %v3706_v57  ;;  %v3761_v14 = vld [vmem:[#allocation3 + $0x330] sm:$0xff] }
 0xc4d   :  { %3976 = vmatprep.subr.bf16.mxu1 %v3738_v48  ;;  %v3793_v57 = vld [vmem:[#allocation3 + $0x430] sm:$0xff]  ;;  %v3764_v48 = vld [vmem:[#allocation3 + $0x348] sm:$0xff] }
 0xc4f   :  { %3936 = vmatpush1.bf16.msra.mxu0 %v3705_v27  ;;  %v3796_v27 = vld [vmem:[#allocation3 + $0x448] sm:$0xff] }
 0xc50   :  { %3977 = vmatpush1.bf16.msra.mxu1 %v3737_v29  ;;  %3937 = vmatprep.subr.bf16.mxu0 %v3708_v7  ;;  %v3763_v29 = vld [vmem:[#allocation3 + $0x340] sm:$0xff] }
 0xc51   :  { %3978 = vmatprep.subr.bf16.mxu1 %v3740_v47  ;;  %v3795_v7 = vld [vmem:[#allocation3 + $0x440] sm:$0xff]  ;;  %v3766_v47 = vld [vmem:[#allocation3 + $0x358] sm:$0xff] }
 0xc53   :  { %3938 = vmatpush1.bf16.msra.mxu0 %v3707_v35  ;;  %v3798_v35 = vld [vmem:[#allocation3 + $0x458] sm:$0xff] }
 0xc54   :  { %3979 = vmatpush1.bf16.msra.mxu1 %v3739_v4  ;;  %3939 = vmatprep.subr.bf16.mxu0 %v3710_v16  ;;  %v3765_v4 = vld [vmem:[#allocation3 + $0x350] sm:$0xff] }
 0xc55   :  { %3980 = vmatprep.subr.bf16.mxu1 %v3742_v12  ;;  %v3797_v16 = vld [vmem:[#allocation3 + $0x450] sm:$0xff]  ;;  %v3768_v12 = vld [vmem:[#allocation3 + $0x368] sm:$0xff] }
 0xc57   :  { %3940 = vmatpush1.bf16.msra.mxu0 %v3709_v20  ;;  %v3800_v20 = vld [vmem:[#allocation3 + $0x468] sm:$0xff] }
 0xc58   :  { %3981 = vmatpush1.bf16.msra.mxu1 %v3741_v15  ;;  %3941 = vmatprep.subr.bf16.mxu0 %v3712_v3  ;;  %v3767_v15 = vld [vmem:[#allocation3 + $0x360] sm:$0xff] }
 0xc59   :  { %3982 = vmatprep.subr.bf16.mxu1 %v3744_v58  ;;  %v3799_v3 = vld [vmem:[#allocation3 + $0x460] sm:$0xff]  ;;  %v3770_v58 = vld [vmem:[#allocation3 + $0x378] sm:$0xff] }
 0xc5b   :  { %3942 = vmatpush1.bf16.msra.mxu0 %v3711_v13  ;;  %v3802_v13 = vld [vmem:[#allocation3 + $0x478] sm:$0xff] }
 0xc5c   :  { %3983 = vmatpush1.bf16.msra.mxu1 %v3743_v18  ;;  %3943 = vmatprep.subr.bf16.mxu0 %v3714_v42  ;;  %v3649_v18 = vld [vmem:[%s8470_s2 + $0x40] sm:$0xff] }
 0xc5d   :  { %3984 = vmatprep.subr.bf16.mxu1 %v3746_v56  ;;  %v3769_v42 = vld [vmem:[#allocation3 + $0x370] sm:$0xff] }
 0xc5e   :  { %v3801_v56 = vld [vmem:[#allocation3 + $0x470] sm:$0xff] }
 0xc5f   :  { %3944 = vmatpush1.bf16.msra.mxu0 %v3713_v46  ;;  %v3772_v46 = vld [vmem:[#allocation3 + $0x388] sm:$0xff] }
 0xc60   :  { %3985 = vmatpush1.bf16.msra.mxu1 %v3745_v10  ;;  %3945 = vmatprep.subr.bf16.mxu0 %v3716_v52  ;;  %v3658_v10 = vpack.c.bf16 %v3649_v18, %v3649_v18  ;;  %v3771_v52 = vld [vmem:[#allocation3 + $0x380] sm:$0xff] }
 0xc61   :  { %3986 = vmatprep.subr.bf16.mxu1 %v3748_v49  ;;  %v3774_v49 = vld [vmem:[#allocation3 + $0x398] sm:$0xff] }
 0xc63   :  { %3946 = vmatpush1.bf16.msra.mxu0 %v3715_v45  ;;  %v3773_v45 = vld [vmem:[#allocation3 + $0x390] sm:$0xff] }
 0xc64   :  { %3987 = vmatpush1.bf16.msra.mxu1 %v3747_v44  ;;  %3947 = vmatprep.subr.bf16.mxu0 %v3718_v37  ;;  %v3776_v44 = vld [vmem:[#allocation3 + $0x3a8] sm:$0xff]  ;;  %v3775_v37 = vld [vmem:[#allocation3 + $0x3a0] sm:$0xff] }
 0xc65   :  { %3988 = vmatprep.subr.bf16.mxu1 %v3750_v54  ;;  %v3778_v54 = vld [vmem:[#allocation3 + $0x3b8] sm:$0xff] }
 0xc67   :  { %3948 = vmatpush1.bf16.msra.mxu0 %v3717_v53  ;;  %v3777_v53 = vld [vmem:[#allocation3 + $0x3b0] sm:$0xff] }
 0xc68   :  { %3989 = vmatpush1.bf16.msra.mxu1 %v3749_v36  ;;  %3949 = vmatprep.subr.bf16.mxu0 %v3720_v60  ;;  %v3780_v36 = vld [vmem:[#allocation3 + $0x3c8] sm:$0xff]  ;;  %v3779_v60 = vld [vmem:[#allocation3 + $0x3c0] sm:$0xff] }
 0xc69   :  { %3990 = vmatprep.subr.bf16.mxu1 %v3752_v17  ;;  %v3782_v17 = vld [vmem:[#allocation3 + $0x3d8] sm:$0xff] }
 0xc6b   :  { %3950 = vmatpush1.bf16.msra.mxu0 %v3719_v61  ;;  %v3781_v61 = vld [vmem:[#allocation3 + $0x3d0] sm:$0xff] }
 0xc6c   :  { %3991 = vmatpush1.bf16.msra.mxu1 %v3751_v31  ;;  %3951 = vmatprep.subr.bf16.mxu0 %v3722_v30  ;;  %v3784_v31 = vld [vmem:[#allocation3 + $0x3e8] sm:$0xff]  ;;  %v3783_v30 = vld [vmem:[#allocation3 + $0x3e0] sm:$0xff] }
 0xc6d   :  { %3992 = vmatprep.subr.bf16.mxu1 %v3754_v34  ;;  %v3786_v34 = vld [vmem:[#allocation3 + $0x3f8] sm:$0xff] }
 0xc6f   :  { %3952 = vmatpush1.bf16.msra.mxu0 %v3721_v51  ;;  %v3656_v51 = vpack.c.bf16 %v3647_v39, %v3647_v39 }
 0xc70   :  { %3993 = vmatpush1.bf16.msra.mxu1 %v3753_v43  ;;  %4003 = vmatprep.subr.bf16.mxu0 %v3756_v1 }
 0xc71   :  { %4044 = vmatprep.subr.bf16.mxu1 %v3788_v25 }
 0xc72   :  { %3954 = vmatmul.mubr.bf16.vlgmr.msra.gmra.mrb[76].mxu0 %v3652_v19 }
 0xc73   :  { %3995 = vmatmul.mubr.bf16.vlgmr.msra.gmra.mrb[76].mxu1 %v3654_v38  ;;  %4004 = vmatpush1.bf16.msra.mxu0 %v3755_v55 }
 0xc74   :  { %4045 = vmatpush1.bf16.msra.mxu1 %v3787_v2  ;;  %4005 = vmatprep.subr.bf16.mxu0 %v3758_v41 }
 0xc75   :  { %4046 = vmatprep.subr.bf16.mxu1 %v3790_v40  ;;  %4076 = vmatprep.mubr.bf16.mxu1 %v9530_v21 }
 0xc76   :  { %4035 = vmatprep.mubr.bf16.mxu0 %v3657_v24 }
 0xc77   :  { %4006 = vmatpush1.bf16.msra.mxu0 %v3757_v22 }
 0xc78   :  { %4047 = vmatpush1.bf16.msra.mxu1 %v3789_v50  ;;  %4007 = vmatprep.subr.bf16.mxu0 %v3760_v59 }
 0xc79   :  { %4048 = vmatprep.subr.bf16.mxu1 %v3792_v26 }
 0xc7b   :  { %4008 = vmatpush1.bf16.msra.mxu0 %v3759_v0 }
 0xc7c   :  { %4049 = vmatpush1.bf16.msra.mxu1 %v3791_v62  ;;  %4009 = vmatprep.subr.bf16.mxu0 %v3762_v9 }
 0xc7d   :  { %4050 = vmatprep.subr.bf16.mxu1 %v3794_v11 }
 0xc7f   :  { %4010 = vmatpush1.bf16.msra.mxu0 %v3761_v14 }
 0xc80   :  { %4051 = vmatpush1.bf16.msra.mxu1 %v3793_v57  ;;  %4011 = vmatprep.subr.bf16.mxu0 %v3764_v48 }
 0xc81   :  { %4052 = vmatprep.subr.bf16.mxu1 %v3796_v27 }
 0xc83   :  { %4012 = vmatpush1.bf16.msra.mxu0 %v3763_v29 }
 0xc84   :  { %4053 = vmatpush1.bf16.msra.mxu1 %v3795_v7  ;;  %4013 = vmatprep.subr.bf16.mxu0 %v3766_v47 }
 0xc85   :  { %4054 = vmatprep.subr.bf16.mxu1 %v3798_v35 }
 0xc87   :  { %4014 = vmatpush1.bf16.msra.mxu0 %v3765_v4  ;;  %v9531_v4 = vld [vmem:[#allocation165_spill] sm:$0xff] }
 0xc88   :  { %4055 = vmatpush1.bf16.msra.mxu1 %v3797_v16  ;;  %4015 = vmatprep.subr.bf16.mxu0 %v3768_v12  ;;  %v9532_v16 = vld [vmem:[#allocation33_spill] sm:$0xff] }
 0xc89   :  { %4056 = vmatprep.subr.bf16.mxu1 %v3800_v20  ;;  %v4088_v12 = vrot.slane %v9532_v16, %v9531_v4 }
 0xc8b   :  { %4016 = vmatpush1.bf16.msra.mxu0 %v3767_v15 }
 0xc8c   :  { %4057 = vmatpush1.bf16.msra.mxu1 %v3799_v3  ;;  %4017 = vmatprep.subr.bf16.mxu0 %v3770_v58  ;;  %v9533_v3 = vld [vmem:[#allocation34_spill] sm:$0xff] }
 0xc8d   :  { %4058 = vmatprep.subr.bf16.mxu1 %v3802_v13  ;;  %v4092_v58 = vrot.slane %v9533_v3, %v9531_v4 }
 0xc8f   :  { %4018 = vmatpush1.bf16.msra.mxu0 %v3769_v42 }
 0xc90   :  { %4059 = vmatpush1.bf16.msra.mxu1 %v3801_v56  ;;  %4019 = vmatprep.subr.bf16.mxu0 %v3772_v46 }
 0xc93   :  { %4077 = vmatmul.mubr.bf16.vlgmr.msra.gmra.mrb[80].mxu1 %v3658_v10  ;;  %4020 = vmatpush1.bf16.msra.mxu0 %v3771_v52 }
 0xc94   :  { %4021 = vmatprep.subr.bf16.mxu0 %v3774_v49 }
 0xc97   :  { %4022 = vmatpush1.bf16.msra.mxu0 %v3773_v45 }
 0xc98   :  { %4023 = vmatprep.subr.bf16.mxu0 %v3776_v44 }
 0xc9b   :  { %4024 = vmatpush1.bf16.msra.mxu0 %v3775_v37 }
 0xc9c   :  { %4025 = vmatprep.subr.bf16.mxu0 %v3778_v54 }
 0xc9f   :  { %4026 = vmatpush1.bf16.msra.mxu0 %v3777_v53 }
 0xca0   :  { %4027 = vmatprep.subr.bf16.mxu0 %v3780_v36 }
 0xca3   :  { %4028 = vmatpush1.bf16.msra.mxu0 %v3779_v60 }
 0xca4   :  { %4029 = vmatprep.subr.bf16.mxu0 %v3782_v17 }
 0xca7   :  { %4030 = vmatpush1.bf16.msra.mxu0 %v3781_v61 }
 0xca8   :  { %4031 = vmatprep.subr.bf16.mxu0 %v3784_v31 }
 0xcab   :  { %4032 = vmatpush1.bf16.msra.mxu0 %v3783_v30 }
 0xcac   :  { %4033 = vmatprep.subr.bf16.mxu0 %v3786_v34 }
 0xcaf   :  { %4034 = vmatpush1.bf16.msra.mxu0 %v3785_v32 }
 0xcb2   :  { %4036 = vmatmul.mubr.bf16.vlgmr.msra.gmra.mrb[80].mxu0 %v3656_v51 }
 0xd05   :  { %v3873_v43 = vpop.f32.mrb[72].mxu0 }
 0xd06   :  { %v3914_v1 = vpop.f32.mrb[72].mxu1  ;;  %v3875_v19 = vpop.f32.mrb[73].mxu0 }
 0xd07   :  { %v3915_v25 = vadd.f32 %v3914_v1, %v3873_v43  ;;  %v3916_v38 = vpop.f32.mrb[73].mxu1  ;;  %v3877_v55 = vpop.f32.mrb[74].mxu0 }
 0xd08   :  { %v3917_v28 = vadd.f32 %v3916_v38, %v3875_v19  ;;  %v3918_v2 = vpop.f32.mrb[74].mxu1  ;;  %v3878_v41 = vpop.f32.mrb[75].mxu0 }
 0xd09   :  { %v3919_v40 = vpop.f32.mrb[75].mxu1 }
 0xd45   :  { %v3955_v24 = vpop.f32.mrb[76].mxu0 }
 0xd46   :  { %v3996_v22 = vpop.f32.mrb[76].mxu1  ;;  %v3956_v50 = vadd.f32 %v3955_v24, %v3915_v25  ;;  %v3957_v59 = vpop.f32.mrb[77].mxu0 }
 0xd47   :  { %v3998_v26 = vpop.f32.mrb[77].mxu1  ;;  %v3958_v21 = vadd.f32 %v3957_v59, %v3917_v28  ;;  %v3959_v0 = vpop.f32.mrb[78].mxu0 }
 0xd48   :  { %v4000_v62 = vpop.f32.mrb[78].mxu1  ;;  %v3997_v9 = vadd.f32 %v3996_v22, %v3956_v50  ;;  %v3960_v11 = vpop.f32.mrb[79].mxu0 }
 0xd49   :  { %v4001_v14 = vpop.f32.mrb[79].mxu1  ;;  %v3999_v57 = vadd.f32 %v3998_v26, %v3958_v21 }
 0xd66   :  { %v4078_v48 = vpop.f32.mrb[80].mxu1 }
 0xd67   :  { %v4080_v27 = vpop.f32.mrb[81].mxu1 }
 0xd68   :  { %v4082_v29 = vpop.f32.mrb[82].mxu1 }
 0xd69   :  { %v4083_v7 = vpop.f32.mrb[83].mxu1 }
 0xd85   :  { %v4037_v47 = vpop.f32.mrb[80].mxu0 }
 0xd86   :  { %v4038_v35 = vadd.f32 %v4037_v47, %v3997_v9  ;;  %v4039_v20 = vpop.f32.mrb[81].mxu0 }
 0xd87   :  { %v4040_v15 = vadd.f32 %v4039_v20, %v3999_v57  ;;  %v4041_v13 = vpop.f32.mrb[82].mxu0 }
 0xd88   :  { %v4079_v18 = vadd.f32 %v4078_v48, %v4038_v35  ;;  %v4042_v42 = vpop.f32.mrb[83].mxu0 }
 0xd89   :  { %v4081_v56 = vadd.f32 %v4080_v27, %v4040_v15 }
 0xd8a   :  { %v8236_v46 = vadd.f32 %v4088_v12, %v4079_v18 }
 0xd8b   :  { %v8238_v10 = vadd.f32 %v4092_v58, %v4081_v56 }
 0xd8c   :  { %6457 = dma.done.wait [#allocation8 + $0x2], 16384 }
 0xd8d   :  { %6458 = vsyncadd [#allocation8 + $0x2], 4294950912  ;;  %v4101_v52 = vpack.c.bf16 %v8196_v63, %v8196_v63  ;;  %v4188_v49 = vpack.c.bf16 %v8238_v10, %v8238_v10  ;;  %v4103_v45 = vld [vmem:[#allocation5 + $0x8] sm:$0xff]  ;;  %v4102_v44 = vld [vmem:[#allocation5] sm:$0xff] }
 0xd8e   :  { %v4191_v37 = vld [vmem:[#allocation5 + $0x108] sm:$0xff]  ;;  %4142 = vmatprep.subr.bf16.mxu1 %v4103_v45  ;;  %v4190_v54 = vld [vmem:[#allocation5 + $0x100] sm:$0xff]  ;;  %v4105_v53 = vld [vmem:[#allocation5 + $0x18] sm:$0xff] }
 0xd8f   :  { %4174 = vmatprep.mubr.bf16.mxu1 %v4101_v52  ;;  %4262 = vmatprep.mubr.bf16.mxu0 %v4188_v49  ;;  %v4193_v36 = vld [vmem:[#allocation5 + $0x118] sm:$0xff]  ;;  %v4104_v60 = vld [vmem:[#allocation5 + $0x10] sm:$0xff]  ;;  %v4107_v61 = vld [vmem:[#allocation5 + $0x28] sm:$0xff] }
 0xd90   :  { %4230 = vmatprep.subr.bf16.mxu0 %v4191_v37  ;;  %4143 = vmatpush1.bf16.msra.mxu1 %v4102_v44  ;;  %v4192_v17 = vld [vmem:[#allocation5 + $0x110] sm:$0xff]  ;;  %v4195_v31 = vld [vmem:[#allocation5 + $0x128] sm:$0xff]  ;;  %v4106_v30 = vld [vmem:[#allocation5 + $0x20] sm:$0xff] }
 0xd91   :  { %4231 = vmatpush1.bf16.msra.mxu0 %v4190_v54  ;;  %4144 = vmatprep.subr.bf16.mxu1 %v4105_v53  ;;  %v4194_v34 = vld [vmem:[#allocation5 + $0x120] sm:$0xff]  ;;  %v4109_v39 = vld [vmem:[#allocation5 + $0x38] sm:$0xff]  ;;  %v4108_v51 = vld [vmem:[#allocation5 + $0x30] sm:$0xff] }
 0xd92   :  { %4232 = vmatprep.subr.bf16.mxu0 %v4193_v36  ;;  %v4197_v32 = vld [vmem:[#allocation5 + $0x138] sm:$0xff]  ;;  %v4196_v43 = vld [vmem:[#allocation5 + $0x130] sm:$0xff]  ;;  %v4111_v1 = vld [vmem:[#allocation5 + $0x48] sm:$0xff] }
 0xd93   :  { %v4199_v25 = vld [vmem:[#allocation5 + $0x148] sm:$0xff]  ;;  %v4110_v19 = vld [vmem:[#allocation5 + $0x40] sm:$0xff]  ;;  %v4113_v28 = vld [vmem:[#allocation5 + $0x58] sm:$0xff] }
 0xd94   :  { %4145 = vmatpush1.bf16.msra.mxu1 %v4104_v60  ;;  %v4198_v38 = vld [vmem:[#allocation5 + $0x140] sm:$0xff]  ;;  %v4201_v55 = vld [vmem:[#allocation5 + $0x158] sm:$0xff]  ;;  %v4112_v2 = vld [vmem:[#allocation5 + $0x50] sm:$0xff] }
 0xd95   :  { %4233 = vmatpush1.bf16.msra.mxu0 %v4192_v17  ;;  %4146 = vmatprep.subr.bf16.mxu1 %v4107_v61  ;;  %v4200_v41 = vld [vmem:[#allocation5 + $0x150] sm:$0xff]  ;;  %v4115_v40 = vld [vmem:[#allocation5 + $0x68] sm:$0xff]  ;;  %v4114_v22 = vld [vmem:[#allocation5 + $0x60] sm:$0xff] }
 0xd96   :  { %4234 = vmatprep.subr.bf16.mxu0 %v4195_v31  ;;  %v4203_v24 = vld [vmem:[#allocation5 + $0x168] sm:$0xff]  ;;  %v4202_v50 = vld [vmem:[#allocation5 + $0x160] sm:$0xff]  ;;  %v4117_v59 = vld [vmem:[#allocation5 + $0x78] sm:$0xff] }
 0xd97   :  { %v4205_v26 = vld [vmem:[#allocation5 + $0x178] sm:$0xff]  ;;  %v4116_v21 = vld [vmem:[#allocation5 + $0x70] sm:$0xff]  ;;  %v4119_v62 = vld [vmem:[#allocation5 + $0x88] sm:$0xff] }
 0xd98   :  { %4147 = vmatpush1.bf16.msra.mxu1 %v4106_v30  ;;  %v4204_v0 = vld [vmem:[#allocation5 + $0x170] sm:$0xff]  ;;  %v4207_v9 = vld [vmem:[#allocation5 + $0x188] sm:$0xff]  ;;  %v4118_v11 = vld [vmem:[#allocation5 + $0x80] sm:$0xff] }
 0xd99   :  { %4235 = vmatpush1.bf16.msra.mxu0 %v4194_v34  ;;  %4148 = vmatprep.subr.bf16.mxu1 %v4109_v39  ;;  %v4206_v14 = vld [vmem:[#allocation5 + $0x180] sm:$0xff]  ;;  %v4121_v57 = vld [vmem:[#allocation5 + $0x98] sm:$0xff]  ;;  %v4120_v27 = vld [vmem:[#allocation5 + $0x90] sm:$0xff]  ;;  %v4100_v34 = vpack.c.bf16 %v8194_v8, %v8194_v8  ;;  %v4187_v39 = vpack.c.bf16 %v8236_v46, %v8236_v46 }
 0xd9a   :  { %4236 = vmatprep.subr.bf16.mxu0 %v4197_v32  ;;  %v4209_v48 = vld [vmem:[#allocation5 + $0x198] sm:$0xff]  ;;  %v4208_v29 = vld [vmem:[#allocation5 + $0x190] sm:$0xff]  ;;  %v4123_v7 = vld [vmem:[#allocation5 + $0xa8] sm:$0xff] }
 0xd9b   :  { %v4211_v47 = vld [vmem:[#allocation5 + $0x1a8] sm:$0xff]  ;;  %v4122_v35 = vld [vmem:[#allocation5 + $0xa0] sm:$0xff]  ;;  %v4125_v20 = vld [vmem:[#allocation5 + $0xb8] sm:$0xff] }
 0xd9c   :  { %4149 = vmatpush1.bf16.msra.mxu1 %v4108_v51  ;;  %v4210_v12 = vld [vmem:[#allocation5 + $0x1a0] sm:$0xff]  ;;  %v4213_v15 = vld [vmem:[#allocation5 + $0x1b8] sm:$0xff]  ;;  %v4124_v58 = vld [vmem:[#allocation5 + $0xb0] sm:$0xff] }
 0xd9d   :  { %4237 = vmatpush1.bf16.msra.mxu0 %v4196_v43  ;;  %4150 = vmatprep.subr.bf16.mxu1 %v4111_v1  ;;  %v4212_v13 = vld [vmem:[#allocation5 + $0x1b0] sm:$0xff]  ;;  %v4127_v18 = vld [vmem:[#allocation5 + $0xc8] sm:$0xff]  ;;  %v4126_v56 = vld [vmem:[#allocation5 + $0xc0] sm:$0xff] }
 0xd9e   :  { %4238 = vmatprep.subr.bf16.mxu0 %v4199_v25  ;;  %v4215_v42 = vld [vmem:[#allocation5 + $0x1c8] sm:$0xff]  ;;  %v4214_v52 = vld [vmem:[#allocation5 + $0x1c0] sm:$0xff]  ;;  %v4129_v49 = vld [vmem:[#allocation5 + $0xd8] sm:$0xff] }
 0xd9f   :  { %v4217_v45 = vld [vmem:[#allocation5 + $0x1d8] sm:$0xff]  ;;  %v4128_v44 = vld [vmem:[#allocation5 + $0xd0] sm:$0xff]  ;;  %v4131_v54 = vld [vmem:[#allocation5 + $0xe8] sm:$0xff] }
 0xda0   :  { %4151 = vmatpush1.bf16.msra.mxu1 %v4110_v19  ;;  %v4216_v37 = vld [vmem:[#allocation5 + $0x1d0] sm:$0xff]  ;;  %v4219_v53 = vld [vmem:[#allocation5 + $0x1e8] sm:$0xff]  ;;  %v4130_v36 = vld [vmem:[#allocation5 + $0xe0] sm:$0xff] }
 0xda1   :  { %4239 = vmatpush1.bf16.msra.mxu0 %v4198_v38  ;;  %4152 = vmatprep.subr.bf16.mxu1 %v4113_v28  ;;  %v4218_v60 = vld [vmem:[#allocation5 + $0x1e0] sm:$0xff]  ;;  %v4133_v17 = vld [vmem:[#allocation5 + $0xf8] sm:$0xff]  ;;  %v4132_v31 = vld [vmem:[#allocation5 + $0xf0] sm:$0xff] }
 0xda2   :  { %4240 = vmatprep.subr.bf16.mxu0 %v4201_v55  ;;  %v4221_v61 = vld [vmem:[#allocation5 + $0x1f8] sm:$0xff]  ;;  %v4220_v30 = vld [vmem:[#allocation5 + $0x1f0] sm:$0xff]  ;;  %v9534_v32 = vld [vmem:[#allocation166_spill] sm:$0xff] }
 0xda3   :  { %v4137_v51 = vrot.slane %v9532_v16, %v9534_v32  ;;  %v9535_v43 = vld [vmem:[#allocation169_spill] sm:$0xff]  ;;  %v4141_v25 = vrot.slane %v9533_v3, %v9534_v32 }
 0xda4   :  { %4153 = vmatpush1.bf16.msra.mxu1 %v4112_v2  ;;  %v4225_v1 = vrot.slane %v9532_v16, %v9535_v43  ;;  %v4229_v19 = vrot.slane %v9533_v3, %v9535_v43 }
 0xda5   :  { %4241 = vmatpush1.bf16.msra.mxu0 %v4200_v41  ;;  %4154 = vmatprep.subr.bf16.mxu1 %v4115_v40 }
 0xda6   :  { %4242 = vmatprep.subr.bf16.mxu0 %v4203_v24 }
 0xda8   :  { %4155 = vmatpush1.bf16.msra.mxu1 %v4114_v22 }
 0xda9   :  { %4243 = vmatpush1.bf16.msra.mxu0 %v4202_v50  ;;  %4156 = vmatprep.subr.bf16.mxu1 %v4117_v59 }
 0xdaa   :  { %4244 = vmatprep.subr.bf16.mxu0 %v4205_v26 }
 0xdac   :  { %4157 = vmatpush1.bf16.msra.mxu1 %v4116_v21 }
 0xdad   :  { %4245 = vmatpush1.bf16.msra.mxu0 %v4204_v0  ;;  %4158 = vmatprep.subr.bf16.mxu1 %v4119_v62 }
 0xdae   :  { %4246 = vmatprep.subr.bf16.mxu0 %v4207_v9 }
 0xdb0   :  { %4159 = vmatpush1.bf16.msra.mxu1 %v4118_v11 }
 0xdb1   :  { %4247 = vmatpush1.bf16.msra.mxu0 %v4206_v14  ;;  %4160 = vmatprep.subr.bf16.mxu1 %v4121_v57 }
 0xdb2   :  { %4248 = vmatprep.subr.bf16.mxu0 %v4209_v48 }
 0xdb4   :  { %4161 = vmatpush1.bf16.msra.mxu1 %v4120_v27 }
 0xdb5   :  { %4249 = vmatpush1.bf16.msra.mxu0 %v4208_v29  ;;  %4162 = vmatprep.subr.bf16.mxu1 %v4123_v7 }
 0xdb6   :  { %4250 = vmatprep.subr.bf16.mxu0 %v4211_v47 }
 0xdb8   :  { %4163 = vmatpush1.bf16.msra.mxu1 %v4122_v35 }
 0xdb9   :  { %4251 = vmatpush1.bf16.msra.mxu0 %v4210_v12  ;;  %4164 = vmatprep.subr.bf16.mxu1 %v4125_v20 }
 0xdba   :  { %4252 = vmatprep.subr.bf16.mxu0 %v4213_v15  ;;  %v4355_v15 = vld [vmem:[#allocation5 + $0x208] sm:$0xff] }
 0xdbc   :  { %4165 = vmatpush1.bf16.msra.mxu1 %v4124_v58  ;;  %v4357_v58 = vld [vmem:[#allocation5 + $0x218] sm:$0xff] }
 0xdbd   :  { %4253 = vmatpush1.bf16.msra.mxu0 %v4212_v13  ;;  %4166 = vmatprep.subr.bf16.mxu1 %v4127_v18  ;;  %v4442_v13 = vld [vmem:[#allocation5 + $0x300] sm:$0xff]  ;;  %v4359_v18 = vld [vmem:[#allocation5 + $0x228] sm:$0xff] }
 0xdbe   :  { %4254 = vmatprep.subr.bf16.mxu0 %v4215_v42  ;;  %v4444_v42 = vld [vmem:[#allocation5 + $0x310] sm:$0xff] }
 0xdc0   :  { %4167 = vmatpush1.bf16.msra.mxu1 %v4126_v56  ;;  %v4447_v56 = vld [vmem:[#allocation5 + $0x328] sm:$0xff] }
 0xdc1   :  { %4255 = vmatpush1.bf16.msra.mxu0 %v4214_v52  ;;  %4168 = vmatprep.subr.bf16.mxu1 %v4129_v49  ;;  %v4358_v52 = vld [vmem:[#allocation5 + $0x220] sm:$0xff]  ;;  %v4361_v49 = vld [vmem:[#allocation5 + $0x238] sm:$0xff] }
 0xdc2   :  { %4256 = vmatprep.subr.bf16.mxu0 %v4217_v45  ;;  %v4446_v45 = vld [vmem:[#allocation5 + $0x320] sm:$0xff] }
 0xdc4   :  { %4169 = vmatpush1.bf16.msra.mxu1 %v4128_v44  ;;  %v4449_v44 = vld [vmem:[#allocation5 + $0x338] sm:$0xff] }
 0xdc5   :  { %4257 = vmatpush1.bf16.msra.mxu0 %v4216_v37  ;;  %4170 = vmatprep.subr.bf16.mxu1 %v4131_v54  ;;  %v4360_v37 = vld [vmem:[#allocation5 + $0x230] sm:$0xff]  ;;  %v4363_v54 = vld [vmem:[#allocation5 + $0x248] sm:$0xff] }
 0xdc6   :  { %4258 = vmatprep.subr.bf16.mxu0 %v4219_v53  ;;  %v4448_v53 = vld [vmem:[#allocation5 + $0x330] sm:$0xff] }
 0xdc8   :  { %4171 = vmatpush1.bf16.msra.mxu1 %v4130_v36  ;;  %v4451_v36 = vld [vmem:[#allocation5 + $0x348] sm:$0xff] }
 0xdc9   :  { %4259 = vmatpush1.bf16.msra.mxu0 %v4218_v60  ;;  %4172 = vmatprep.subr.bf16.mxu1 %v4133_v17  ;;  %v4362_v60 = vld [vmem:[#allocation5 + $0x240] sm:$0xff]  ;;  %v4365_v17 = vld [vmem:[#allocation5 + $0x258] sm:$0xff] }
 0xdca   :  { %4260 = vmatprep.subr.bf16.mxu0 %v4221_v61  ;;  %v4450_v61 = vld [vmem:[#allocation5 + $0x340] sm:$0xff] }
 0xdcc   :  { %4173 = vmatpush1.bf16.msra.mxu1 %v4132_v31  ;;  %v4453_v31 = vld [vmem:[#allocation5 + $0x358] sm:$0xff] }
 0xdcd   :  { %4261 = vmatpush1.bf16.msra.mxu0 %v4220_v30  ;;  %4394 = vmatprep.subr.bf16.mxu1 %v4355_v15  ;;  %v4364_v30 = vld [vmem:[#allocation5 + $0x250] sm:$0xff]  ;;  %v4461_v15 = vld [vmem:[#allocation5 + $0x398] sm:$0xff] }
 0xdcf   :  { %4175 = vmatmul.mubr.bf16.vlgmr.msra.gmra.mrb[84].mxu1 %v4100_v34  ;;  %v4367_v34 = vld [vmem:[#allocation5 + $0x268] sm:$0xff] }
 0xdd0   :  { %4263 = vmatmul.mubr.bf16.vlgmr.msra.gmra.mrb[84].mxu0 %v4187_v39  ;;  %v4452_v39 = vld [vmem:[#allocation5 + $0x350] sm:$0xff] }
 0xea2   :  { %v4176_v38 = vpop.f32.mrb[84].mxu1 }
 0xea3   :  { %v4264_v28 = vpop.f32.mrb[84].mxu0  ;;  %v4177_v55 = vadd.f32 %v4176_v38, %v4137_v51  ;;  %v4178_v2 = vpop.f32.mrb[85].mxu1  ;;  %v4455_v51 = vld [vmem:[#allocation5 + $0x368] sm:$0xff]  ;;  %v4457_v38 = vld [vmem:[#allocation5 + $0x378] sm:$0xff] }
 0xea4   :  { %v4265_v41 = vadd.f32 %v4264_v28, %v4225_v1  ;;  %v4266_v40 = vpop.f32.mrb[85].mxu0  ;;  %v4179_v24 = vadd.f32 %v4178_v2, %v4141_v25  ;;  %v4180_v22 = vpop.f32.mrb[86].mxu1  ;;  %v4366_v1 = vld [vmem:[#allocation5 + $0x260] sm:$0xff]  ;;  %v4369_v25 = vld [vmem:[#allocation5 + $0x278] sm:$0xff]  ;;  %v4368_v28 = vld [vmem:[#allocation5 + $0x270] sm:$0xff] }
 0xea5   :  { %v4267_v50 = vadd.f32 %v4266_v40, %v4229_v19  ;;  %v4268_v59 = vpop.f32.mrb[86].mxu0  ;;  %v4183_v26 = vmax.f32 %v4177_v55, 0.0  ;;  %v4181_v0 = vpop.f32.mrb[87].mxu1  ;;  %v4454_v19 = vld [vmem:[#allocation5 + $0x360] sm:$0xff]  ;;  %v4371_v55 = vld [vmem:[#allocation5 + $0x288] sm:$0xff]  ;;  %v4456_v2 = vld [vmem:[#allocation5 + $0x370] sm:$0xff] }
 0xea6   :  { %v4271_v21 = vmax.f32 %v4265_v41, 0.0  ;;  %v4269_v62 = vpop.f32.mrb[87].mxu0  ;;  %v4184_v9 = vmax.f32 %v4179_v24, 0.0  ;;  %v4459_v41 = vld [vmem:[#allocation5 + $0x388] sm:$0xff]  ;;  %v4370_v40 = vld [vmem:[#allocation5 + $0x280] sm:$0xff]  ;;  %v4373_v24 = vld [vmem:[#allocation5 + $0x298] sm:$0xff] }
 0xea7   :  { %v4272_v11 = vmax.f32 %v4267_v50, 0.0  ;;  %v4185_v14 = vadd.f32 %v4183_v26, %v8236_v46  ;;  %v4458_v22 = vld [vmem:[#allocation5 + $0x380] sm:$0xff]  ;;  %v4372_v50 = vld [vmem:[#allocation5 + $0x290] sm:$0xff] }
 0xea8   :  { %v4273_v57 = vadd.f32 %v4271_v21, %v8194_v8  ;;  %v4186_v48 = vadd.f32 %v4184_v9, %v8238_v10 }
 0xea9   :  { %v4274_v27 = vadd.f32 %v4272_v11, %v8196_v63  ;;  %v8261_v29 = vadd.f32 %v4185_v14, %v8236_v46  ;;  %v4354_v46 = vld [vmem:[#allocation5 + $0x200] sm:$0xff] }
 0xeaa   :  { %v8264_v7 = vadd.f32 %v4273_v57, %v8194_v8  ;;  %v8270_v35 = vadd.f32 %v4186_v48, %v8238_v10  ;;  %v4443_v8 = vld [vmem:[#allocation5 + $0x308] sm:$0xff]  ;;  %4395 = vmatpush1.bf16.msra.mxu1 %v4354_v46  ;;  %v4356_v10 = vld [vmem:[#allocation5 + $0x210] sm:$0xff]  ;;  %v4374_v46 = vld [vmem:[#allocation5 + $0x2a0] sm:$0xff] }
 0xeab   :  { %v8267_v47 = vadd.f32 %v4274_v27, %v8196_v63  ;;  %4482 = vmatprep.subr.bf16.mxu0 %v4443_v8  ;;  %v4445_v63 = vld [vmem:[#allocation5 + $0x318] sm:$0xff]  ;;  %4396 = vmatprep.subr.bf16.mxu1 %v4357_v58  ;;  %v4463_v58 = vld [vmem:[#allocation5 + $0x3a8] sm:$0xff]  ;;  %v4376_v8 = vld [vmem:[#allocation5 + $0x2b0] sm:$0xff] }
 0xeac   :  { %v4277_v12 = vadd.f32 %v8270_v35, %v8261_v29  ;;  %4483 = vmatpush1.bf16.msra.mxu0 %v4442_v13  ;;  %v4462_v13 = vld [vmem:[#allocation5 + $0x3a0] sm:$0xff] }
 0xead   :  { %v4315_v20 = vadd.f32 %v8267_v47, %v8264_v7  ;;  %4484 = vmatprep.subr.bf16.mxu0 %v4445_v63  ;;  %v4379_v63 = vld [vmem:[#allocation5 + $0x2c8] sm:$0xff] }
 0xeae   :  { %4278 = vadd.xlane.f32.xlu0 %v4277_v12  ;;  %4397 = vmatpush1.bf16.msra.mxu1 %v4356_v10  ;;  %v4465_v10 = vld [vmem:[#allocation5 + $0x3b8] sm:$0xff] }
 0xeaf   :  { %4398 = vmatprep.subr.bf16.mxu1 %v4359_v18  ;;  %v4378_v18 = vld [vmem:[#allocation5 + $0x2c0] sm:$0xff] }
 0xeb0   :  { %4485 = vmatpush1.bf16.msra.mxu0 %v4444_v42  ;;  %v4464_v42 = vld [vmem:[#allocation5 + $0x3b0] sm:$0xff] }
 0xeb1   :  { %4486 = vmatprep.subr.bf16.mxu0 %v4447_v56  ;;  %v4381_v56 = vld [vmem:[#allocation5 + $0x2d8] sm:$0xff] }
 0xeb2   :  { %4316 = vadd.xlane.f32.xlu0 %v4315_v20  ;;  %4399 = vmatpush1.bf16.msra.mxu1 %v4358_v52  ;;  %v4375_v20 = vld [vmem:[#allocation5 + $0x2a8] sm:$0xff] }
 0xeb3   :  { %4400 = vmatprep.subr.bf16.mxu1 %v4361_v49  ;;  %v4467_v52 = vld [vmem:[#allocation5 + $0x3c8] sm:$0xff]  ;;  %v4380_v49 = vld [vmem:[#allocation5 + $0x2d0] sm:$0xff] }
 0xeb4   :  { %4487 = vmatpush1.bf16.msra.mxu0 %v4446_v45  ;;  %v4466_v45 = vld [vmem:[#allocation5 + $0x3c0] sm:$0xff] }
 0xeb5   :  { %4488 = vmatprep.subr.bf16.mxu0 %v4449_v44  ;;  %v4383_v44 = vld [vmem:[#allocation5 + $0x2e8] sm:$0xff] }
 0xeb6   :  { %4401 = vmatpush1.bf16.msra.mxu1 %v4360_v37  ;;  %v4469_v37 = vld [vmem:[#allocation5 + $0x3d8] sm:$0xff] }
 0xeb7   :  { %4402 = vmatprep.subr.bf16.mxu1 %v4363_v54  ;;  %v4382_v54 = vld [vmem:[#allocation5 + $0x2e0] sm:$0xff] }
 0xeb8   :  { %4489 = vmatpush1.bf16.msra.mxu0 %v4448_v53  ;;  %v4468_v53 = vld [vmem:[#allocation5 + $0x3d0] sm:$0xff] }
 0xeb9   :  { %4490 = vmatprep.subr.bf16.mxu0 %v4451_v36  ;;  %v4385_v36 = vld [vmem:[#allocation5 + $0x2f8] sm:$0xff] }
 0xeba   :  { %4403 = vmatpush1.bf16.msra.mxu1 %v4362_v60  ;;  %v4471_v60 = vld [vmem:[#allocation5 + $0x3e8] sm:$0xff] }
 0xebb   :  { %4404 = vmatprep.subr.bf16.mxu1 %v4365_v17  ;;  %v4384_v17 = vld [vmem:[#allocation5 + $0x2f0] sm:$0xff] }
 0xebc   :  { %4491 = vmatpush1.bf16.msra.mxu0 %v4450_v61  ;;  %v4470_v61 = vld [vmem:[#allocation5 + $0x3e0] sm:$0xff] }
 0xebd   :  { %4492 = vmatprep.subr.bf16.mxu0 %v4453_v31  ;;  %v4473_v31 = vld [vmem:[#allocation5 + $0x3f8] sm:$0xff] }
 0xebe   :  { %4405 = vmatpush1.bf16.msra.mxu1 %v4364_v30  ;;  %v4472_v30 = vld [vmem:[#allocation5 + $0x3f0] sm:$0xff] }
 0xebf   :  { %4406 = vmatprep.subr.bf16.mxu1 %v4367_v34 }
 0xec0   :  { %4493 = vmatpush1.bf16.msra.mxu0 %v4452_v39 }
 0xec1   :  { %4494 = vmatprep.subr.bf16.mxu0 %v4455_v51 }
 0xec2   :  { %4407 = vmatpush1.bf16.msra.mxu1 %v4366_v1 }
 0xec3   :  { %4408 = vmatprep.subr.bf16.mxu1 %v4369_v25 }
 0xec4   :  { %4495 = vmatpush1.bf16.msra.mxu0 %v4454_v19 }
 0xec5   :  { %4496 = vmatprep.subr.bf16.mxu0 %v4457_v38  ;;  %v4300_v38 = vrot.slane %v8184_v6, %v9531_v4 }
 0xec6   :  { %4409 = vmatpush1.bf16.msra.mxu1 %v4368_v28  ;;  %v4296_v28 = vrot.slane %v8179_v5, %v9531_v4 }
 0xec7   :  { %4410 = vmatprep.subr.bf16.mxu1 %v4371_v55 }
 0xec8   :  { %4497 = vmatpush1.bf16.msra.mxu0 %v4456_v2 }
 0xec9   :  { %4498 = vmatprep.subr.bf16.mxu0 %v4459_v41 }
 0xeca   :  { %4411 = vmatpush1.bf16.msra.mxu1 %v4370_v40  ;;  %v4310_v40 = vrot.slane %v8184_v6, %v9534_v32 }
 0xecb   :  { %4412 = vmatprep.subr.bf16.mxu1 %v4373_v24  ;;  %v4306_v24 = vrot.slane %v8179_v5, %v9534_v32 }
 0xecc   :  { %4499 = vmatpush1.bf16.msra.mxu0 %v4458_v22 }
 0xecd   :  { %4500 = vmatprep.subr.bf16.mxu0 %v4461_v15 }
 0xece   :  { %4413 = vmatpush1.bf16.msra.mxu1 %v4372_v50 }
 0xecf   :  { %4414 = vmatprep.subr.bf16.mxu1 %v4375_v20 }
 0xed2   :  { %4415 = vmatpush1.bf16.msra.mxu1 %v4374_v46 }
 0xf3b   :  { %v4279_v59 = vpop.xlane.xlu0 %4278 }
 0xf3c   :  { %v4280_v26 = vmul.f32 0.00390625, %v4279_v59  ;;  %v4338_v59 = vrot.slane %v8184_v6, %v9535_v43 }
 0xf3e   :  { %v8277_v21 = vsub.f32 %v8261_v29, %v4280_v26  ;;  %v8280_v0 = vsub.f32 %v8270_v35, %v4280_v26  ;;  %v4334_v26 = vrot.slane %v8179_v5, %v9535_v43 }
 0xf3f   :  { %v4317_v62 = vpop.xlane.xlu0 %4316 }
 0xf40   :  { %v4318_v9 = vmul.f32 0.00390625, %v4317_v62  ;;  %v4283_v11 = vmul.f32 %v8277_v21, %v8277_v21  ;;  %v4284_v14 = vmul.f32 %v8280_v0, %v8280_v0 }
 0xf42   :  { %v8287_v57 = vsub.f32 %v8264_v7, %v4318_v9  ;;  %v8290_v48 = vsub.f32 %v8267_v47, %v4318_v9  ;;  %v4285_v27 = vadd.f32 %v4284_v14, %v4283_v11  ;;  %v4460_v7 = vld [vmem:[#allocation5 + $0x390] sm:$0xff]  ;;  %v4377_v47 = vld [vmem:[#allocation5 + $0x2b8] sm:$0xff]  ;;  %v9536_v9 = vld [vmem:[#allocation170_spill] sm:$0xff] }
 0xf43   :  { %4501 = vmatpush1.bf16.msra.mxu0 %v4460_v7  ;;  %4416 = vmatprep.subr.bf16.mxu1 %v4377_v47 }
 0xf44   :  { %4286 = vadd.xlane.f32.xlu1 %v4285_v27  ;;  %v4321_v29 = vmul.f32 %v8287_v57, %v8287_v57  ;;  %v4322_v35 = vmul.f32 %v8290_v48, %v8290_v48  ;;  %4502 = vmatprep.subr.bf16.mxu0 %v4463_v58 }
 0xf45   :  { %4417 = vmatpush1.bf16.msra.mxu1 %v4376_v8  ;;  %v4389_v8 = vrot.slane %v9532_v16, %v9536_v9 }
 0xf46   :  { %v4323_v12 = vadd.f32 %v4322_v35, %v4321_v29  ;;  %4418 = vmatprep.subr.bf16.mxu1 %v4379_v63 }
 0xf47   :  { %4503 = vmatpush1.bf16.msra.mxu0 %v4462_v13 }
 0xf48   :  { %4324 = vadd.xlane.f32.xlu1 %v4323_v12  ;;  %4504 = vmatprep.subr.bf16.mxu0 %v4465_v10  ;;  %v9537_v10 = vld [vmem:[#allocation171_spill] sm:$0xff] }
 0xf49   :  { %4419 = vmatpush1.bf16.msra.mxu1 %v4378_v18  ;;  %v4477_v18 = vrot.slane %v9532_v16, %v9537_v10 }
 0xf4a   :  { %4420 = vmatprep.subr.bf16.mxu1 %v4381_v56 }
 0xf4b   :  { %4505 = vmatpush1.bf16.msra.mxu0 %v4464_v42 }
 0xf4c   :  { %4506 = vmatprep.subr.bf16.mxu0 %v4467_v52  ;;  %v4481_v52 = vrot.slane %v9533_v3, %v9537_v10 }
 0xf4d   :  { %4421 = vmatpush1.bf16.msra.mxu1 %v4380_v49 }
 0xf4e   :  { %4422 = vmatprep.subr.bf16.mxu1 %v4383_v44 }
 0xf4f   :  { %4507 = vmatpush1.bf16.msra.mxu0 %v4466_v45 }
 0xf50   :  { %4508 = vmatprep.subr.bf16.mxu0 %v4469_v37 }
 0xf51   :  { %4423 = vmatpush1.bf16.msra.mxu1 %v4382_v54 }
 0xf52   :  { %4424 = vmatprep.subr.bf16.mxu1 %v4385_v36 }
 0xf53   :  { %4509 = vmatpush1.bf16.msra.mxu0 %v4468_v53 }
 0xf54   :  { %4510 = vmatprep.subr.bf16.mxu0 %v4471_v60 }
 0xf55   :  { %4425 = vmatpush1.bf16.msra.mxu1 %v4384_v17 }
 0xf57   :  { %4511 = vmatpush1.bf16.msra.mxu0 %v4470_v61 }
 0xf58   :  { %4512 = vmatprep.subr.bf16.mxu0 %v4473_v31 }
 0xf5b   :  { %4513 = vmatpush1.bf16.msra.mxu0 %v4472_v30 }
 0xfd1   :  { %v4287_v34 = vpop.xlane.xlu1 %4286 }
 0xfd2   :  { %v4288_v39 = vmul.f32 0.00390625, %v4287_v34 }
 0xfd4   :  { %v4289_v51 = vadd.f32 1e-05, %v4288_v39 }
 0xfd5   :  { %v4325_v1 = vpop.xlane.xlu1 %4324 }
 0xfd6   :  { %6375 = vrsqrt.f32 %v4289_v51  ;;  %v4326_v25 = vmul.f32 0.00390625, %v4325_v1 }
 0xfd8   :  { %v4327_v19 = vadd.f32 1e-05, %v4326_v25 }
 0xfda   :  { %6377 = vrsqrt.f32 %v4327_v19 }
 0xfe0   :  { %v6376_v55 = vpop.eup %6375 }
 0xfe1   :  { %v4291_v2 = vmul.f32 %v6376_v55, %v8277_v21  ;;  %v4292_v41 = vmul.f32 %v6376_v55, %v8280_v0  ;;  %v4348_v21 = vrot.slane %v8184_v6, %v9536_v9  ;;  %v4344_v0 = vrot.slane %v8179_v5, %v9536_v9 }
 0xfe3   :  { %v4302_v22 = vmul.f32 %v4300_v38, %v4292_v41  ;;  %v4301_v50 = vmul.f32 %v4296_v28, %v4291_v2 }
 0xfe4   :  { %v6378_v62 = vpop.eup %6377 }
 0xfe5   :  { %v4329_v11 = vmul.f32 %v6378_v62, %v8287_v57  ;;  %v4312_v14 = vadd.f32 %v4310_v40, %v4302_v22  ;;  %v4311_v27 = vadd.f32 %v4306_v24, %v4301_v50  ;;  %v4330_v29 = vmul.f32 %v6378_v62, %v8290_v48 }
 0xfe6   :  { %v4393_v57 = vrot.slane %v9533_v3, %v9536_v9 }
 0xfe7   :  { %v4352_v35 = vpack.c.bf16 %v4312_v14, %v4312_v14  ;;  %v4351_v12 = vpack.c.bf16 %v4311_v27, %v4311_v27  ;;  %v4340_v20 = vmul.f32 %v4338_v59, %v4330_v29  ;;  %v4339_v15 = vmul.f32 %v4334_v26, %v4329_v11 }
 0xfe9   :  { %4426 = vmatprep.mubr.bf16.mxu1 %v4352_v35  ;;  %v4350_v46 = vadd.f32 %v4348_v21, %v4340_v20  ;;  %v4349_v7 = vadd.f32 %v4344_v0, %v4339_v15 }
 0xfea   :  { %4427 = vmatmul.mubr.bf16.vlgmr.msra.gmra.mrb[88].mxu1 %v4351_v12 }
 0xfeb   :  { %v4440_v47 = vpack.c.bf16 %v4350_v46, %v4350_v46  ;;  %v4439_v58 = vpack.c.bf16 %v4349_v7, %v4349_v7 }
 0xfed   :  { %4514 = vmatprep.mubr.bf16.mxu0 %v4440_v47 }
 0xfee   :  { %4515 = vmatmul.mubr.bf16.vlgmr.msra.gmra.mrb[88].mxu0 %v4439_v58 }
0x10bd   :  { %v4428_v13 = vpop.f32.mrb[88].mxu1 }
0x10be   :  { %v4429_v48 = vadd.f32 %v4428_v13, %v4389_v8  ;;  %v4430_v63 = vpop.f32.mrb[89].mxu1 }
0x10bf   :  { %v4431_v42 = vadd.f32 %v4430_v63, %v4393_v57  ;;  %v4432_v56 = vpop.f32.mrb[90].mxu1 }
0x10c0   :  { %v4435_v49 = vmax.f32 %v4429_v48, 0.0  ;;  %v4433_v45 = vpop.f32.mrb[91].mxu1 }
0x10c1   :  { %v4436_v44 = vmax.f32 %v4431_v42, 0.0  ;;  %v4516_v37 = vpop.f32.mrb[88].mxu0 }
0x10c2   :  { %v8324_v54 = vadd.f32 %v4435_v49, %v4311_v27  ;;  %v4517_v53 = vadd.f32 %v4516_v37, %v4477_v18  ;;  %v4518_v36 = vpop.f32.mrb[89].mxu0 }
0x10c3   :  { %v8326_v60 = vadd.f32 %v4436_v44, %v4312_v14  ;;  %v4519_v17 = vadd.f32 %v4518_v36, %v4481_v52  ;;  %v4520_v61 = vpop.f32.mrb[90].mxu0 }
0x10c4   :  { %v4523_v31 = vmax.f32 %v4517_v53, 0.0  ;;  %v4521_v30 = vpop.f32.mrb[91].mxu0 }
0x10c5   :  { %v4524_v34 = vmax.f32 %v4519_v17, 0.0 }
0x10c6   :  { %v8328_v39 = vadd.f32 %v4523_v31, %v4349_v7 }
0x10c7   :  { %v8330_v51 = vadd.f32 %v4524_v34, %v4350_v46 }
0x10c8   :  { %6459 = dma.done.wait [#allocation8 + $0x3], 32768 }
0x10c9   :  { %6460 = vsyncadd [#allocation8 + $0x3], 4294934528 }
0x10ca   :  { %6461 = dma.done.wait [#allocation8 + $0x4], 32768 }
0x10cb   :  { %6462 = vsyncadd [#allocation8 + $0x4], 4294934528  ;;  %v8334_v1 = vpack.c.bf16 %v8326_v60, %v8326_v60  ;;  %v4539_v25 = vld [vmem:[#allocation6 + $0x8] sm:$0xff]  ;;  %v4541_v19 = vld [vmem:[#allocation6 + $0x18] sm:$0xff] }
0x10cc   :  { %v4538_v38 = vld [vmem:[#allocation6] sm:$0xff]  ;;  %4709 = vmatprep.subr.bf16.mxu1 %v4539_v25  ;;  %4750 = vmatprep.subr.bf16.mxu0 %v4541_v19  ;;  %v4540_v28 = vld [vmem:[#allocation6 + $0x10] sm:$0xff]  ;;  %v4547_v55 = vld [vmem:[#allocation6 + $0x48] sm:$0xff] }
0x10cd   :  { %4741 = vmatprep.mubr.bf16.mxu1 %v8334_v1  ;;  %4782 = vmatprep.mubr.bf16.mxu0 %v8334_v1  ;;  %v4549_v2 = vld [vmem:[#allocation6 + $0x58] sm:$0xff]  ;;  %v4546_v41 = vld [vmem:[#allocation6 + $0x40] sm:$0xff]  ;;  %v4548_v40 = vld [vmem:[#allocation6 + $0x50] sm:$0xff] }
0x10ce   :  { %4710 = vmatpush1.bf16.msra.mxu1 %v4538_v38  ;;  %4751 = vmatpush1.bf16.msra.mxu0 %v4540_v28  ;;  %v4555_v24 = vld [vmem:[#allocation6 + $0x88] sm:$0xff]  ;;  %v4557_v22 = vld [vmem:[#allocation6 + $0x98] sm:$0xff]  ;;  %v4554_v50 = vld [vmem:[#allocation6 + $0x80] sm:$0xff] }
0x10cf   :  { %4711 = vmatprep.subr.bf16.mxu1 %v4547_v55  ;;  %4752 = vmatprep.subr.bf16.mxu0 %v4549_v2  ;;  %v4556_v59 = vld [vmem:[#allocation6 + $0x90] sm:$0xff]  ;;  %v4563_v26 = vld [vmem:[#allocation6 + $0xc8] sm:$0xff]  ;;  %v4565_v62 = vld [vmem:[#allocation6 + $0xd8] sm:$0xff] }
0x10d0   :  { %v4562_v21 = vld [vmem:[#allocation6 + $0xc0] sm:$0xff]  ;;  %v4564_v0 = vld [vmem:[#allocation6 + $0xd0] sm:$0xff]  ;;  %v4571_v11 = vld [vmem:[#allocation6 + $0x108] sm:$0xff] }
0x10d1   :  { %v4573_v14 = vld [vmem:[#allocation6 + $0x118] sm:$0xff]  ;;  %v4570_v27 = vld [vmem:[#allocation6 + $0x100] sm:$0xff]  ;;  %v4572_v29 = vld [vmem:[#allocation6 + $0x110] sm:$0xff] }
0x10d2   :  { %4712 = vmatpush1.bf16.msra.mxu1 %v4546_v41  ;;  %4753 = vmatpush1.bf16.msra.mxu0 %v4548_v40  ;;  %v4579_v35 = vld [vmem:[#allocation6 + $0x148] sm:$0xff]  ;;  %v4581_v12 = vld [vmem:[#allocation6 + $0x158] sm:$0xff]  ;;  %v4578_v20 = vld [vmem:[#allocation6 + $0x140] sm:$0xff] }
0x10d3   :  { %4713 = vmatprep.subr.bf16.mxu1 %v4555_v24  ;;  %4754 = vmatprep.subr.bf16.mxu0 %v4557_v22  ;;  %v4580_v15 = vld [vmem:[#allocation6 + $0x150] sm:$0xff]  ;;  %v4587_v46 = vld [vmem:[#allocation6 + $0x188] sm:$0xff]  ;;  %v4589_v7 = vld [vmem:[#allocation6 + $0x198] sm:$0xff] }
0x10d4   :  { %v4586_v47 = vld [vmem:[#allocation6 + $0x180] sm:$0xff]  ;;  %v4588_v58 = vld [vmem:[#allocation6 + $0x190] sm:$0xff]  ;;  %v4595_v8 = vld [vmem:[#allocation6 + $0x1c8] sm:$0xff] }
0x10d5   :  { %v4597_v57 = vld [vmem:[#allocation6 + $0x1d8] sm:$0xff]  ;;  %v4594_v13 = vld [vmem:[#allocation6 + $0x1c0] sm:$0xff]  ;;  %v4596_v48 = vld [vmem:[#allocation6 + $0x1d0] sm:$0xff] }
0x10d6   :  { %4714 = vmatpush1.bf16.msra.mxu1 %v4554_v50  ;;  %4755 = vmatpush1.bf16.msra.mxu0 %v4556_v59  ;;  %v4603_v63 = vld [vmem:[#allocation6 + $0x208] sm:$0xff]  ;;  %v4605_v18 = vld [vmem:[#allocation6 + $0x218] sm:$0xff]  ;;  %v4602_v42 = vld [vmem:[#allocation6 + $0x200] sm:$0xff] }
0x10d7   :  { %4715 = vmatprep.subr.bf16.mxu1 %v4563_v26  ;;  %4756 = vmatprep.subr.bf16.mxu0 %v4565_v62  ;;  %v4604_v56 = vld [vmem:[#allocation6 + $0x210] sm:$0xff]  ;;  %v4611_v52 = vld [vmem:[#allocation6 + $0x248] sm:$0xff]  ;;  %v4613_v49 = vld [vmem:[#allocation6 + $0x258] sm:$0xff] }
0x10d8   :  { %v4610_v45 = vld [vmem:[#allocation6 + $0x240] sm:$0xff]  ;;  %v4612_v44 = vld [vmem:[#allocation6 + $0x250] sm:$0xff]  ;;  %v4619_v37 = vld [vmem:[#allocation6 + $0x288] sm:$0xff] }
0x10d9   :  { %v4621_v53 = vld [vmem:[#allocation6 + $0x298] sm:$0xff]  ;;  %v4618_v36 = vld [vmem:[#allocation6 + $0x280] sm:$0xff]  ;;  %v4620_v17 = vld [vmem:[#allocation6 + $0x290] sm:$0xff] }
0x10da   :  { %4716 = vmatpush1.bf16.msra.mxu1 %v4562_v21  ;;  %4757 = vmatpush1.bf16.msra.mxu0 %v4564_v0  ;;  %v4627_v61 = vld [vmem:[#allocation6 + $0x2c8] sm:$0xff]  ;;  %v4629_v31 = vld [vmem:[#allocation6 + $0x2d8] sm:$0xff]  ;;  %v4626_v30 = vld [vmem:[#allocation6 + $0x2c0] sm:$0xff] }
0x10db   :  { %4717 = vmatprep.subr.bf16.mxu1 %v4571_v11  ;;  %4758 = vmatprep.subr.bf16.mxu0 %v4573_v14  ;;  %v4628_v34 = vld [vmem:[#allocation6 + $0x2d0] sm:$0xff]  ;;  %v4635_v25 = vld [vmem:[#allocation6 + $0x308] sm:$0xff]  ;;  %v4637_v19 = vld [vmem:[#allocation6 + $0x318] sm:$0xff] }
0x10dc   :  { %v4634_v38 = vld [vmem:[#allocation6 + $0x300] sm:$0xff]  ;;  %v4636_v28 = vld [vmem:[#allocation6 + $0x310] sm:$0xff]  ;;  %v4643_v55 = vld [vmem:[#allocation6 + $0x348] sm:$0xff] }
0x10dd   :  { %v4645_v2 = vld [vmem:[#allocation6 + $0x358] sm:$0xff]  ;;  %v4642_v41 = vld [vmem:[#allocation6 + $0x340] sm:$0xff]  ;;  %v4644_v40 = vld [vmem:[#allocation6 + $0x350] sm:$0xff] }
0x10de   :  { %4718 = vmatpush1.bf16.msra.mxu1 %v4570_v27  ;;  %4759 = vmatpush1.bf16.msra.mxu0 %v4572_v29  ;;  %v4651_v24 = vld [vmem:[#allocation6 + $0x388] sm:$0xff]  ;;  %v4653_v22 = vld [vmem:[#allocation6 + $0x398] sm:$0xff]  ;;  %v4650_v50 = vld [vmem:[#allocation6 + $0x380] sm:$0xff]  ;;  %v8340_v27 = vpack.c.bf16 %v8324_v54, %v8324_v54 }
0x10df   :  { %4719 = vmatprep.subr.bf16.mxu1 %v4579_v35  ;;  %4760 = vmatprep.subr.bf16.mxu0 %v4581_v12  ;;  %v4652_v59 = vld [vmem:[#allocation6 + $0x390] sm:$0xff]  ;;  %v4659_v26 = vld [vmem:[#allocation6 + $0x3c8] sm:$0xff]  ;;  %v4661_v62 = vld [vmem:[#allocation6 + $0x3d8] sm:$0xff] }
0x10e0   :  { %v4658_v21 = vld [vmem:[#allocation6 + $0x3c0] sm:$0xff]  ;;  %v4660_v0 = vld [vmem:[#allocation6 + $0x3d0] sm:$0xff]  ;;  %v4543_v11 = vld [vmem:[#allocation6 + $0x28] sm:$0xff] }
0x10e1   :  { %v4545_v14 = vld [vmem:[#allocation6 + $0x38] sm:$0xff]  ;;  %v4542_v29 = vld [vmem:[#allocation6 + $0x20] sm:$0xff]  ;;  %v4544_v35 = vld [vmem:[#allocation6 + $0x30] sm:$0xff] }
0x10e2   :  { %4720 = vmatpush1.bf16.msra.mxu1 %v4578_v20  ;;  %4761 = vmatpush1.bf16.msra.mxu0 %v4580_v15  ;;  %v4551_v12 = vld [vmem:[#allocation6 + $0x68] sm:$0xff]  ;;  %v4553_v20 = vld [vmem:[#allocation6 + $0x78] sm:$0xff]  ;;  %v4550_v15 = vld [vmem:[#allocation6 + $0x60] sm:$0xff] }
0x10e3   :  { %4721 = vmatprep.subr.bf16.mxu1 %v4587_v46  ;;  %4762 = vmatprep.subr.bf16.mxu0 %v4589_v7  ;;  %v4552_v46 = vld [vmem:[#allocation6 + $0x70] sm:$0xff]  ;;  %v4559_v7 = vld [vmem:[#allocation6 + $0xa8] sm:$0xff] }
0x10e6   :  { %4722 = vmatpush1.bf16.msra.mxu1 %v4586_v47  ;;  %4763 = vmatpush1.bf16.msra.mxu0 %v4588_v58  ;;  %v4561_v47 = vld [vmem:[#allocation6 + $0xb8] sm:$0xff]  ;;  %v4558_v58 = vld [vmem:[#allocation6 + $0xa0] sm:$0xff] }
0x10e7   :  { %4723 = vmatprep.subr.bf16.mxu1 %v4595_v8  ;;  %4764 = vmatprep.subr.bf16.mxu0 %v4597_v57  ;;  %v4560_v8 = vld [vmem:[#allocation6 + $0xb0] sm:$0xff]  ;;  %v4567_v57 = vld [vmem:[#allocation6 + $0xe8] sm:$0xff] }
0x10ea   :  { %4724 = vmatpush1.bf16.msra.mxu1 %v4594_v13  ;;  %4765 = vmatpush1.bf16.msra.mxu0 %v4596_v48  ;;  %v4569_v13 = vld [vmem:[#allocation6 + $0xf8] sm:$0xff]  ;;  %v4566_v48 = vld [vmem:[#allocation6 + $0xe0] sm:$0xff] }
0x10eb   :  { %4725 = vmatprep.subr.bf16.mxu1 %v4603_v63  ;;  %4766 = vmatprep.subr.bf16.mxu0 %v4605_v18  ;;  %v4568_v63 = vld [vmem:[#allocation6 + $0xf0] sm:$0xff]  ;;  %v4575_v18 = vld [vmem:[#allocation6 + $0x128] sm:$0xff] }
0x10ee   :  { %4726 = vmatpush1.bf16.msra.mxu1 %v4602_v42  ;;  %4767 = vmatpush1.bf16.msra.mxu0 %v4604_v56  ;;  %v4577_v42 = vld [vmem:[#allocation6 + $0x138] sm:$0xff]  ;;  %v4576_v56 = vld [vmem:[#allocation6 + $0x130] sm:$0xff] }
0x10ef   :  { %4727 = vmatprep.subr.bf16.mxu1 %v4611_v52  ;;  %4768 = vmatprep.subr.bf16.mxu0 %v4613_v49  ;;  %v4583_v52 = vld [vmem:[#allocation6 + $0x168] sm:$0xff]  ;;  %v4585_v49 = vld [vmem:[#allocation6 + $0x178] sm:$0xff] }
0x10f2   :  { %4728 = vmatpush1.bf16.msra.mxu1 %v4610_v45  ;;  %4769 = vmatpush1.bf16.msra.mxu0 %v4612_v44  ;;  %v4582_v45 = vld [vmem:[#allocation6 + $0x160] sm:$0xff]  ;;  %v4584_v44 = vld [vmem:[#allocation6 + $0x170] sm:$0xff] }
0x10f3   :  { %4729 = vmatprep.subr.bf16.mxu1 %v4619_v37  ;;  %4770 = vmatprep.subr.bf16.mxu0 %v4621_v53  ;;  %v4591_v37 = vld [vmem:[#allocation6 + $0x1a8] sm:$0xff]  ;;  %v4593_v53 = vld [vmem:[#allocation6 + $0x1b8] sm:$0xff] }
0x10f6   :  { %4730 = vmatpush1.bf16.msra.mxu1 %v4618_v36  ;;  %4771 = vmatpush1.bf16.msra.mxu0 %v4620_v17  ;;  %v4590_v36 = vld [vmem:[#allocation6 + $0x1a0] sm:$0xff]  ;;  %v4592_v17 = vld [vmem:[#allocation6 + $0x1b0] sm:$0xff] }
0x10f7   :  { %4731 = vmatprep.subr.bf16.mxu1 %v4627_v61  ;;  %4772 = vmatprep.subr.bf16.mxu0 %v4629_v31  ;;  %v4599_v61 = vld [vmem:[#allocation6 + $0x1e8] sm:$0xff]  ;;  %v4601_v31 = vld [vmem:[#allocation6 + $0x1f8] sm:$0xff] }
0x10fa   :  { %4732 = vmatpush1.bf16.msra.mxu1 %v4626_v30  ;;  %4773 = vmatpush1.bf16.msra.mxu0 %v4628_v34  ;;  %v4598_v30 = vld [vmem:[#allocation6 + $0x1e0] sm:$0xff]  ;;  %v4600_v34 = vld [vmem:[#allocation6 + $0x1f0] sm:$0xff] }
0x10fb   :  { %4733 = vmatprep.subr.bf16.mxu1 %v4635_v25  ;;  %4774 = vmatprep.subr.bf16.mxu0 %v4637_v19  ;;  %v4607_v25 = vld [vmem:[#allocation6 + $0x228] sm:$0xff]  ;;  %v4609_v19 = vld [vmem:[#allocation6 + $0x238] sm:$0xff] }
0x10fe   :  { %4734 = vmatpush1.bf16.msra.mxu1 %v4634_v38  ;;  %4775 = vmatpush1.bf16.msra.mxu0 %v4636_v28  ;;  %v4606_v38 = vld [vmem:[#allocation6 + $0x220] sm:$0xff]  ;;  %v4608_v28 = vld [vmem:[#allocation6 + $0x230] sm:$0xff] }
0x10ff   :  { %4735 = vmatprep.subr.bf16.mxu1 %v4643_v55  ;;  %4776 = vmatprep.subr.bf16.mxu0 %v4645_v2  ;;  %v4615_v55 = vld [vmem:[#allocation6 + $0x268] sm:$0xff]  ;;  %v4617_v2 = vld [vmem:[#allocation6 + $0x278] sm:$0xff] }
0x1102   :  { %4736 = vmatpush1.bf16.msra.mxu1 %v4642_v41  ;;  %4777 = vmatpush1.bf16.msra.mxu0 %v4644_v40  ;;  %v4614_v41 = vld [vmem:[#allocation6 + $0x260] sm:$0xff]  ;;  %v4616_v40 = vld [vmem:[#allocation6 + $0x270] sm:$0xff] }
0x1103   :  { %4737 = vmatprep.subr.bf16.mxu1 %v4651_v24  ;;  %4778 = vmatprep.subr.bf16.mxu0 %v4653_v22  ;;  %v4623_v24 = vld [vmem:[#allocation6 + $0x2a8] sm:$0xff]  ;;  %v4625_v22 = vld [vmem:[#allocation6 + $0x2b8] sm:$0xff] }
0x1106   :  { %4738 = vmatpush1.bf16.msra.mxu1 %v4650_v50  ;;  %4779 = vmatpush1.bf16.msra.mxu0 %v4652_v59  ;;  %v4622_v50 = vld [vmem:[#allocation6 + $0x2a0] sm:$0xff]  ;;  %v4624_v59 = vld [vmem:[#allocation6 + $0x2b0] sm:$0xff] }
0x1107   :  { %4739 = vmatprep.subr.bf16.mxu1 %v4659_v26  ;;  %4780 = vmatprep.subr.bf16.mxu0 %v4661_v62  ;;  %v4631_v26 = vld [vmem:[#allocation6 + $0x2e8] sm:$0xff]  ;;  %v4633_v62 = vld [vmem:[#allocation6 + $0x2f8] sm:$0xff] }
0x110a   :  { %4740 = vmatpush1.bf16.msra.mxu1 %v4658_v21  ;;  %4781 = vmatpush1.bf16.msra.mxu0 %v4660_v0  ;;  %v4630_v21 = vld [vmem:[#allocation6 + $0x2e0] sm:$0xff]  ;;  %v4632_v0 = vld [vmem:[#allocation6 + $0x2f0] sm:$0xff] }
0x110b   :  { %4791 = vmatprep.subr.bf16.mxu1 %v4543_v11  ;;  %4832 = vmatprep.subr.bf16.mxu0 %v4545_v14  ;;  %v4639_v11 = vld [vmem:[#allocation6 + $0x328] sm:$0xff]  ;;  %v4641_v14 = vld [vmem:[#allocation6 + $0x338] sm:$0xff] }
0x110d   :  { %4742 = vmatmul.mubr.bf16.vlgmr.msra.gmra.mrb[92].mxu1 %v8340_v27  ;;  %4783 = vmatmul.mubr.bf16.vlgmr.msra.gmra.mrb[92].mxu0 %v8340_v27 }
0x110e   :  { %4792 = vmatpush1.bf16.msra.mxu1 %v4542_v29  ;;  %4833 = vmatpush1.bf16.msra.mxu0 %v4544_v35  ;;  %v4638_v29 = vld [vmem:[#allocation6 + $0x320] sm:$0xff]  ;;  %v4640_v35 = vld [vmem:[#allocation6 + $0x330] sm:$0xff] }
0x110f   :  { %4793 = vmatprep.subr.bf16.mxu1 %v4551_v12  ;;  %4834 = vmatprep.subr.bf16.mxu0 %v4553_v20  ;;  %v4647_v12 = vld [vmem:[#allocation6 + $0x368] sm:$0xff]  ;;  %v4649_v20 = vld [vmem:[#allocation6 + $0x378] sm:$0xff] }
0x1110   :  { %4823 = vmatprep.mubr.bf16.mxu1 %v8334_v1  ;;  %4864 = vmatprep.mubr.bf16.mxu0 %v8334_v1  ;;  %v4574_v1 = vld [vmem:[#allocation6 + $0x120] sm:$0xff] }
0x1112   :  { %4794 = vmatpush1.bf16.msra.mxu1 %v4550_v15  ;;  %4835 = vmatpush1.bf16.msra.mxu0 %v4552_v46  ;;  %v4646_v15 = vld [vmem:[#allocation6 + $0x360] sm:$0xff]  ;;  %v4648_v46 = vld [vmem:[#allocation6 + $0x370] sm:$0xff] }
0x1113   :  { %4795 = vmatprep.subr.bf16.mxu1 %v4559_v7  ;;  %4836 = vmatprep.subr.bf16.mxu0 %v4561_v47  ;;  %v4655_v7 = vld [vmem:[#allocation6 + $0x3a8] sm:$0xff]  ;;  %v4657_v47 = vld [vmem:[#allocation6 + $0x3b8] sm:$0xff] }
0x1116   :  { %4796 = vmatpush1.bf16.msra.mxu1 %v4558_v58  ;;  %4837 = vmatpush1.bf16.msra.mxu0 %v4560_v8  ;;  %v4654_v58 = vld [vmem:[#allocation6 + $0x3a0] sm:$0xff]  ;;  %v4656_v8 = vld [vmem:[#allocation6 + $0x3b0] sm:$0xff] }
0x1117   :  { %4797 = vmatprep.subr.bf16.mxu1 %v4567_v57  ;;  %4838 = vmatprep.subr.bf16.mxu0 %v4569_v13  ;;  %v4663_v57 = vld [vmem:[#allocation6 + $0x3e8] sm:$0xff]  ;;  %v4665_v13 = vld [vmem:[#allocation6 + $0x3f8] sm:$0xff] }
0x111a   :  { %4798 = vmatpush1.bf16.msra.mxu1 %v4566_v48  ;;  %4839 = vmatpush1.bf16.msra.mxu0 %v4568_v63  ;;  %v4662_v48 = vld [vmem:[#allocation6 + $0x3e0] sm:$0xff]  ;;  %v4664_v63 = vld [vmem:[#allocation6 + $0x3f0] sm:$0xff] }
0x111b   :  { %4799 = vmatprep.subr.bf16.mxu1 %v4575_v18  ;;  %4840 = vmatprep.subr.bf16.mxu0 %v4577_v42  ;;  %v4885_v18 = vld [vmem:[#allocation6 + $0x408] sm:$0xff]  ;;  %v4887_v42 = vld [vmem:[#allocation6 + $0x418] sm:$0xff] }
0x111e   :  { %4800 = vmatpush1.bf16.msra.mxu1 %v4574_v1  ;;  %4841 = vmatpush1.bf16.msra.mxu0 %v4576_v56  ;;  %v4884_v1 = vld [vmem:[#allocation6 + $0x400] sm:$0xff]  ;;  %v4886_v56 = vld [vmem:[#allocation6 + $0x410] sm:$0xff] }
0x111f   :  { %4801 = vmatprep.subr.bf16.mxu1 %v4583_v52  ;;  %4842 = vmatprep.subr.bf16.mxu0 %v4585_v49  ;;  %v4893_v52 = vld [vmem:[#allocation6 + $0x448] sm:$0xff]  ;;  %v4895_v49 = vld [vmem:[#allocation6 + $0x458] sm:$0xff] }
0x1122   :  { %4802 = vmatpush1.bf16.msra.mxu1 %v4582_v45  ;;  %4843 = vmatpush1.bf16.msra.mxu0 %v4584_v44  ;;  %v8348_v45 = vpack.c.bf16 %v8330_v51, %v8330_v51  ;;  %v4892_v44 = vld [vmem:[#allocation6 + $0x440] sm:$0xff] }
0x1123   :  { %4803 = vmatprep.subr.bf16.mxu1 %v4591_v37  ;;  %4844 = vmatprep.subr.bf16.mxu0 %v4593_v53  ;;  %v4894_v37 = vld [vmem:[#allocation6 + $0x450] sm:$0xff]  ;;  %v4901_v53 = vld [vmem:[#allocation6 + $0x488] sm:$0xff] }
0x1126   :  { %4804 = vmatpush1.bf16.msra.mxu1 %v4590_v36  ;;  %4845 = vmatpush1.bf16.msra.mxu0 %v4592_v17  ;;  %v4903_v36 = vld [vmem:[#allocation6 + $0x498] sm:$0xff]  ;;  %v4900_v17 = vld [vmem:[#allocation6 + $0x480] sm:$0xff] }
0x1127   :  { %4805 = vmatprep.subr.bf16.mxu1 %v4599_v61  ;;  %4846 = vmatprep.subr.bf16.mxu0 %v4601_v31  ;;  %v4902_v61 = vld [vmem:[#allocation6 + $0x490] sm:$0xff]  ;;  %v4909_v31 = vld [vmem:[#allocation6 + $0x4c8] sm:$0xff] }
0x112a   :  { %4806 = vmatpush1.bf16.msra.mxu1 %v4598_v30  ;;  %4847 = vmatpush1.bf16.msra.mxu0 %v4600_v34  ;;  %v4908_v30 = vld [vmem:[#allocation6 + $0x4c0] sm:$0xff]  ;;  %v4910_v34 = vld [vmem:[#allocation6 + $0x4d0] sm:$0xff] }
0x112b   :  { %4807 = vmatprep.subr.bf16.mxu1 %v4607_v25  ;;  %4848 = vmatprep.subr.bf16.mxu0 %v4609_v19  ;;  %v4917_v25 = vld [vmem:[#allocation6 + $0x508] sm:$0xff]  ;;  %v4919_v19 = vld [vmem:[#allocation6 + $0x518] sm:$0xff] }
0x112e   :  { %4808 = vmatpush1.bf16.msra.mxu1 %v4606_v38  ;;  %4849 = vmatpush1.bf16.msra.mxu0 %v4608_v28  ;;  %v4916_v38 = vld [vmem:[#allocation6 + $0x500] sm:$0xff]  ;;  %v4918_v28 = vld [vmem:[#allocation6 + $0x510] sm:$0xff] }
0x112f   :  { %4809 = vmatprep.subr.bf16.mxu1 %v4615_v55  ;;  %4850 = vmatprep.subr.bf16.mxu0 %v4617_v2  ;;  %v4925_v55 = vld [vmem:[#allocation6 + $0x548] sm:$0xff]  ;;  %v4927_v2 = vld [vmem:[#allocation6 + $0x558] sm:$0xff] }
0x1132   :  { %4810 = vmatpush1.bf16.msra.mxu1 %v4614_v41  ;;  %4851 = vmatpush1.bf16.msra.mxu0 %v4616_v40  ;;  %v4924_v41 = vld [vmem:[#allocation6 + $0x540] sm:$0xff]  ;;  %v4926_v40 = vld [vmem:[#allocation6 + $0x550] sm:$0xff] }
0x1133   :  { %4811 = vmatprep.subr.bf16.mxu1 %v4623_v24  ;;  %4852 = vmatprep.subr.bf16.mxu0 %v4625_v22  ;;  %v4933_v24 = vld [vmem:[#allocation6 + $0x588] sm:$0xff]  ;;  %v4935_v22 = vld [vmem:[#allocation6 + $0x598] sm:$0xff] }
0x1136   :  { %4812 = vmatpush1.bf16.msra.mxu1 %v4622_v50  ;;  %4853 = vmatpush1.bf16.msra.mxu0 %v4624_v59  ;;  %v4932_v50 = vld [vmem:[#allocation6 + $0x580] sm:$0xff]  ;;  %v4934_v59 = vld [vmem:[#allocation6 + $0x590] sm:$0xff] }
0x1137   :  { %4813 = vmatprep.subr.bf16.mxu1 %v4631_v26  ;;  %4854 = vmatprep.subr.bf16.mxu0 %v4633_v62  ;;  %v4941_v26 = vld [vmem:[#allocation6 + $0x5c8] sm:$0xff]  ;;  %v4943_v62 = vld [vmem:[#allocation6 + $0x5d8] sm:$0xff] }
0x113a   :  { %4814 = vmatpush1.bf16.msra.mxu1 %v4630_v21  ;;  %4855 = vmatpush1.bf16.msra.mxu0 %v4632_v0  ;;  %v4940_v21 = vld [vmem:[#allocation6 + $0x5c0] sm:$0xff]  ;;  %v4942_v0 = vld [vmem:[#allocation6 + $0x5d0] sm:$0xff] }
0x113b   :  { %4815 = vmatprep.subr.bf16.mxu1 %v4639_v11  ;;  %4856 = vmatprep.subr.bf16.mxu0 %v4641_v14  ;;  %v4949_v11 = vld [vmem:[#allocation6 + $0x608] sm:$0xff]  ;;  %v4951_v14 = vld [vmem:[#allocation6 + $0x618] sm:$0xff] }
0x113e   :  { %4816 = vmatpush1.bf16.msra.mxu1 %v4638_v29  ;;  %4857 = vmatpush1.bf16.msra.mxu0 %v4640_v35  ;;  %v4948_v29 = vld [vmem:[#allocation6 + $0x600] sm:$0xff]  ;;  %v4950_v35 = vld [vmem:[#allocation6 + $0x610] sm:$0xff] }
0x113f   :  { %4817 = vmatprep.subr.bf16.mxu1 %v4647_v12  ;;  %4858 = vmatprep.subr.bf16.mxu0 %v4649_v20  ;;  %v4957_v12 = vld [vmem:[#allocation6 + $0x648] sm:$0xff]  ;;  %v4959_v20 = vld [vmem:[#allocation6 + $0x658] sm:$0xff] }
0x1142   :  { %4818 = vmatpush1.bf16.msra.mxu1 %v4646_v15  ;;  %4859 = vmatpush1.bf16.msra.mxu0 %v4648_v46  ;;  %v4956_v15 = vld [vmem:[#allocation6 + $0x640] sm:$0xff]  ;;  %v4958_v46 = vld [vmem:[#allocation6 + $0x650] sm:$0xff] }
0x1143   :  { %4819 = vmatprep.subr.bf16.mxu1 %v4655_v7  ;;  %4860 = vmatprep.subr.bf16.mxu0 %v4657_v47  ;;  %v4965_v7 = vld [vmem:[#allocation6 + $0x688] sm:$0xff]  ;;  %v4967_v47 = vld [vmem:[#allocation6 + $0x698] sm:$0xff] }
0x1146   :  { %4820 = vmatpush1.bf16.msra.mxu1 %v4654_v58  ;;  %4861 = vmatpush1.bf16.msra.mxu0 %v4656_v8  ;;  %v4964_v58 = vld [vmem:[#allocation6 + $0x680] sm:$0xff]  ;;  %v4966_v8 = vld [vmem:[#allocation6 + $0x690] sm:$0xff] }
0x1147   :  { %4821 = vmatprep.subr.bf16.mxu1 %v4663_v57  ;;  %4862 = vmatprep.subr.bf16.mxu0 %v4665_v13  ;;  %v4973_v57 = vld [vmem:[#allocation6 + $0x6c8] sm:$0xff]  ;;  %v4975_v13 = vld [vmem:[#allocation6 + $0x6d8] sm:$0xff] }
0x114a   :  { %4822 = vmatpush1.bf16.msra.mxu1 %v4662_v48  ;;  %4863 = vmatpush1.bf16.msra.mxu0 %v4664_v63  ;;  %v4972_v48 = vld [vmem:[#allocation6 + $0x6c0] sm:$0xff]  ;;  %v4974_v63 = vld [vmem:[#allocation6 + $0x6d0] sm:$0xff] }
0x114b   :  { %5055 = vmatprep.subr.bf16.mxu1 %v4885_v18  ;;  %5096 = vmatprep.subr.bf16.mxu0 %v4887_v42  ;;  %v4981_v18 = vld [vmem:[#allocation6 + $0x708] sm:$0xff]  ;;  %v4983_v42 = vld [vmem:[#allocation6 + $0x718] sm:$0xff] }
0x114d   :  { %4824 = vmatmul.mubr.bf16.vlgmr.msra.gmra.mrb[96].mxu1 %v8340_v27  ;;  %4865 = vmatmul.mubr.bf16.vlgmr.msra.gmra.mrb[96].mxu0 %v8340_v27  ;;  %v4911_v27 = vld [vmem:[#allocation6 + $0x4d8] sm:$0xff] }
0x114e   :  { %5056 = vmatpush1.bf16.msra.mxu1 %v4884_v1  ;;  %5097 = vmatpush1.bf16.msra.mxu0 %v4886_v56  ;;  %v4980_v1 = vld [vmem:[#allocation6 + $0x700] sm:$0xff]  ;;  %v4982_v56 = vld [vmem:[#allocation6 + $0x710] sm:$0xff] }
0x114f   :  { %5057 = vmatprep.subr.bf16.mxu1 %v4893_v52  ;;  %5098 = vmatprep.subr.bf16.mxu0 %v4895_v49  ;;  %v4989_v52 = vld [vmem:[#allocation6 + $0x748] sm:$0xff]  ;;  %v4991_v49 = vld [vmem:[#allocation6 + $0x758] sm:$0xff] }
0x1150   :  { %5087 = vmatprep.mubr.bf16.mxu1 %v8348_v45  ;;  %5128 = vmatprep.mubr.bf16.mxu0 %v8348_v45 }
0x1152   :  { %5058 = vmatpush1.bf16.msra.mxu1 %v4892_v44  ;;  %5099 = vmatpush1.bf16.msra.mxu0 %v4894_v37  ;;  %v4988_v44 = vld [vmem:[#allocation6 + $0x740] sm:$0xff]  ;;  %v4990_v37 = vld [vmem:[#allocation6 + $0x750] sm:$0xff] }
0x1153   :  { %5059 = vmatprep.subr.bf16.mxu1 %v4901_v53  ;;  %5100 = vmatprep.subr.bf16.mxu0 %v4903_v36  ;;  %v4997_v53 = vld [vmem:[#allocation6 + $0x788] sm:$0xff]  ;;  %v4999_v36 = vld [vmem:[#allocation6 + $0x798] sm:$0xff] }
0x1156   :  { %5060 = vmatpush1.bf16.msra.mxu1 %v4900_v17  ;;  %5101 = vmatpush1.bf16.msra.mxu0 %v4902_v61  ;;  %v4996_v17 = vld [vmem:[#allocation6 + $0x780] sm:$0xff]  ;;  %v4998_v61 = vld [vmem:[#allocation6 + $0x790] sm:$0xff] }
0x1157   :  { %5061 = vmatprep.subr.bf16.mxu1 %v4909_v31  ;;  %5102 = vmatprep.subr.bf16.mxu0 %v4911_v27  ;;  %v5005_v31 = vld [vmem:[#allocation6 + $0x7c8] sm:$0xff]  ;;  %v5007_v27 = vld [vmem:[#allocation6 + $0x7d8] sm:$0xff] }
0x115a   :  { %5062 = vmatpush1.bf16.msra.mxu1 %v4908_v30  ;;  %5103 = vmatpush1.bf16.msra.mxu0 %v4910_v34  ;;  %v5004_v30 = vld [vmem:[#allocation6 + $0x7c0] sm:$0xff]  ;;  %v5006_v34 = vld [vmem:[#allocation6 + $0x7d0] sm:$0xff] }
0x115b   :  { %5063 = vmatprep.subr.bf16.mxu1 %v4917_v25  ;;  %5104 = vmatprep.subr.bf16.mxu0 %v4919_v19  ;;  %v4889_v25 = vld [vmem:[#allocation6 + $0x428] sm:$0xff]  ;;  %v4891_v19 = vld [vmem:[#allocation6 + $0x438] sm:$0xff] }
0x115e   :  { %5064 = vmatpush1.bf16.msra.mxu1 %v4916_v38  ;;  %5105 = vmatpush1.bf16.msra.mxu0 %v4918_v28  ;;  %v8356_v38 = vpack.c.bf16 %v8328_v39, %v8328_v39  ;;  %v4888_v28 = vld [vmem:[#allocation6 + $0x420] sm:$0xff] }
0x115f   :  { %5065 = vmatprep.subr.bf16.mxu1 %v4925_v55  ;;  %5106 = vmatprep.subr.bf16.mxu0 %v4927_v2  ;;  %v4890_v55 = vld [vmem:[#allocation6 + $0x430] sm:$0xff]  ;;  %v4897_v2 = vld [vmem:[#allocation6 + $0x468] sm:$0xff] }
0x1162   :  { %5066 = vmatpush1.bf16.msra.mxu1 %v4924_v41  ;;  %5107 = vmatpush1.bf16.msra.mxu0 %v4926_v40  ;;  %v4899_v41 = vld [vmem:[#allocation6 + $0x478] sm:$0xff]  ;;  %v4896_v40 = vld [vmem:[#allocation6 + $0x460] sm:$0xff] }
0x1163   :  { %5067 = vmatprep.subr.bf16.mxu1 %v4933_v24  ;;  %5108 = vmatprep.subr.bf16.mxu0 %v4935_v22  ;;  %v4898_v24 = vld [vmem:[#allocation6 + $0x470] sm:$0xff]  ;;  %v4905_v22 = vld [vmem:[#allocation6 + $0x4a8] sm:$0xff] }
0x1166   :  { %5068 = vmatpush1.bf16.msra.mxu1 %v4932_v50  ;;  %5109 = vmatpush1.bf16.msra.mxu0 %v4934_v59  ;;  %v4907_v50 = vld [vmem:[#allocation6 + $0x4b8] sm:$0xff]  ;;  %v4904_v59 = vld [vmem:[#allocation6 + $0x4a0] sm:$0xff] }
0x1167   :  { %5069 = vmatprep.subr.bf16.mxu1 %v4941_v26  ;;  %5110 = vmatprep.subr.bf16.mxu0 %v4943_v62  ;;  %v4906_v26 = vld [vmem:[#allocation6 + $0x4b0] sm:$0xff]  ;;  %v4913_v62 = vld [vmem:[#allocation6 + $0x4e8] sm:$0xff] }
0x116a   :  { %5070 = vmatpush1.bf16.msra.mxu1 %v4940_v21  ;;  %5111 = vmatpush1.bf16.msra.mxu0 %v4942_v0  ;;  %v4915_v21 = vld [vmem:[#allocation6 + $0x4f8] sm:$0xff]  ;;  %v4912_v0 = vld [vmem:[#allocation6 + $0x4e0] sm:$0xff] }
0x116b   :  { %5071 = vmatprep.subr.bf16.mxu1 %v4949_v11  ;;  %5112 = vmatprep.subr.bf16.mxu0 %v4951_v14  ;;  %v4914_v11 = vld [vmem:[#allocation6 + $0x4f0] sm:$0xff]  ;;  %v4921_v14 = vld [vmem:[#allocation6 + $0x528] sm:$0xff] }
0x116e   :  { %5072 = vmatpush1.bf16.msra.mxu1 %v4948_v29  ;;  %5113 = vmatpush1.bf16.msra.mxu0 %v4950_v35  ;;  %v4923_v29 = vld [vmem:[#allocation6 + $0x538] sm:$0xff]  ;;  %v4922_v35 = vld [vmem:[#allocation6 + $0x530] sm:$0xff] }
0x116f   :  { %5073 = vmatprep.subr.bf16.mxu1 %v4957_v12  ;;  %5114 = vmatprep.subr.bf16.mxu0 %v4959_v20  ;;  %v4929_v12 = vld [vmem:[#allocation6 + $0x568] sm:$0xff]  ;;  %v4931_v20 = vld [vmem:[#allocation6 + $0x578] sm:$0xff] }
0x1172   :  { %5074 = vmatpush1.bf16.msra.mxu1 %v4956_v15  ;;  %5115 = vmatpush1.bf16.msra.mxu0 %v4958_v46  ;;  %v4928_v15 = vld [vmem:[#allocation6 + $0x560] sm:$0xff]  ;;  %v4930_v46 = vld [vmem:[#allocation6 + $0x570] sm:$0xff] }
0x1173   :  { %5075 = vmatprep.subr.bf16.mxu1 %v4965_v7  ;;  %5116 = vmatprep.subr.bf16.mxu0 %v4967_v47  ;;  %v4937_v7 = vld [vmem:[#allocation6 + $0x5a8] sm:$0xff]  ;;  %v4939_v47 = vld [vmem:[#allocation6 + $0x5b8] sm:$0xff] }
0x1176   :  { %5076 = vmatpush1.bf16.msra.mxu1 %v4964_v58  ;;  %5117 = vmatpush1.bf16.msra.mxu0 %v4966_v8  ;;  %v4936_v58 = vld [vmem:[#allocation6 + $0x5a0] sm:$0xff]  ;;  %v4938_v8 = vld [vmem:[#allocation6 + $0x5b0] sm:$0xff] }
0x1177   :  { %5077 = vmatprep.subr.bf16.mxu1 %v4973_v57  ;;  %5118 = vmatprep.subr.bf16.mxu0 %v4975_v13  ;;  %v4945_v57 = vld [vmem:[#allocation6 + $0x5e8] sm:$0xff]  ;;  %v4947_v13 = vld [vmem:[#allocation6 + $0x5f8] sm:$0xff] }
0x117a   :  { %5078 = vmatpush1.bf16.msra.mxu1 %v4972_v48  ;;  %5119 = vmatpush1.bf16.msra.mxu0 %v4974_v63  ;;  %v4944_v48 = vld [vmem:[#allocation6 + $0x5e0] sm:$0xff]  ;;  %v4946_v63 = vld [vmem:[#allocation6 + $0x5f0] sm:$0xff] }
0x117b   :  { %5079 = vmatprep.subr.bf16.mxu1 %v4981_v18  ;;  %5120 = vmatprep.subr.bf16.mxu0 %v4983_v42  ;;  %v4953_v18 = vld [vmem:[#allocation6 + $0x628] sm:$0xff]  ;;  %v4955_v42 = vld [vmem:[#allocation6 + $0x638] sm:$0xff] }
0x117e   :  { %5080 = vmatpush1.bf16.msra.mxu1 %v4980_v1  ;;  %5121 = vmatpush1.bf16.msra.mxu0 %v4982_v56  ;;  %v4952_v1 = vld [vmem:[#allocation6 + $0x620] sm:$0xff]  ;;  %v4954_v56 = vld [vmem:[#allocation6 + $0x630] sm:$0xff] }
0x117f   :  { %5081 = vmatprep.subr.bf16.mxu1 %v4989_v52  ;;  %5122 = vmatprep.subr.bf16.mxu0 %v4991_v49  ;;  %v4961_v52 = vld [vmem:[#allocation6 + $0x668] sm:$0xff]  ;;  %v4963_v49 = vld [vmem:[#allocation6 + $0x678] sm:$0xff] }
0x1182   :  { %5082 = vmatpush1.bf16.msra.mxu1 %v4988_v44  ;;  %5123 = vmatpush1.bf16.msra.mxu0 %v4990_v37  ;;  %v4960_v44 = vld [vmem:[#allocation6 + $0x660] sm:$0xff]  ;;  %v4962_v37 = vld [vmem:[#allocation6 + $0x670] sm:$0xff] }
0x1183   :  { %5083 = vmatprep.subr.bf16.mxu1 %v4997_v53  ;;  %5124 = vmatprep.subr.bf16.mxu0 %v4999_v36  ;;  %v4969_v53 = vld [vmem:[#allocation6 + $0x6a8] sm:$0xff]  ;;  %v4971_v36 = vld [vmem:[#allocation6 + $0x6b8] sm:$0xff] }
0x1186   :  { %5084 = vmatpush1.bf16.msra.mxu1 %v4996_v17  ;;  %5125 = vmatpush1.bf16.msra.mxu0 %v4998_v61  ;;  %v4968_v17 = vld [vmem:[#allocation6 + $0x6a0] sm:$0xff]  ;;  %v4970_v61 = vld [vmem:[#allocation6 + $0x6b0] sm:$0xff] }
0x1187   :  { %5085 = vmatprep.subr.bf16.mxu1 %v5005_v31  ;;  %5126 = vmatprep.subr.bf16.mxu0 %v5007_v27  ;;  %v4977_v31 = vld [vmem:[#allocation6 + $0x6e8] sm:$0xff]  ;;  %v4979_v27 = vld [vmem:[#allocation6 + $0x6f8] sm:$0xff] }
0x118a   :  { %5086 = vmatpush1.bf16.msra.mxu1 %v5004_v30  ;;  %5127 = vmatpush1.bf16.msra.mxu0 %v5006_v34  ;;  %v4976_v30 = vld [vmem:[#allocation6 + $0x6e0] sm:$0xff]  ;;  %v4978_v34 = vld [vmem:[#allocation6 + $0x6f0] sm:$0xff] }
0x118b   :  { %5137 = vmatprep.subr.bf16.mxu1 %v4889_v25  ;;  %5178 = vmatprep.subr.bf16.mxu0 %v4891_v19  ;;  %v4985_v25 = vld [vmem:[#allocation6 + $0x728] sm:$0xff]  ;;  %v4987_v19 = vld [vmem:[#allocation6 + $0x738] sm:$0xff] }
0x118d   :  { %5088 = vmatmul.mubr.bf16.vlgmr.msra.gmra.mrb[100].mxu1 %v8356_v38  ;;  %5129 = vmatmul.mubr.bf16.vlgmr.msra.gmra.mrb[100].mxu0 %v8356_v38 }
0x118e   :  { %5138 = vmatpush1.bf16.msra.mxu1 %v4888_v28  ;;  %5179 = vmatpush1.bf16.msra.mxu0 %v4890_v55  ;;  %v4984_v28 = vld [vmem:[#allocation6 + $0x720] sm:$0xff]  ;;  %v4986_v55 = vld [vmem:[#allocation6 + $0x730] sm:$0xff] }
0x118f   :  { %5139 = vmatprep.subr.bf16.mxu1 %v4897_v2  ;;  %5180 = vmatprep.subr.bf16.mxu0 %v4899_v41  ;;  %v4993_v2 = vld [vmem:[#allocation6 + $0x768] sm:$0xff]  ;;  %v4995_v41 = vld [vmem:[#allocation6 + $0x778] sm:$0xff] }
0x1190   :  { %5169 = vmatprep.mubr.bf16.mxu1 %v8348_v45  ;;  %5210 = vmatprep.mubr.bf16.mxu0 %v8348_v45  ;;  %v4920_v45 = vld [vmem:[#allocation6 + $0x520] sm:$0xff] }
0x1192   :  { %5140 = vmatpush1.bf16.msra.mxu1 %v4896_v40  ;;  %5181 = vmatpush1.bf16.msra.mxu0 %v4898_v24  ;;  %v4992_v40 = vld [vmem:[#allocation6 + $0x760] sm:$0xff]  ;;  %v4994_v24 = vld [vmem:[#allocation6 + $0x770] sm:$0xff] }
0x1193   :  { %5141 = vmatprep.subr.bf16.mxu1 %v4905_v22  ;;  %5182 = vmatprep.subr.bf16.mxu0 %v4907_v50  ;;  %v5001_v22 = vld [vmem:[#allocation6 + $0x7a8] sm:$0xff]  ;;  %v5003_v50 = vld [vmem:[#allocation6 + $0x7b8] sm:$0xff] }
0x1196   :  { %5142 = vmatpush1.bf16.msra.mxu1 %v4904_v59  ;;  %5183 = vmatpush1.bf16.msra.mxu0 %v4906_v26  ;;  %v5000_v59 = vld [vmem:[#allocation6 + $0x7a0] sm:$0xff]  ;;  %v5002_v26 = vld [vmem:[#allocation6 + $0x7b0] sm:$0xff] }
0x1197   :  { %5143 = vmatprep.subr.bf16.mxu1 %v4913_v62  ;;  %5184 = vmatprep.subr.bf16.mxu0 %v4915_v21  ;;  %v5009_v62 = vld [vmem:[#allocation6 + $0x7e8] sm:$0xff]  ;;  %v5011_v21 = vld [vmem:[#allocation6 + $0x7f8] sm:$0xff] }
0x119a   :  { %5144 = vmatpush1.bf16.msra.mxu1 %v4912_v0  ;;  %5185 = vmatpush1.bf16.msra.mxu0 %v4914_v11  ;;  %v5008_v0 = vld [vmem:[#allocation6 + $0x7e0] sm:$0xff]  ;;  %v5010_v11 = vld [vmem:[#allocation6 + $0x7f0] sm:$0xff] }
0x119b   :  { %5145 = vmatprep.subr.bf16.mxu1 %v4921_v14  ;;  %5186 = vmatprep.subr.bf16.mxu0 %v4923_v29  ;;  %v5236_v14 = vld [vmem:[#allocation7 + $0x8] sm:$0xff] }
0x119c   :  { %v5268_v29 = vld [vmem:[#allocation7 + $0x108] sm:$0xff] }
0x119e   :  { %5146 = vmatpush1.bf16.msra.mxu1 %v4920_v45  ;;  %5187 = vmatpush1.bf16.msra.mxu0 %v4922_v35  ;;  %v5235_v45 = vld [vmem:[#allocation7] sm:$0xff] }
0x119f   :  { %5147 = vmatprep.subr.bf16.mxu1 %v4929_v12  ;;  %5188 = vmatprep.subr.bf16.mxu0 %v4931_v20  ;;  %v5267_v35 = vld [vmem:[#allocation7 + $0x100] sm:$0xff]  ;;  %v5238_v12 = vld [vmem:[#allocation7 + $0x18] sm:$0xff] }
0x11a0   :  { %v5270_v20 = vld [vmem:[#allocation7 + $0x118] sm:$0xff] }
0x11a2   :  { %5148 = vmatpush1.bf16.msra.mxu1 %v4928_v15  ;;  %5189 = vmatpush1.bf16.msra.mxu0 %v4930_v46  ;;  %v5237_v15 = vld [vmem:[#allocation7 + $0x10] sm:$0xff] }
0x11a3   :  { %5149 = vmatprep.subr.bf16.mxu1 %v4937_v7  ;;  %5190 = vmatprep.subr.bf16.mxu0 %v4939_v47  ;;  %v5269_v46 = vld [vmem:[#allocation7 + $0x110] sm:$0xff]  ;;  %v5240_v7 = vld [vmem:[#allocation7 + $0x28] sm:$0xff] }
0x11a4   :  { %v5272_v47 = vld [vmem:[#allocation7 + $0x128] sm:$0xff] }
0x11a6   :  { %5150 = vmatpush1.bf16.msra.mxu1 %v4936_v58  ;;  %5191 = vmatpush1.bf16.msra.mxu0 %v4938_v8  ;;  %v5239_v58 = vld [vmem:[#allocation7 + $0x20] sm:$0xff] }
0x11a7   :  { %5151 = vmatprep.subr.bf16.mxu1 %v4945_v57  ;;  %5192 = vmatprep.subr.bf16.mxu0 %v4947_v13  ;;  %v5271_v8 = vld [vmem:[#allocation7 + $0x120] sm:$0xff]  ;;  %v5242_v57 = vld [vmem:[#allocation7 + $0x38] sm:$0xff] }
0x11a8   :  { %v5274_v13 = vld [vmem:[#allocation7 + $0x138] sm:$0xff] }
0x11aa   :  { %5152 = vmatpush1.bf16.msra.mxu1 %v4944_v48  ;;  %5193 = vmatpush1.bf16.msra.mxu0 %v4946_v63  ;;  %v5273_v48 = vld [vmem:[#allocation7 + $0x130] sm:$0xff]  ;;  %v5244_v63 = vld [vmem:[#allocation7 + $0x48] sm:$0xff] }
0x11ab   :  { %5153 = vmatprep.subr.bf16.mxu1 %v4953_v18  ;;  %5194 = vmatprep.subr.bf16.mxu0 %v4955_v42  ;;  %v5276_v18 = vld [vmem:[#allocation7 + $0x148] sm:$0xff]  ;;  %v5243_v42 = vld [vmem:[#allocation7 + $0x40] sm:$0xff] }
0x11ae   :  { %5154 = vmatpush1.bf16.msra.mxu1 %v4952_v1  ;;  %5195 = vmatpush1.bf16.msra.mxu0 %v4954_v56  ;;  %v5275_v1 = vld [vmem:[#allocation7 + $0x140] sm:$0xff] }
0x11af   :  { %5155 = vmatprep.subr.bf16.mxu1 %v4961_v52  ;;  %5196 = vmatprep.subr.bf16.mxu0 %v4963_v49  ;;  %v8367_v56 = vld [vmem:[%s8474_s6 + $0x1] ss:$4 sm:$0xff] }
0x11b0   :  { %v5246_v52 = vld [vmem:[#allocation7 + $0x58] sm:$0xff] }
0x11b1   :  { %v5278_v49 = vld [vmem:[#allocation7 + $0x158] sm:$0xff] }
0x11b2   :  { %5156 = vmatpush1.bf16.msra.mxu1 %v4960_v44  ;;  %5197 = vmatpush1.bf16.msra.mxu0 %v4962_v37  ;;  %v4676_v44 = vrot.slane %v8367_v56, %v9529_v33  ;;  %v4684_v37 = vrot.slane %v8367_v56, %v9534_v32 }
0x11b3   :  { %5157 = vmatprep.subr.bf16.mxu1 %v4969_v53  ;;  %5198 = vmatprep.subr.bf16.mxu0 %v4971_v36  ;;  %v5245_v53 = vld [vmem:[#allocation7 + $0x50] sm:$0xff] }
0x11b4   :  { %v5277_v36 = vld [vmem:[#allocation7 + $0x150] sm:$0xff] }
0x11b6   :  { %5158 = vmatpush1.bf16.msra.mxu1 %v4968_v17  ;;  %5199 = vmatpush1.bf16.msra.mxu0 %v4970_v61 }
0x11b7   :  { %5159 = vmatprep.subr.bf16.mxu1 %v4977_v31  ;;  %5200 = vmatprep.subr.bf16.mxu0 %v4979_v27  ;;  %v5248_v31 = vld [vmem:[#allocation7 + $0x68] sm:$0xff] }
0x11b8   :  { %v5280_v27 = vld [vmem:[#allocation7 + $0x168] sm:$0xff] }
0x11ba   :  { %5160 = vmatpush1.bf16.msra.mxu1 %v4976_v30  ;;  %5201 = vmatpush1.bf16.msra.mxu0 %v4978_v34 }
0x11bb   :  { %5161 = vmatprep.subr.bf16.mxu1 %v4985_v25  ;;  %5202 = vmatprep.subr.bf16.mxu0 %v4987_v19 }
0x11be   :  { %5162 = vmatpush1.bf16.msra.mxu1 %v4984_v28  ;;  %5203 = vmatpush1.bf16.msra.mxu0 %v4986_v55 }
0x11bf   :  { %5163 = vmatprep.subr.bf16.mxu1 %v4993_v2  ;;  %5204 = vmatprep.subr.bf16.mxu0 %v4995_v41 }
0x11c2   :  { %5164 = vmatpush1.bf16.msra.mxu1 %v4992_v40  ;;  %5205 = vmatpush1.bf16.msra.mxu0 %v4994_v24  ;;  %v5247_v40 = vld [vmem:[#allocation7 + $0x60] sm:$0xff] }
0x11c3   :  { %5165 = vmatprep.subr.bf16.mxu1 %v5001_v22  ;;  %5206 = vmatprep.subr.bf16.mxu0 %v5003_v50  ;;  %v5279_v24 = vld [vmem:[#allocation7 + $0x160] sm:$0xff] }
0x11c6   :  { %5166 = vmatpush1.bf16.msra.mxu1 %v5000_v59  ;;  %5207 = vmatpush1.bf16.msra.mxu0 %v5002_v26  ;;  %v5250_v59 = vld [vmem:[#allocation7 + $0x78] sm:$0xff] }
0x11c7   :  { %5167 = vmatprep.subr.bf16.mxu1 %v5009_v62  ;;  %5208 = vmatprep.subr.bf16.mxu0 %v5011_v21  ;;  %v5282_v26 = vld [vmem:[#allocation7 + $0x178] sm:$0xff] }
0x11ca   :  { %5168 = vmatpush1.bf16.msra.mxu1 %v5008_v0  ;;  %5209 = vmatpush1.bf16.msra.mxu0 %v5010_v11  ;;  %v5249_v0 = vld [vmem:[#allocation7 + $0x70] sm:$0xff] }
0x11cb   :  { %5371 = vmatprep.subr.bf16.mxu1 %v5236_v14  ;;  %5412 = vmatprep.subr.bf16.mxu0 %v5268_v29  ;;  %v5281_v11 = vld [vmem:[#allocation7 + $0x170] sm:$0xff]  ;;  %v5252_v14 = vld [vmem:[#allocation7 + $0x88] sm:$0xff] }
0x11cc   :  { %v5284_v29 = vld [vmem:[#allocation7 + $0x188] sm:$0xff] }
0x11cd   :  { %5170 = vmatmul.mubr.bf16.vlgmr.msra.gmra.mrb[104].mxu1 %v8356_v38  ;;  %5211 = vmatmul.mubr.bf16.vlgmr.msra.gmra.mrb[104].mxu0 %v8356_v38  ;;  %v5241_v38 = vld [vmem:[#allocation7 + $0x30] sm:$0xff] }
0x11ce   :  { %5372 = vmatpush1.bf16.msra.mxu1 %v5235_v45  ;;  %5413 = vmatpush1.bf16.msra.mxu0 %v5267_v35  ;;  %v5251_v45 = vld [vmem:[#allocation7 + $0x80] sm:$0xff] }
0x11cf   :  { %5373 = vmatprep.subr.bf16.mxu1 %v5238_v12  ;;  %5414 = vmatprep.subr.bf16.mxu0 %v5270_v20  ;;  %v5283_v35 = vld [vmem:[#allocation7 + $0x180] sm:$0xff]  ;;  %v5254_v12 = vld [vmem:[#allocation7 + $0x98] sm:$0xff] }
0x11d0   :  { %v5286_v20 = vld [vmem:[#allocation7 + $0x198] sm:$0xff] }
0x11d2   :  { %5374 = vmatpush1.bf16.msra.mxu1 %v5237_v15  ;;  %5415 = vmatpush1.bf16.msra.mxu0 %v5269_v46  ;;  %v5253_v15 = vld [vmem:[#allocation7 + $0x90] sm:$0xff] }
0x11d3   :  { %5375 = vmatprep.subr.bf16.mxu1 %v5240_v7  ;;  %5416 = vmatprep.subr.bf16.mxu0 %v5272_v47  ;;  %v5285_v46 = vld [vmem:[#allocation7 + $0x190] sm:$0xff]  ;;  %v5256_v7 = vld [vmem:[#allocation7 + $0xa8] sm:$0xff] }
0x11d4   :  { %v5288_v47 = vld [vmem:[#allocation7 + $0x1a8] sm:$0xff] }
0x11d6   :  { %5376 = vmatpush1.bf16.msra.mxu1 %v5239_v58  ;;  %5417 = vmatpush1.bf16.msra.mxu0 %v5271_v8  ;;  %v5255_v58 = vld [vmem:[#allocation7 + $0xa0] sm:$0xff] }
0x11d7   :  { %5377 = vmatprep.subr.bf16.mxu1 %v5242_v57  ;;  %5418 = vmatprep.subr.bf16.mxu0 %v5274_v13  ;;  %v5287_v8 = vld [vmem:[#allocation7 + $0x1a0] sm:$0xff]  ;;  %v5258_v57 = vld [vmem:[#allocation7 + $0xb8] sm:$0xff] }
0x11d8   :  { %v5290_v13 = vld [vmem:[#allocation7 + $0x1b8] sm:$0xff] }
0x11da   :  { %5378 = vmatpush1.bf16.msra.mxu1 %v5241_v38  ;;  %5419 = vmatpush1.bf16.msra.mxu0 %v5273_v48  ;;  %v5257_v38 = vld [vmem:[#allocation7 + $0xb0] sm:$0xff] }
0x11db   :  { %5379 = vmatprep.subr.bf16.mxu1 %v5244_v63  ;;  %5420 = vmatprep.subr.bf16.mxu0 %v5276_v18  ;;  %v5289_v48 = vld [vmem:[#allocation7 + $0x1b0] sm:$0xff]  ;;  %v5260_v63 = vld [vmem:[#allocation7 + $0xc8] sm:$0xff] }
0x11dc   :  { %v5292_v18 = vld [vmem:[#allocation7 + $0x1c8] sm:$0xff] }
0x11de   :  { %5380 = vmatpush1.bf16.msra.mxu1 %v5243_v42  ;;  %5421 = vmatpush1.bf16.msra.mxu0 %v5275_v1  ;;  %v5259_v42 = vld [vmem:[#allocation7 + $0xc0] sm:$0xff] }
0x11df   :  { %5381 = vmatprep.subr.bf16.mxu1 %v5246_v52  ;;  %5422 = vmatprep.subr.bf16.mxu0 %v5278_v49  ;;  %v5291_v1 = vld [vmem:[#allocation7 + $0x1c0] sm:$0xff]  ;;  %v5262_v52 = vld [vmem:[#allocation7 + $0xd8] sm:$0xff] }
0x11e0   :  { %v8373_v17 = vpop.f32.mrb[92].mxu1  ;;  %v8375_v61 = vpop.f32.mrb[92].mxu0  ;;  %v5294_v49 = vld [vmem:[#allocation7 + $0x1d8] sm:$0xff] }
0x11e1   :  { %v4745_v30 = vpop.f32.mrb[93].mxu1  ;;  %v4786_v34 = vpop.f32.mrb[93].mxu0 }
0x11e2   :  { %v4746_v25 = vadd.f32 %v4745_v30, %v4676_v44  ;;  %v4787_v19 = vadd.f32 %v4786_v34, %v4684_v37  ;;  %v4747_v28 = vpop.f32.mrb[94].mxu1  ;;  %v4788_v55 = vpop.f32.mrb[94].mxu0  ;;  %5382 = vmatpush1.bf16.msra.mxu1 %v5245_v53  ;;  %5423 = vmatpush1.bf16.msra.mxu0 %v5277_v36  ;;  %v4672_v44 = vrot.slane %v8367_v56, %v9528_v23  ;;  %v5261_v53 = vld [vmem:[#allocation7 + $0xd0] sm:$0xff] }
0x11e3   :  { %v4748_v2 = vpop.f32.mrb[95].mxu1  ;;  %v4789_v41 = vpop.f32.mrb[95].mxu0  ;;  %5383 = vmatprep.subr.bf16.mxu1 %v5248_v31  ;;  %5424 = vmatprep.subr.bf16.mxu0 %v5280_v27  ;;  %v4680_v37 = vrot.slane %v8367_v56, %v9531_v4  ;;  %v5293_v36 = vld [vmem:[#allocation7 + $0x1d0] sm:$0xff]  ;;  %v5264_v31 = vld [vmem:[#allocation7 + $0xe8] sm:$0xff]  ;;  %v5266_v28 = vld [vmem:[#allocation7 + $0xf8] sm:$0xff] }
0x11e4   :  { %v4874_v22 = vmax.f32 %v4746_v25, 0.0  ;;  %v4876_v50 = vmax.f32 %v4787_v19, 0.0  ;;  %v5296_v27 = vld [vmem:[#allocation7 + $0x1e8] sm:$0xff]  ;;  %v4744_v30 = vadd.f32 %v8373_v17, %v4672_v44  ;;  %v5263_v25 = vld [vmem:[#allocation7 + $0xe0] sm:$0xff]  ;;  %v5298_v55 = vld [vmem:[#allocation7 + $0x1f8] sm:$0xff] }
0x11e5   :  { %v4785_v34 = vadd.f32 %v8375_v61, %v4680_v37  ;;  %v5295_v19 = vld [vmem:[#allocation7 + $0x1e0] sm:$0xff]  ;;  %v5344_v44 = vld [vmem:[#allocation7 + $0x368] sm:$0xff] }
0x11e6   :  { %v5228_v62 = vpack.c.bf16 %v4874_v22, %v4874_v22  ;;  %v5230_v21 = vpack.c.bf16 %v4876_v50, %v4876_v50  ;;  %5384 = vmatpush1.bf16.msra.mxu1 %v5247_v40  ;;  %5425 = vmatpush1.bf16.msra.mxu0 %v5279_v24  ;;  %v4873_v2 = vmax.f32 %v4744_v30, 0.0  ;;  %v5265_v40 = vld [vmem:[#allocation7 + $0xf0] sm:$0xff]  ;;  %v5300_v22 = vld [vmem:[#allocation7 + $0x208] sm:$0xff] }
0x11e7   :  { %5385 = vmatprep.subr.bf16.mxu1 %v5250_v59  ;;  %5426 = vmatprep.subr.bf16.mxu0 %v5282_v26  ;;  %v4875_v41 = vmax.f32 %v4785_v34, 0.0  ;;  %v5297_v24 = vld [vmem:[#allocation7 + $0x1f0] sm:$0xff]  ;;  %v5332_v50 = vld [vmem:[#allocation7 + $0x308] sm:$0xff]  ;;  %v5299_v59 = vld [vmem:[#allocation7 + $0x200] sm:$0xff] }
0x11e8   :  { %5403 = vmatprep.mubr.bf16.mxu1 %v5228_v62  ;;  %5444 = vmatprep.mubr.bf16.mxu0 %v5230_v21  ;;  %v5227_v17 = vpack.c.bf16 %v4873_v2, %v4873_v2  ;;  %v5331_v26 = vld [vmem:[#allocation7 + $0x300] sm:$0xff]  ;;  %v5302_v62 = vld [vmem:[#allocation7 + $0x218] sm:$0xff] }
0x11e9   :  { %v5229_v61 = vpack.c.bf16 %v4875_v41, %v4875_v41  ;;  %v5334_v21 = vld [vmem:[#allocation7 + $0x318] sm:$0xff] }
0x11ea   :  { %5386 = vmatpush1.bf16.msra.mxu1 %v5249_v0  ;;  %5427 = vmatpush1.bf16.msra.mxu0 %v5281_v11  ;;  %v5301_v0 = vld [vmem:[#allocation7 + $0x210] sm:$0xff]  ;;  %v5314_v41 = vld [vmem:[#allocation7 + $0x278] sm:$0xff] }
0x11eb   :  { %5387 = vmatprep.subr.bf16.mxu1 %v5252_v14  ;;  %5428 = vmatprep.subr.bf16.mxu0 %v5284_v29  ;;  %v5333_v11 = vld [vmem:[#allocation7 + $0x310] sm:$0xff]  ;;  %v5304_v14 = vld [vmem:[#allocation7 + $0x228] sm:$0xff] }
0x11ec   :  { %v5336_v29 = vld [vmem:[#allocation7 + $0x328] sm:$0xff] }
0x11ee   :  { %5388 = vmatpush1.bf16.msra.mxu1 %v5251_v45  ;;  %5429 = vmatpush1.bf16.msra.mxu0 %v5283_v35  ;;  %v5303_v45 = vld [vmem:[#allocation7 + $0x220] sm:$0xff] }
0x11ef   :  { %5389 = vmatprep.subr.bf16.mxu1 %v5254_v12  ;;  %5430 = vmatprep.subr.bf16.mxu0 %v5286_v20  ;;  %v5335_v35 = vld [vmem:[#allocation7 + $0x320] sm:$0xff]  ;;  %v5306_v12 = vld [vmem:[#allocation7 + $0x238] sm:$0xff] }
0x11f0   :  { %v5338_v20 = vld [vmem:[#allocation7 + $0x338] sm:$0xff] }
0x11f2   :  { %5390 = vmatpush1.bf16.msra.mxu1 %v5253_v15  ;;  %5431 = vmatpush1.bf16.msra.mxu0 %v5285_v46  ;;  %v5305_v15 = vld [vmem:[#allocation7 + $0x230] sm:$0xff] }
0x11f3   :  { %5391 = vmatprep.subr.bf16.mxu1 %v5256_v7  ;;  %5432 = vmatprep.subr.bf16.mxu0 %v5288_v47  ;;  %v5337_v46 = vld [vmem:[#allocation7 + $0x330] sm:$0xff]  ;;  %v5308_v7 = vld [vmem:[#allocation7 + $0x248] sm:$0xff] }
0x11f4   :  { %v5340_v47 = vld [vmem:[#allocation7 + $0x348] sm:$0xff] }
0x11f6   :  { %5392 = vmatpush1.bf16.msra.mxu1 %v5255_v58  ;;  %5433 = vmatpush1.bf16.msra.mxu0 %v5287_v8  ;;  %v5307_v58 = vld [vmem:[#allocation7 + $0x240] sm:$0xff] }
0x11f7   :  { %5393 = vmatprep.subr.bf16.mxu1 %v5258_v57  ;;  %5434 = vmatprep.subr.bf16.mxu0 %v5290_v13  ;;  %v5339_v8 = vld [vmem:[#allocation7 + $0x340] sm:$0xff]  ;;  %v5310_v57 = vld [vmem:[#allocation7 + $0x258] sm:$0xff] }
0x11f8   :  { %v5342_v13 = vld [vmem:[#allocation7 + $0x358] sm:$0xff] }
0x11fa   :  { %5394 = vmatpush1.bf16.msra.mxu1 %v5257_v38  ;;  %5435 = vmatpush1.bf16.msra.mxu0 %v5289_v48  ;;  %v4692_v38 = vrot.slane %v8367_v56, %v9536_v9  ;;  %v9538_v48 = vld [vmem:[#allocation172_spill] sm:$0xff] }
0x11fb   :  { %5395 = vmatprep.subr.bf16.mxu1 %v5260_v63  ;;  %5436 = vmatprep.subr.bf16.mxu0 %v5292_v18  ;;  %v4700_v63 = vrot.slane %v8367_v56, %v9538_v48  ;;  %v5309_v18 = vld [vmem:[#allocation7 + $0x250] sm:$0xff] }
0x11fe   :  { %5396 = vmatpush1.bf16.msra.mxu1 %v5259_v42  ;;  %5437 = vmatpush1.bf16.msra.mxu0 %v5291_v1  ;;  %v5341_v42 = vld [vmem:[#allocation7 + $0x350] sm:$0xff] }
0x11ff   :  { %5397 = vmatprep.subr.bf16.mxu1 %v5262_v52  ;;  %5438 = vmatprep.subr.bf16.mxu0 %v5294_v49  ;;  %v5312_v49 = vld [vmem:[#allocation7 + $0x268] sm:$0xff] }
0x1202   :  { %5398 = vmatpush1.bf16.msra.mxu1 %v5261_v53  ;;  %5439 = vmatpush1.bf16.msra.mxu0 %v5293_v36 }
0x1203   :  { %5399 = vmatprep.subr.bf16.mxu1 %v5264_v31  ;;  %5440 = vmatprep.subr.bf16.mxu0 %v5296_v27 }
0x1206   :  { %5400 = vmatpush1.bf16.msra.mxu1 %v5263_v25  ;;  %5441 = vmatpush1.bf16.msra.mxu0 %v5295_v19  ;;  %v5311_v19 = vld [vmem:[#allocation7 + $0x260] sm:$0xff] }
0x1207   :  { %5401 = vmatprep.subr.bf16.mxu1 %v5266_v28  ;;  %5442 = vmatprep.subr.bf16.mxu0 %v5298_v55  ;;  %v5343_v28 = vld [vmem:[#allocation7 + $0x360] sm:$0xff] }
0x120a   :  { %5402 = vmatpush1.bf16.msra.mxu1 %v5265_v40  ;;  %5443 = vmatpush1.bf16.msra.mxu0 %v5297_v24  ;;  %v5346_v40 = vld [vmem:[#allocation7 + $0x378] sm:$0xff] }
0x120b   :  { %5453 = vmatprep.subr.bf16.mxu1 %v5300_v22  ;;  %5494 = vmatprep.subr.bf16.mxu0 %v5332_v50  ;;  %v5313_v50 = vld [vmem:[#allocation7 + $0x270] sm:$0xff] }
0x120d   :  { %5404 = vmatmul.mubr.bf16.vlgmr.msra.gmra.mrb[108].mxu1 %v5227_v17  ;;  %5445 = vmatmul.mubr.bf16.vlgmr.msra.gmra.mrb[108].mxu0 %v5229_v61  ;;  %v5345_v17 = vld [vmem:[#allocation7 + $0x370] sm:$0xff]  ;;  %v5316_v61 = vld [vmem:[#allocation7 + $0x288] sm:$0xff] }
0x120e   :  { %5454 = vmatpush1.bf16.msra.mxu1 %v5299_v59  ;;  %5495 = vmatpush1.bf16.msra.mxu0 %v5331_v26  ;;  %v5348_v59 = vld [vmem:[#allocation7 + $0x388] sm:$0xff]  ;;  %v5315_v26 = vld [vmem:[#allocation7 + $0x280] sm:$0xff] }
0x120f   :  { %5455 = vmatprep.subr.bf16.mxu1 %v5302_v62  ;;  %5496 = vmatprep.subr.bf16.mxu0 %v5334_v21  ;;  %v5347_v62 = vld [vmem:[#allocation7 + $0x380] sm:$0xff]  ;;  %v5318_v21 = vld [vmem:[#allocation7 + $0x298] sm:$0xff] }
0x1212   :  { %5456 = vmatpush1.bf16.msra.mxu1 %v5301_v0  ;;  %5497 = vmatpush1.bf16.msra.mxu0 %v5333_v11  ;;  %v5350_v0 = vld [vmem:[#allocation7 + $0x398] sm:$0xff]  ;;  %v5317_v11 = vld [vmem:[#allocation7 + $0x290] sm:$0xff] }
0x1213   :  { %5457 = vmatprep.subr.bf16.mxu1 %v5304_v14  ;;  %5498 = vmatprep.subr.bf16.mxu0 %v5336_v29  ;;  %v5349_v14 = vld [vmem:[#allocation7 + $0x390] sm:$0xff]  ;;  %v5320_v29 = vld [vmem:[#allocation7 + $0x2a8] sm:$0xff] }
0x1216   :  { %5458 = vmatpush1.bf16.msra.mxu1 %v5303_v45  ;;  %5499 = vmatpush1.bf16.msra.mxu0 %v5335_v35  ;;  %v5352_v45 = vld [vmem:[#allocation7 + $0x3a8] sm:$0xff]  ;;  %v5319_v35 = vld [vmem:[#allocation7 + $0x2a0] sm:$0xff] }
0x1217   :  { %5459 = vmatprep.subr.bf16.mxu1 %v5306_v12  ;;  %5500 = vmatprep.subr.bf16.mxu0 %v5338_v20  ;;  %v5351_v12 = vld [vmem:[#allocation7 + $0x3a0] sm:$0xff]  ;;  %v5322_v20 = vld [vmem:[#allocation7 + $0x2b8] sm:$0xff] }
0x121a   :  { %5460 = vmatpush1.bf16.msra.mxu1 %v5305_v15  ;;  %5501 = vmatpush1.bf16.msra.mxu0 %v5337_v46  ;;  %v5354_v15 = vld [vmem:[#allocation7 + $0x3b8] sm:$0xff]  ;;  %v5321_v46 = vld [vmem:[#allocation7 + $0x2b0] sm:$0xff] }
0x121b   :  { %5461 = vmatprep.subr.bf16.mxu1 %v5308_v7  ;;  %5502 = vmatprep.subr.bf16.mxu0 %v5340_v47  ;;  %v5353_v7 = vld [vmem:[#allocation7 + $0x3b0] sm:$0xff]  ;;  %v5324_v47 = vld [vmem:[#allocation7 + $0x2c8] sm:$0xff] }
0x121e   :  { %5462 = vmatpush1.bf16.msra.mxu1 %v5307_v58  ;;  %5503 = vmatpush1.bf16.msra.mxu0 %v5339_v8  ;;  %v5356_v58 = vld [vmem:[#allocation7 + $0x3c8] sm:$0xff]  ;;  %v5323_v8 = vld [vmem:[#allocation7 + $0x2c0] sm:$0xff] }
0x121f   :  { %5463 = vmatprep.subr.bf16.mxu1 %v5310_v57  ;;  %5504 = vmatprep.subr.bf16.mxu0 %v5342_v13  ;;  %v5355_v57 = vld [vmem:[#allocation7 + $0x3c0] sm:$0xff]  ;;  %v5326_v13 = vld [vmem:[#allocation7 + $0x2d8] sm:$0xff] }
0x1220   :  { %v8387_v1 = vpop.f32.mrb[96].mxu1  ;;  %v8389_v52 = vpop.f32.mrb[96].mxu0 }
0x1221   :  { %v4827_v37 = vpop.f32.mrb[97].mxu1  ;;  %v4868_v53 = vpop.f32.mrb[97].mxu0 }
0x1222   :  { %v4828_v36 = vadd.f32 %v4827_v37, %v4692_v38  ;;  %v4869_v31 = vadd.f32 %v4868_v53, %v4700_v63  ;;  %v4829_v27 = vpop.f32.mrb[98].mxu1  ;;  %v4870_v30 = vpop.f32.mrb[98].mxu0  ;;  %5464 = vmatpush1.bf16.msra.mxu1 %v5309_v18  ;;  %5505 = vmatpush1.bf16.msra.mxu0 %v5341_v42  ;;  %v5358_v38 = vld [vmem:[#allocation7 + $0x3d8] sm:$0xff]  ;;  %v4688_v63 = vrot.slane %v8367_v56, %v9535_v43  ;;  %v5325_v42 = vld [vmem:[#allocation7 + $0x2d0] sm:$0xff]  ;;  %v5360_v37 = vld [vmem:[#allocation7 + $0x3e8] sm:$0xff] }
0x1223   :  { %v4830_v34 = vpop.f32.mrb[99].mxu1  ;;  %v4871_v25 = vpop.f32.mrb[99].mxu0  ;;  %5465 = vmatprep.subr.bf16.mxu1 %v5312_v49  ;;  %5506 = vmatprep.subr.bf16.mxu0 %v5344_v44  ;;  %v4696_v18 = vrot.slane %v8367_v56, %v9537_v10  ;;  %v5357_v49 = vld [vmem:[#allocation7 + $0x3d0] sm:$0xff]  ;;  %v5328_v44 = vld [vmem:[#allocation7 + $0x2e8] sm:$0xff]  ;;  %v5359_v27 = vld [vmem:[#allocation7 + $0x3e0] sm:$0xff] }
0x1224   :  { %v4878_v55 = vmax.f32 %v4828_v36, 0.0  ;;  %v4880_v2 = vmax.f32 %v4869_v31, 0.0  ;;  %v4826_v53 = vadd.f32 %v8387_v1, %v4688_v63  ;;  %v5327_v31 = vld [vmem:[#allocation7 + $0x2e0] sm:$0xff]  ;;  %v5330_v30 = vld [vmem:[#allocation7 + $0x2f8] sm:$0xff]  ;;  %v5589_v63 = vld [vmem:[#allocation7 + $0x568] sm:$0xff] }
0x1225   :  { %v4867_v36 = vadd.f32 %v8389_v52, %v4696_v18  ;;  %v5362_v34 = vld [vmem:[#allocation7 + $0x3f8] sm:$0xff] }
0x1226   :  { %v5232_v24 = vpack.c.bf16 %v4878_v55, %v4878_v55  ;;  %v5234_v22 = vpack.c.bf16 %v4880_v2, %v4880_v2  ;;  %5466 = vmatpush1.bf16.msra.mxu1 %v5311_v19  ;;  %5507 = vmatpush1.bf16.msra.mxu0 %v5343_v28  ;;  %v4877_v56 = vmax.f32 %v4826_v53, 0.0  ;;  %v5329_v19 = vld [vmem:[#allocation7 + $0x2f0] sm:$0xff]  ;;  %v5545_v55 = vld [vmem:[#allocation7 + $0x408] sm:$0xff] }
0x1227   :  { %5467 = vmatprep.subr.bf16.mxu1 %v5314_v41  ;;  %5508 = vmatprep.subr.bf16.mxu0 %v5346_v40  ;;  %v4879_v25 = vmax.f32 %v4867_v36, 0.0  ;;  %v5361_v28 = vld [vmem:[#allocation7 + $0x3f0] sm:$0xff]  ;;  %v5577_v2 = vld [vmem:[#allocation7 + $0x508] sm:$0xff]  ;;  %v5544_v41 = vld [vmem:[#allocation7 + $0x400] sm:$0xff] }
0x1228   :  { %5485 = vmatprep.mubr.bf16.mxu1 %v5232_v24  ;;  %5526 = vmatprep.mubr.bf16.mxu0 %v5234_v22  ;;  %v5231_v1 = vpack.c.bf16 %v4877_v56, %v4877_v56  ;;  %v5576_v40 = vld [vmem:[#allocation7 + $0x500] sm:$0xff]  ;;  %v5547_v24 = vld [vmem:[#allocation7 + $0x418] sm:$0xff] }
0x1229   :  { %v5233_v52 = vpack.c.bf16 %v4879_v25, %v4879_v25  ;;  %v5579_v22 = vld [vmem:[#allocation7 + $0x518] sm:$0xff] }
0x122a   :  { %5468 = vmatpush1.bf16.msra.mxu1 %v5313_v50  ;;  %5509 = vmatpush1.bf16.msra.mxu0 %v5345_v17  ;;  %v5546_v50 = vld [vmem:[#allocation7 + $0x410] sm:$0xff]  ;;  %v5559_v56 = vld [vmem:[#allocation7 + $0x478] sm:$0xff] }
0x122b   :  { %5469 = vmatprep.subr.bf16.mxu1 %v5316_v61  ;;  %5510 = vmatprep.subr.bf16.mxu0 %v5348_v59  ;;  %v5578_v17 = vld [vmem:[#allocation7 + $0x510] sm:$0xff]  ;;  %v5549_v61 = vld [vmem:[#allocation7 + $0x428] sm:$0xff]  ;;  %v5591_v25 = vld [vmem:[#allocation7 + $0x578] sm:$0xff] }
0x122c   :  { %v5581_v59 = vld [vmem:[#allocation7 + $0x528] sm:$0xff] }
0x122e   :  { %5470 = vmatpush1.bf16.msra.mxu1 %v5315_v26  ;;  %5511 = vmatpush1.bf16.msra.mxu0 %v5347_v62  ;;  %v5548_v26 = vld [vmem:[#allocation7 + $0x420] sm:$0xff] }
0x122f   :  { %5471 = vmatprep.subr.bf16.mxu1 %v5318_v21  ;;  %5512 = vmatprep.subr.bf16.mxu0 %v5350_v0  ;;  %v5580_v62 = vld [vmem:[#allocation7 + $0x520] sm:$0xff]  ;;  %v5551_v21 = vld [vmem:[#allocation7 + $0x438] sm:$0xff] }
0x1230   :  { %v5583_v0 = vld [vmem:[#allocation7 + $0x538] sm:$0xff] }
0x1232   :  { %5472 = vmatpush1.bf16.msra.mxu1 %v5317_v11  ;;  %5513 = vmatpush1.bf16.msra.mxu0 %v5349_v14  ;;  %v5550_v11 = vld [vmem:[#allocation7 + $0x430] sm:$0xff] }
0x1233   :  { %5473 = vmatprep.subr.bf16.mxu1 %v5320_v29  ;;  %5514 = vmatprep.subr.bf16.mxu0 %v5352_v45  ;;  %v5582_v14 = vld [vmem:[#allocation7 + $0x530] sm:$0xff]  ;;  %v5553_v29 = vld [vmem:[#allocation7 + $0x448] sm:$0xff] }
0x1234   :  { %v5585_v45 = vld [vmem:[#allocation7 + $0x548] sm:$0xff] }
0x1236   :  { %5474 = vmatpush1.bf16.msra.mxu1 %v5319_v35  ;;  %5515 = vmatpush1.bf16.msra.mxu0 %v5351_v12  ;;  %v5552_v35 = vld [vmem:[#allocation7 + $0x440] sm:$0xff] }
0x1237   :  { %5475 = vmatprep.subr.bf16.mxu1 %v5322_v20  ;;  %5516 = vmatprep.subr.bf16.mxu0 %v5354_v15  ;;  %v5584_v12 = vld [vmem:[#allocation7 + $0x540] sm:$0xff]  ;;  %v5555_v15 = vld [vmem:[#allocation7 + $0x458] sm:$0xff] }
0x1238   :  { %v8400_v20 = vld [vmem:[%s8474_s6 + $0x2] ss:$4 sm:$0xff]  ;;  %s6492_s6 = smov [#allocation14]  }
0x1239   :  { %s5930_s23 = sshll.u32 %s6492_s6, 4  ;;  %s5931_s23 = int_to_ptr.vmem [resolvable:$true] %s5930_s23 }
0x123a   :  { %5476 = vmatpush1.bf16.msra.mxu1 %v5321_v46  ;;  %5517 = vmatpush1.bf16.msra.mxu0 %v5353_v7  ;;  %v5587_v46 = vld [vmem:[#allocation7 + $0x558] sm:$0xff]  ;;  %v5022_v7 = vrot.slane %v8400_v20, %v9529_v33  ;;  %s6427_s24 = scalar_lea.vmem %s5931_s23, 512  ;;  %p6432_p3 = scmp.lt.s32.totalorder %s5931_s23, %s5931_s23 }
0x123b   :  { %5477 = vmatprep.subr.bf16.mxu1 %v5324_v47  ;;  %5518 = vmatprep.subr.bf16.mxu0 %v5356_v58  ;;  %v5030_v47 = vrot.slane %v8400_v20, %v9534_v32  ;;  %v5554_v58 = vld [vmem:[#allocation7 + $0x450] sm:$0xff]  ;;  %p6428_p2 = scmp.ne.s32.totalorder %s5931_s23, %s6427_s24  ;;  %p6433_p4 = scmp.lt.s32.totalorder %s6427_s24, %s6427_s24 }
0x123d   :  { %p6434_p5 = por %p6433_p4, %p6432_p3 }
0x123e   :  { %5478 = vmatpush1.bf16.msra.mxu1 %v5323_v8  ;;  %5519 = vmatpush1.bf16.msra.mxu0 %v5355_v57  ;;  %v5586_v8 = vld [vmem:[#allocation7 + $0x550] sm:$0xff] }
0x123f   :  { %5479 = vmatprep.subr.bf16.mxu1 %v5326_v13  ;;  %5520 = vmatprep.subr.bf16.mxu0 %v5358_v38  ;;  %v5557_v38 = vld [vmem:[#allocation7 + $0x468] sm:$0xff]  ;;  %p6435_p6 = pnand %p6434_p5, %p6428_p2 }
0x1242   :  { %5480 = vmatpush1.bf16.msra.mxu1 %v5325_v42  ;;  %5521 = vmatpush1.bf16.msra.mxu0 %v5357_v49 }
0x1243   :  { %5481 = vmatprep.subr.bf16.mxu1 %v5328_v44  ;;  %5522 = vmatprep.subr.bf16.mxu0 %v5360_v37 }
0x1246   :  { %5482 = vmatpush1.bf16.msra.mxu1 %v5327_v31  ;;  %5523 = vmatpush1.bf16.msra.mxu0 %v5359_v27  ;;  %v5556_v31 = vld [vmem:[#allocation7 + $0x460] sm:$0xff] }
0x1247   :  { %5483 = vmatprep.subr.bf16.mxu1 %v5330_v30  ;;  %5524 = vmatprep.subr.bf16.mxu0 %v5362_v34  ;;  %v5588_v27 = vld [vmem:[#allocation7 + $0x560] sm:$0xff] }
0x124a   :  { %5484 = vmatpush1.bf16.msra.mxu1 %v5329_v19  ;;  %5525 = vmatpush1.bf16.msra.mxu0 %v5361_v28 }
0x124b   :  { %5680 = vmatprep.subr.bf16.mxu1 %v5545_v55  ;;  %5721 = vmatprep.subr.bf16.mxu0 %v5577_v2  ;;  %v5558_v55 = vld [vmem:[#allocation7 + $0x470] sm:$0xff] }
0x124c   :  { %v5590_v2 = vld [vmem:[#allocation7 + $0x570] sm:$0xff] }
0x124d   :  { %5486 = vmatmul.mubr.bf16.vlgmr.msra.gmra.mrb[112].mxu1 %v5231_v1  ;;  %5527 = vmatmul.mubr.bf16.vlgmr.msra.gmra.mrb[112].mxu0 %v5233_v52  ;;  %v5561_v1 = vld [vmem:[#allocation7 + $0x488] sm:$0xff] }
0x124e   :  { %5681 = vmatpush1.bf16.msra.mxu1 %v5544_v41  ;;  %5722 = vmatpush1.bf16.msra.mxu0 %v5576_v40  ;;  %v5593_v52 = vld [vmem:[#allocation7 + $0x588] sm:$0xff]  ;;  %v5560_v41 = vld [vmem:[#allocation7 + $0x480] sm:$0xff] }
0x124f   :  { %5682 = vmatprep.subr.bf16.mxu1 %v5547_v24  ;;  %5723 = vmatprep.subr.bf16.mxu0 %v5579_v22  ;;  %v5592_v40 = vld [vmem:[#allocation7 + $0x580] sm:$0xff]  ;;  %v5563_v24 = vld [vmem:[#allocation7 + $0x498] sm:$0xff] }
0x1250   :  { %v5595_v22 = vld [vmem:[#allocation7 + $0x598] sm:$0xff] }
0x1252   :  { %5683 = vmatpush1.bf16.msra.mxu1 %v5546_v50  ;;  %5724 = vmatpush1.bf16.msra.mxu0 %v5578_v17  ;;  %v5562_v50 = vld [vmem:[#allocation7 + $0x490] sm:$0xff] }
0x1253   :  { %5684 = vmatprep.subr.bf16.mxu1 %v5549_v61  ;;  %5725 = vmatprep.subr.bf16.mxu0 %v5581_v59  ;;  %v5594_v17 = vld [vmem:[#allocation7 + $0x590] sm:$0xff]  ;;  %v5565_v61 = vld [vmem:[#allocation7 + $0x4a8] sm:$0xff] }
0x1254   :  { %v5597_v59 = vld [vmem:[#allocation7 + $0x5a8] sm:$0xff] }
0x1256   :  { %5685 = vmatpush1.bf16.msra.mxu1 %v5548_v26  ;;  %5726 = vmatpush1.bf16.msra.mxu0 %v5580_v62  ;;  %v5564_v26 = vld [vmem:[#allocation7 + $0x4a0] sm:$0xff] }
0x1257   :  { %5686 = vmatprep.subr.bf16.mxu1 %v5551_v21  ;;  %5727 = vmatprep.subr.bf16.mxu0 %v5583_v0  ;;  %v5596_v62 = vld [vmem:[#allocation7 + $0x5a0] sm:$0xff]  ;;  %v5567_v21 = vld [vmem:[#allocation7 + $0x4b8] sm:$0xff] }
0x1258   :  { %v5599_v0 = vld [vmem:[#allocation7 + $0x5b8] sm:$0xff] }
0x125a   :  { %5687 = vmatpush1.bf16.msra.mxu1 %v5550_v11  ;;  %5728 = vmatpush1.bf16.msra.mxu0 %v5582_v14  ;;  %v5566_v11 = vld [vmem:[#allocation7 + $0x4b0] sm:$0xff] }
0x125b   :  { %5688 = vmatprep.subr.bf16.mxu1 %v5553_v29  ;;  %5729 = vmatprep.subr.bf16.mxu0 %v5585_v45  ;;  %v5598_v14 = vld [vmem:[#allocation7 + $0x5b0] sm:$0xff]  ;;  %v5569_v29 = vld [vmem:[#allocation7 + $0x4c8] sm:$0xff] }
0x125c   :  { %v5601_v45 = vld [vmem:[#allocation7 + $0x5c8] sm:$0xff] }
0x125e   :  { %5689 = vmatpush1.bf16.msra.mxu1 %v5552_v35  ;;  %5730 = vmatpush1.bf16.msra.mxu0 %v5584_v12  ;;  %v5568_v35 = vld [vmem:[#allocation7 + $0x4c0] sm:$0xff] }
0x125f   :  { %5690 = vmatprep.subr.bf16.mxu1 %v5555_v15  ;;  %5731 = vmatprep.subr.bf16.mxu0 %v5587_v46  ;;  %v5600_v12 = vld [vmem:[#allocation7 + $0x5c0] sm:$0xff]  ;;  %v5571_v15 = vld [vmem:[#allocation7 + $0x4d8] sm:$0xff] }
0x1260   :  { %v8406_v57 = vpop.f32.mrb[100].mxu1  ;;  %v8408_v13 = vpop.f32.mrb[100].mxu0  ;;  %v5603_v46 = vld [vmem:[#allocation7 + $0x5d8] sm:$0xff] }
0x1261   :  { %v5091_v18 = vpop.f32.mrb[101].mxu1  ;;  %v5132_v42 = vpop.f32.mrb[101].mxu0 }
0x1262   :  { %v5092_v49 = vadd.f32 %v5091_v18, %v5022_v7  ;;  %v5133_v44 = vadd.f32 %v5132_v42, %v5030_v47  ;;  %v5093_v37 = vpop.f32.mrb[102].mxu1  ;;  %v5134_v53 = vpop.f32.mrb[102].mxu0  ;;  %5691 = vmatpush1.bf16.msra.mxu1 %v5554_v58  ;;  %5732 = vmatpush1.bf16.msra.mxu0 %v5586_v8  ;;  %v5018_v7 = vrot.slane %v8400_v20, %v9528_v23  ;;  %v5570_v58 = vld [vmem:[#allocation7 + $0x4d0] sm:$0xff] }
0x1263   :  { %v5094_v36 = vpop.f32.mrb[103].mxu1  ;;  %v5135_v32 = vpop.f32.mrb[103].mxu0  ;;  %5692 = vmatprep.subr.bf16.mxu1 %v5557_v38  ;;  %5733 = vmatprep.subr.bf16.mxu0 %v5589_v63  ;;  %v5026_v47 = vrot.slane %v8400_v20, %v9531_v4  ;;  %v5602_v8 = vld [vmem:[#allocation7 + $0x5d0] sm:$0xff]  ;;  %v5573_v38 = vld [vmem:[#allocation7 + $0x4e8] sm:$0xff]  ;;  %v5575_v37 = vld [vmem:[#allocation7 + $0x4f8] sm:$0xff] }
0x1264   :  { %v5220_v30 = vmax.f32 %v5092_v49, 0.0  ;;  %v5222_v34 = vmax.f32 %v5133_v44, 0.0  ;;  %v5605_v63 = vld [vmem:[#allocation7 + $0x5e8] sm:$0xff]  ;;  %v5090_v18 = vadd.f32 %v8406_v57, %v5018_v7  ;;  %v5572_v49 = vld [vmem:[#allocation7 + $0x4e0] sm:$0xff]  ;;  %v5607_v53 = vld [vmem:[#allocation7 + $0x5f8] sm:$0xff] }
0x1265   :  { %v5131_v42 = vadd.f32 %v8408_v13, %v5026_v47  ;;  %v5604_v44 = vld [vmem:[#allocation7 + $0x5e0] sm:$0xff]  ;;  %v5574_v32 = vld [vmem:[#allocation7 + $0x4f0] sm:$0xff] }
0x1266   :  { %v5536_v19 = vpack.c.bf16 %v5220_v30, %v5220_v30  ;;  %v5538_v28 = vpack.c.bf16 %v5222_v34, %v5222_v34  ;;  %5693 = vmatpush1.bf16.msra.mxu1 %v5556_v31  ;;  %5734 = vmatpush1.bf16.msra.mxu0 %v5588_v27  ;;  %v5219_v4 = vmax.f32 %v5090_v18, 0.0  ;;  %v5606_v31 = vld [vmem:[#allocation7 + $0x5f0] sm:$0xff]  ;;  %v5609_v27 = vld [vmem:[#allocation7 + $0x608] sm:$0xff]  ;;  %v5608_v34 = vld [vmem:[#allocation7 + $0x600] sm:$0xff] }
0x1267   :  { %5694 = vmatprep.subr.bf16.mxu1 %v5559_v56  ;;  %5735 = vmatprep.subr.bf16.mxu0 %v5591_v25  ;;  %v5221_v36 = vmax.f32 %v5131_v42, 0.0  ;;  %v5641_v30 = vld [vmem:[#allocation7 + $0x708] sm:$0xff]  ;;  %v5640_v56 = vld [vmem:[#allocation7 + $0x700] sm:$0xff]  ;;  %v5611_v25 = vld [vmem:[#allocation7 + $0x618] sm:$0xff] }
0x1268   :  { %5712 = vmatprep.mubr.bf16.mxu1 %v5536_v19  ;;  %5753 = vmatprep.mubr.bf16.mxu0 %v5538_v28  ;;  %v5535_v57 = vpack.c.bf16 %v5219_v4, %v5219_v4  ;;  %v5643_v19 = vld [vmem:[#allocation7 + $0x718] sm:$0xff]  ;;  %v5610_v28 = vld [vmem:[#allocation7 + $0x610] sm:$0xff]  ;;  %v5620_v18 = vld [vmem:[#allocation7 + $0x660] sm:$0xff] }
0x1269   :  { %v5537_v13 = vpack.c.bf16 %v5221_v36, %v5221_v36  ;;  %v5652_v42 = vld [vmem:[#allocation7 + $0x760] sm:$0xff] }
0x126a   :  { %5695 = vmatpush1.bf16.msra.mxu1 %v5558_v55  ;;  %5736 = vmatpush1.bf16.msra.mxu0 %v5590_v2  ;;  %v5642_v55 = vld [vmem:[#allocation7 + $0x710] sm:$0xff]  ;;  %v5613_v2 = vld [vmem:[#allocation7 + $0x628] sm:$0xff] }
0x126b   :  { %5696 = vmatprep.subr.bf16.mxu1 %v5561_v1  ;;  %5737 = vmatprep.subr.bf16.mxu0 %v5593_v52  ;;  %v5645_v1 = vld [vmem:[#allocation7 + $0x728] sm:$0xff]  ;;  %v5612_v52 = vld [vmem:[#allocation7 + $0x620] sm:$0xff] }
0x126e   :  { %5697 = vmatpush1.bf16.msra.mxu1 %v5560_v41  ;;  %5738 = vmatpush1.bf16.msra.mxu0 %v5592_v40  ;;  %v5644_v41 = vld [vmem:[#allocation7 + $0x720] sm:$0xff]  ;;  %v5615_v40 = vld [vmem:[#allocation7 + $0x638] sm:$0xff] }
0x126f   :  { %5698 = vmatprep.subr.bf16.mxu1 %v5563_v24  ;;  %5739 = vmatprep.subr.bf16.mxu0 %v5595_v22  ;;  %v5647_v24 = vld [vmem:[#allocation7 + $0x738] sm:$0xff]  ;;  %v5614_v22 = vld [vmem:[#allocation7 + $0x630] sm:$0xff] }
0x1272   :  { %5699 = vmatpush1.bf16.msra.mxu1 %v5562_v50  ;;  %5740 = vmatpush1.bf16.msra.mxu0 %v5594_v17  ;;  %v5646_v50 = vld [vmem:[#allocation7 + $0x730] sm:$0xff]  ;;  %v5617_v17 = vld [vmem:[#allocation7 + $0x648] sm:$0xff] }
0x1273   :  { %5700 = vmatprep.subr.bf16.mxu1 %v5565_v61  ;;  %5741 = vmatprep.subr.bf16.mxu0 %v5597_v59  ;;  %v5649_v61 = vld [vmem:[#allocation7 + $0x748] sm:$0xff]  ;;  %v5616_v59 = vld [vmem:[#allocation7 + $0x640] sm:$0xff] }
0x1276   :  { %5701 = vmatpush1.bf16.msra.mxu1 %v5564_v26  ;;  %5742 = vmatpush1.bf16.msra.mxu0 %v5596_v62  ;;  %v5648_v26 = vld [vmem:[#allocation7 + $0x740] sm:$0xff]  ;;  %v5619_v62 = vld [vmem:[#allocation7 + $0x658] sm:$0xff] }
0x1277   :  { %5702 = vmatprep.subr.bf16.mxu1 %v5567_v21  ;;  %5743 = vmatprep.subr.bf16.mxu0 %v5599_v0  ;;  %v5651_v21 = vld [vmem:[#allocation7 + $0x758] sm:$0xff]  ;;  %v5038_v0 = vrot.slane %v8400_v20, %v9536_v9 }
0x127a   :  { %5703 = vmatpush1.bf16.msra.mxu1 %v5566_v11  ;;  %5744 = vmatpush1.bf16.msra.mxu0 %v5598_v14  ;;  %v5046_v11 = vrot.slane %v8400_v20, %v9538_v48  ;;  %v5618_v14 = vld [vmem:[#allocation7 + $0x650] sm:$0xff] }
0x127b   :  { %5704 = vmatprep.subr.bf16.mxu1 %v5569_v29  ;;  %5745 = vmatprep.subr.bf16.mxu0 %v5601_v45  ;;  %v5650_v29 = vld [vmem:[#allocation7 + $0x750] sm:$0xff] }
0x127e   :  { %5705 = vmatpush1.bf16.msra.mxu1 %v5568_v35  ;;  %5746 = vmatpush1.bf16.msra.mxu0 %v5600_v12  ;;  %v5621_v12 = vld [vmem:[#allocation7 + $0x668] sm:$0xff] }
0x127f   :  { %5706 = vmatprep.subr.bf16.mxu1 %v5571_v15  ;;  %5747 = vmatprep.subr.bf16.mxu0 %v5603_v46  ;;  %v5653_v15 = vld [vmem:[#allocation7 + $0x768] sm:$0xff] }
0x1282   :  { %5707 = vmatpush1.bf16.msra.mxu1 %v5570_v58  ;;  %5748 = vmatpush1.bf16.msra.mxu0 %v5602_v8 }
0x1283   :  { %5708 = vmatprep.subr.bf16.mxu1 %v5573_v38  ;;  %5749 = vmatprep.subr.bf16.mxu0 %v5605_v63 }
0x1286   :  { %5709 = vmatpush1.bf16.msra.mxu1 %v5572_v49  ;;  %5750 = vmatpush1.bf16.msra.mxu0 %v5604_v44 }
0x1287   :  { %5710 = vmatprep.subr.bf16.mxu1 %v5575_v37  ;;  %5751 = vmatprep.subr.bf16.mxu0 %v5607_v53  ;;  %v5623_v37 = vld [vmem:[#allocation7 + $0x678] sm:$0xff] }
0x1288   :  { %v5655_v53 = vld [vmem:[#allocation7 + $0x778] sm:$0xff] }
0x128a   :  { %5711 = vmatpush1.bf16.msra.mxu1 %v5574_v32  ;;  %5752 = vmatpush1.bf16.msra.mxu0 %v5606_v31  ;;  %v5622_v32 = vld [vmem:[#allocation7 + $0x670] sm:$0xff] }
0x128b   :  { %5762 = vmatprep.subr.bf16.mxu1 %v5609_v27  ;;  %5803 = vmatprep.subr.bf16.mxu0 %v5641_v30  ;;  %v5654_v31 = vld [vmem:[#allocation7 + $0x770] sm:$0xff]  ;;  %v5625_v27 = vld [vmem:[#allocation7 + $0x688] sm:$0xff] }
0x128c   :  { %v5657_v30 = vld [vmem:[#allocation7 + $0x788] sm:$0xff] }
0x128d   :  { %5713 = vmatmul.mubr.bf16.vlgmr.msra.gmra.mrb[116].mxu1 %v5535_v57  ;;  %5754 = vmatmul.mubr.bf16.vlgmr.msra.gmra.mrb[116].mxu0 %v5537_v13  ;;  %v5624_v57 = vld [vmem:[#allocation7 + $0x680] sm:$0xff] }
0x128e   :  { %5763 = vmatpush1.bf16.msra.mxu1 %v5608_v34  ;;  %5804 = vmatpush1.bf16.msra.mxu0 %v5640_v56  ;;  %v5656_v13 = vld [vmem:[#allocation7 + $0x780] sm:$0xff]  ;;  %v5627_v34 = vld [vmem:[#allocation7 + $0x698] sm:$0xff] }
0x128f   :  { %5764 = vmatprep.subr.bf16.mxu1 %v5611_v25  ;;  %5805 = vmatprep.subr.bf16.mxu0 %v5643_v19  ;;  %v5659_v56 = vld [vmem:[#allocation7 + $0x798] sm:$0xff]  ;;  %v5626_v25 = vld [vmem:[#allocation7 + $0x690] sm:$0xff] }
0x1290   :  { %v5658_v19 = vld [vmem:[#allocation7 + $0x790] sm:$0xff] }
0x1292   :  { %5765 = vmatpush1.bf16.msra.mxu1 %v5610_v28  ;;  %5806 = vmatpush1.bf16.msra.mxu0 %v5642_v55  ;;  %v5629_v28 = vld [vmem:[#allocation7 + $0x6a8] sm:$0xff] }
0x1293   :  { %5766 = vmatprep.subr.bf16.mxu1 %v5613_v2  ;;  %5807 = vmatprep.subr.bf16.mxu0 %v5645_v1  ;;  %v5661_v55 = vld [vmem:[#allocation7 + $0x7a8] sm:$0xff]  ;;  %v5628_v2 = vld [vmem:[#allocation7 + $0x6a0] sm:$0xff] }
0x1294   :  { %v5660_v1 = vld [vmem:[#allocation7 + $0x7a0] sm:$0xff] }
0x1296   :  { %5767 = vmatpush1.bf16.msra.mxu1 %v5612_v52  ;;  %5808 = vmatpush1.bf16.msra.mxu0 %v5644_v41  ;;  %v5631_v52 = vld [vmem:[#allocation7 + $0x6b8] sm:$0xff] }
0x1297   :  { %5768 = vmatprep.subr.bf16.mxu1 %v5615_v40  ;;  %5809 = vmatprep.subr.bf16.mxu0 %v5647_v24  ;;  %v5663_v41 = vld [vmem:[#allocation7 + $0x7b8] sm:$0xff]  ;;  %v5630_v40 = vld [vmem:[#allocation7 + $0x6b0] sm:$0xff] }
0x1298   :  { %v5662_v24 = vld [vmem:[#allocation7 + $0x7b0] sm:$0xff] }
0x129a   :  { %5769 = vmatpush1.bf16.msra.mxu1 %v5614_v22  ;;  %5810 = vmatpush1.bf16.msra.mxu0 %v5646_v50  ;;  %v5633_v22 = vld [vmem:[#allocation7 + $0x6c8] sm:$0xff] }
0x129b   :  { %5770 = vmatprep.subr.bf16.mxu1 %v5617_v17  ;;  %5811 = vmatprep.subr.bf16.mxu0 %v5649_v61  ;;  %v5665_v50 = vld [vmem:[#allocation7 + $0x7c8] sm:$0xff]  ;;  %v5632_v17 = vld [vmem:[#allocation7 + $0x6c0] sm:$0xff] }
0x129c   :  { %v5664_v61 = vld [vmem:[#allocation7 + $0x7c0] sm:$0xff] }
0x129e   :  { %5771 = vmatpush1.bf16.msra.mxu1 %v5616_v59  ;;  %5812 = vmatpush1.bf16.msra.mxu0 %v5648_v26  ;;  %v5635_v59 = vld [vmem:[#allocation7 + $0x6d8] sm:$0xff] }
0x129f   :  { %5772 = vmatprep.subr.bf16.mxu1 %v5619_v62  ;;  %5813 = vmatprep.subr.bf16.mxu0 %v5651_v21  ;;  %v5667_v26 = vld [vmem:[#allocation7 + $0x7d8] sm:$0xff]  ;;  %v5034_v62 = vrot.slane %v8400_v20, %v9535_v43  ;;  %v5042_v21 = vrot.slane %v8400_v20, %v9537_v10 }
0x12a0   :  { %v8420_v45 = vpop.f32.mrb[104].mxu1  ;;  %v8422_v35 = vpop.f32.mrb[104].mxu0  ;;  %v5639_v43 = vld [vmem:[#allocation7 + $0x6f8] sm:$0xff] }
0x12a1   :  { %v5173_v46 = vpop.f32.mrb[105].mxu1  ;;  %v5214_v7 = vpop.f32.mrb[105].mxu0 }
0x12a2   :  { %v5174_v47 = vadd.f32 %v5173_v46, %v5038_v0  ;;  %v5215_v58 = vadd.f32 %v5214_v7, %v5046_v11  ;;  %v5175_v8 = vpop.f32.mrb[106].mxu1  ;;  %v5216_v38 = vpop.f32.mrb[106].mxu0  ;;  %5773 = vmatpush1.bf16.msra.mxu1 %v5618_v14  ;;  %5814 = vmatpush1.bf16.msra.mxu0 %v5650_v29  ;;  %v5634_v0 = vld [vmem:[#allocation7 + $0x6d0] sm:$0xff]  ;;  %v5637_v14 = vld [vmem:[#allocation7 + $0x6e8] sm:$0xff]  ;;  %v5636_v46 = vld [vmem:[#allocation7 + $0x6e0] sm:$0xff] }
0x12a3   :  { %v5176_v9 = vpop.f32.mrb[107].mxu1  ;;  %v5217_v63 = vpop.f32.mrb[107].mxu0  ;;  %5774 = vmatprep.subr.bf16.mxu1 %v5621_v12  ;;  %5815 = vmatprep.subr.bf16.mxu0 %v5653_v15  ;;  %v5666_v11 = vld [vmem:[#allocation7 + $0x7d0] sm:$0xff]  ;;  %v5669_v29 = vld [vmem:[#allocation7 + $0x7e8] sm:$0xff]  ;;  %v5172_v12 = vadd.f32 %v8420_v45, %v5034_v62  ;;  %v5213_v15 = vadd.f32 %v8422_v35, %v5042_v21  ;;  %v5668_v7 = vld [vmem:[#allocation7 + $0x7e0] sm:$0xff]  ;;  %v5366_v35 = vrot.slane %v9532_v16, %v9538_v48 }
0x12a4   :  { %v5224_v49 = vmax.f32 %v5174_v47, 0.0  ;;  %v5226_v44 = vmax.f32 %v5215_v58, 0.0  ;;  %v5671_v47 = vld [vmem:[#allocation7 + $0x7f8] sm:$0xff]  ;;  %v5638_v8 = vld [vmem:[#allocation7 + $0x6f0] sm:$0xff]  ;;  %v5370_v63 = vrot.slane %v9533_v3, %v9538_v48 }
0x12a5   :  { %v5223_v20 = vmax.f32 %v5172_v12, 0.0  ;;  %v5225_v58 = vmax.f32 %v5213_v15, 0.0  ;;  %v5670_v38 = vld [vmem:[#allocation7 + $0x7f0] sm:$0xff]  ;;  %v9540_v21 = vld [vmem:[#allocation36_spill] sm:$0xff] }
0x12a6   :  { %v5540_v4 = vpack.c.bf16 %v5224_v49, %v5224_v49  ;;  %v5542_v36 = vpack.c.bf16 %v5226_v44, %v5226_v44  ;;  %5775 = vmatpush1.bf16.msra.mxu1 %v5620_v18  ;;  %5816 = vmatpush1.bf16.msra.mxu0 %v5652_v42 }
0x12a7   :  { %5776 = vmatprep.subr.bf16.mxu1 %v5623_v37  ;;  %5817 = vmatprep.subr.bf16.mxu0 %v5655_v53  ;;  %v5539_v9 = vpack.c.bf16 %v5223_v20, %v5223_v20  ;;  %v5541_v45 = vpack.c.bf16 %v5225_v58, %v5225_v58 }
0x12a8   :  { %5794 = vmatprep.mubr.bf16.mxu1 %v5540_v4  ;;  %5835 = vmatprep.mubr.bf16.mxu0 %v5542_v36 }
0x12aa   :  { %5777 = vmatpush1.bf16.msra.mxu1 %v5622_v32  ;;  %5818 = vmatpush1.bf16.msra.mxu0 %v5654_v31 }
0x12ab   :  { %5778 = vmatprep.subr.bf16.mxu1 %v5625_v27  ;;  %5819 = vmatprep.subr.bf16.mxu0 %v5657_v30 }
0x12ae   :  { %5779 = vmatpush1.bf16.msra.mxu1 %v5624_v57  ;;  %5820 = vmatpush1.bf16.msra.mxu0 %v5656_v13 }
0x12af   :  { %5780 = vmatprep.subr.bf16.mxu1 %v5627_v34  ;;  %5821 = vmatprep.subr.bf16.mxu0 %v5659_v56 }
0x12b2   :  { %5781 = vmatpush1.bf16.msra.mxu1 %v5626_v25  ;;  %5822 = vmatpush1.bf16.msra.mxu0 %v5658_v19 }
0x12b3   :  { %5782 = vmatprep.subr.bf16.mxu1 %v5629_v28  ;;  %5823 = vmatprep.subr.bf16.mxu0 %v5661_v55 }
0x12b6   :  { %5783 = vmatpush1.bf16.msra.mxu1 %v5628_v2  ;;  %5824 = vmatpush1.bf16.msra.mxu0 %v5660_v1 }
0x12b7   :  { %5784 = vmatprep.subr.bf16.mxu1 %v5631_v52  ;;  %5825 = vmatprep.subr.bf16.mxu0 %v5663_v41 }
0x12ba   :  { %5785 = vmatpush1.bf16.msra.mxu1 %v5630_v40  ;;  %5826 = vmatpush1.bf16.msra.mxu0 %v5662_v24 }
0x12bb   :  { %5786 = vmatprep.subr.bf16.mxu1 %v5633_v22  ;;  %5827 = vmatprep.subr.bf16.mxu0 %v5665_v50 }
0x12be   :  { %5787 = vmatpush1.bf16.msra.mxu1 %v5632_v17  ;;  %5828 = vmatpush1.bf16.msra.mxu0 %v5664_v61  ;;  %v9539_v61 = vld [vmem:[#allocation35_spill] sm:$0xff] }
0x12bf   :  { %5788 = vmatprep.subr.bf16.mxu1 %v5635_v59  ;;  %5829 = vmatprep.subr.bf16.mxu0 %v5667_v26 }
0x12c2   :  { %5789 = vmatpush1.bf16.msra.mxu1 %v5634_v0  ;;  %5830 = vmatpush1.bf16.msra.mxu0 %v5666_v11 }
0x12c3   :  { %5790 = vmatprep.subr.bf16.mxu1 %v5637_v14  ;;  %5831 = vmatprep.subr.bf16.mxu0 %v5669_v29 }
0x12c6   :  { %5791 = vmatpush1.bf16.msra.mxu1 %v5636_v46  ;;  %5832 = vmatpush1.bf16.msra.mxu0 %v5668_v7 }
0x12c7   :  { %5792 = vmatprep.subr.bf16.mxu1 %v5639_v43  ;;  %5833 = vmatprep.subr.bf16.mxu0 %v5671_v47 }
0x12ca   :  { %5793 = vmatpush1.bf16.msra.mxu1 %v5638_v8  ;;  %5834 = vmatpush1.bf16.msra.mxu0 %v5670_v38 }
0x12cd   :  { %5795 = vmatmul.mubr.bf16.vlgmr.msra.gmra.mrb[120].mxu1 %v5539_v9  ;;  %5836 = vmatmul.mubr.bf16.vlgmr.msra.gmra.mrb[120].mxu0 %v5541_v45 }
0x12e0   :  { %v5405_v18 = vpop.f32.mrb[108].mxu1  ;;  %v5446_v42 = vpop.f32.mrb[108].mxu0 }
0x12e1   :  { %v5406_v49 = vadd.f32 %v5405_v18, %v5366_v35  ;;  %v5407_v44 = vpop.f32.mrb[109].mxu1  ;;  %v5448_v37 = vpop.f32.mrb[109].mxu0 }
0x12e2   :  { %v5408_v53 = vadd.f32 %v5407_v44, %v5370_v63  ;;  %v5409_v4 = vpop.f32.mrb[110].mxu1  ;;  %v5450_v36 = vpop.f32.mrb[110].mxu0 }
0x12e3   :  { %v5447_v32 = vadd.f32 %v5446_v42, %v5406_v49  ;;  %v5410_v31 = vpop.f32.mrb[111].mxu1  ;;  %v5451_v27 = vpop.f32.mrb[111].mxu0 }
0x12e4   :  { %v5449_v30 = vadd.f32 %v5448_v37, %v5408_v53 }
0x1320   :  { %v5487_v57 = vpop.f32.mrb[112].mxu1  ;;  %v5528_v13 = vpop.f32.mrb[112].mxu0 }
0x1321   :  { %v5488_v34 = vadd.f32 %v5487_v57, %v5447_v32  ;;  %v5489_v56 = vpop.f32.mrb[113].mxu1  ;;  %v5530_v25 = vpop.f32.mrb[113].mxu0 }
0x1322   :  { %v5490_v19 = vadd.f32 %v5489_v56, %v5449_v30  ;;  %v5491_v28 = vpop.f32.mrb[114].mxu1  ;;  %v5532_v55 = vpop.f32.mrb[114].mxu0 }
0x1323   :  { %v5529_v2 = vadd.f32 %v5528_v13, %v5488_v34  ;;  %v5492_v1 = vpop.f32.mrb[115].mxu1  ;;  %v5533_v52 = vpop.f32.mrb[115].mxu0  ;;  %v5869_v28 = vrot.slane %v8184_v6, %v9537_v10 }
0x1324   :  { %v5531_v41 = vadd.f32 %v5530_v25, %v5490_v19  ;;  %v5865_v19 = vrot.slane %v8179_v5, %v9537_v10  ;;  %v5875_v52 = vrot.slane %v8179_v5, %v9538_v48  ;;  %v5903_v10 = vrot.slane %v9532_v16, %v9528_v23 }
0x1325   :  { %v5844_v40 = vadd.f32 %v5529_v2, %v8324_v54 }
0x1326   :  { %v5845_v24 = vadd.f32 %v5531_v41, %v8326_v60  ;;  %v5879_v41 = vrot.slane %v8184_v6, %v9538_v48  ;;  %v5913_v6 = vrot.slane %v9532_v16, %v9529_v33  ;;  %v5917_v48 = vrot.slane %v9533_v3, %v9529_v33 }
0x1328   :  { %v5846_v22 = vadd.f32 %v5845_v24, %v5844_v40 }
0x132a   :  { %5847 = vadd.xlane.f32.xlu0 %v5846_v22 }
0x1360   :  { %v5714_v50 = vpop.f32.mrb[116].mxu1  ;;  %v5755_v17 = vpop.f32.mrb[116].mxu0 }
0x1361   :  { %v5715_v59 = vadd.f32 %v9539_v61, %v5714_v50  ;;  %v5716_v26 = vpop.f32.mrb[117].mxu1  ;;  %v5757_v62 = vpop.f32.mrb[117].mxu0 }
0x1362   :  { %v5717_v0 = vadd.f32 %v9540_v21, %v5716_v26  ;;  %v5718_v11 = vpop.f32.mrb[118].mxu1  ;;  %v5759_v14 = vpop.f32.mrb[118].mxu0  ;;  %v5907_v26 = vrot.slane %v9533_v3, %v9528_v23 }
0x1363   :  { %v5756_v29 = vadd.f32 %v5755_v17, %v5715_v59  ;;  %v5719_v12 = vpop.f32.mrb[119].mxu1  ;;  %v5760_v15 = vpop.f32.mrb[119].mxu0 }
0x1364   :  { %v5758_v46 = vadd.f32 %v5757_v62, %v5717_v0 }
0x13a0   :  { %v5796_v7 = vpop.f32.mrb[120].mxu1  ;;  %v5837_v54 = vpop.f32.mrb[120].mxu0 }
0x13a1   :  { %v5797_v43 = vadd.f32 %v5796_v7, %v5756_v29  ;;  %v5798_v60 = vpop.f32.mrb[121].mxu1  ;;  %v5839_v47 = vpop.f32.mrb[121].mxu0 }
0x13a2   :  { %v5799_v20 = vadd.f32 %v5798_v60, %v5758_v46  ;;  %v5800_v58 = vpop.f32.mrb[122].mxu1  ;;  %v5841_v8 = vpop.f32.mrb[122].mxu0 }
0x13a3   :  { %v5838_v38 = vadd.f32 %v5837_v54, %v5797_v43  ;;  %v5801_v9 = vpop.f32.mrb[123].mxu1  ;;  %v5842_v45 = vpop.f32.mrb[123].mxu0 }
0x13a4   :  { %v5840_v35 = vadd.f32 %v5839_v47, %v5799_v20 }
0x13a5   :  { %v5882_v63 = vadd.f32 %v5838_v38, %v8328_v39 }
0x13a6   :  { %v5883_v18 = vadd.f32 %v5840_v35, %v8330_v51 }
0x13a8   :  { %v5884_v42 = vadd.f32 %v5883_v18, %v5882_v63 }
0x13aa   :  { %5885 = vadd.xlane.f32.xlu0 %v5884_v42 }
0x13b7   :  { %v5848_v49 = vpop.xlane.xlu0 %5847 }
0x13b8   :  { %v5849_v44 = vmul.f32 0.00390625, %v5848_v49 }
0x13ba   :  { %v5850_v37 = vsub.f32 %v5844_v40, %v5849_v44  ;;  %v5851_v53 = vsub.f32 %v5845_v24, %v5849_v44 }
0x13bc   :  { %v5852_v4 = vmul.f32 %v5850_v37, %v5850_v37  ;;  %v5853_v36 = vmul.f32 %v5851_v53, %v5851_v53 }
0x13be   :  { %v5854_v32 = vadd.f32 %v5853_v36, %v5852_v4 }
0x13c0   :  { %5855 = vadd.xlane.f32.xlu1 %v5854_v32 }
0x1437   :  { %v5886_v31 = vpop.xlane.xlu0 %5885 }
0x1438   :  { %v5887_v27 = vmul.f32 0.00390625, %v5886_v31 }
0x143a   :  { %v5888_v30 = vsub.f32 %v5882_v63, %v5887_v27  ;;  %v5889_v57 = vsub.f32 %v5883_v18, %v5887_v27 }
0x143c   :  { %v5890_v13 = vmul.f32 %v5888_v30, %v5888_v30  ;;  %v5891_v34 = vmul.f32 %v5889_v57, %v5889_v57 }
0x143e   :  { %v5892_v56 = vadd.f32 %v5891_v34, %v5890_v13 }
0x1440   :  { %5893 = vadd.xlane.f32.xlu1 %v5892_v56 }
0x144d   :  { %v5856_v39 = vpop.xlane.xlu1 %5855 }
0x144e   :  { %v5857_v51 = vmul.f32 0.00390625, %v5856_v39 }
0x1450   :  { %v5858_v25 = vadd.f32 1e-05, %v5857_v51 }
0x1452   :  { %6379 = vrsqrt.f32 %v5858_v25 }
0x145c   :  { %v6380_v55 = vpop.eup %6379 }
0x145d   :  { %v5860_v2 = vmul.f32 %v6380_v55, %v5850_v37  ;;  %v5861_v1 = vmul.f32 %v6380_v55, %v5851_v53 }
0x145f   :  { %v5870_v40 = vmul.f32 %v5865_v19, %v5860_v2  ;;  %v5871_v24 = vmul.f32 %v5869_v28, %v5861_v1 }
0x1461   :  { %v5880_v22 = vadd.f32 %v5875_v52, %v5870_v40  ;;  %v5881_v50 = vadd.f32 %v5879_v41, %v5871_v24 }
0x1463   :  { %5920 = vst [vmem:[#allocation14] sm:$0xff] %v5880_v22  ;;  %5921 = vst [vmem:[#allocation14 + $0x8] sm:$0xff] %v5881_v50 }
0x14cd   :  { %v5894_v17 = vpop.xlane.xlu1 %5893 }
0x14ce   :  { %v5895_v61 = vmul.f32 0.00390625, %v5894_v17 }
0x14d0   :  { %v5896_v59 = vadd.f32 1e-05, %v5895_v61 }
0x14d2   :  { %6381 = vrsqrt.f32 %v5896_v59 }
0x14dc   :  { %v6382_v5 = vpop.eup %6381 }
0x14dd   :  { %v5898_v62 = vmul.f32 %v6382_v5, %v5888_v30  ;;  %v5899_v21 = vmul.f32 %v6382_v5, %v5889_v57 }
0x14df   :  { %v5908_v0 = vmul.f32 %v5903_v10, %v5898_v62  ;;  %v5909_v11 = vmul.f32 %v5907_v26, %v5899_v21 }
0x14e1   :  { %v5918_v14 = vadd.f32 %v5913_v6, %v5908_v0  ;;  %v5919_v29 = vadd.f32 %v5917_v48, %v5909_v11 }
0x14e3   :  { %5922 = vst [vmem:[#allocation14 + $0x10] sm:$0xff] %v5918_v14  ;;  %5923 = vst [vmem:[#allocation14 + $0x18] sm:$0xff] %v5919_v29 }
0x14e4   :  { %6438 = shalt.err (!%p6435_p6)
}
0x14e5   :  { %s6439_s9 = scalar_lea.hbm %s8480_s12, 512 }
0x14e6   :  { %p6440_p7 = scmp.ne.s32.totalorder %s8480_s12, %s6439_s9  ;;  %p6443_p8 = scmp.lt.u32.totalorder %s6439_s9, %s8480_s12 }
0x14e8   :  { %p6445_p9 = pnand %p6443_p8, %p6440_p7 }
0x14ea   :  { %6448 = shalt.err (!%p6445_p9)
}
0x14eb   :  { %5933 = dma.vmem_to_hbm [thread:$0]  %s5931_s23, 512, %s8480_s12, [#allocation11]  }
0x14ec   :  { %6463 = dma.done.wait [#allocation11], 512  }
0x14ed   :  { %6464 = vsyncadd [#allocation11], 4294966784 }
0x14ee   :  { %5937 = vsyncpa [#allocation10], 1 }
0x14ef   :  { %5938 = vsyncpa [#allocation13], 1 }
0x14f0   :  { %5939 = vsyncpa [#allocation11], 1 }
0x14f1   :  { %5940 = vsyncmov [#allocation8] }
0x14f4   :  { %s5941_s13 = vpop.sfrf %5940 }
0x14f5   :  { %p6180_p10 = scmp.ne.s32.totalorder %s5941_s13, 0 }
0x14f7   :  { %5945 = shalt.err (%p6180_p10)  }
0x14f8   :  { %5947 = vsyncmov [#allocation8 + $0x1] }
0x14fb   :  { %s5948_s29 = vpop.sfrf %5947 }
0x14fc   :  { %p6181_p11 = scmp.ne.s32.totalorder %s5948_s29, 0 }
0x14fe   :  { %5952 = shalt.err (%p6181_p11)  }
0x14ff   :  { %5954 = vsyncmov [#allocation8 + $0x2] }
0x1502   :  { %s5955_s28 = vpop.sfrf %5954 }
0x1503   :  { %p6182_p12 = scmp.ne.s32.totalorder %s5955_s28, 0 }
0x1505   :  { %5959 = shalt.err (%p6182_p12)  }
0x1506   :  { %5961 = vsyncmov [#allocation8 + $0x3] }
0x1509   :  { %s5962_s14 = vpop.sfrf %5961 }
0x150a   :  { %p6183_p13 = scmp.ne.s32.totalorder %s5962_s14, 0 }
0x150c   :  { %5966 = shalt.err (%p6183_p13)  }
0x150d   :  { %5968 = vsyncmov [#allocation8 + $0x4] }
0x1510   :  { %s5969_s12 = vpop.sfrf %5968 }
0x1511   :  { %p6184_p0 = scmp.ne.s32.totalorder %s5969_s12, 0 }
0x1513   :  { %5973 = shalt.err (%p6184_p0)  }

</bundles_post_ra>
